<compile_context>
chip_gen: v6e
topology: v6e:2x2x1
jax: 0.10.0
libtpu: 0.0.40
codegen_flags: <defaults>
</compile_context>

<pallas_src>
import jax
import jax.numpy as jnp
import numpy as np
from jax.experimental import pallas as pl
from jax.experimental.pallas import tpu as pltpu


# --------------- fused Conv(3x3, pad=1) + bias + ReLU + MaxPool(2x2) kernel ---------------
def conv_pool_kernel(x_ref, w_ref, b_ref, o_ref):
    # x_ref: (1, 4, 9*Cin, T) bf16   phase-separated im2col (one 2x2-pool phase per axis-1 idx)
    # w_ref: (Cout, 9*Cin)    bf16
    # b_ref: (Cout, 1)        f32
    # o_ref: (1, Cout, T)     lane-dense spatial tile
    w = w_ref[...]
    m = jnp.dot(w, x_ref[0, 0], preferred_element_type=jnp.float32)
    for p in range(1, 4):
        m = jnp.maximum(m, jnp.dot(w, x_ref[0, p], preferred_element_type=jnp.float32))
    # bias is uniform over the 2x2 window and ReLU is monotone, so
    # relu(max_p(conv_p) + b) == maxpool(relu(conv + b)).
    o_ref[0] = jnp.maximum(m + b_ref[...], 0.0).astype(o_ref.dtype)


def conv_relu_pool(x_nchw, w_oihw, bias, *, out_dtype=jnp.bfloat16, spatial_tiles=1):
    """x: (B, Cin, H, W); w: (Cout, Cin, 3, 3); bias: (Cout,).
    Returns (B, Cout, (H//2)*(W//2)) in NCHW-flattened order."""
    B, Cin, H, W = x_nchw.shape
    Cout = w_oihw.shape[0]
    H2, W2 = H // 2, W // 2
    S = H2 * W2
    K = 9 * Cin
    assert S % spatial_tiles == 0
    T = S // spatial_tiles
    assert T % 128 == 0

    # ---- glue: phase-separated im2col, all in bf16 (conv path is DMA-bound) ----
    xb = x_nchw.astype(jnp.bfloat16)
    xp = jnp.pad(xb, ((0, 0), (0, 0), (1, 1), (1, 1)))          # zero pad = 1
    phases = []
    for a in range(2):                                          # pooling row parity
        for bb in range(2):                                     # pooling col parity
            taps = [xp[:, :, a + dy:a + dy + H:2, bb + dx:bb + dx + W:2]
                    for dy in range(3) for dx in range(3)]      # each (B, Cin, H2, W2)
            phases.append(jnp.stack(taps, axis=1))              # (B, 9, Cin, H2, W2)
    xcol = jnp.stack(phases, axis=1).reshape(B, 4, K, S)        # (B, 4, 9*Cin, S) bf16

    w2d = jnp.transpose(w_oihw, (0, 2, 3, 1)).reshape(Cout, K).astype(jnp.bfloat16)
    b2d = bias.reshape(Cout, 1).astype(jnp.float32)

    return pl.pallas_call(
        conv_pool_kernel,
        out_shape=jax.ShapeDtypeStruct((B, Cout, S), out_dtype),
        grid_spec=pltpu.PrefetchScalarGridSpec(
            num_scalar_prefetch=0,
            grid=(B, spatial_tiles),
            in_specs=[pl.BlockSpec((1, 4, K, T), lambda i, j: (i, 0, 0, j)),
                      pl.BlockSpec((Cout, K), lambda i, j: (0, 0)),
                      pl.BlockSpec((Cout, 1), lambda i, j: (0, 0))],
            out_specs=pl.BlockSpec((1, Cout, T), lambda i, j: (i, 0, j)),
        ),
        compiler_params=pltpu.CompilerParams(
            dimension_semantics=("parallel", "parallel")),
    )(xcol, w2d, b2d)


# ---------------------- FC1 (32768 -> 128) split over K, then fused head ----------------------
def fc1_partial_kernel(x_ref, w_ref, o_ref):
    # x_ref: (B, KH) bf16; w_ref: (KH, N1) bf16; o_ref: (1, B, N1) f32 partial
    o_ref[0] = jnp.dot(x_ref[...], w_ref[...], preferred_element_type=jnp.float32)


def fc_head_kernel(p_ref, b1_ref, w2_ref, b2_ref, o_ref):
    # p_ref: (k_split, B, N1) f32; b1: (1, N1); w2: (N1, N2); b2: (1, N2); o: (B, N2)
    z = jnp.maximum(jnp.sum(p_ref[...], axis=0) + b1_ref[...], 0.0)
    o_ref[...] = jnp.dot(z, w2_ref[...], preferred_element_type=jnp.float32) + b2_ref[...]


def fc_call(x_bf16, w1_bf16, b1, w2, b2, *, k_split=2):
    """x: (B, K) bf16; w1: (K, N1) bf16; b1: (N1,); w2: (N1, N2) f32; b2: (N2,)."""
    M, K = x_bf16.shape
    N1 = w1_bf16.shape[1]
    N2 = w2.shape[1]
    assert K % k_split == 0
    KH = K // k_split

    # FC1 partials: disjoint K halves on a parallel grid axis -> both v7x TensorCores
    # stream half of the 8 MiB bf16 weight; 4 MiB per-step weight block on v5e/v6e.
    partials = pl.pallas_call(
        fc1_partial_kernel,
        out_shape=jax.ShapeDtypeStruct((k_split, M, N1), jnp.float32),
        grid_spec=pltpu.PrefetchScalarGridSpec(
            num_scalar_prefetch=0,
            grid=(k_split,),
            in_specs=[pl.BlockSpec((M, KH), lambda n: (0, n)),
                      pl.BlockSpec((KH, N1), lambda n: (n, 0))],
            out_specs=pl.BlockSpec((1, M, N1), lambda n: (n, 0, 0)),
        ),
        compiler_params=pltpu.CompilerParams(dimension_semantics=("parallel",)),
    )(x_bf16, w1_bf16)

    b1r = b1.reshape(1, N1).astype(jnp.float32)
    b2r = b2.reshape(1, N2).astype(jnp.float32)
    # Tiny head: sum partials + bias + ReLU + FC2 + bias, single grid step.
    return pl.pallas_call(
        fc_head_kernel,
        out_shape=jax.ShapeDtypeStruct((M, N2), jnp.float32),
        grid_spec=pltpu.PrefetchScalarGridSpec(
            num_scalar_prefetch=0,
            grid=(1,),
            in_specs=[pl.BlockSpec((k_split, M, N1), lambda i: (0, 0, 0)),
                      pl.BlockSpec((1, N1), lambda i: (0, 0)),
                      pl.BlockSpec((N1, N2), lambda i: (0, 0)),
                      pl.BlockSpec((1, N2), lambda i: (0, 0))],
            out_specs=pl.BlockSpec((M, N2), lambda i: (0, 0)),
        ),
    )(partials, b1r, w2.astype(jnp.float32), b2r)


# --------------------------------------- full forward ---------------------------------------
def simple_cnn_forward(x_nchw, params):
    w1, b1, w2, b2, wf1, bf1, wf2, bf2 = params
    B = x_nchw.shape[0]
    h = conv_relu_pool(x_nchw, w1, b1)          # (B, 16, 4096) bf16
    h = h.reshape(B, 16, 64, 64)
    h = conv_relu_pool(h, w2, b2)               # (B, 32, 1024) bf16
    feat = h.reshape(B, -1)                     # == torch x.view(B, -1) on NCHW; already bf16
    return fc_call(feat, wf1, bf1, wf2, bf2)    # (B, num_classes)


def simple_cnn_reference(x_nchw, params):
    w1, b1, w2, b2, wf1, bf1, wf2, bf2 = params

    def block(x, w, b):
        y = jax.lax.conv_general_dilated(x, w, (1, 1), [(1, 1), (1, 1)],
                                         dimension_numbers=('NCHW', 'OIHW', 'NCHW'))
        y = jax.nn.relu(y + b.reshape(1, -1, 1, 1))
        return jax.lax.reduce_window(y, -jnp.inf, jax.lax.max,
                                     (1, 1, 2, 2), (1, 1, 2, 2), 'VALID')

    h = block(x_nchw, w1, b1)
    h = block(h, w2, b2)
    feat = h.reshape(h.shape[0], -1)
    z = jax.nn.relu(feat @ wf1.astype(jnp.float32) + bf1)
    return z @ wf2 + bf2


if __name__ == "__main__":
    num_classes = 2
    B, Cin, H, W = 2, 3, 128, 128        # fc1 in_features = 32*32*32 implies 128x128 inputs

    key = jax.random.PRNGKey(0)
    ks = jax.random.split(key, 9)
    x = jax.random.normal(ks[0], (B, Cin, H, W), jnp.float32)

    # PyTorch-layout parameters (conv OIHW; linear weights stored pre-transposed as (in, out);
    # fc1 weights stored in bf16 — the deployment dtype).
    w1 = jax.random.normal(ks[1], (16, 3, 3, 3), jnp.float32) * 0.1
    b1 = jax.random.normal(ks[2], (16,), jnp.float32) * 0.01
    w2 = jax.random.normal(ks[3], (32, 16, 3, 3), jnp.float32) * 0.1
    b2 = jax.random.normal(ks[4], (32,), jnp.float32) * 0.01
    wf1 = (jax.random.normal(ks[5], (32 * 32 * 32, 128), jnp.float32)
           / np.sqrt(32 * 32 * 32)).astype(jnp.bfloat16)
    bf1 = jax.random.normal(ks[6], (128,), jnp.float32) * 0.01
    wf2 = jax.random.normal(ks[7], (128, num_classes), jnp.float32) / np.sqrt(128.0)
    bf2 = jax.random.normal(ks[8], (num_classes,), jnp.float32) * 0.01

    params = (w1, b1, w2, b2, wf1, bf1, wf2, bf2)

    out = jax.block_until_ready(jax.jit(simple_cnn_forward)(x, params))
    ref = jax.block_until_ready(jax.jit(simple_cnn_reference)(x, params))

    assert out.shape == (B, num_classes), out.shape
    # bf16 conv path + bf16 FC1 weights/activations (f32 accumulation) vs. f32 reference.
    np.testing.assert_allclose(np.asarray(out), np.asarray(ref), rtol=2e-2, atol=2e-2)
    print("KERNEL_OK")
</pallas_src>

<mosaic_0001>
module attributes {stable_mosaic.version = 11 : i64} {
  func.func @conv_pool_kernel(%arg0: i32, %arg1: i32, %arg2: memref<1x4x27x4096xbf16, #tpu.memory_space<vmem>>, %arg3: memref<16x27xbf16, #tpu.memory_space<vmem>>, %arg4: memref<16x1xf32, #tpu.memory_space<vmem>>, %arg5: memref<1x16x4096xbf16, #tpu.memory_space<vmem>>) attributes {dimension_semantics = [#tpu.dimension_semantics<parallel>, #tpu.dimension_semantics<parallel>], iteration_bounds = array<i64: 2, 1>, scalar_prefetch = 0 : i64, scratch_operands = 0 : i64, tpu.core_type = #tpu.core_type<tc>, window_params = [{transform_indices = @transform_0, window_bounds = array<i64: 1, 4, 27, 4096>}, {pipeline_mode = #tpu.pipeline_mode<synchronous>, transform_indices = @transform_1, window_bounds = array<i64: 16, 27>}, {pipeline_mode = #tpu.pipeline_mode<synchronous>, transform_indices = @transform_2, window_bounds = array<i64: 16, 1>}, {transform_indices = @transform_3, window_bounds = array<i64: 1, 16, 4096>}]} {
    %c0 = arith.constant 0 : index
    %c0_0 = arith.constant 0 : index
    %0 = vector.load %arg3[%c0, %c0_0] : memref<16x27xbf16, #tpu.memory_space<vmem>>, vector<16x27xbf16>
    %c0_1 = arith.constant 0 : index
    %c0_2 = arith.constant 0 : index
    %c0_3 = arith.constant 0 : index
    %c0_4 = arith.constant 0 : index
    %1 = vector.load %arg2[%c0_1, %c0_2, %c0_3, %c0_4] : memref<1x4x27x4096xbf16, #tpu.memory_space<vmem>>, vector<1x1x27x4096xbf16>
    %2 = vector.shape_cast %1 : vector<1x1x27x4096xbf16> to vector<27x4096xbf16>
    %cst = arith.constant dense<0.000000e+00> : vector<16x4096xf32>
    %3 = tpu.matmul %0, %2, %cst {dimension_numbers = #tpu.dot_dimension_numbers<[1], [0], [0], [1], [0, 0, 1, 1], [], []>} : vector<16x27xbf16>, vector<27x4096xbf16>, vector<16x4096xf32> -> vector<16x4096xf32>
    %c0_5 = arith.constant 0 : index
    %c1 = arith.constant 1 : index
    %c0_6 = arith.constant 0 : index
    %c0_7 = arith.constant 0 : index
    %4 = vector.load %arg2[%c0_5, %c1, %c0_6, %c0_7] : memref<1x4x27x4096xbf16, #tpu.memory_space<vmem>>, vector<1x1x27x4096xbf16>
    %5 = vector.shape_cast %4 : vector<1x1x27x4096xbf16> to vector<27x4096xbf16>
    %cst_8 = arith.constant dense<0.000000e+00> : vector<16x4096xf32>
    %6 = tpu.matmul %0, %5, %cst_8 {dimension_numbers = #tpu.dot_dimension_numbers<[1], [0], [0], [1], [0, 0, 1, 1], [], []>} : vector<16x27xbf16>, vector<27x4096xbf16>, vector<16x4096xf32> -> vector<16x4096xf32>
    %7 = arith.maximumf %3, %6 : vector<16x4096xf32>
    %c0_9 = arith.constant 0 : index
    %c2 = arith.constant 2 : index
    %c0_10 = arith.constant 0 : index
    %c0_11 = arith.constant 0 : index
    %8 = vector.load %arg2[%c0_9, %c2, %c0_10, %c0_11] : memref<1x4x27x4096xbf16, #tpu.memory_space<vmem>>, vector<1x1x27x4096xbf16>
    %9 = vector.shape_cast %8 : vector<1x1x27x4096xbf16> to vector<27x4096xbf16>
    %cst_12 = arith.constant dense<0.000000e+00> : vector<16x4096xf32>
    %10 = tpu.matmul %0, %9, %cst_12 {dimension_numbers = #tpu.dot_dimension_numbers<[1], [0], [0], [1], [0, 0, 1, 1], [], []>} : vector<16x27xbf16>, vector<27x4096xbf16>, vector<16x4096xf32> -> vector<16x4096xf32>
    %11 = arith.maximumf %7, %10 : vector<16x4096xf32>
    %c0_13 = arith.constant 0 : index
    %c3 = arith.constant 3 : index
    %c0_14 = arith.constant 0 : index
    %c0_15 = arith.constant 0 : index
    %12 = vector.load %arg2[%c0_13, %c3, %c0_14, %c0_15] : memref<1x4x27x4096xbf16, #tpu.memory_space<vmem>>, vector<1x1x27x4096xbf16>
    %13 = vector.shape_cast %12 : vector<1x1x27x4096xbf16> to vector<27x4096xbf16>
    %cst_16 = arith.constant dense<0.000000e+00> : vector<16x4096xf32>
    %14 = tpu.matmul %0, %13, %cst_16 {dimension_numbers = #tpu.dot_dimension_numbers<[1], [0], [0], [1], [0, 0, 1, 1], [], []>} : vector<16x27xbf16>, vector<27x4096xbf16>, vector<16x4096xf32> -> vector<16x4096xf32>
    %15 = arith.maximumf %11, %14 : vector<16x4096xf32>
    %c0_17 = arith.constant 0 : index
    %c0_18 = arith.constant 0 : index
    %16 = vector.load %arg4[%c0_17, %c0_18] : memref<16x1xf32, #tpu.memory_space<vmem>>, vector<16x1xf32>
    %17 = vector.broadcast %16 : vector<16x1xf32> to vector<16x4096xf32>
    %18 = arith.addf %15, %17 : vector<16x4096xf32>
    %cst_19 = arith.constant 0.000000e+00 : f32
    %19 = vector.broadcast %cst_19 : f32 to vector<16x4096xf32>
    %20 = arith.maximumf %18, %19 : vector<16x4096xf32>
    %21 = arith.truncf %20 : vector<16x4096xf32> to vector<16x4096xbf16>
    %c0_20 = arith.constant 0 : index
    %c0_21 = arith.constant 0 : index
    %c0_22 = arith.constant 0 : index
    %22 = vector.load %arg5[%c0_20, %c0_21, %c0_22] : memref<1x16x4096xbf16, #tpu.memory_space<vmem>>, vector<1x16x4096xbf16>
    %23 = vector.shape_cast %22 : vector<1x16x4096xbf16> to vector<16x4096xbf16>
    %24 = vector.shape_cast %21 : vector<16x4096xbf16> to vector<1x16x4096xbf16>
    tpu.vector_store %arg5[%c0_20, %c0_21, %c0_22], %24 {strides = array<i32>} : memref<1x16x4096xbf16, #tpu.memory_space<vmem>>, vector<1x16x4096xbf16>,
    return
  }
  func.func @transform_0(%arg0: i32, %arg1: i32) -> (i32, i32, i32, i32) {
    %c0_i32 = arith.constant 0 : i32
    %c0_i32_0 = arith.constant 0 : i32
    %c0_i32_1 = arith.constant 0 : i32
    return %arg0, %c0_i32, %c0_i32_0, %arg1 : i32, i32, i32, i32
  }
  func.func @transform_1(%arg0: i32, %arg1: i32) -> (i32, i32) {
    %c0_i32 = arith.constant 0 : i32
    %c0_i32_0 = arith.constant 0 : i32
    %c0_i32_1 = arith.constant 0 : i32
    return %c0_i32, %c0_i32_0 : i32, i32
  }
  func.func @transform_2(%arg0: i32, %arg1: i32) -> (i32, i32) {
    %c0_i32 = arith.constant 0 : i32
    %c0_i32_0 = arith.constant 0 : i32
    %c0_i32_1 = arith.constant 0 : i32
    return %c0_i32, %c0_i32_0 : i32, i32
  }
  func.func @transform_3(%arg0: i32, %arg1: i32) -> (i32, i32, i32) {
    %c0_i32 = arith.constant 0 : i32
    %c0_i32_0 = arith.constant 0 : i32
    return %arg0, %c0_i32, %arg1 : i32, i32, i32
  }
}

module attributes {stable_mosaic.version = 11 : i64} {
  func.func @conv_pool_kernel(%arg0: i32, %arg1: i32, %arg2: memref<1x4x144x1024xbf16, #tpu.memory_space<vmem>>, %arg3: memref<32x144xbf16, #tpu.memory_space<vmem>>, %arg4: memref<32x1xf32, #tpu.memory_space<vmem>>, %arg5: memref<1x32x1024xbf16, #tpu.memory_space<vmem>>) attributes {dimension_semantics = [#tpu.dimension_semantics<parallel>, #tpu.dimension_semantics<parallel>], iteration_bounds = array<i64: 2, 1>, scalar_prefetch = 0 : i64, scratch_operands = 0 : i64, tpu.core_type = #tpu.core_type<tc>, window_params = [{transform_indices = @transform_0, window_bounds = array<i64: 1, 4, 144, 1024>}, {pipeline_mode = #tpu.pipeline_mode<synchronous>, transform_indices = @transform_1, window_bounds = array<i64: 32, 144>}, {pipeline_mode = #tpu.pipeline_mode<synchronous>, transform_indices = @transform_2, window_bounds = array<i64: 32, 1>}, {transform_indices = @transform_3, window_bounds = array<i64: 1, 32, 1024>}]} {
    %c0 = arith.constant 0 : index
    %c0_0 = arith.constant 0 : index
    %0 = vector.load %arg3[%c0, %c0_0] : memref<32x144xbf16, #tpu.memory_space<vmem>>, vector<32x144xbf16>
    %c0_1 = arith.constant 0 : index
    %c0_2 = arith.constant 0 : index
    %c0_3 = arith.constant 0 : index
    %c0_4 = arith.constant 0 : index
    %1 = vector.load %arg2[%c0_1, %c0_2, %c0_3, %c0_4] : memref<1x4x144x1024xbf16, #tpu.memory_space<vmem>>, vector<1x1x144x1024xbf16>
    %2 = vector.shape_cast %1 : vector<1x1x144x1024xbf16> to vector<144x1024xbf16>
    %cst = arith.constant dense<0.000000e+00> : vector<32x1024xf32>
    %3 = tpu.matmul %0, %2, %cst {dimension_numbers = #tpu.dot_dimension_numbers<[1], [0], [0], [1], [0, 0, 1, 1], [], []>} : vector<32x144xbf16>, vector<144x1024xbf16>, vector<32x1024xf32> -> vector<32x1024xf32>
    %c0_5 = arith.constant 0 : index
    %c1 = arith.constant 1 : index
    %c0_6 = arith.constant 0 : index
    %c0_7 = arith.constant 0 : index
    %4 = vector.load %arg2[%c0_5, %c1, %c0_6, %c0_7] : memref<1x4x144x1024xbf16, #tpu.memory_space<vmem>>, vector<1x1x144x1024xbf16>
    %5 = vector.shape_cast %4 : vector<1x1x144x1024xbf16> to vector<144x1024xbf16>
    %cst_8 = arith.constant dense<0.000000e+00> : vector<32x1024xf32>
    %6 = tpu.matmul %0, %5, %cst_8 {dimension_numbers = #tpu.dot_dimension_numbers<[1], [0], [0], [1], [0, 0, 1, 1], [], []>} : vector<32x144xbf16>, vector<144x1024xbf16>, vector<32x1024xf32> -> vector<32x1024xf32>
    %7 = arith.maximumf %3, %6 : vector<32x1024xf32>
    %c0_9 = arith.constant 0 : index
    %c2 = arith.constant 2 : index
    %c0_10 = arith.constant 0 : index
    %c0_11 = arith.constant 0 : index
    %8 = vector.load %arg2[%c0_9, %c2, %c0_10, %c0_11] : memref<1x4x144x1024xbf16, #tpu.memory_space<vmem>>, vector<1x1x144x1024xbf16>
    %9 = vector.shape_cast %8 : vector<1x1x144x1024xbf16> to vector<144x1024xbf16>
    %cst_12 = arith.constant dense<0.000000e+00> : vector<32x1024xf32>
    %10 = tpu.matmul %0, %9, %cst_12 {dimension_numbers = #tpu.dot_dimension_numbers<[1], [0], [0], [1], [0, 0, 1, 1], [], []>} : vector<32x144xbf16>, vector<144x1024xbf16>, vector<32x1024xf32> -> vector<32x1024xf32>
    %11 = arith.maximumf %7, %10 : vector<32x1024xf32>
    %c0_13 = arith.constant 0 : index
    %c3 = arith.constant 3 : index
    %c0_14 = arith.constant 0 : index
    %c0_15 = arith.constant 0 : index
    %12 = vector.load %arg2[%c0_13, %c3, %c0_14, %c0_15] : memref<1x4x144x1024xbf16, #tpu.memory_space<vmem>>, vector<1x1x144x1024xbf16>
    %13 = vector.shape_cast %12 : vector<1x1x144x1024xbf16> to vector<144x1024xbf16>
    %cst_16 = arith.constant dense<0.000000e+00> : vector<32x1024xf32>
    %14 = tpu.matmul %0, %13, %cst_16 {dimension_numbers = #tpu.dot_dimension_numbers<[1], [0], [0], [1], [0, 0, 1, 1], [], []>} : vector<32x144xbf16>, vector<144x1024xbf16>, vector<32x1024xf32> -> vector<32x1024xf32>
    %15 = arith.maximumf %11, %14 : vector<32x1024xf32>
    %c0_17 = arith.constant 0 : index
    %c0_18 = arith.constant 0 : index
    %16 = vector.load %arg4[%c0_17, %c0_18] : memref<32x1xf32, #tpu.memory_space<vmem>>, vector<32x1xf32>
    %17 = vector.broadcast %16 : vector<32x1xf32> to vector<32x1024xf32>
    %18 = arith.addf %15, %17 : vector<32x1024xf32>
    %cst_19 = arith.constant 0.000000e+00 : f32
    %19 = vector.broadcast %cst_19 : f32 to vector<32x1024xf32>
    %20 = arith.maximumf %18, %19 : vector<32x1024xf32>
    %21 = arith.truncf %20 : vector<32x1024xf32> to vector<32x1024xbf16>
    %c0_20 = arith.constant 0 : index
    %c0_21 = arith.constant 0 : index
    %c0_22 = arith.constant 0 : index
    %22 = vector.load %arg5[%c0_20, %c0_21, %c0_22] : memref<1x32x1024xbf16, #tpu.memory_space<vmem>>, vector<1x32x1024xbf16>
    %23 = vector.shape_cast %22 : vector<1x32x1024xbf16> to vector<32x1024xbf16>
    %24 = vector.shape_cast %21 : vector<32x1024xbf16> to vector<1x32x1024xbf16>
    tpu.vector_store %arg5[%c0_20, %c0_21, %c0_22], %24 {strides = array<i32>} : memref<1x32x1024xbf16, #tpu.memory_space<vmem>>, vector<1x32x1024xbf16>,
    return
  }
  func.func @transform_0(%arg0: i32, %arg1: i32) -> (i32, i32, i32, i32) {
    %c0_i32 = arith.constant 0 : i32
    %c0_i32_0 = arith.constant 0 : i32
    %c0_i32_1 = arith.constant 0 : i32
    return %arg0, %c0_i32, %c0_i32_0, %arg1 : i32, i32, i32, i32
  }
  func.func @transform_1(%arg0: i32, %arg1: i32) -> (i32, i32) {
    %c0_i32 = arith.constant 0 : i32
    %c0_i32_0 = arith.constant 0 : i32
    %c0_i32_1 = arith.constant 0 : i32
    return %c0_i32, %c0_i32_0 : i32, i32
  }
  func.func @transform_2(%arg0: i32, %arg1: i32) -> (i32, i32) {
    %c0_i32 = arith.constant 0 : i32
    %c0_i32_0 = arith.constant 0 : i32
    %c0_i32_1 = arith.constant 0 : i32
    return %c0_i32, %c0_i32_0 : i32, i32
  }
  func.func @transform_3(%arg0: i32, %arg1: i32) -> (i32, i32, i32) {
    %c0_i32 = arith.constant 0 : i32
    %c0_i32_0 = arith.constant 0 : i32
    return %arg0, %c0_i32, %arg1 : i32, i32, i32
  }
}

module attributes {stable_mosaic.version = 11 : i64} {
  func.func @fc1_partial_kernel(%arg0: i32, %arg1: memref<2x16384xbf16, #tpu.memory_space<vmem>>, %arg2: memref<16384x128xbf16, #tpu.memory_space<vmem>>, %arg3: memref<1x2x128xf32, #tpu.memory_space<vmem>>) attributes {dimension_semantics = [#tpu.dimension_semantics<parallel>], iteration_bounds = array<i64: 2>, scalar_prefetch = 0 : i64, scratch_operands = 0 : i64, tpu.core_type = #tpu.core_type<tc>, window_params = [{transform_indices = @transform_0, window_bounds = array<i64: 2, 16384>}, {transform_indices = @transform_1, window_bounds = array<i64: 16384, 128>}, {transform_indices = @transform_2, window_bounds = array<i64: 1, 2, 128>}]} {
    %c0 = arith.constant 0 : index
    %c0_0 = arith.constant 0 : index
    %0 = vector.load %arg1[%c0, %c0_0] : memref<2x16384xbf16, #tpu.memory_space<vmem>>, vector<2x16384xbf16>
    %c0_1 = arith.constant 0 : index
    %c0_2 = arith.constant 0 : index
    %1 = vector.load %arg2[%c0_1, %c0_2] : memref<16384x128xbf16, #tpu.memory_space<vmem>>, vector<16384x128xbf16>
    %cst = arith.constant dense<0.000000e+00> : vector<2x128xf32>
    %2 = tpu.matmul %0, %1, %cst {dimension_numbers = #tpu.dot_dimension_numbers<[1], [0], [0], [1], [0, 0, 1, 1], [], []>} : vector<2x16384xbf16>, vector<16384x128xbf16>, vector<2x128xf32> -> vector<2x128xf32>
    %c0_3 = arith.constant 0 : index
    %c0_4 = arith.constant 0 : index
    %c0_5 = arith.constant 0 : index
    %3 = vector.load %arg3[%c0_3, %c0_4, %c0_5] : memref<1x2x128xf32, #tpu.memory_space<vmem>>, vector<1x2x128xf32>
    %4 = vector.shape_cast %3 : vector<1x2x128xf32> to vector<2x128xf32>
    %5 = vector.shape_cast %2 : vector<2x128xf32> to vector<1x2x128xf32>
    tpu.vector_store %arg3[%c0_3, %c0_4, %c0_5], %5 {strides = array<i32>} : memref<1x2x128xf32, #tpu.memory_space<vmem>>, vector<1x2x128xf32>,
    return
  }
  func.func @transform_0(%arg0: i32) -> (i32, i32) {
    %c0_i32 = arith.constant 0 : i32
    %c0_i32_0 = arith.constant 0 : i32
    return %c0_i32, %arg0 : i32, i32
  }
  func.func @transform_1(%arg0: i32) -> (i32, i32) {
    %c0_i32 = arith.constant 0 : i32
    %c0_i32_0 = arith.constant 0 : i32
    return %arg0, %c0_i32 : i32, i32
  }
  func.func @transform_2(%arg0: i32) -> (i32, i32, i32) {
    %c0_i32 = arith.constant 0 : i32
    %c0_i32_0 = arith.constant 0 : i32
    %c0_i32_1 = arith.constant 0 : i32
    return %arg0, %c0_i32, %c0_i32_0 : i32, i32, i32
  }
}

module attributes {stable_mosaic.version = 11 : i64} {
  func.func @fc_head_kernel(%arg0: i32, %arg1: memref<2x2x128xf32, #tpu.memory_space<vmem>>, %arg2: memref<1x128xf32, #tpu.memory_space<vmem>>, %arg3: memref<128x2xf32, #tpu.memory_space<vmem>>, %arg4: memref<1x2xf32, #tpu.memory_space<vmem>>, %arg5: memref<2x2xf32, #tpu.memory_space<vmem>>) attributes {dimension_semantics = [#tpu.dimension_semantics<arbitrary>], iteration_bounds = array<i64: 1>, scalar_prefetch = 0 : i64, scratch_operands = 0 : i64, tpu.core_type = #tpu.core_type<tc>, window_params = [{pipeline_mode = #tpu.pipeline_mode<synchronous>, transform_indices = @transform_0, window_bounds = array<i64: 2, 2, 128>}, {pipeline_mode = #tpu.pipeline_mode<synchronous>, transform_indices = @transform_1, window_bounds = array<i64: 1, 128>}, {pipeline_mode = #tpu.pipeline_mode<synchronous>, transform_indices = @transform_2, window_bounds = array<i64: 128, 2>}, {pipeline_mode = #tpu.pipeline_mode<synchronous>, transform_indices = @transform_3, window_bounds = array<i64: 1, 2>}, {pipeline_mode = #tpu.pipeline_mode<synchronous>, transform_indices = @transform_4, window_bounds = array<i64: 2, 2>}]} {
    %c0 = arith.constant 0 : index
    %c0_0 = arith.constant 0 : index
    %c0_1 = arith.constant 0 : index
    %0 = vector.load %arg1[%c0, %c0_0, %c0_1] : memref<2x2x128xf32, #tpu.memory_space<vmem>>, vector<2x2x128xf32>
    %cst = arith.constant dense<0.000000e+00> : vector<2x128xf32>
    %1 = vector.multi_reduction <add>, %0, %cst [0] : vector<2x2x128xf32> to vector<2x128xf32>
    %c0_2 = arith.constant 0 : index
    %c0_3 = arith.constant 0 : index
    %2 = vector.load %arg2[%c0_2, %c0_3] : memref<1x128xf32, #tpu.memory_space<vmem>>, vector<1x128xf32>
    %3 = vector.broadcast %2 : vector<1x128xf32> to vector<2x128xf32>
    %4 = arith.addf %1, %3 : vector<2x128xf32>
    %cst_4 = arith.constant 0.000000e+00 : f32
    %5 = vector.broadcast %cst_4 : f32 to vector<2x128xf32>
    %6 = arith.maximumf %4, %5 : vector<2x128xf32>
    %c0_5 = arith.constant 0 : index
    %c0_6 = arith.constant 0 : index
    %7 = vector.load %arg3[%c0_5, %c0_6] : memref<128x2xf32, #tpu.memory_space<vmem>>, vector<128x2xf32>
    %cst_7 = arith.constant dense<0.000000e+00> : vector<2x2xf32>
    %8 = tpu.matmul %6, %7, %cst_7 {dimension_numbers = #tpu.dot_dimension_numbers<[1], [0], [0], [1], [0, 0, 1, 1], [], []>} : vector<2x128xf32>, vector<128x2xf32>, vector<2x2xf32> -> vector<2x2xf32>
    %c0_8 = arith.constant 0 : index
    %c0_9 = arith.constant 0 : index
    %9 = vector.load %arg4[%c0_8, %c0_9] : memref<1x2xf32, #tpu.memory_space<vmem>>, vector<1x2xf32>
    %10 = vector.broadcast %9 : vector<1x2xf32> to vector<2x2xf32>
    %11 = arith.addf %8, %10 : vector<2x2xf32>
    %c0_10 = arith.constant 0 : index
    %c0_11 = arith.constant 0 : index
    %12 = vector.load %arg5[%c0_10, %c0_11] : memref<2x2xf32, #tpu.memory_space<vmem>>, vector<2x2xf32>
    tpu.vector_store %arg5[%c0_10, %c0_11], %11 {strides = array<i32>} : memref<2x2xf32, #tpu.memory_space<vmem>>, vector<2x2xf32>,
    return
  }
  func.func @transform_0(%arg0: i32) -> (i32, i32, i32) {
    %c0_i32 = arith.constant 0 : i32
    %c0_i32_0 = arith.constant 0 : i32
    %c0_i32_1 = arith.constant 0 : i32
    %c0_i32_2 = arith.constant 0 : i32
    return %c0_i32, %c0_i32_0, %c0_i32_1 : i32, i32, i32
  }
  func.func @transform_1(%arg0: i32) -> (i32, i32) {
    %c0_i32 = arith.constant 0 : i32
    %c0_i32_0 = arith.constant 0 : i32
    %c0_i32_1 = arith.constant 0 : i32
    return %c0_i32, %c0_i32_0 : i32, i32
  }
  func.func @transform_2(%arg0: i32) -> (i32, i32) {
    %c0_i32 = arith.constant 0 : i32
    %c0_i32_0 = arith.constant 0 : i32
    %c0_i32_1 = arith.constant 0 : i32
    return %c0_i32, %c0_i32_0 : i32, i32
  }
  func.func @transform_3(%arg0: i32) -> (i32, i32) {
    %c0_i32 = arith.constant 0 : i32
    %c0_i32_0 = arith.constant 0 : i32
    %c0_i32_1 = arith.constant 0 : i32
    return %c0_i32, %c0_i32_0 : i32, i32
  }
  func.func @transform_4(%arg0: i32) -> (i32, i32) {
    %c0_i32 = arith.constant 0 : i32
    %c0_i32_0 = arith.constant 0 : i32
    %c0_i32_1 = arith.constant 0 : i32
    return %c0_i32, %c0_i32_0 : i32, i32
  }
}

</mosaic_0001>

<bundles_post_ra>
// kernel: simple_cnn_forward.4
= control target key start
LH: loop header
LB: loop body
LE: loop exit
PB: predicated region body
PF: predicated region fallthrough
CT: control target
= control target key end

     0   :  { %s6082_s12 = smov 0   ;;  %s6084_s13 = smov 0   ;;  %s7587_s0 = inlined_call_operand.vmem [shape: bf16[2,4,27,4096], index: 0, kind: input, shape index: {}]   ;;  %s7588_s1 = inlined_call_operand.vmem [shape: bf16[16,27], index: 1, kind: input, shape index: {}]   ;;  %s7589_s2 = inlined_call_operand.vmem [shape: f32[16,1], index: 2, kind: input, shape index: {}]   ;;  %s7590_s3 = inlined_call_operand.vmem [shape: bf16[2,16,4096], index: 3, kind: output, shape index: {}]  }
   0x1   :  { %s6086_s14 = smov 0  }
   0x2 LB: > { %s25_s15 = sadd.s32 1, %s6054_s13  ;;  %p5420_p0 = scmp.ge.s32.totalorder %s6058_s14, 1  ;;  %s6058_s14 = sphi %s6086_s14, %s13_s14   ;;  %s6054_s13 = sphi %s6084_s13, %s7947_s13   ;;  %s6050_s12 = sphi %s6082_s12, %s7946_s12  }
   0x3   : > { %p27_p1 = scmp.ge.s32.totalorder %s25_s15, 2  ;;  %p158_p2 = scmp.lt.s32.totalorder %s6058_s14, 3 }
   0x5   : > { %s7949_s15 = smov (%p27_p1, %s25_s15), 0  ;;  %p159_p3 = pnand %p5420_p0, %p158_p2 }
   0x7   : > { %162 = sbr.rel (%p159_p3) target bundleno = 495 (0x1ef), region = 32 }
   0xc   : > { %p191_p4 = scmp.lt.s32.totalorder %s6050_s12, 1  ;;  %vm574_vm0 = vcmask 1044480   ;;  %v7591_v0 = vmov 0   ;;  %vm575_vm1 = vcmask 1045504   ;;  %v6061_v1 = vmov 65535   ;;  %v6132_v31 = vld [vmem:[%s7588_s1] sm:$0xff]  }
   0xd   : > { %706 = vmatprep.mubr.bf16.mxu0 %v7591_v0  ;;  %749 = vmatprep.mubr.bf16.mxu1 %v7591_v0  ;;  %v576_v2 = vsel %vm574_vm0, 4294967295, %v6061_v1  ;;  %vm570_vm2 = vcmask 220160  }
   0xe   : > { %s7951_s12 = smov (!%p191_p4, %s6050_s12), 1  ;;  %6032 = vset.pattern.permute.xlu0 %v7591_v0  ;;  %v6113_v5 = vsel %vm575_vm1, %v576_v2, 0 }
   0xf   : > { %s5972_s16 = sshll.u32 %s7951_s12, 11  ;;  %s5973_s30 = sshll.u32 %s7951_s12, 8 }
  0x10   : > { %s6109_s19 = scalar_lea.vmem %s7587_s0, %s5972_s16  ;;  %s7345_s6 = scalar_lea.vmem %s7590_s3, %s5973_s30 }
  0x11   : > { %v245_v3 = vld [vmem:[%s6109_s19 + $0x100] sm:$0xff]  ;;  %v246_v6 = vld [vmem:[%s6109_s19 + $0x108] sm:$0xff]  ;;  %v247_v16 = vld [vmem:[%s6109_s19 + $0x110] sm:$0xff] }
  0x12   : > { %v261_v4 = vld [vmem:[%s6109_s19 + $0x180] sm:$0x33]  ;;  %v262_v8 = vld [vmem:[%s6109_s19 + $0x188] sm:$0x33]  ;;  %v263_v20 = vld [vmem:[%s6109_s19 + $0x190] sm:$0x33] }
  0x13   : > { %v5459_v7 = vcombine.high %v245_v3, %v261_v4  ;;  %v5458_v9 = vcombine.low %v245_v3, %v261_v4  ;;  %v213_v10 = vld [vmem:[%s6109_s19] sm:$0xff]  ;;  %v5461_v12 = vcombine.high %v246_v6, %v262_v8  ;;  %v5460_v13 = vcombine.low %v246_v6, %v262_v8  ;;  %v214_v14 = vld [vmem:[%s6109_s19 + $0x8] sm:$0xff]  ;;  %v248_v21 = vld [vmem:[%s6109_s19 + $0x118] sm:$0xff] }
  0x14   : > { %v229_v11 = vld [vmem:[%s6109_s19 + $0x80] sm:$0xff]  ;;  %v230_v15 = vld [vmem:[%s6109_s19 + $0x88] sm:$0xff]  ;;  %v264_v22 = vld [vmem:[%s6109_s19 + $0x198] sm:$0x33]  ;;  %v5463_v26 = vcombine.high %v247_v16, %v263_v20  ;;  %v5462_v29 = vcombine.low %v247_v16, %v263_v20 }
  0x15   : > { %v582_v17 = vand.u32 %v5459_v7, %v6113_v5  ;;  %v579_v18 = vand.u32 %v5458_v9, %v6113_v5  ;;  %v5427_v19 = vcombine.high %v213_v10, %v229_v11  ;;  %v588_v23 = vand.u32 %v5461_v12, %v6113_v5  ;;  %v215_v34 = vld [vmem:[%s6109_s19 + $0x10] sm:$0xff]  ;;  %v216_v37 = vld [vmem:[%s6109_s19 + $0x18] sm:$0xff]  ;;  %v249_v38 = vld [vmem:[%s6109_s19 + $0x120] sm:$0xff] }
  0x16   : > { %v585_v24 = vand.u32 %v5460_v13, %v6113_v5  ;;  %v5429_v25 = vcombine.high %v214_v14, %v230_v15  ;;  %v5465_v27 = vcombine.high %v248_v21, %v264_v22  ;;  %v5426_v28 = vcombine.low %v213_v10, %v229_v11  ;;  %v231_v35 = vld [vmem:[%s6109_s19 + $0x90] sm:$0xff]  ;;  %v265_v39 = vld [vmem:[%s6109_s19 + $0x1a0] sm:$0x33]  ;;  %v232_v40 = vld [vmem:[%s6109_s19 + $0x98] sm:$0xff] }
  0x17   : > { %686 = vmatprep.subr.bf16.mxu0 %v582_v17  ;;  %729 = vmatprep.subr.bf16.mxu1 %v588_v23  ;;  %v5428_v30 = vcombine.low %v214_v14, %v230_v15  ;;  %v594_v32 = vand.u32 %v5463_v26, %v6113_v5  ;;  %v5464_v33 = vcombine.low %v248_v21, %v264_v22  ;;  %v250_v41 = vld [vmem:[%s6109_s19 + $0x128] sm:$0xff]  ;;  %v217_v54 = vld [vmem:[%s6109_s19 + $0x20] sm:$0xff]  ;;  %v251_v58 = vld [vmem:[%s6109_s19 + $0x130] sm:$0xff] }
  0x18   : > { %687 = vmatpush1.bf16.msra.mxu0 %v579_v18  ;;  %730 = vmatpush1.bf16.msra.mxu1 %v585_v24  ;;  %v600_v36 = vand.u32 %v5465_v27, %v6113_v5  ;;  %v266_v42 = vld [vmem:[%s6109_s19 + $0x1a8] sm:$0x33]  ;;  %v591_v43 = vand.u32 %v5462_v29, %v6113_v5  ;;  %v5431_v45 = vcombine.high %v215_v34, %v231_v35  ;;  %v233_v55 = vld [vmem:[%s6109_s19 + $0xa0] sm:$0xff]  ;;  %v267_v59 = vld [vmem:[%s6109_s19 + $0x1b0] sm:$0x33] }
  0x19   : > { %688 = vmatprep.subr.bf16.mxu0 %v5427_v19  ;;  %731 = vmatprep.subr.bf16.mxu1 %v5429_v25  ;;  %v597_v44 = vand.u32 %v5464_v33, %v6113_v5  ;;  %v5467_v46 = vcombine.high %v249_v38, %v265_v39  ;;  %v5433_v47 = vcombine.high %v216_v37, %v232_v40  ;;  %v218_v57 = vld [vmem:[%s6109_s19 + $0x28] sm:$0xff]  ;;  %v252_v61 = vld [vmem:[%s6109_s19 + $0x138] sm:$0xff]  ;;  %v219_v12 = vld [vmem:[%s6109_s19 + $0x30] sm:$0xff] }
  0x1a   : > { %v5469_v48 = vcombine.high %v250_v41, %v266_v42  ;;  %v5430_v49 = vcombine.low %v215_v34, %v231_v35  ;;  %v5466_v50 = vcombine.low %v249_v38, %v265_v39  ;;  %v5432_v51 = vcombine.low %v216_v37, %v232_v40  ;;  %v234_v60 = vld [vmem:[%s6109_s19 + $0xa8] sm:$0xff]  ;;  %v268_v62 = vld [vmem:[%s6109_s19 + $0x1b8] sm:$0x33]  ;;  %v235_v13 = vld [vmem:[%s6109_s19 + $0xb0] sm:$0xff] }
  0x1b   : > { %v606_v52 = vand.u32 %v5467_v46, %v6113_v5  ;;  %v5468_v53 = vcombine.low %v250_v41, %v266_v42  ;;  %v5435_v2 = vcombine.high %v217_v54, %v233_v55  ;;  %v5471_v3 = vcombine.high %v251_v58, %v267_v59  ;;  %v220_v15 = vld [vmem:[%s6109_s19 + $0x38] sm:$0xff]  ;;  %v253_v16 = vld [vmem:[%s6109_s19 + $0x140] sm:$0xff]  ;;  %v254_v19 = vld [vmem:[%s6109_s19 + $0x148] sm:$0xff] }
  0x1c   : > { %689 = vmatpush1.bf16.msra.mxu0 %v5426_v28  ;;  %732 = vmatpush1.bf16.msra.mxu1 %v5428_v30  ;;  %v612_v56 = vand.u32 %v5469_v48, %v6113_v5  ;;  %v603_v63 = vand.u32 %v5466_v50, %v6113_v5  ;;  %v5437_v4 = vcombine.high %v218_v57, %v234_v60  ;;  %v269_v17 = vld [vmem:[%s6109_s19 + $0x1c0] sm:$0x33]  ;;  %v236_v18 = vld [vmem:[%s6109_s19 + $0xb8] sm:$0xff]  ;;  %v270_v20 = vld [vmem:[%s6109_s19 + $0x1c8] sm:$0x33] }
  0x1d   : > { %772 = vmatprep.subr.bf16.mxu0 %v594_v32  ;;  %815 = vmatprep.subr.bf16.mxu1 %v600_v36  ;;  %v609_v1 = vand.u32 %v5468_v53, %v6113_v5  ;;  %v5473_v6 = vcombine.high %v252_v61, %v268_v62  ;;  %v5434_v7 = vcombine.low %v217_v54, %v233_v55  ;;  %v221_v33 = vld [vmem:[%s6109_s19 + $0x40] sm:$0xff]  ;;  %v222_v36 = vld [vmem:[%s6109_s19 + $0x48] sm:$0xff]  ;;  %v255_v37 = vld [vmem:[%s6109_s19 + $0x150] sm:$0xff] }
  0x1e   : > { %v5470_v8 = vcombine.low %v251_v58, %v267_v59  ;;  %v5436_v9 = vcombine.low %v218_v57, %v234_v60  ;;  %v618_v10 = vand.u32 %v5471_v3, %v6113_v5  ;;  %v5472_v11 = vcombine.low %v252_v61, %v268_v62  ;;  %v237_v34 = vld [vmem:[%s6109_s19 + $0xc0] sm:$0xff]  ;;  %v271_v38 = vld [vmem:[%s6109_s19 + $0x1d0] sm:$0x33]  ;;  %v238_v39 = vld [vmem:[%s6109_s19 + $0xc8] sm:$0xff] }
  0x1f   : > { %5490 = vmatmul.mubr.msk.bf16.vlgmr.msra.gmra.mxu0 %vm570_vm2, %v6132_v31  ;;  %5491 = vmatmul.mubr.msk.bf16.vlgmr.msra.gmra.mxu1 %vm570_vm2, %v6132_v31  ;;  %v624_v14 = vand.u32 %v5473_v6, %v6113_v5  ;;  %v5439_v23 = vcombine.high %v219_v12, %v235_v13  ;;  %v5475_v24 = vcombine.high %v253_v16, %v269_v17  ;;  %v256_v40 = vld [vmem:[%s6109_s19 + $0x158] sm:$0xff]  ;;  %v223_v53 = vld [vmem:[%s6109_s19 + $0x50] sm:$0xff]  ;;  %v257_v57 = vld [vmem:[%s6109_s19 + $0x160] sm:$0xff] }
  0x20   : > { %773 = vmatpush1.bf16.msra.mxu0 %v591_v43  ;;  %816 = vmatpush1.bf16.msra.mxu1 %v597_v44  ;;  %v615_v21 = vand.u32 %v5470_v8, %v6113_v5  ;;  %v621_v22 = vand.u32 %v5472_v11, %v6113_v5  ;;  %v5441_v25 = vcombine.high %v220_v15, %v236_v18  ;;  %v272_v41 = vld [vmem:[%s6109_s19 + $0x1d8] sm:$0x33]  ;;  %v239_v54 = vld [vmem:[%s6109_s19 + $0xd0] sm:$0xff]  ;;  %v273_v58 = vld [vmem:[%s6109_s19 + $0x1e0] sm:$0x33] }
  0x21   : > { %774 = vmatprep.subr.bf16.mxu0 %v5431_v45  ;;  %817 = vmatprep.subr.bf16.mxu1 %v5433_v47  ;;  %v5477_v26 = vcombine.high %v254_v19, %v270_v20  ;;  %v5438_v27 = vcombine.low %v219_v12, %v235_v13  ;;  %v5474_v28 = vcombine.low %v253_v16, %v269_v17  ;;  %v240_v59 = vld [vmem:[%s6109_s19 + $0xd8] sm:$0xff]  ;;  %v258_v60 = vld [vmem:[%s6109_s19 + $0x168] sm:$0xff]  ;;  %v225_v11 = vld [vmem:[%s6109_s19 + $0x60] sm:$0xff] }
  0x22   : > { %792 = vmatprep.mubr.bf16.mxu0 %v7591_v0  ;;  %835 = vmatprep.mubr.bf16.mxu1 %v7591_v0  ;;  %v5440_v29 = vcombine.low %v220_v15, %v236_v18  ;;  %v630_v30 = vand.u32 %v5475_v24, %v6113_v5  ;;  %v5476_v32 = vcombine.low %v254_v19, %v270_v20  ;;  %v274_v61 = vld [vmem:[%s6109_s19 + $0x1e8] sm:$0x33]  ;;  %v241_v12 = vld [vmem:[%s6109_s19 + $0xe0] sm:$0xff]  ;;  %v259_v15 = vld [vmem:[%s6109_s19 + $0x170] sm:$0xff] }
  0x23   : > { %v636_v35 = vand.u32 %v5477_v26, %v6113_v5  ;;  %v627_v42 = vand.u32 %v5474_v28, %v6113_v5  ;;  %v5443_v44 = vcombine.high %v221_v33, %v237_v34  ;;  %v5479_v45 = vcombine.high %v255_v37, %v271_v38  ;;  %v275_v16 = vld [vmem:[%s6109_s19 + $0x1f0] sm:$0x33]  ;;  %v242_v17 = vld [vmem:[%s6109_s19 + $0xe8] sm:$0xff]  ;;  %v260_v18 = vld [vmem:[%s6109_s19 + $0x178] sm:$0xff] }
  0x24   : > { %775 = vmatpush1.bf16.msra.mxu0 %v5430_v49  ;;  %818 = vmatpush1.bf16.msra.mxu1 %v5432_v51  ;;  %v633_v43 = vand.u32 %v5476_v32, %v6113_v5  ;;  %v5445_v46 = vcombine.high %v222_v36, %v238_v39  ;;  %v5481_v47 = vcombine.high %v256_v40, %v272_v41  ;;  %v276_v19 = vld [vmem:[%s6109_s19 + $0x1f8] sm:$0x33]  ;;  %v227_v32 = vld [vmem:[%s6109_s19 + $0x70] sm:$0xff] }
  0x25   : > { %858 = vmatprep.subr.bf16.mxu0 %v606_v52  ;;  %901 = vmatprep.subr.bf16.mxu1 %v612_v56  ;;  %v5442_v48 = vcombine.low %v221_v33, %v237_v34  ;;  %v5478_v49 = vcombine.low %v255_v37, %v271_v38  ;;  %v5444_v50 = vcombine.low %v222_v36, %v238_v39  ;;  %v224_v56 = vld [vmem:[%s6109_s19 + $0x58] sm:$0xff]  ;;  %v243_v33 = vld [vmem:[%s6109_s19 + $0xf0] sm:$0xff]  ;;  %v5538_v36 = vld [vmem:[%s6109_s19 + $0x300] sm:$0xff] }
  0x26   : > { %v642_v51 = vand.u32 %v5479_v45, %v6113_v5  ;;  %v5480_v52 = vcombine.low %v256_v40, %v272_v41  ;;  %v648_v55 = vand.u32 %v5481_v47, %v6113_v5  ;;  %v5449_v3 = vcombine.high %v224_v56, %v240_v59  ;;  %v5554_v37 = vld [vmem:[%s6109_s19 + $0x380] sm:$0x33]  ;;  %v244_v38 = vld [vmem:[%s6109_s19 + $0xf8] sm:$0xff]  ;;  %v5539_v39 = vld [vmem:[%s6109_s19 + $0x308] sm:$0xff] }
  0x27   : > { %5492 = vmatmul.mubr.msk.bf16.vlgmr.msra.gmra.mxu0 %vm570_vm2, %v6132_v31  ;;  %5493 = vmatmul.mubr.msk.bf16.vlgmr.msra.gmra.mxu1 %vm570_vm2, %v6132_v31  ;;  %v639_v62 = vand.u32 %v5478_v49, %v6113_v5  ;;  %v5446_v6 = vcombine.low %v223_v53, %v239_v54  ;;  %v5448_v8 = vcombine.low %v224_v56, %v240_v59  ;;  %v5555_v40 = vld [vmem:[%s6109_s19 + $0x388] sm:$0x33]  ;;  %v5540_v56 = vld [vmem:[%s6109_s19 + $0x310] sm:$0xff]  ;;  %v5541_v59 = vld [vmem:[%s6109_s19 + $0x318] sm:$0xff] }
  0x28   : > { %859 = vmatpush1.bf16.msra.mxu0 %v603_v63  ;;  %902 = vmatpush1.bf16.msra.mxu1 %v609_v1  ;;  %v645_v63 = vand.u32 %v5480_v52, %v6113_v5  ;;  %v5447_v1 = vcombine.high %v223_v53, %v239_v54  ;;  %v5450_v26 = vcombine.low %v225_v11, %v241_v12  ;;  %v5506_v52 = vld [vmem:[%s6109_s19 + $0x200] sm:$0xff] }
  0x29   : > { %860 = vmatprep.subr.bf16.mxu0 %v5435_v2  ;;  %903 = vmatprep.subr.bf16.mxu1 %v5437_v4  ;;  %v5483_v2 = vcombine.high %v257_v57, %v273_v58  ;;  %v5485_v4 = vcombine.high %v258_v60, %v274_v61  ;;  %v5454_v47 = vcombine.low %v227_v32, %v243_v33  ;;  %v5522_v53 = vld [vmem:[%s6109_s19 + $0x280] sm:$0xff] }
  0x2a   : > { %878 = vmatprep.mubr.bf16.mxu0 %v7591_v0  ;;  %921 = vmatprep.mubr.bf16.mxu1 %v7591_v0 }
  0x2b   : > { %v660_v13 = vand.u32 %v5485_v4, %v6113_v5  ;;  %v5570_v4 = vcombine.low %v5506_v52, %v5522_v53 }
  0x2c   : > { %861 = vmatpush1.bf16.msra.mxu0 %v5434_v7  ;;  %904 = vmatpush1.bf16.msra.mxu1 %v5436_v9  ;;  %v5482_v7 = vcombine.low %v257_v57, %v273_v58  ;;  %v654_v9 = vand.u32 %v5483_v2, %v6113_v5  ;;  %v5556_v57 = vld [vmem:[%s6109_s19 + $0x390] sm:$0x33]  ;;  %v5523_v58 = vld [vmem:[%s6109_s19 + $0x288] sm:$0xff] }
  0x2d   : > { %944 = vmatprep.subr.bf16.mxu0 %v618_v10  ;;  %987 = vmatprep.subr.bf16.mxu1 %v624_v14  ;;  %v5484_v10 = vcombine.low %v258_v60, %v274_v61  ;;  %v226_v14 = vld [vmem:[%s6109_s19 + $0x68] sm:$0xff]  ;;  %v5557_v60 = vld [vmem:[%s6109_s19 + $0x398] sm:$0x33] }
  0x2e   : > { %v651_v20 = vand.u32 %v5482_v7, %v6113_v5  ;;  %v5453_v24 = vcombine.high %v226_v14, %v242_v17  ;;  %v5452_v28 = vcombine.low %v226_v14, %v242_v17  ;;  %v5542_v14 = vld [vmem:[%s6109_s19 + $0x320] sm:$0xff]  ;;  %v5543_v17 = vld [vmem:[%s6109_s19 + $0x328] sm:$0xff] }
  0x2f   : > { %5494 = vmatmul.mubr.msk.bf16.vlgmr.msra.gmra.mxu0 %vm570_vm2, %v6132_v31  ;;  %5495 = vmatmul.mubr.msk.bf16.vlgmr.msra.gmra.mxu1 %vm570_vm2, %v6132_v31 }
  0x30   : > { %945 = vmatpush1.bf16.msra.mxu0 %v615_v21  ;;  %988 = vmatpush1.bf16.msra.mxu1 %v621_v22  ;;  %v657_v21 = vand.u32 %v5484_v10, %v6113_v5  ;;  %v5451_v22 = vcombine.high %v225_v11, %v241_v12  ;;  %v5508_v10 = vld [vmem:[%s6109_s19 + $0x210] sm:$0xff] }
  0x31   : > { %946 = vmatprep.subr.bf16.mxu0 %v5439_v23  ;;  %989 = vmatprep.subr.bf16.mxu1 %v5441_v25  ;;  %v5487_v23 = vcombine.high %v259_v15, %v275_v16  ;;  %v5489_v25 = vcombine.high %v260_v18, %v276_v19  ;;  %v5524_v11 = vld [vmem:[%s6109_s19 + $0x290] sm:$0xff] }
  0x32   : > { %964 = vmatprep.mubr.bf16.mxu0 %v7591_v0  ;;  %1007 = vmatprep.mubr.bf16.mxu1 %v7591_v0 }
  0x33   : > { %v672_v34 = vand.u32 %v5489_v25, %v6113_v5  ;;  %v5574_v25 = vcombine.low %v5508_v10, %v5524_v11 }
  0x34   : > { %947 = vmatpush1.bf16.msra.mxu0 %v5438_v27  ;;  %990 = vmatpush1.bf16.msra.mxu1 %v5440_v29  ;;  %v5486_v27 = vcombine.low %v259_v15, %v275_v16  ;;  %v666_v29 = vand.u32 %v5487_v23, %v6113_v5  ;;  %v5558_v15 = vld [vmem:[%s6109_s19 + $0x3a0] sm:$0x33]  ;;  %v5525_v16 = vld [vmem:[%s6109_s19 + $0x298] sm:$0xff] }
  0x35   : > { %1030 = vmatprep.subr.bf16.mxu0 %v630_v30  ;;  %1073 = vmatprep.subr.bf16.mxu1 %v636_v35  ;;  %v5488_v30 = vcombine.low %v260_v18, %v276_v19  ;;  %v228_v35 = vld [vmem:[%s6109_s19 + $0x78] sm:$0xff]  ;;  %v5559_v18 = vld [vmem:[%s6109_s19 + $0x3a8] sm:$0x33] }
  0x36   : > { %v663_v41 = vand.u32 %v5486_v27, %v6113_v5  ;;  %v5457_v45 = vcombine.high %v228_v35, %v244_v38  ;;  %v5456_v49 = vcombine.low %v228_v35, %v244_v38  ;;  %v5544_v35 = vld [vmem:[%s6109_s19 + $0x330] sm:$0xff]  ;;  %v5545_v38 = vld [vmem:[%s6109_s19 + $0x338] sm:$0xff] }
  0x37   : > { %5496 = vmatmul.mubr.msk.bf16.vlgmr.msra.gmra.mxu0 %vm570_vm2, %v6132_v31  ;;  %5497 = vmatmul.mubr.msk.bf16.vlgmr.msra.gmra.mxu1 %vm570_vm2, %v6132_v31 }
  0x38   : > { %1031 = vmatpush1.bf16.msra.mxu0 %v627_v42  ;;  %1074 = vmatpush1.bf16.msra.mxu1 %v633_v43  ;;  %v669_v42 = vand.u32 %v5488_v30, %v6113_v5  ;;  %v5455_v43 = vcombine.high %v227_v32, %v243_v33  ;;  %v5510_v30 = vld [vmem:[%s6109_s19 + $0x220] sm:$0xff] }
  0x39   : > { %1032 = vmatprep.subr.bf16.mxu0 %v5443_v44  ;;  %1075 = vmatprep.subr.bf16.mxu1 %v5445_v46  ;;  %v5603_v44 = vcombine.high %v5538_v36, %v5554_v37  ;;  %v5605_v46 = vcombine.high %v5539_v39, %v5555_v40  ;;  %v5526_v32 = vld [vmem:[%s6109_s19 + $0x2a0] sm:$0xff] }
  0x3a   : > { %1050 = vmatprep.mubr.bf16.mxu0 %v7591_v0  ;;  %1093 = vmatprep.mubr.bf16.mxu1 %v7591_v0 }
  0x3b   : > { %v1725_v54 = vand.u32 %v5605_v46, %v6113_v5  ;;  %v5578_v46 = vcombine.low %v5510_v30, %v5526_v32 }
  0x3c   : > { %1033 = vmatpush1.bf16.msra.mxu0 %v5442_v48  ;;  %1076 = vmatpush1.bf16.msra.mxu1 %v5444_v50  ;;  %v5602_v48 = vcombine.low %v5538_v36, %v5554_v37  ;;  %v1719_v50 = vand.u32 %v5603_v44, %v6113_v5  ;;  %v5560_v36 = vld [vmem:[%s6109_s19 + $0x3b0] sm:$0x33]  ;;  %v5527_v37 = vld [vmem:[%s6109_s19 + $0x2a8] sm:$0xff] }
  0x3d   : > { %1116 = vmatprep.subr.bf16.mxu0 %v642_v51  ;;  %1159 = vmatprep.subr.bf16.mxu1 %v648_v55  ;;  %v5604_v51 = vcombine.low %v5539_v39, %v5555_v40  ;;  %v5507_v55 = vld [vmem:[%s6109_s19 + $0x208] sm:$0xff]  ;;  %v5561_v39 = vld [vmem:[%s6109_s19 + $0x3b8] sm:$0x33] }
  0x3e   : > { %v1716_v61 = vand.u32 %v5602_v48, %v6113_v5  ;;  %v5573_v2 = vcombine.high %v5507_v55, %v5523_v58  ;;  %v5572_v7 = vcombine.low %v5507_v55, %v5523_v58  ;;  %v5546_v55 = vld [vmem:[%s6109_s19 + $0x340] sm:$0xff]  ;;  %v5547_v58 = vld [vmem:[%s6109_s19 + $0x348] sm:$0xff] }
  0x3f   : > { %5498 = vmatmul.mubr.msk.bf16.vlgmr.msra.gmra.mxu0 %vm570_vm2, %v6132_v31  ;;  %5499 = vmatmul.mubr.msk.bf16.vlgmr.msra.gmra.mxu1 %vm570_vm2, %v6132_v31 }
  0x40   : > { %1117 = vmatpush1.bf16.msra.mxu0 %v639_v62  ;;  %1160 = vmatpush1.bf16.msra.mxu1 %v645_v63  ;;  %v1722_v62 = vand.u32 %v5604_v51, %v6113_v5  ;;  %v5571_v63 = vcombine.high %v5506_v52, %v5522_v53  ;;  %v5512_v51 = vld [vmem:[%s6109_s19 + $0x230] sm:$0xff] }
  0x41   : > { %1118 = vmatprep.subr.bf16.mxu0 %v5447_v1  ;;  %1161 = vmatprep.subr.bf16.mxu1 %v5449_v3  ;;  %v5607_v1 = vcombine.high %v5540_v56, %v5556_v57  ;;  %v5609_v3 = vcombine.high %v5541_v59, %v5557_v60  ;;  %v5528_v52 = vld [vmem:[%s6109_s19 + $0x2b0] sm:$0xff] }
  0x42   : > { %1136 = vmatprep.mubr.bf16.mxu0 %v7591_v0  ;;  %1179 = vmatprep.mubr.bf16.mxu1 %v7591_v0 }
  0x43   : > { %v1737_v12 = vand.u32 %v5609_v3, %v6113_v5  ;;  %v5582_v3 = vcombine.low %v5512_v51, %v5528_v52 }
  0x44   : > { %1119 = vmatpush1.bf16.msra.mxu0 %v5446_v6  ;;  %1162 = vmatpush1.bf16.msra.mxu1 %v5448_v8  ;;  %v5606_v6 = vcombine.low %v5540_v56, %v5556_v57  ;;  %v1731_v8 = vand.u32 %v5607_v1, %v6113_v5  ;;  %v5562_v56 = vld [vmem:[%s6109_s19 + $0x3c0] sm:$0x33]  ;;  %v5529_v57 = vld [vmem:[%s6109_s19 + $0x2b8] sm:$0xff] }
  0x45   : > { %1202 = vmatprep.subr.bf16.mxu0 %v654_v9  ;;  %1245 = vmatprep.subr.bf16.mxu1 %v660_v13  ;;  %v5608_v9 = vcombine.low %v5541_v59, %v5557_v60  ;;  %v5509_v13 = vld [vmem:[%s6109_s19 + $0x218] sm:$0xff]  ;;  %v5563_v59 = vld [vmem:[%s6109_s19 + $0x3c8] sm:$0x33] }
  0x46   : > { %v1728_v19 = vand.u32 %v5606_v6, %v6113_v5  ;;  %v5577_v23 = vcombine.high %v5509_v13, %v5525_v16  ;;  %v5576_v27 = vcombine.low %v5509_v13, %v5525_v16  ;;  %v5548_v13 = vld [vmem:[%s6109_s19 + $0x350] sm:$0xff]  ;;  %v5549_v16 = vld [vmem:[%s6109_s19 + $0x358] sm:$0xff] }
  0x47   : > { %5500 = vmatmul.mubr.msk.bf16.vlgmr.msra.gmra.mxu0 %vm570_vm2, %v6132_v31  ;;  %5501 = vmatmul.mubr.msk.bf16.vlgmr.msra.gmra.mxu1 %vm570_vm2, %v6132_v31 }
  0x48   : > { %1203 = vmatpush1.bf16.msra.mxu0 %v651_v20  ;;  %1246 = vmatpush1.bf16.msra.mxu1 %v657_v21  ;;  %v1734_v20 = vand.u32 %v5608_v9, %v6113_v5  ;;  %v5575_v21 = vcombine.high %v5508_v10, %v5524_v11  ;;  %v5514_v9 = vld [vmem:[%s6109_s19 + $0x240] sm:$0xff] }
  0x49   : > { %1204 = vmatprep.subr.bf16.mxu0 %v5451_v22  ;;  %1247 = vmatprep.subr.bf16.mxu1 %v5453_v24  ;;  %v5611_v22 = vcombine.high %v5542_v14, %v5558_v15  ;;  %v5613_v24 = vcombine.high %v5543_v17, %v5559_v18  ;;  %v5530_v10 = vld [vmem:[%s6109_s19 + $0x2c0] sm:$0xff] }
  0x4a   : > { %1222 = vmatprep.mubr.bf16.mxu0 %v7591_v0  ;;  %1265 = vmatprep.mubr.bf16.mxu1 %v7591_v0 }
  0x4b   : > { %v1749_v33 = vand.u32 %v5613_v24, %v6113_v5  ;;  %v5586_v24 = vcombine.low %v5514_v9, %v5530_v10 }
  0x4c   : > { %1205 = vmatpush1.bf16.msra.mxu0 %v5450_v26  ;;  %1248 = vmatpush1.bf16.msra.mxu1 %v5452_v28  ;;  %v5610_v26 = vcombine.low %v5542_v14, %v5558_v15  ;;  %v1743_v28 = vand.u32 %v5611_v22, %v6113_v5  ;;  %v5564_v14 = vld [vmem:[%s6109_s19 + $0x3d0] sm:$0x33]  ;;  %v5531_v15 = vld [vmem:[%s6109_s19 + $0x2c8] sm:$0xff] }
  0x4d   : > { %1288 = vmatprep.subr.bf16.mxu0 %v666_v29  ;;  %1331 = vmatprep.subr.bf16.mxu1 %v672_v34  ;;  %v5612_v29 = vcombine.low %v5543_v17, %v5559_v18  ;;  %v5511_v34 = vld [vmem:[%s6109_s19 + $0x228] sm:$0xff]  ;;  %v5565_v17 = vld [vmem:[%s6109_s19 + $0x3d8] sm:$0x33] }
  0x4e   : > { %v1740_v40 = vand.u32 %v5610_v26, %v6113_v5  ;;  %v5581_v44 = vcombine.high %v5511_v34, %v5527_v37  ;;  %v5580_v48 = vcombine.low %v5511_v34, %v5527_v37  ;;  %v5550_v34 = vld [vmem:[%s6109_s19 + $0x360] sm:$0xff]  ;;  %v5551_v37 = vld [vmem:[%s6109_s19 + $0x368] sm:$0xff] }
  0x4f   : > { %5502 = vmatmul.mubr.msk.bf16.vlgmr.msra.gmra.mxu0 %vm570_vm2, %v6132_v31  ;;  %5503 = vmatmul.mubr.msk.bf16.vlgmr.msra.gmra.mxu1 %vm570_vm2, %v6132_v31 }
  0x50   : > { %1289 = vmatpush1.bf16.msra.mxu0 %v663_v41  ;;  %1332 = vmatpush1.bf16.msra.mxu1 %v669_v42  ;;  %v1746_v41 = vand.u32 %v5612_v29, %v6113_v5  ;;  %v5579_v42 = vcombine.high %v5510_v30, %v5526_v32  ;;  %v5516_v29 = vld [vmem:[%s6109_s19 + $0x250] sm:$0xff] }
  0x51   : > { %1290 = vmatprep.subr.bf16.mxu0 %v5455_v43  ;;  %1333 = vmatprep.subr.bf16.mxu1 %v5457_v45  ;;  %v5615_v43 = vcombine.high %v5544_v35, %v5560_v36  ;;  %v5617_v45 = vcombine.high %v5545_v38, %v5561_v39  ;;  %v5532_v30 = vld [vmem:[%s6109_s19 + $0x2d0] sm:$0xff] }
  0x52   : > { %1308 = vmatprep.mubr.bf16.mxu0 %v7591_v0  ;;  %1351 = vmatprep.mubr.bf16.mxu1 %v7591_v0 }
  0x53   : > { %v1761_v53 = vand.u32 %v5617_v45, %v6113_v5  ;;  %v5590_v45 = vcombine.low %v5516_v29, %v5532_v30 }
  0x54   : > { %1291 = vmatpush1.bf16.msra.mxu0 %v5454_v47  ;;  %1334 = vmatpush1.bf16.msra.mxu1 %v5456_v49  ;;  %v5614_v47 = vcombine.low %v5544_v35, %v5560_v36  ;;  %v1755_v49 = vand.u32 %v5615_v43, %v6113_v5  ;;  %v5566_v35 = vld [vmem:[%s6109_s19 + $0x3e0] sm:$0x33]  ;;  %v5533_v36 = vld [vmem:[%s6109_s19 + $0x2d8] sm:$0xff] }
  0x55   : > { %1823 = vmatprep.subr.bf16.mxu0 %v1719_v50  ;;  %1866 = vmatprep.subr.bf16.mxu1 %v1725_v54  ;;  %v5616_v50 = vcombine.low %v5545_v38, %v5561_v39  ;;  %v5513_v54 = vld [vmem:[%s6109_s19 + $0x238] sm:$0xff]  ;;  %v5567_v38 = vld [vmem:[%s6109_s19 + $0x3e8] sm:$0x33] }
  0x56   : > { %v1752_v60 = vand.u32 %v5614_v47, %v6113_v5  ;;  %v5585_v1 = vcombine.high %v5513_v54, %v5529_v57  ;;  %v5584_v6 = vcombine.low %v5513_v54, %v5529_v57  ;;  %v5552_v54 = vld [vmem:[%s6109_s19 + $0x370] sm:$0xff]  ;;  %v5553_v57 = vld [vmem:[%s6109_s19 + $0x378] sm:$0xff] }
  0x57   : > { %5504 = vmatmul.mubr.msk.bf16.vlgmr.msra.gmra.mxu0 %vm570_vm2, %v6132_v31  ;;  %5505 = vmatmul.mubr.msk.bf16.vlgmr.msra.gmra.mxu1 %vm570_vm2, %v6132_v31 }
  0x58   : > { %1824 = vmatpush1.bf16.msra.mxu0 %v1716_v61  ;;  %1867 = vmatpush1.bf16.msra.mxu1 %v1722_v62  ;;  %v1758_v61 = vand.u32 %v5616_v50, %v6113_v5  ;;  %v5583_v62 = vcombine.high %v5512_v51, %v5528_v52  ;;  %v5518_v50 = vld [vmem:[%s6109_s19 + $0x260] sm:$0xff] }
  0x59   : > { %1825 = vmatprep.subr.bf16.mxu0 %v5571_v63  ;;  %1868 = vmatprep.subr.bf16.mxu1 %v5573_v2  ;;  %v5619_v63 = vcombine.high %v5546_v55, %v5562_v56  ;;  %v5621_v2 = vcombine.high %v5547_v58, %v5563_v59  ;;  %v5534_v51 = vld [vmem:[%s6109_s19 + $0x2e0] sm:$0xff] }
  0x5a   : > { %1843 = vmatprep.mubr.bf16.mxu0 %v7591_v0  ;;  %1886 = vmatprep.mubr.bf16.mxu1 %v7591_v0 }
  0x5b   : > { %v1773_v11 = vand.u32 %v5621_v2, %v6113_v5  ;;  %v5594_v2 = vcombine.low %v5518_v50, %v5534_v51 }
  0x5c   : > { %1826 = vmatpush1.bf16.msra.mxu0 %v5570_v4  ;;  %1869 = vmatpush1.bf16.msra.mxu1 %v5572_v7  ;;  %v5618_v4 = vcombine.low %v5546_v55, %v5562_v56  ;;  %v1767_v7 = vand.u32 %v5619_v63, %v6113_v5  ;;  %v5568_v55 = vld [vmem:[%s6109_s19 + $0x3f0] sm:$0x33]  ;;  %v5535_v56 = vld [vmem:[%s6109_s19 + $0x2e8] sm:$0xff] }
  0x5d   : > { %1909 = vmatprep.subr.bf16.mxu0 %v1731_v8  ;;  %1952 = vmatprep.subr.bf16.mxu1 %v1737_v12  ;;  %v5620_v8 = vcombine.low %v5547_v58, %v5563_v59  ;;  %v5515_v12 = vld [vmem:[%s6109_s19 + $0x248] sm:$0xff]  ;;  %v5569_v58 = vld [vmem:[%s6109_s19 + $0x3f8] sm:$0x33] }
  0x5e   : > { %v1764_v18 = vand.u32 %v5618_v4, %v6113_v5  ;;  %v5589_v22 = vcombine.high %v5515_v12, %v5531_v15  ;;  %v5588_v26 = vcombine.low %v5515_v12, %v5531_v15  ;;  %v5682_v12 = vld [vmem:[%s6109_s19 + $0x500] sm:$0xff]  ;;  %v5683_v15 = vld [vmem:[%s6109_s19 + $0x508] sm:$0xff] }
  0x5f   : > { %5634 = vmatmul.mubr.msk.bf16.vlgmr.msra.gmra.mxu0 %vm570_vm2, %v6132_v31  ;;  %5635 = vmatmul.mubr.msk.bf16.vlgmr.msra.gmra.mxu1 %vm570_vm2, %v6132_v31 }
  0x60   : > { %1910 = vmatpush1.bf16.msra.mxu0 %v1728_v19  ;;  %1953 = vmatpush1.bf16.msra.mxu1 %v1734_v20  ;;  %v1770_v19 = vand.u32 %v5620_v8, %v6113_v5  ;;  %v5587_v20 = vcombine.high %v5514_v9, %v5530_v10  ;;  %v5520_v8 = vld [vmem:[%s6109_s19 + $0x270] sm:$0xff] }
  0x61   : > { %1911 = vmatprep.subr.bf16.mxu0 %v5575_v21  ;;  %1954 = vmatprep.subr.bf16.mxu1 %v5577_v23  ;;  %v5623_v21 = vcombine.high %v5548_v13, %v5564_v14  ;;  %v5625_v23 = vcombine.high %v5549_v16, %v5565_v17  ;;  %v5536_v9 = vld [vmem:[%s6109_s19 + $0x2f0] sm:$0xff] }
  0x62   : > { %1929 = vmatprep.mubr.bf16.mxu0 %v7591_v0  ;;  %1972 = vmatprep.mubr.bf16.mxu1 %v7591_v0 }
  0x63   : > { %v1785_v32 = vand.u32 %v5625_v23, %v6113_v5  ;;  %v5598_v23 = vcombine.low %v5520_v8, %v5536_v9 }
  0x64   : > { %1912 = vmatpush1.bf16.msra.mxu0 %v5574_v25  ;;  %1955 = vmatpush1.bf16.msra.mxu1 %v5576_v27  ;;  %v5622_v25 = vcombine.low %v5548_v13, %v5564_v14  ;;  %v1779_v27 = vand.u32 %v5623_v21, %v6113_v5  ;;  %v5698_v13 = vld [vmem:[%s6109_s19 + $0x580] sm:$0x33]  ;;  %v5537_v14 = vld [vmem:[%s6109_s19 + $0x2f8] sm:$0xff] }
  0x65   : > { %1995 = vmatprep.subr.bf16.mxu0 %v1743_v28  ;;  %2038 = vmatprep.subr.bf16.mxu1 %v1749_v33  ;;  %v5624_v28 = vcombine.low %v5549_v16, %v5565_v17  ;;  %v5517_v33 = vld [vmem:[%s6109_s19 + $0x258] sm:$0xff]  ;;  %v5699_v16 = vld [vmem:[%s6109_s19 + $0x588] sm:$0x33] }
  0x66   : > { %v1776_v39 = vand.u32 %v5622_v25, %v6113_v5  ;;  %v5593_v43 = vcombine.high %v5517_v33, %v5533_v36  ;;  %v5592_v47 = vcombine.low %v5517_v33, %v5533_v36  ;;  %v5684_v33 = vld [vmem:[%s6109_s19 + $0x510] sm:$0xff]  ;;  %v5685_v36 = vld [vmem:[%s6109_s19 + $0x518] sm:$0xff] }
  0x67   : > { %5636 = vmatmul.mubr.msk.bf16.vlgmr.msra.gmra.mxu0 %vm570_vm2, %v6132_v31  ;;  %5637 = vmatmul.mubr.msk.bf16.vlgmr.msra.gmra.mxu1 %vm570_vm2, %v6132_v31 }
  0x68   : > { %1996 = vmatpush1.bf16.msra.mxu0 %v1740_v40  ;;  %2039 = vmatpush1.bf16.msra.mxu1 %v1746_v41  ;;  %v1782_v40 = vand.u32 %v5624_v28, %v6113_v5  ;;  %v5591_v41 = vcombine.high %v5516_v29, %v5532_v30  ;;  %v5650_v28 = vld [vmem:[%s6109_s19 + $0x400] sm:$0xff] }
  0x69   : > { %1997 = vmatprep.subr.bf16.mxu0 %v5579_v42  ;;  %2040 = vmatprep.subr.bf16.mxu1 %v5581_v44  ;;  %v5627_v42 = vcombine.high %v5550_v34, %v5566_v35  ;;  %v5629_v44 = vcombine.high %v5551_v37, %v5567_v38  ;;  %v5666_v29 = vld [vmem:[%s6109_s19 + $0x480] sm:$0xff] }
  0x6a   : > { %2015 = vmatprep.mubr.bf16.mxu0 %v7591_v0  ;;  %2058 = vmatprep.mubr.bf16.mxu1 %v7591_v0 }
  0x6b   : > { %v1797_v52 = vand.u32 %v5629_v44, %v6113_v5  ;;  %v5714_v44 = vcombine.low %v5650_v28, %v5666_v29 }
  0x6c   : > { %1998 = vmatpush1.bf16.msra.mxu0 %v5578_v46  ;;  %2041 = vmatpush1.bf16.msra.mxu1 %v5580_v48  ;;  %v5626_v46 = vcombine.low %v5550_v34, %v5566_v35  ;;  %v1791_v48 = vand.u32 %v5627_v42, %v6113_v5  ;;  %v5700_v34 = vld [vmem:[%s6109_s19 + $0x590] sm:$0x33]  ;;  %v5667_v35 = vld [vmem:[%s6109_s19 + $0x488] sm:$0xff] }
  0x6d   : > { %2081 = vmatprep.subr.bf16.mxu0 %v1755_v49  ;;  %2124 = vmatprep.subr.bf16.mxu1 %v1761_v53  ;;  %v5628_v49 = vcombine.low %v5551_v37, %v5567_v38  ;;  %v5519_v53 = vld [vmem:[%s6109_s19 + $0x268] sm:$0xff]  ;;  %v5701_v37 = vld [vmem:[%s6109_s19 + $0x598] sm:$0x33] }
  0x6e   : > { %v1788_v59 = vand.u32 %v5626_v46, %v6113_v5  ;;  %v5597_v63 = vcombine.high %v5519_v53, %v5535_v56  ;;  %v5596_v4 = vcombine.low %v5519_v53, %v5535_v56  ;;  %v5702_v53 = vld [vmem:[%s6109_s19 + $0x5a0] sm:$0x33]  ;;  %v5703_v56 = vld [vmem:[%s6109_s19 + $0x5a8] sm:$0x33] }
  0x6f   : > { %5638 = vmatmul.mubr.msk.bf16.vlgmr.msra.gmra.mxu0 %vm570_vm2, %v6132_v31  ;;  %5639 = vmatmul.mubr.msk.bf16.vlgmr.msra.gmra.mxu1 %vm570_vm2, %v6132_v31 }
  0x70   : > { %2082 = vmatpush1.bf16.msra.mxu0 %v1752_v60  ;;  %2125 = vmatpush1.bf16.msra.mxu1 %v1758_v61  ;;  %v1794_v60 = vand.u32 %v5628_v49, %v6113_v5  ;;  %v5595_v61 = vcombine.high %v5518_v50, %v5534_v51  ;;  %v5652_v49 = vld [vmem:[%s6109_s19 + $0x410] sm:$0xff]  ;;  %v5653_v51 = vld [vmem:[%s6109_s19 + $0x418] sm:$0xff] }
  0x71   : > { %2083 = vmatprep.subr.bf16.mxu0 %v5583_v62  ;;  %2126 = vmatprep.subr.bf16.mxu1 %v5585_v1  ;;  %v5631_v62 = vcombine.high %v5552_v54, %v5568_v55  ;;  %v5633_v1 = vcombine.high %v5553_v57, %v5569_v58  ;;  %v5668_v50 = vld [vmem:[%s6109_s19 + $0x490] sm:$0xff] }
  0x72   : > { %2101 = vmatprep.mubr.bf16.mxu0 %v7591_v0  ;;  %2144 = vmatprep.mubr.bf16.mxu1 %v7591_v0 }
  0x73   : > { %v1809_v10 = vand.u32 %v5633_v1, %v6113_v5  ;;  %v5718_v1 = vcombine.low %v5652_v49, %v5668_v50 }
  0x74   : > { %2084 = vmatpush1.bf16.msra.mxu0 %v5582_v3  ;;  %2127 = vmatpush1.bf16.msra.mxu1 %v5584_v6  ;;  %v5630_v3 = vcombine.low %v5552_v54, %v5568_v55  ;;  %v1803_v6 = vand.u32 %v5631_v62, %v6113_v5  ;;  %v5669_v54 = vld [vmem:[%s6109_s19 + $0x498] sm:$0xff]  ;;  %v5687_v55 = vld [vmem:[%s6109_s19 + $0x528] sm:$0xff] }
  0x75   : > { %2167 = vmatprep.subr.bf16.mxu0 %v1767_v7  ;;  %2210 = vmatprep.subr.bf16.mxu1 %v1773_v11  ;;  %v5632_v7 = vcombine.low %v5553_v57, %v5569_v58  ;;  %v5521_v11 = vld [vmem:[%s6109_s19 + $0x278] sm:$0xff]  ;;  %v5757_v62 = vcombine.high %v5687_v55, %v5703_v56 }
  0x76   : > { %v1800_v17 = vand.u32 %v5630_v3, %v6113_v5  ;;  %v5601_v21 = vcombine.high %v5521_v11, %v5537_v14  ;;  %v5600_v25 = vcombine.low %v5521_v11, %v5537_v14  ;;  %v5720_v3 = vcombine.low %v5653_v51, %v5669_v54  ;;  %v5688_v11 = vld [vmem:[%s6109_s19 + $0x530] sm:$0xff]  ;;  %v5689_v14 = vld [vmem:[%s6109_s19 + $0x538] sm:$0xff] }
  0x77   : > { %5640 = vmatmul.mubr.msk.bf16.vlgmr.msra.gmra.mxu0 %vm570_vm2, %v6132_v31  ;;  %5641 = vmatmul.mubr.msk.bf16.vlgmr.msra.gmra.mxu1 %vm570_vm2, %v6132_v31 }
  0x78   : > { %2168 = vmatpush1.bf16.msra.mxu0 %v1764_v18  ;;  %2211 = vmatpush1.bf16.msra.mxu1 %v1770_v19  ;;  %v1806_v18 = vand.u32 %v5632_v7, %v6113_v5  ;;  %v5599_v19 = vcombine.high %v5520_v8, %v5536_v9  ;;  %v5654_v7 = vld [vmem:[%s6109_s19 + $0x420] sm:$0xff]  ;;  %v2950_v9 = vand.u32 %v5757_v62, %v6113_v5 }
  0x79   : > { %2169 = vmatprep.subr.bf16.mxu0 %v5587_v20  ;;  %2212 = vmatprep.subr.bf16.mxu1 %v5589_v22  ;;  %v5747_v20 = vcombine.high %v5682_v12, %v5698_v13  ;;  %v5749_v22 = vcombine.high %v5683_v15, %v5699_v16  ;;  %v5670_v8 = vld [vmem:[%s6109_s19 + $0x4a0] sm:$0xff] }
  0x7a   : > { %2187 = vmatprep.mubr.bf16.mxu0 %v7591_v0  ;;  %2230 = vmatprep.mubr.bf16.mxu1 %v7591_v0 }
  0x7b   : > { %v2926_v30 = vand.u32 %v5749_v22, %v6113_v5  ;;  %v4965_v22 = vld [vmem:[%s7589_s2] sm:$0xff] }
  0x7c   : > { %2170 = vmatpush1.bf16.msra.mxu0 %v5586_v24  ;;  %2213 = vmatpush1.bf16.msra.mxu1 %v5588_v26  ;;  %v5746_v24 = vcombine.low %v5682_v12, %v5698_v13  ;;  %v2920_v26 = vand.u32 %v5747_v20, %v6113_v5  ;;  %v5704_v12 = vld [vmem:[%s6109_s19 + $0x5b0] sm:$0x33]  ;;  %v5671_v13 = vld [vmem:[%s6109_s19 + $0x4a8] sm:$0xff] }
  0x7d   : > { %2253 = vmatprep.subr.bf16.mxu0 %v1779_v27  ;;  %2296 = vmatprep.subr.bf16.mxu1 %v1785_v32  ;;  %v5748_v27 = vcombine.low %v5683_v15, %v5699_v16  ;;  %v5651_v32 = vld [vmem:[%s6109_s19 + $0x408] sm:$0xff]  ;;  %v5705_v15 = vld [vmem:[%s6109_s19 + $0x5b8] sm:$0x33] }
  0x7e   : > { %v2917_v38 = vand.u32 %v5746_v24, %v6113_v5  ;;  %v5717_v42 = vcombine.high %v5651_v32, %v5667_v35  ;;  %v5716_v46 = vcombine.low %v5651_v32, %v5667_v35  ;;  %4969 = vperm.xlu0 %6032, %v4965_v22   ;;  %v5758_v24 = vcombine.low %v5688_v11, %v5704_v12  ;;  %v4966_v35 = vld [vmem:[%s7589_s2 + $0x8] sm:$0xff] }
  0x7f   : > { %5642 = vmatmul.mubr.msk.bf16.vlgmr.msra.gmra.mxu0 %vm570_vm2, %v6132_v31  ;;  %5643 = vmatmul.mubr.msk.bf16.vlgmr.msra.gmra.mxu1 %vm570_vm2, %v6132_v31 }
  0x80   : > { %2254 = vmatpush1.bf16.msra.mxu0 %v1776_v39  ;;  %2297 = vmatpush1.bf16.msra.mxu1 %v1782_v40  ;;  %v2923_v39 = vand.u32 %v5748_v27, %v6113_v5  ;;  %v5715_v40 = vcombine.high %v5650_v28, %v5666_v29  ;;  %v5760_v27 = vcombine.low %v5689_v14, %v5705_v15  ;;  %v5656_v28 = vld [vmem:[%s6109_s19 + $0x430] sm:$0xff] }
  0x81   : > { %2255 = vmatprep.subr.bf16.mxu0 %v5591_v41  ;;  %2298 = vmatprep.subr.bf16.mxu1 %v5593_v43  ;;  %v5751_v41 = vcombine.high %v5684_v33, %v5700_v34  ;;  %v5753_v43 = vcombine.high %v5685_v36, %v5701_v37  ;;  %v5672_v29 = vld [vmem:[%s6109_s19 + $0x4b0] sm:$0xff] }
  0x82   : > { %2273 = vmatprep.mubr.bf16.mxu0 %v7591_v0  ;;  %2316 = vmatprep.mubr.bf16.mxu1 %v7591_v0 }
  0x83   : > { %4974 = vperm.xlu0 %6032, %v4966_v35   ;;  %v5679_v35 = vld [vmem:[%s6109_s19 + $0x4e8] sm:$0xff] }
  0x84   : > { %2256 = vmatpush1.bf16.msra.mxu0 %v5590_v45  ;;  %2299 = vmatpush1.bf16.msra.mxu1 %v5592_v47  ;;  %v5750_v45 = vcombine.low %v5684_v33, %v5700_v34  ;;  %v2932_v47 = vand.u32 %v5751_v41, %v6113_v5  ;;  %v5690_v33 = vld [vmem:[%s6109_s19 + $0x540] sm:$0xff]  ;;  %v5727_v41 = vcombine.high %v5656_v28, %v5672_v29 }
  0x85   : > { %2339 = vmatprep.subr.bf16.mxu0 %v1791_v48  ;;  %2382 = vmatprep.subr.bf16.mxu1 %v1797_v52  ;;  %v5752_v48 = vcombine.low %v5685_v36, %v5701_v37  ;;  %v5686_v52 = vld [vmem:[%s6109_s19 + $0x520] sm:$0xff]  ;;  %v5673_v36 = vld [vmem:[%s6109_s19 + $0x4b8] sm:$0xff]  ;;  %v5691_v37 = vld [vmem:[%s6109_s19 + $0x548] sm:$0xff] }
  0x86   : > { %v2929_v57 = vand.u32 %v5750_v45, %v6113_v5  ;;  %v5706_v34 = vld [vmem:[%s6109_s19 + $0x5c0] sm:$0x33]  ;;  %v5726_v45 = vcombine.low %v5656_v28, %v5672_v29 }
  0x87   : > { %5644 = vmatmul.mubr.msk.bf16.vlgmr.msra.gmra.mxu0 %vm570_vm2, %v6132_v31  ;;  %5645 = vmatmul.mubr.msk.bf16.vlgmr.msra.gmra.mxu1 %vm570_vm2, %v6132_v31  ;;  %v2935_v58 = vand.u32 %v5752_v48, %v6113_v5  ;;  %v5662_v28 = vld [vmem:[%s6109_s19 + $0x460] sm:$0xff] }
  0x88   : > { %2340 = vmatpush1.bf16.msra.mxu0 %v1788_v59  ;;  %2383 = vmatpush1.bf16.msra.mxu1 %v1794_v60  ;;  %v5719_v59 = vcombine.high %v5652_v49, %v5668_v50  ;;  %v5755_v60 = vcombine.high %v5686_v52, %v5702_v53  ;;  %v5658_v50 = vld [vmem:[%s6109_s19 + $0x440] sm:$0xff] }
  0x89   : > { %2341 = vmatprep.subr.bf16.mxu0 %v5595_v61  ;;  %2384 = vmatprep.subr.bf16.mxu1 %v5597_v63  ;;  %v5721_v61 = vcombine.high %v5653_v51, %v5669_v54  ;;  %v6437_v63 = vld [vmem:[%s7588_s1] sm:$0xff]   ;;  %v5708_v54 = vld [vmem:[%s6109_s19 + $0x5d0] sm:$0x33] }
  0x8a   : > { %2359 = vmatprep.mubr.bf16.mxu0 %v7591_v0  ;;  %2402 = vmatprep.mubr.bf16.mxu1 %v7591_v0  ;;  %v5678_v29 = vld [vmem:[%s6109_s19 + $0x4e0] sm:$0xff] }
  0x8c   : > { %2342 = vmatpush1.bf16.msra.mxu0 %v5594_v2  ;;  %2385 = vmatpush1.bf16.msra.mxu1 %v5596_v4  ;;  %v5754_v2 = vcombine.low %v5686_v52, %v5702_v53  ;;  %v2944_v4 = vand.u32 %v5755_v60, %v6113_v5  ;;  %v5659_v52 = vld [vmem:[%s6109_s19 + $0x448] sm:$0xff]  ;;  %v5692_v53 = vld [vmem:[%s6109_s19 + $0x550] sm:$0xff] }
  0x8d   : > { %2425 = vmatprep.subr.bf16.mxu0 %v1803_v6  ;;  %2468 = vmatprep.subr.bf16.mxu1 %v1809_v10  ;;  %v5756_v6 = vcombine.low %v5687_v55, %v5703_v56  ;;  %v5655_v10 = vld [vmem:[%s6109_s19 + $0x428] sm:$0xff]  ;;  %v5693_v56 = vld [vmem:[%s6109_s19 + $0x558] sm:$0xff] }
  0x8e   : > { %v2941_v16 = vand.u32 %v5754_v2, %v6113_v5  ;;  %v5725_v20 = vcombine.high %v5655_v10, %v5671_v13  ;;  %v5675_v55 = vld [vmem:[%s6109_s19 + $0x4c8] sm:$0xff] }
  0x8f   : > { %5646 = vmatmul.mubr.msk.bf16.vlgmr.msra.gmra.mxu0 %vm570_vm2, %v6132_v31  ;;  %5647 = vmatmul.mubr.msk.bf16.vlgmr.msra.gmra.mxu1 %vm570_vm2, %v6132_v31  ;;  %v5733_v62 = vcombine.high %v5659_v52, %v5675_v55 }
  0x90   : > { %2426 = vmatpush1.bf16.msra.mxu0 %v1800_v17  ;;  %2469 = vmatpush1.bf16.msra.mxu1 %v1806_v18  ;;  %v2947_v17 = vand.u32 %v5756_v6, %v6113_v5  ;;  %v5723_v18 = vcombine.high %v5654_v7, %v5670_v8 }
  0x91   : > { %2427 = vmatprep.subr.bf16.mxu0 %v5599_v19  ;;  %2470 = vmatprep.subr.bf16.mxu1 %v5601_v21  ;;  %v5759_v19 = vcombine.high %v5688_v11, %v5704_v12  ;;  %v5761_v21 = vcombine.high %v5689_v14, %v5705_v15  ;;  %v5661_v11 = vld [vmem:[%s6109_s19 + $0x458] sm:$0xff]  ;;  %v5694_v12 = vld [vmem:[%s6109_s19 + $0x560] sm:$0xff]  ;;  %v5695_v15 = vld [vmem:[%s6109_s19 + $0x568] sm:$0xff] }
  0x92   : > { %2445 = vmatprep.mubr.bf16.mxu0 %v7591_v0  ;;  %2488 = vmatprep.mubr.bf16.mxu1 %v7591_v0  ;;  %v5677_v14 = vld [vmem:[%s6109_s19 + $0x4d8] sm:$0xff] }
  0x93   : > { %v2962_v32 = vand.u32 %v5761_v21, %v6113_v5  ;;  %v5737_v21 = vcombine.high %v5661_v11, %v5677_v14 }
  0x94   : > { %2428 = vmatpush1.bf16.msra.mxu0 %v5598_v23  ;;  %2471 = vmatpush1.bf16.msra.mxu1 %v5600_v25  ;;  %v5722_v23 = vcombine.low %v5654_v7, %v5670_v8  ;;  %v5724_v25 = vcombine.low %v5655_v10, %v5671_v13  ;;  %v5660_v8 = vld [vmem:[%s6109_s19 + $0x450] sm:$0xff]  ;;  %v5710_v13 = vld [vmem:[%s6109_s19 + $0x5e0] sm:$0x33] }
  0x95   : > { %3024 = vmatprep.subr.bf16.mxu0 %v2920_v26  ;;  %3067 = vmatprep.subr.bf16.mxu1 %v2926_v30  ;;  %v2956_v26 = vand.u32 %v5759_v19, %v6113_v5  ;;  %v5657_v30 = vld [vmem:[%s6109_s19 + $0x438] sm:$0xff] }
  0x97   : > { %5648 = vmatmul.mubr.msk.bf16.vlgmr.msra.gmra.mxu0 %vm570_vm2, %v6132_v31  ;;  %5649 = vmatmul.mubr.msk.bf16.vlgmr.msra.gmra.mxu1 %vm570_vm2, %v6132_v31  ;;  %v2938_v31 = vand.u32 %v5753_v43, %v6113_v5  ;;  %v5729_v43 = vcombine.high %v5657_v30, %v5673_v36 }
  0x98   : > { %3025 = vmatpush1.bf16.msra.mxu0 %v2917_v38  ;;  %3068 = vmatpush1.bf16.msra.mxu1 %v2923_v39  ;;  %v5707_v38 = vld [vmem:[%s6109_s19 + $0x5c8] sm:$0x33]  ;;  %v2953_v39 = vand.u32 %v5758_v24, %v6113_v5  ;;  %v5770_v24 = vcombine.low %v5694_v12, %v5710_v13 }
  0x99   : > { %3026 = vmatprep.subr.bf16.mxu0 %v5715_v40  ;;  %3069 = vmatprep.subr.bf16.mxu1 %v5717_v42  ;;  %v2959_v40 = vand.u32 %v5760_v27, %v6113_v5  ;;  %v5763_v42 = vcombine.high %v5690_v33, %v5706_v34  ;;  %v5764_v49 = vcombine.low %v5691_v37, %v5707_v38 }
  0x9a   : > { %3044 = vmatprep.mubr.bf16.mxu0 %v7591_v0  ;;  %3087 = vmatprep.mubr.bf16.mxu1 %v7591_v0 }
  0x9b   : > { %v2968_v48 = vand.u32 %v5763_v42, %v6113_v5 }
  0x9c   : > { %3027 = vmatpush1.bf16.msra.mxu0 %v5714_v44  ;;  %3070 = vmatpush1.bf16.msra.mxu1 %v5716_v46  ;;  %v5765_v44 = vcombine.high %v5691_v37, %v5707_v38  ;;  %v5762_v46 = vcombine.low %v5690_v33, %v5706_v34  ;;  %v5696_v33 = vld [vmem:[%s6109_s19 + $0x570] sm:$0xff]  ;;  %v5713_v37 = vld [vmem:[%s6109_s19 + $0x5f8] sm:$0x33]  ;;  %v2989_v38 = vand.u32 %v5770_v24, %v6113_v5 }
  0x9d   : > { %3110 = vmatprep.subr.bf16.mxu0 %v2932_v47  ;;  %3153 = vmatprep.subr.bf16.mxu1 %v2938_v31  ;;  %v5728_v47 = vcombine.low %v5657_v30, %v5673_v36  ;;  %v5674_v31 = vld [vmem:[%s6109_s19 + $0x4c0] sm:$0xff]  ;;  %v5712_v34 = vld [vmem:[%s6109_s19 + $0x5f0] sm:$0x33]  ;;  %v5697_v36 = vld [vmem:[%s6109_s19 + $0x578] sm:$0xff] }
  0x9e   : > { %v2974_v51 = vand.u32 %v5765_v44, %v6113_v5  ;;  %v5731_v60 = vcombine.high %v5658_v50, %v5674_v31  ;;  %v5730_v2 = vcombine.low %v5658_v50, %v5674_v31  ;;  %v5738_v44 = vcombine.low %v5662_v28, %v5678_v29  ;;  %v5680_v50 = vld [vmem:[%s6109_s19 + $0x4f0] sm:$0xff] }
  0x9f   : > { %5778 = vmatmul.mubr.msk.bf16.vlgmr.msra.gmra.mxu0 %vm570_vm2, %v6437_v63  ;;  %5779 = vmatmul.mubr.msk.bf16.vlgmr.msra.gmra.mxu1 %vm570_vm2, %v6437_v63 }
  0xa0   : > { %3111 = vmatpush1.bf16.msra.mxu0 %v2929_v57  ;;  %3154 = vmatpush1.bf16.msra.mxu1 %v2935_v58  ;;  %v5709_v57 = vld [vmem:[%s6109_s19 + $0x5d8] sm:$0x33]  ;;  %v2965_v58 = vand.u32 %v5762_v46, %v6113_v5 }
  0xa1   : > { %3112 = vmatprep.subr.bf16.mxu0 %v5719_v59  ;;  %3155 = vmatprep.subr.bf16.mxu1 %v5721_v61  ;;  %v2971_v59 = vand.u32 %v5764_v49, %v6113_v5  ;;  %v5767_v61 = vcombine.high %v5692_v53, %v5708_v54  ;;  %v5768_v7 = vcombine.low %v5693_v56, %v5709_v57  ;;  %v5664_v49 = vld [vmem:[%s6109_s19 + $0x470] sm:$0xff] }
  0xa2   : > { %3130 = vmatprep.mubr.bf16.mxu0 %v7591_v0  ;;  %3173 = vmatprep.mubr.bf16.mxu1 %v7591_v0 }
  0xa3   : > { %v2980_v6 = vand.u32 %v5767_v61, %v6113_v5 }
  0xa4   : > { %3113 = vmatpush1.bf16.msra.mxu0 %v5718_v1  ;;  %3156 = vmatpush1.bf16.msra.mxu1 %v5720_v3  ;;  %v5769_v1 = vcombine.high %v5693_v56, %v5709_v57  ;;  %v5766_v3 = vcombine.low %v5692_v53, %v5708_v54  ;;  %v5842_v53 = vld [vmem:[%s6109_s19 + $0x780] sm:$0x33]  ;;  %v5681_v54 = vld [vmem:[%s6109_s19 + $0x4f8] sm:$0xff]  ;;  %v5843_v56 = vld [vmem:[%s6109_s19 + $0x788] sm:$0x33] }
  0xa5   : > { %3196 = vmatprep.subr.bf16.mxu0 %v2944_v4  ;;  %3239 = vmatprep.subr.bf16.mxu1 %v2950_v9  ;;  %v5732_v4 = vcombine.low %v5659_v52, %v5675_v55  ;;  %v5676_v9 = vld [vmem:[%s6109_s19 + $0x4d0] sm:$0xff]  ;;  %v5826_v52 = vld [vmem:[%s6109_s19 + $0x700] sm:$0xff]  ;;  %v5827_v55 = vld [vmem:[%s6109_s19 + $0x708] sm:$0xff] }
  0xa6   : > { %v2986_v10 = vand.u32 %v5769_v1, %v6113_v5  ;;  %v5735_v19 = vcombine.high %v5660_v8, %v5676_v9  ;;  %v5742_v1 = vcombine.low %v5664_v49, %v5680_v50 }
  0xa7   : > { %5780 = vmatmul.mubr.msk.bf16.vlgmr.msra.gmra.mxu0 %vm570_vm2, %v6437_v63  ;;  %5781 = vmatmul.mubr.msk.bf16.vlgmr.msra.gmra.mxu1 %vm570_vm2, %v6437_v63 }
  0xa8   : > { %3197 = vmatpush1.bf16.msra.mxu0 %v2941_v16  ;;  %3240 = vmatpush1.bf16.msra.mxu1 %v2947_v17  ;;  %v5711_v16 = vld [vmem:[%s6109_s19 + $0x5e8] sm:$0x33]  ;;  %v2977_v17 = vand.u32 %v5766_v3, %v6113_v5 }
  0xa9   : > { %3198 = vmatprep.subr.bf16.mxu0 %v5723_v18  ;;  %3241 = vmatprep.subr.bf16.mxu1 %v5725_v20  ;;  %v2983_v18 = vand.u32 %v5768_v7, %v6113_v5  ;;  %v5771_v20 = vcombine.high %v5694_v12, %v5710_v13  ;;  %v5773_v22 = vcombine.high %v5695_v15, %v5711_v16  ;;  %v5794_v7 = vld [vmem:[%s6109_s19 + $0x600] sm:$0xff]  ;;  %v5844_v12 = vld [vmem:[%s6109_s19 + $0x790] sm:$0x33]  ;;  %v5811_v13 = vld [vmem:[%s6109_s19 + $0x688] sm:$0xff] }
  0xaa   : > { %3216 = vmatprep.mubr.bf16.mxu0 %v7591_v0  ;;  %3259 = vmatprep.mubr.bf16.mxu1 %v7591_v0  ;;  %v5772_v27 = vcombine.low %v5695_v15, %v5711_v16  ;;  %v5845_v15 = vld [vmem:[%s6109_s19 + $0x798] sm:$0x33] }
  0xab   : > { %v2998_v30 = vand.u32 %v5773_v22, %v6113_v5 }
  0xac   : > { %3199 = vmatpush1.bf16.msra.mxu0 %v5722_v23  ;;  %3242 = vmatpush1.bf16.msra.mxu1 %v5724_v25  ;;  %v5734_v23 = vcombine.low %v5660_v8, %v5676_v9  ;;  %v5736_v25 = vcombine.low %v5661_v11, %v5677_v14  ;;  %v5810_v8 = vld [vmem:[%s6109_s19 + $0x680] sm:$0xff]  ;;  %v5828_v11 = vld [vmem:[%s6109_s19 + $0x710] sm:$0xff]  ;;  %v5829_v14 = vld [vmem:[%s6109_s19 + $0x718] sm:$0xff] }
  0xad   : > { %3282 = vmatprep.subr.bf16.mxu0 %v2956_v26  ;;  %3325 = vmatprep.subr.bf16.mxu1 %v2962_v32  ;;  %v2992_v26 = vand.u32 %v5771_v20, %v6113_v5  ;;  %v5663_v32 = vld [vmem:[%s6109_s19 + $0x468] sm:$0xff]  ;;  %v5858_v22 = vcombine.low %v5794_v7, %v5810_v8 }
  0xae   : > { %v5741_v42 = vcombine.high %v5663_v32, %v5679_v35  ;;  %v5740_v46 = vcombine.low %v5663_v32, %v5679_v35  ;;  %v5830_v32 = vld [vmem:[%s6109_s19 + $0x720] sm:$0xff]  ;;  %v5831_v35 = vld [vmem:[%s6109_s19 + $0x728] sm:$0xff] }
  0xaf   : > { %5782 = vmatmul.mubr.msk.bf16.vlgmr.msra.gmra.mxu0 %vm570_vm2, %v6437_v63  ;;  %5783 = vmatmul.mubr.msk.bf16.vlgmr.msra.gmra.mxu1 %vm570_vm2, %v6437_v63 }
  0xb0   : > { %3283 = vmatpush1.bf16.msra.mxu0 %v2953_v39  ;;  %3326 = vmatpush1.bf16.msra.mxu1 %v2959_v40  ;;  %v2995_v39 = vand.u32 %v5772_v27, %v6113_v5  ;;  %v5739_v40 = vcombine.high %v5662_v28, %v5678_v29  ;;  %v5796_v27 = vld [vmem:[%s6109_s19 + $0x610] sm:$0xff] }
  0xb1   : > { %3284 = vmatprep.subr.bf16.mxu0 %v5727_v41  ;;  %3327 = vmatprep.subr.bf16.mxu1 %v5729_v43  ;;  %v5775_v41 = vcombine.high %v5696_v33, %v5712_v34  ;;  %v5777_v43 = vcombine.high %v5697_v36, %v5713_v37  ;;  %v5812_v28 = vld [vmem:[%s6109_s19 + $0x690] sm:$0xff] }
  0xb2   : > { %3302 = vmatprep.mubr.bf16.mxu0 %v7591_v0  ;;  %3345 = vmatprep.mubr.bf16.mxu1 %v7591_v0 }
  0xb3   : > { %v3010_v31 = vand.u32 %v5777_v43, %v6113_v5 }
  0xb4   : > { %3285 = vmatpush1.bf16.msra.mxu0 %v5726_v45  ;;  %3328 = vmatpush1.bf16.msra.mxu1 %v5728_v47  ;;  %v5774_v45 = vcombine.low %v5696_v33, %v5712_v34  ;;  %v3004_v47 = vand.u32 %v5775_v41, %v6113_v5  ;;  %v5846_v33 = vld [vmem:[%s6109_s19 + $0x7a0] sm:$0x33]  ;;  %v5813_v34 = vld [vmem:[%s6109_s19 + $0x698] sm:$0xff] }
  0xb5   : > { %3368 = vmatprep.subr.bf16.mxu0 %v2968_v48  ;;  %3411 = vmatprep.subr.bf16.mxu1 %v2974_v51  ;;  %v5776_v48 = vcombine.low %v5697_v36, %v5713_v37  ;;  %v5665_v51 = vld [vmem:[%s6109_s19 + $0x478] sm:$0xff]  ;;  %v5847_v36 = vld [vmem:[%s6109_s19 + $0x7a8] sm:$0x33] }
  0xb6   : > { %v3001_v57 = vand.u32 %v5774_v45, %v6113_v5  ;;  %v5745_v61 = vcombine.high %v5665_v51, %v5681_v54  ;;  %v5744_v3 = vcombine.low %v5665_v51, %v5681_v54  ;;  %v5862_v45 = vcombine.low %v5796_v27, %v5812_v28  ;;  %v5814_v51 = vld [vmem:[%s6109_s19 + $0x6a0] sm:$0xff]  ;;  %v5799_v54 = vld [vmem:[%s6109_s19 + $0x628] sm:$0xff] }
  0xb7   : > { %5784 = vmatmul.mubr.msk.bf16.vlgmr.msra.gmra.mxu0 %vm570_vm2, %v6437_v63  ;;  %5785 = vmatmul.mubr.msk.bf16.vlgmr.msra.gmra.mxu1 %vm570_vm2, %v6437_v63 }
  0xb8   : > { %3369 = vmatpush1.bf16.msra.mxu0 %v2965_v58  ;;  %3412 = vmatpush1.bf16.msra.mxu1 %v2971_v59  ;;  %v3007_v58 = vand.u32 %v5776_v48, %v6113_v5  ;;  %v5743_v59 = vcombine.high %v5664_v49, %v5680_v50  ;;  %v5900_v50 = vcombine.low %v5831_v35, %v5847_v36 }
  0xb9   : > { %3370 = vmatprep.subr.bf16.mxu0 %v5731_v60  ;;  %3413 = vmatprep.subr.bf16.mxu1 %v5733_v62  ;;  %v5891_v60 = vcombine.high %v5826_v52, %v5842_v53  ;;  %v5893_v62 = vcombine.high %v5827_v55, %v5843_v56 }
  0xba   : > { %3388 = vmatprep.mubr.bf16.mxu0 %v7591_v0  ;;  %3431 = vmatprep.mubr.bf16.mxu1 %v7591_v0 }
  0xbb   : > { %v4127_v9 = vand.u32 %v5893_v62, %v6113_v5 }
  0xbc   : > { %3371 = vmatpush1.bf16.msra.mxu0 %v5730_v2  ;;  %3414 = vmatpush1.bf16.msra.mxu1 %v5732_v4  ;;  %v5890_v2 = vcombine.low %v5826_v52, %v5842_v53  ;;  %v4121_v4 = vand.u32 %v5891_v60, %v6113_v5  ;;  %v5849_v60 = vld [vmem:[%s6109_s19 + $0x7b8] sm:$0x33] }
  0xbd   : > { %3454 = vmatprep.subr.bf16.mxu0 %v2980_v6  ;;  %3497 = vmatprep.subr.bf16.mxu1 %v2986_v10  ;;  %v5892_v6 = vcombine.low %v5827_v55, %v5843_v56  ;;  %v5795_v10 = vld [vmem:[%s6109_s19 + $0x608] sm:$0xff]  ;;  %v5832_v55 = vld [vmem:[%s6109_s19 + $0x730] sm:$0xff] }
  0xbe   : > { %v4118_v16 = vand.u32 %v5890_v2, %v6113_v5  ;;  %v5861_v20 = vcombine.high %v5795_v10, %v5811_v13  ;;  %v5860_v24 = vcombine.low %v5795_v10, %v5811_v13  ;;  %v5848_v56 = vld [vmem:[%s6109_s19 + $0x7b0] sm:$0x33]  ;;  %v4148_v2 = vand.u32 %v5900_v50, %v6113_v5  ;;  %v5818_v50 = vld [vmem:[%s6109_s19 + $0x6c0] sm:$0xff] }
  0xbf   : > { %5786 = vmatmul.mubr.msk.bf16.vlgmr.msra.gmra.mxu0 %vm570_vm2, %v6437_v63  ;;  %5787 = vmatmul.mubr.msk.bf16.vlgmr.msra.gmra.mxu1 %vm570_vm2, %v6437_v63 }
  0xc0   : > { %3455 = vmatpush1.bf16.msra.mxu0 %v2977_v17  ;;  %3498 = vmatpush1.bf16.msra.mxu1 %v2983_v18  ;;  %v4124_v17 = vand.u32 %v5892_v6, %v6113_v5  ;;  %v5859_v18 = vcombine.high %v5794_v7, %v5810_v8 }
  0xc1   : > { %3456 = vmatprep.subr.bf16.mxu0 %v5735_v19  ;;  %3499 = vmatprep.subr.bf16.mxu1 %v5737_v21  ;;  %v5895_v19 = vcombine.high %v5828_v11, %v5844_v12  ;;  %v5897_v21 = vcombine.high %v5829_v14, %v5845_v15 }
  0xc2   : > { %3474 = vmatprep.mubr.bf16.mxu0 %v7591_v0  ;;  %3517 = vmatprep.mubr.bf16.mxu1 %v7591_v0 }
  0xc3   : > { %v4139_v29 = vand.u32 %v5897_v21, %v6113_v5  ;;  %v5801_v21 = vld [vmem:[%s6109_s19 + $0x638] sm:$0xff] }
  0xc4   : > { %3457 = vmatpush1.bf16.msra.mxu0 %v5734_v23  ;;  %3500 = vmatpush1.bf16.msra.mxu1 %v5736_v25  ;;  %v5894_v23 = vcombine.low %v5828_v11, %v5844_v12  ;;  %v4133_v25 = vand.u32 %v5895_v19, %v6113_v5  ;;  %v5902_v12 = vcombine.low %v5832_v55, %v5848_v56 }
  0xc5   : > { %3540 = vmatprep.subr.bf16.mxu0 %v2992_v26  ;;  %3583 = vmatprep.subr.bf16.mxu1 %v2998_v30  ;;  %v5896_v26 = vcombine.low %v5829_v14, %v5845_v15  ;;  %v5797_v30 = vld [vmem:[%s6109_s19 + $0x618] sm:$0xff] }
  0xc6   : > { %v4130_v37 = vand.u32 %v5894_v23, %v6113_v5  ;;  %v5865_v41 = vcombine.high %v5797_v30, %v5813_v34  ;;  %v5864_v48 = vcombine.low %v5797_v30, %v5813_v34  ;;  %v5850_v23 = vld [vmem:[%s6109_s19 + $0x7c0] sm:$0x33] }
  0xc7   : > { %5788 = vmatmul.mubr.msk.bf16.vlgmr.msra.gmra.mxu0 %vm570_vm2, %v6437_v63  ;;  %5789 = vmatmul.mubr.msk.bf16.vlgmr.msra.gmra.mxu1 %vm570_vm2, %v6437_v63 }
  0xc8   : > { %3541 = vmatpush1.bf16.msra.mxu0 %v2989_v38  ;;  %3584 = vmatpush1.bf16.msra.mxu1 %v2995_v39  ;;  %v4136_v38 = vand.u32 %v5896_v26, %v6113_v5  ;;  %v5863_v39 = vcombine.high %v5796_v27, %v5812_v28  ;;  %v5835_v26 = vld [vmem:[%s6109_s19 + $0x748] sm:$0xff] }
  0xc9   : > { %3542 = vmatprep.subr.bf16.mxu0 %v5739_v40  ;;  %3585 = vmatprep.subr.bf16.mxu1 %v5741_v42  ;;  %v5899_v40 = vcombine.high %v5830_v32, %v5846_v33  ;;  %v5901_v42 = vcombine.high %v5831_v35, %v5847_v36  ;;  %v5851_v27 = vld [vmem:[%s6109_s19 + $0x7c8] sm:$0x33] }
  0xca   : > { %3560 = vmatprep.mubr.bf16.mxu0 %v7591_v0  ;;  %3603 = vmatprep.mubr.bf16.mxu1 %v7591_v0 }
  0xcb   : > { %v4145_v49 = vand.u32 %v5899_v40, %v6113_v5  ;;  %v4151_v53 = vand.u32 %v5901_v42, %v6113_v5 }
  0xcc   : > { %3543 = vmatpush1.bf16.msra.mxu0 %v5738_v44  ;;  %3586 = vmatpush1.bf16.msra.mxu1 %v5740_v46  ;;  %v5898_v46 = vcombine.low %v5830_v32, %v5846_v33 }
  0xcd   : > { %3626 = vmatprep.subr.bf16.mxu0 %v3004_v47  ;;  %3669 = vmatprep.subr.bf16.mxu1 %v3010_v31  ;;  %v5798_v31 = vld [vmem:[%s6109_s19 + $0x620] sm:$0xff] }
  0xce   : > { %v4142_v62 = vand.u32 %v5898_v46, %v6113_v5  ;;  %v5866_v11 = vcombine.low %v5798_v31, %v5814_v51 }
  0xcf   : > { %5790 = vmatmul.mubr.msk.bf16.vlgmr.msra.gmra.mxu0 %vm570_vm2, %v6437_v63  ;;  %5791 = vmatmul.mubr.msk.bf16.vlgmr.msra.gmra.mxu1 %vm570_vm2, %v6437_v63 }
  0xd0   : > { %3627 = vmatpush1.bf16.msra.mxu0 %v3001_v57  ;;  %3670 = vmatpush1.bf16.msra.mxu1 %v3007_v58  ;;  %v5815_v58 = vld [vmem:[%s6109_s19 + $0x6a8] sm:$0xff] }
  0xd1   : > { %3628 = vmatprep.subr.bf16.mxu0 %v5743_v59  ;;  %3671 = vmatprep.subr.bf16.mxu1 %v5745_v61  ;;  %v5833_v59 = vld [vmem:[%s6109_s19 + $0x738] sm:$0xff]  ;;  %v5869_v7 = vcombine.high %v5799_v54, %v5815_v58  ;;  %v5868_v14 = vcombine.low %v5799_v54, %v5815_v58  ;;  %v5836_v54 = vld [vmem:[%s6109_s19 + $0x750] sm:$0xff]  ;;  %v5819_v58 = vld [vmem:[%s6109_s19 + $0x6c8] sm:$0xff] }
  0xd2   : > { %3646 = vmatprep.mubr.bf16.mxu0 %v7591_v0  ;;  %3689 = vmatprep.mubr.bf16.mxu1 %v7591_v0  ;;  %v5905_v8 = vcombine.high %v5833_v59, %v5849_v60 }
  0xd4   : > { %3629 = vmatpush1.bf16.msra.mxu0 %v5742_v1  ;;  %3672 = vmatpush1.bf16.msra.mxu1 %v5744_v3  ;;  %v5867_v3 = vcombine.high %v5798_v31, %v5814_v51 }
  0xd5   : > { %4225 = vmatprep.subr.bf16.mxu0 %v4121_v4  ;;  %4268 = vmatprep.subr.bf16.mxu1 %v4127_v9  ;;  %v5903_v4 = vcombine.high %v5832_v55, %v5848_v56  ;;  %v5852_v55 = vld [vmem:[%s6109_s19 + $0x7d0] sm:$0x33] }
  0xd7   : > { %5792 = vmatmul.mubr.msk.bf16.vlgmr.msra.gmra.mxu0 %vm570_vm2, %v6437_v63  ;;  %5793 = vmatmul.mubr.msk.bf16.vlgmr.msra.gmra.mxu1 %vm570_vm2, %v6437_v63  ;;  %v4157_v15 = vand.u32 %v5903_v4, %v6113_v5 }
  0xd8   : > { %4226 = vmatpush1.bf16.msra.mxu0 %v4118_v16  ;;  %4269 = vmatpush1.bf16.msra.mxu1 %v4124_v17  ;;  %v5904_v16 = vcombine.low %v5833_v59, %v5849_v60  ;;  %v5800_v17 = vld [vmem:[%s6109_s19 + $0x630] sm:$0xff]  ;;  %v5837_v59 = vld [vmem:[%s6109_s19 + $0x758] sm:$0xff] }
  0xd9   : > { %4227 = vmatprep.subr.bf16.mxu0 %v5859_v18  ;;  %4270 = vmatprep.subr.bf16.mxu1 %v5861_v20  ;;  %v5816_v18 = vld [vmem:[%s6109_s19 + $0x6b0] sm:$0xff]  ;;  %v4163_v20 = vand.u32 %v5905_v8, %v6113_v5  ;;  %v5853_v60 = vld [vmem:[%s6109_s19 + $0x7d8] sm:$0x33]  ;;  %v5911_v8 = vcombine.high %v5836_v54, %v5852_v55 }
  0xda   : > { %4245 = vmatprep.mubr.bf16.mxu0 %v7591_v0  ;;  %4288 = vmatprep.mubr.bf16.mxu1 %v7591_v0  ;;  %v4160_v32 = vand.u32 %v5904_v16, %v6113_v5  ;;  %v5871_v33 = vcombine.high %v5800_v17, %v5816_v18  ;;  %v5870_v40 = vcombine.low %v5800_v17, %v5816_v18 }
  0xdb   : > { %v5910_v18 = vcombine.low %v5836_v54, %v5852_v55 }
  0xdc   : > { %4228 = vmatpush1.bf16.msra.mxu0 %v5858_v22  ;;  %4271 = vmatpush1.bf16.msra.mxu1 %v5860_v24  ;;  %v5834_v22 = vld [vmem:[%s6109_s19 + $0x740] sm:$0xff] }
  0xdd   : > { %4311 = vmatprep.subr.bf16.mxu0 %v4133_v25  ;;  %4354 = vmatprep.subr.bf16.mxu1 %v4139_v29  ;;  %v5817_v25 = vld [vmem:[%s6109_s19 + $0x6b8] sm:$0xff]  ;;  %v4154_v29 = vand.u32 %v5902_v12, %v6113_v5  ;;  %v5907_v34 = vcombine.high %v5834_v22, %v5850_v23 }
  0xde   : > { %v5873_v36 = vcombine.high %v5801_v21, %v5817_v25 }
  0xdf   : > { %v6589_v43 = vpop.f32.mrf.mxu0  ;;  %5922 = vmatmul.mubr.msk.bf16.vlgmr.msra.gmra.mxu0 %vm570_vm2, %v6437_v63  ;;  %v6593_v44 = vpop.f32.mrf.mxu1  ;;  %5923 = vmatmul.mubr.msk.bf16.vlgmr.msra.gmra.mxu1 %vm570_vm2, %v6437_v63  ;;  %v4169_v46 = vand.u32 %v5907_v34, %v6113_v5  ;;  %v5854_v34 = vld [vmem:[%s6109_s19 + $0x7e0] sm:$0x33] }
  0xe0   : > { %4312 = vmatpush1.bf16.msra.mxu0 %v4130_v37  ;;  %4355 = vmatpush1.bf16.msra.mxu1 %v4136_v38  ;;  %v5909_v37 = vcombine.high %v5835_v26, %v5851_v27 }
  0xe1   : > { %v6597_v47 = vpop.f32.mrf.mxu0  ;;  %4313 = vmatprep.subr.bf16.mxu0 %v5863_v39  ;;  %v6602_v52 = vpop.f32.mrf.mxu1  ;;  %4356 = vmatprep.subr.bf16.mxu1 %v5865_v41  ;;  %v5906_v41 = vcombine.low %v5834_v22, %v5850_v23  ;;  %v4181_v22 = vand.u32 %v5911_v8, %v6113_v5  ;;  %v5912_v23 = vcombine.low %v5837_v59, %v5853_v60 }
  0xe2   : > { %7674 = vst [vmem:[#allocation2_spill] sm:$0xff] %v6597_v47  ;;  %7675 = vst [vmem:[#allocation3_spill] sm:$0xff] %v6602_v52  ;;  %4331 = vmatprep.mubr.bf16.mxu0 %v7591_v0  ;;  %4374 = vmatprep.mubr.bf16.mxu1 %v7591_v0  ;;  %v4175_v51 = vand.u32 %v5909_v37, %v6113_v5  ;;  %v5821_v37 = vld [vmem:[%s6109_s19 + $0x6d8] sm:$0xff] }
  0xe3   : > { %v6609_v57 = vpop.f32.mrf.mxu0  ;;  %v6615_v61 = vpop.f32.mrf.mxu1 }
  0xe4   : > { %4314 = vmatpush1.bf16.msra.mxu0 %v5862_v45  ;;  %4357 = vmatpush1.bf16.msra.mxu1 %v5864_v48  ;;  %v5872_v45 = vcombine.low %v5801_v21, %v5817_v25  ;;  %v5908_v48 = vcombine.low %v5835_v26, %v5851_v27  ;;  %v5804_v25 = vld [vmem:[%s6109_s19 + $0x650] sm:$0xff] }
  0xe5   : > { %v6618_v1 = vpop.f32.mrf.mxu0  ;;  %4397 = vmatprep.subr.bf16.mxu0 %v4145_v49  ;;  %v6621_v6 = vpop.f32.mrf.mxu1  ;;  %4440 = vmatprep.subr.bf16.mxu1 %v4151_v53  ;;  %v5802_v49 = vld [vmem:[%s6109_s19 + $0x640] sm:$0xff]  ;;  %v5803_v53 = vld [vmem:[%s6109_s19 + $0x648] sm:$0xff]  ;;  %v5820_v26 = vld [vmem:[%s6109_s19 + $0x6d0] sm:$0xff] }
  0xe6   : > { %7676 = vst [vmem:[#allocation4_spill] sm:$0xff] %v6618_v1  ;;  %7677 = vst [vmem:[#allocation5_spill] sm:$0xff] %v6621_v6  ;;  %v4172_v4 = vand.u32 %v5908_v48, %v6113_v5  ;;  %v5877_v12 = vcombine.high %v5803_v53, %v5819_v58  ;;  %v5874_v17 = vcombine.low %v5802_v49, %v5818_v50 }
  0xe7   : > { %v6623_v9 = vpop.f32.mrf.mxu0  ;;  %5924 = vmatmul.mubr.msk.bf16.vlgmr.msra.gmra.mxu0 %vm570_vm2, %v6437_v63  ;;  %v6627_v10 = vpop.f32.mrf.mxu1  ;;  %5925 = vmatmul.mubr.msk.bf16.vlgmr.msra.gmra.mxu1 %vm570_vm2, %v6437_v63  ;;  %v5876_v21 = vcombine.low %v5803_v53, %v5819_v58 }
  0xe8   : > { %4398 = vmatpush1.bf16.msra.mxu0 %v4142_v62  ;;  %4441 = vmatpush1.bf16.msra.mxu1 %v4148_v2  ;;  %v4166_v2 = vand.u32 %v5906_v41, %v6113_v5  ;;  %v5855_v41 = vld [vmem:[%s6109_s19 + $0x7e8] sm:$0x33] }
  0xe9   : > { %v6631_v13 = vpop.f32.mrf.mxu0  ;;  %4399 = vmatprep.subr.bf16.mxu0 %v5867_v3  ;;  %v6636_v19 = vpop.f32.mrf.mxu1  ;;  %4442 = vmatprep.subr.bf16.mxu1 %v5869_v7  ;;  %v5875_v7 = vcombine.high %v5802_v49, %v5818_v50  ;;  %v4184_v49 = vand.u32 %v5912_v23, %v6113_v5  ;;  %v5879_v50 = vcombine.high %v5804_v25, %v5820_v26  ;;  %v5840_v23 = vld [vmem:[%s6109_s19 + $0x770] sm:$0xff] }
  0xea   : > { %7678 = vst [vmem:[#allocation6_spill] sm:$0xff] %v6631_v13  ;;  %7679 = vst [vmem:[#allocation7_spill] sm:$0xff] %v6636_v19  ;;  %4417 = vmatprep.mubr.bf16.mxu0 %v7591_v0  ;;  %4460 = vmatprep.mubr.bf16.mxu1 %v7591_v0 }
  0xeb   : > { %v6643_v24 = vpop.f32.mrf.mxu0  ;;  %v6649_v28 = vpop.f32.mrf.mxu1 }
  0xec   : > { %4400 = vmatpush1.bf16.msra.mxu0 %v5866_v11  ;;  %4443 = vmatpush1.bf16.msra.mxu1 %v5868_v14  ;;  %v5913_v14 = vcombine.high %v5837_v59, %v5853_v60  ;;  %v5878_v60 = vcombine.low %v5804_v25, %v5820_v26  ;;  %v5856_v25 = vld [vmem:[%s6109_s19 + $0x7f0] sm:$0x33] }
  0xed   : > { %v6652_v30 = vpop.f32.mrf.mxu0  ;;  %4483 = vmatprep.subr.bf16.mxu0 %v4157_v15  ;;  %v6655_v35 = vpop.f32.mrf.mxu1  ;;  %4526 = vmatprep.subr.bf16.mxu1 %v4163_v20 }
  0xee   : > { %7680 = vst [vmem:[#allocation8_spill] sm:$0xff] %v6652_v30  ;;  %7681 = vst [vmem:[#allocation9_spill] sm:$0xff] %v6655_v35 }
  0xef   : > { %v6657_v38 = vpop.f32.mrf.mxu0  ;;  %5926 = vmatmul.mubr.msk.bf16.vlgmr.msra.gmra.mxu0 %vm570_vm2, %v6437_v63  ;;  %v6661_v39 = vpop.f32.mrf.mxu1  ;;  %5927 = vmatmul.mubr.msk.bf16.vlgmr.msra.gmra.mxu1 %vm570_vm2, %v6437_v63 }
  0xf0   : > { %4484 = vmatpush1.bf16.msra.mxu0 %v4154_v29  ;;  %4527 = vmatpush1.bf16.msra.mxu1 %v4160_v32  ;;  %v4187_v29 = vand.u32 %v5913_v14, %v6113_v5  ;;  %v5805_v32 = vld [vmem:[%s6109_s19 + $0x658] sm:$0xff]  ;;  %v5806_v14 = vld [vmem:[%s6109_s19 + $0x660] sm:$0xff] }
  0xf1   : > { %v6665_v42 = vpop.f32.mrf.mxu0  ;;  %4485 = vmatprep.subr.bf16.mxu0 %v5871_v33  ;;  %v6670_v31 = vpop.f32.mrf.mxu1  ;;  %4528 = vmatprep.subr.bf16.mxu1 %v5873_v36  ;;  %v5838_v33 = vld [vmem:[%s6109_s19 + $0x760] sm:$0xff]  ;;  %v5881_v54 = vcombine.high %v5805_v32, %v5821_v37 }
  0xf2   : > { %7682 = vst [vmem:[#allocation10_spill] sm:$0xff] %v6665_v42  ;;  %7683 = vst [vmem:[#allocation11_spill] sm:$0xff] %v6670_v31  ;;  %4503 = vmatprep.mubr.bf16.mxu0 %v7591_v0  ;;  %4546 = vmatprep.mubr.bf16.mxu1 %v7591_v0 }
  0xf3   : > { %v6677_v56 = vpop.f32.mrf.mxu0  ;;  %v6683_v62 = vpop.f32.mrf.mxu1 }
  0xf4   : > { %4486 = vmatpush1.bf16.msra.mxu0 %v5870_v40  ;;  %4529 = vmatpush1.bf16.msra.mxu1 %v5872_v45  ;;  %v5839_v40 = vld [vmem:[%s6109_s19 + $0x768] sm:$0xff] }
  0xf5   : > { %v6686_v3 = vpop.f32.mrf.mxu0  ;;  %4569 = vmatprep.subr.bf16.mxu0 %v4169_v46  ;;  %v6689_v11 = vpop.f32.mrf.mxu1  ;;  %4612 = vmatprep.subr.bf16.mxu1 %v4175_v51  ;;  %v4178_v46 = vand.u32 %v5910_v18, %v6113_v5  ;;  %v5915_v51 = vcombine.high %v5838_v33, %v5854_v34  ;;  %v5917_v55 = vcombine.high %v5839_v40, %v5855_v41 }
  0xf6   : > { %7684 = vst [vmem:[#allocation12_spill] sm:$0xff] %v6686_v3  ;;  %7685 = vst [vmem:[#allocation13_spill] sm:$0xff] %v6689_v11 }
  0xf7   : > { %v6691_v15 = vpop.f32.mrf.mxu0  ;;  %5928 = vmatmul.mubr.msk.bf16.vlgmr.msra.gmra.mxu0 %vm570_vm2, %v6437_v63  ;;  %v6695_v16 = vpop.f32.mrf.mxu1  ;;  %5929 = vmatmul.mubr.msk.bf16.vlgmr.msra.gmra.mxu1 %vm570_vm2, %v6437_v63  ;;  %v4193_v8 = vand.u32 %v5915_v51, %v6113_v5 }
  0xf8   : > { %4570 = vmatpush1.bf16.msra.mxu0 %v4166_v2  ;;  %4613 = vmatpush1.bf16.msra.mxu1 %v4172_v4  ;;  %v5914_v2 = vcombine.low %v5838_v33, %v5854_v34  ;;  %v5857_v33 = vld [vmem:[%s6109_s19 + $0x7f8] sm:$0x33] }
  0xf9   : > { %v6699_v20 = vpop.f32.mrf.mxu0  ;;  %4571 = vmatprep.subr.bf16.mxu0 %v5875_v7  ;;  %v6704_v27 = vpop.f32.mrf.mxu1  ;;  %4614 = vmatprep.subr.bf16.mxu1 %v5877_v12  ;;  %v5880_v7 = vcombine.low %v5805_v32, %v5821_v37  ;;  %v5916_v12 = vcombine.low %v5839_v40, %v5855_v41  ;;  %v5841_v32 = vld [vmem:[%s6109_s19 + $0x778] sm:$0xff] }
  0xfa   : > { %7686 = vst [vmem:[#allocation14_spill] sm:$0xff] %v6699_v20  ;;  %7687 = vst [vmem:[#allocation15_spill] sm:$0xff] %v6704_v27  ;;  %4589 = vmatprep.mubr.bf16.mxu0 %v7591_v0  ;;  %4632 = vmatprep.mubr.bf16.mxu1 %v7591_v0  ;;  %v4190_v37 = vand.u32 %v5914_v2, %v6113_v5 }
  0xfb   : > { %v6711_v36 = vpop.f32.mrf.mxu0  ;;  %v6717_v45 = vpop.f32.mrf.mxu1  ;;  %v4196_v41 = vand.u32 %v5916_v12, %v6113_v5 }
  0xfc   : > { %4572 = vmatpush1.bf16.msra.mxu0 %v5874_v17  ;;  %4615 = vmatpush1.bf16.msra.mxu1 %v5876_v21  ;;  %v5822_v17 = vld [vmem:[%s6109_s19 + $0x6e0] sm:$0xff]  ;;  %v4199_v21 = vand.u32 %v5917_v55, %v6113_v5 }
  0xfd   : > { %v6720_v48 = vpop.f32.mrf.mxu0  ;;  %4655 = vmatprep.subr.bf16.mxu0 %v4181_v22  ;;  %v6723_v53 = vpop.f32.mrf.mxu1  ;;  %4698 = vmatprep.subr.bf16.mxu1 %v4187_v29  ;;  %v5807_v22 = vld [vmem:[%s6109_s19 + $0x668] sm:$0xff]  ;;  %v5882_v2 = vcombine.low %v5806_v14, %v5822_v17 }
  0xfe   : > { %7688 = vst [vmem:[#allocation16_spill] sm:$0xff] %v6720_v48  ;;  %7689 = vst [vmem:[#allocation17_spill] sm:$0xff] %v6723_v53  ;;  %v5823_v29 = vld [vmem:[%s6109_s19 + $0x6e8] sm:$0xff] }
  0xff   : > { %v6725_v58 = vpop.f32.mrf.mxu0  ;;  %5930 = vmatmul.mubr.msk.bf16.vlgmr.msra.gmra.mxu0 %vm570_vm2, %v6437_v63  ;;  %v6729_v59 = vpop.f32.mrf.mxu1  ;;  %5931 = vmatmul.mubr.msk.bf16.vlgmr.msra.gmra.mxu1 %vm570_vm2, %v6437_v63  ;;  %v5885_v51 = vcombine.high %v5807_v22, %v5823_v29  ;;  %v5884_v12 = vcombine.low %v5807_v22, %v5823_v29 }
 0x100   : > { %4656 = vmatpush1.bf16.msra.mxu0 %v4178_v46  ;;  %4699 = vmatpush1.bf16.msra.mxu1 %v4184_v49  ;;  %v5883_v46 = vcombine.high %v5806_v14, %v5822_v17  ;;  %v5919_v49 = vcombine.high %v5840_v23, %v5856_v25  ;;  %v5824_v14 = vld [vmem:[%s6109_s19 + $0x6f0] sm:$0xff] }
 0x101   : > { %v6733_v4 = vpop.f32.mrf.mxu0  ;;  %4657 = vmatprep.subr.bf16.mxu0 %v5879_v50  ;;  %v6738_v18 = vpop.f32.mrf.mxu1  ;;  %4700 = vmatprep.subr.bf16.mxu1 %v5881_v54  ;;  %v5921_v54 = vcombine.high %v5841_v32, %v5857_v33 }
 0x102   : > { %7690 = vst [vmem:[#allocation18_spill] sm:$0xff] %v6733_v4  ;;  %7691 = vst [vmem:[#allocation19_spill] sm:$0xff] %v6738_v18  ;;  %4675 = vmatprep.mubr.bf16.mxu0 %v7591_v0  ;;  %4718 = vmatprep.mubr.bf16.mxu1 %v7591_v0  ;;  %v5920_v0 = vcombine.low %v5841_v32, %v5857_v33 }
 0x103   : > { %v6745_v26 = vpop.f32.mrf.mxu0  ;;  %v6751_v34 = vpop.f32.mrf.mxu1 }
 0x104   : > { %7692 = vst [vmem:[#allocation20_spill] sm:$0xff] %v6745_v26  ;;  %4658 = vmatpush1.bf16.msra.mxu0 %v5878_v60  ;;  %4701 = vmatpush1.bf16.msra.mxu1 %v5880_v7  ;;  %v5918_v7 = vcombine.low %v5840_v23, %v5856_v25  ;;  %v5809_v23 = vld [vmem:[%s6109_s19 + $0x678] sm:$0xff]  ;;  %v4208_v32 = vand.u32 %v5920_v0, %v6113_v5 }
 0x105   : > { %v6754_v40 = vpop.f32.mrf.mxu0  ;;  %4741 = vmatprep.subr.bf16.mxu0 %v4193_v8  ;;  %v6757_v50 = vpop.f32.mrf.mxu1  ;;  %4784 = vmatprep.subr.bf16.mxu1 %v4199_v21  ;;  %v4205_v21 = vand.u32 %v5919_v49, %v6113_v5  ;;  %v5825_v25 = vld [vmem:[%s6109_s19 + $0x6f8] sm:$0xff] }
 0x106   : > { %7693 = vst [vmem:[#allocation21_spill] sm:$0xff] %v6754_v40  ;;  %7694 = vst [vmem:[#allocation22_spill] sm:$0xff] %v6757_v50  ;;  %v4211_v50 = vand.u32 %v5921_v54, %v6113_v5  ;;  %v4202_v22 = vand.u32 %v5918_v7, %v6113_v5  ;;  %v5889_v49 = vcombine.high %v5809_v23, %v5825_v25 }
 0x107   : > { %v6759_v55 = vpop.f32.mrf.mxu0  ;;  %5932 = vmatmul.mubr.msk.bf16.vlgmr.msra.gmra.mxu0 %vm570_vm2, %v6437_v63  ;;  %v6763_v60 = vpop.f32.mrf.mxu1  ;;  %5933 = vmatmul.mubr.msk.bf16.vlgmr.msra.gmra.mxu1 %vm570_vm2, %v6437_v63  ;;  %v5888_v0 = vcombine.low %v5809_v23, %v5825_v25 }
 0x108   : > { %7695 = vst [vmem:[#allocation23_spill] sm:$0xff] %v6759_v55  ;;  %7696 = vst [vmem:[#allocation24_spill] sm:$0xff] %v6763_v60  ;;  %4742 = vmatpush1.bf16.msra.mxu0 %v4190_v37  ;;  %4785 = vmatpush1.bf16.msra.mxu1 %v4196_v41  ;;  %v7699_v60 = vmov 0   ;;  %v5808_v37 = vld [vmem:[%s6109_s19 + $0x670] sm:$0xff] }
 0x109   : > { %v6767_v8 = vpop.f32.mrf.mxu0  ;;  %4743 = vmatprep.subr.bf16.mxu0 %v5883_v46  ;;  %v6770_v55 = vpop.f32.mrf.mxu1  ;;  %4786 = vmatprep.subr.bf16.mxu1 %v5885_v51  ;;  %v5887_v33 = vcombine.high %v5808_v37, %v5824_v14 }
 0x10a   : > { %7697 = vst [vmem:[#allocation25_spill] sm:$0xff] %v6767_v8  ;;  %7698 = vst [vmem:[#allocation26_spill] sm:$0xff] %v6770_v55  ;;  %4761 = vmatprep.mubr.bf16.mxu0 %v7699_v60  ;;  %4804 = vmatprep.mubr.bf16.mxu1 %v7699_v60 }
 0x10b   : > { %v6776_v17 = vpop.f32.mrf.mxu0  ;;  %v6781_v41 = vpop.f32.mrf.mxu1 }
 0x10c   : > { %4744 = vmatpush1.bf16.msra.mxu0 %v5882_v2  ;;  %4787 = vmatpush1.bf16.msra.mxu1 %v5884_v12  ;;  %v5886_v2 = vcombine.low %v5808_v37, %v5824_v14  ;;  %v6035_v14 = vld [vmem:[%s7588_s1] sm:$0xff]  }
 0x10d   : > { %v6784_v29 = vpop.f32.mrf.mxu0  ;;  %4827 = vmatprep.subr.bf16.mxu0 %v4205_v21  ;;  %v6787_v46 = vpop.f32.mrf.mxu1  ;;  %4870 = vmatprep.subr.bf16.mxu1 %v4211_v50 }
 0x10e   : > { %7700 = vst [vmem:[#allocation27_spill] sm:$0xff] %v6784_v29  ;;  %7701 = vst [vmem:[#allocation28_spill] sm:$0xff] %v6787_v46 }
 0x10f   : > { %v6789_v51 = vpop.f32.mrf.mxu0  ;;  %5934 = vmatmul.mubr.msk.bf16.vlgmr.msra.gmra.mxu0 %vm570_vm2, %v6437_v63  ;;  %v6793_v54 = vpop.f32.mrf.mxu1  ;;  %5935 = vmatmul.mubr.msk.bf16.vlgmr.msra.gmra.mxu1 %vm570_vm2, %v6437_v63  ;;  %v7740_v18 = vld [vmem:[#allocation23_spill] sm:$0xff]  ;;  %v7741_v26 = vld [vmem:[#allocation24_spill] sm:$0xff] }
 0x110   : > { %4828 = vmatpush1.bf16.msra.mxu0 %v4202_v22  ;;  %4871 = vmatpush1.bf16.msra.mxu1 %v4208_v32 }
 0x111   : > { %v6797_v7 = vpop.f32.mrf.mxu0  ;;  %4829 = vmatprep.subr.bf16.mxu0 %v5887_v33  ;;  %v6799_v5 = vpop.f32.mrf.mxu1  ;;  %4872 = vmatprep.subr.bf16.mxu1 %v5889_v49 }
 0x112   : > { %7702 = vst [vmem:[#allocation29_spill] sm:$0xff] %v6797_v7  ;;  %7703 = vst [vmem:[#allocation30_spill] sm:$0xff] %v6799_v5  ;;  %4847 = vmatprep.mubr.bf16.mxu0 %v7699_v60  ;;  %4890 = vmatprep.mubr.bf16.mxu1 %v7699_v60 }
 0x113   : > { %v6802_v50 = vpop.f32.mrf.mxu0  ;;  %v6805_v12 = vpop.f32.mrf.mxu1 }
 0x114   : > { %7704 = vst [vmem:[#allocation31_spill] sm:$0xff] %v6805_v12  ;;  %4830 = vmatpush1.bf16.msra.mxu0 %v5886_v2  ;;  %4873 = vmatpush1.bf16.msra.mxu1 %v5888_v0 }
 0x115   : > { %v6807_v63 = vpop.f32.mrf.mxu0  ;;  %v6809_v21 = vpop.f32.mrf.mxu1 }
 0x116   : > { %7705 = vst [vmem:[#allocation32_spill] sm:$0xff] %v6807_v63  ;;  %7706 = vst [vmem:[#allocation33_spill] sm:$0xff] %v6809_v21 }
 0x117   : > { %v6811_v37 = vpop.f32.mrf.mxu0  ;;  %5936 = vmatmul.mubr.msk.bf16.vlgmr.msra.gmra.mxu0 %vm570_vm2, %v6035_v14  ;;  %v6817_v23 = vpop.f32.mrf.mxu1  ;;  %5937 = vmatmul.mubr.msk.bf16.vlgmr.msra.gmra.mxu1 %vm570_vm2, %v6035_v14 }
 0x118   : > { %7707 = vst [vmem:[#allocation34_spill] sm:$0xff] %v6811_v37  ;;  %7708 = vst [vmem:[#allocation35_spill] sm:$0xff] %v6817_v23 }
 0x119   : > { %v6820_v60 = vpop.f32.mrf.mxu0  ;;  %v6822_v25 = vpop.f32.mrf.mxu1 }
 0x11a   : > { %7709 = vst [vmem:[#allocation36_spill] sm:$0xff] %v6820_v60  ;;  %7710 = vst [vmem:[#allocation37_spill] sm:$0xff] %v6822_v25 }
 0x11b   : > { %v6824_v22 = vpop.f32.mrf.mxu0  ;;  %v6826_v32 = vpop.f32.mrf.mxu1 }
 0x11c   : > { %7711 = vst [vmem:[#allocation38_spill] sm:$0xff] %v6824_v22  ;;  %7712 = vst [vmem:[#allocation39_spill] sm:$0xff] %v6826_v32 }
 0x11d   : > { %v6828_v33 = vpop.f32.mrf.mxu0  ;;  %v6830_v49 = vpop.f32.mrf.mxu1 }
 0x11e   : > { %7713 = vst [vmem:[#allocation40_spill] sm:$0xff] %v6828_v33  ;;  %7714 = vst [vmem:[#allocation41_spill] sm:$0xff] %v6830_v49 }
 0x11f   : > { %v6832_v2 = vpop.f32.mrf.mxu0  ;;  %v6836_v23 = vpop.f32.mrf.mxu1 }
 0x120   : > { %7715 = vst [vmem:[#allocation42_spill] sm:$0xff] %v6832_v2  ;;  %7716 = vst [vmem:[#allocation43_spill] sm:$0xff] %v6836_v23 }
 0x121   : > { %v6840_v60 = vpop.f32.mrf.mxu0  ;;  %v6844_v32 = vpop.f32.mrf.mxu1 }
 0x122   : > { %7717 = vst [vmem:[#allocation44_spill] sm:$0xff] %v6840_v60  ;;  %7718 = vst [vmem:[#allocation45_spill] sm:$0xff] %v6844_v32 }
 0x123   : > { %v6848_v33 = vpop.f32.mrf.mxu0  ;;  %v6852_v2 = vpop.f32.mrf.mxu1 }
 0x124   : > { %v7769_v49 = vmax.f32 %v6609_v57, %v6848_v33 }
 0x125   : > { %v6856_v23 = vpop.f32.mrf.mxu0  ;;  %v6860_v60 = vpop.f32.mrf.mxu1 }
 0x126   : > { %7719 = vst [vmem:[#allocation46_spill] sm:$0xff] %v6856_v23  ;;  %7720 = vst [vmem:[#allocation47_spill] sm:$0xff] %v6860_v60 }
 0x127   : > { %v6864_v32 = vpop.f32.mrf.mxu0  ;;  %v6868_v52 = vpop.f32.mrf.mxu1  ;;  %v7765_v25 = vld [vmem:[#allocation42_spill] sm:$0xff]  ;;  %v7767_v21 = vld [vmem:[#allocation43_spill] sm:$0xff] }
 0x128   : > { %v7766_v37 = vmax.f32 %v6589_v43, %v7765_v25  ;;  %v7768_v14 = vmax.f32 %v6593_v44, %v7767_v21  ;;  %v7770_v43 = vmax.f32 %v6615_v61, %v6852_v2  ;;  %v7771_v21 = vmax.f32 %v6623_v9, %v6864_v32 }
 0x129   : > { %v6872_v47 = vpop.f32.mrf.mxu0  ;;  %v6876_v23 = vpop.f32.mrf.mxu1  ;;  %v7772_v57 = vmax.f32 %v6627_v10, %v6868_v52 }
 0x12a   : > { %7721 = vst [vmem:[#allocation48_spill] sm:$0xff] %v6872_v47  ;;  %7722 = vst [vmem:[#allocation49_spill] sm:$0xff] %v6876_v23 }
 0x12b   : > { %v6880_v60 = vpop.f32.mrf.mxu0  ;;  %v6884_v6 = vpop.f32.mrf.mxu1 }
 0x12c   : > { %v7774_v9 = vmax.f32 %v6649_v28, %v6884_v6 }
 0x12d   : > { %v6888_v1 = vpop.f32.mrf.mxu0  ;;  %v6892_v47 = vpop.f32.mrf.mxu1 }
 0x12e   : > { %7723 = vst [vmem:[#allocation50_spill] sm:$0xff] %v6888_v1  ;;  %7724 = vst [vmem:[#allocation51_spill] sm:$0xff] %v6892_v47 }
 0x12f   : > { %v6896_v23 = vpop.f32.mrf.mxu0  ;;  %v6900_v19 = vpop.f32.mrf.mxu1 }
 0x131   : > { %v6904_v13 = vpop.f32.mrf.mxu0  ;;  %v6908_v1 = vpop.f32.mrf.mxu1 }
 0x132   : > { %7725 = vst [vmem:[#allocation52_spill] sm:$0xff] %v6904_v13  ;;  %7726 = vst [vmem:[#allocation53_spill] sm:$0xff] %v6908_v1 }
 0x133   : > { %v6912_v47 = vpop.f32.mrf.mxu0  ;;  %v6916_v35 = vpop.f32.mrf.mxu1 }
 0x135   : > { %v6920_v30 = vpop.f32.mrf.mxu0  ;;  %v6924_v13 = vpop.f32.mrf.mxu1 }
 0x136   : > { %7727 = vst [vmem:[#allocation54_spill] sm:$0xff] %v6920_v30  ;;  %7728 = vst [vmem:[#allocation55_spill] sm:$0xff] %v6924_v13 }
 0x137   : > { %v6928_v1 = vpop.f32.mrf.mxu0  ;;  %v6932_v31 = vpop.f32.mrf.mxu1 }
 0x139   : > { %v6936_v42 = vpop.f32.mrf.mxu0  ;;  %v6940_v30 = vpop.f32.mrf.mxu1 }
 0x13a   : > { %7729 = vst [vmem:[#allocation56_spill] sm:$0xff] %v6936_v42  ;;  %7730 = vst [vmem:[#allocation57_spill] sm:$0xff] %v6940_v30 }
 0x13b   : > { %v6944_v13 = vpop.f32.mrf.mxu0  ;;  %v6948_v11 = vpop.f32.mrf.mxu1 }
 0x13d   : > { %v6952_v3 = vpop.f32.mrf.mxu0  ;;  %v6956_v42 = vpop.f32.mrf.mxu1 }
 0x13e   : > { %7731 = vst [vmem:[#allocation58_spill] sm:$0xff] %v6952_v3  ;;  %7732 = vst [vmem:[#allocation59_spill] sm:$0xff] %v6956_v42 }
 0x13f   : > { %v6960_v30 = vpop.f32.mrf.mxu0  ;;  %v6964_v27 = vpop.f32.mrf.mxu1 }
 0x141   : > { %v6968_v20 = vpop.f32.mrf.mxu0  ;;  %v6972_v3 = vpop.f32.mrf.mxu1 }
 0x142   : > { %7733 = vst [vmem:[#allocation60_spill] sm:$0xff] %v6968_v20  ;;  %7734 = vst [vmem:[#allocation61_spill] sm:$0xff] %v6972_v3 }
 0x143   : > { %v6976_v42 = vpop.f32.mrf.mxu0  ;;  %v6980_v53 = vpop.f32.mrf.mxu1 }
 0x144   : > { %7735 = vst [vmem:[#allocation62_spill] sm:$0xff] %v6976_v42  ;;  %7736 = vst [vmem:[#allocation63_spill] sm:$0xff] %v6980_v53 }
 0x145   : > { %v6984_v48 = vpop.f32.mrf.mxu0  ;;  %v6988_v20 = vpop.f32.mrf.mxu1 }
 0x146   : > { %7737 = vst [vmem:[#allocation64_spill] sm:$0xff] %v6984_v48  ;;  %7738 = vst [vmem:[#allocation65_spill] sm:$0xff] %v6988_v20 }
 0x147   : > { %v6992_v3 = vpop.f32.mrf.mxu0  ;;  %v6996_v42 = vpop.f32.mrf.mxu1 }
 0x149   : > { %v7000_v53 = vpop.f32.mrf.mxu0  ;;  %v7004_v48 = vpop.f32.mrf.mxu1 }
 0x14a   : > { %7742 = vst [vmem:[#allocation23_spill] sm:$0xff] %v7000_v53  ;;  %7743 = vst [vmem:[#allocation24_spill] sm:$0xff] %v7004_v48 }
 0x14b   : > { %v7008_v20 = vpop.f32.mrf.mxu0  ;;  %v7012_v4 = vpop.f32.mrf.mxu1 }
 0x14d   : > { %v7016_v40 = vpop.f32.mrf.mxu0  ;;  %v7020_v53 = vpop.f32.mrf.mxu1 }
 0x14e   : > { %7744 = vst [vmem:[#allocation66_spill] sm:$0xff] %v7016_v40  ;;  %7745 = vst [vmem:[#allocation67_spill] sm:$0xff] %v7020_v53 }
 0x14f   : > { %v7024_v48 = vpop.f32.mrf.mxu0  ;;  %v7028_v55 = vpop.f32.mrf.mxu1 }
 0x151   : > { %v7032_v8 = vpop.f32.mrf.mxu0  ;;  %v7036_v40 = vpop.f32.mrf.mxu1 }
 0x152   : > { %7746 = vst [vmem:[#allocation68_spill] sm:$0xff] %v7032_v8  ;;  %7747 = vst [vmem:[#allocation69_spill] sm:$0xff] %v7036_v40 }
 0x153   : > { %v7040_v53 = vpop.f32.mrf.mxu0  ;;  %v7044_v46 = vpop.f32.mrf.mxu1 }
 0x154   : > { %7748 = vst [vmem:[#allocation70_spill] sm:$0xff] %v7044_v46 }
 0x155   : > { %v7048_v29 = vpop.f32.mrf.mxu0  ;;  %v7052_v8 = vpop.f32.mrf.mxu1 }
 0x156   : > { %7749 = vst [vmem:[#allocation71_spill] sm:$0xff] %v7048_v29  ;;  %7750 = vst [vmem:[#allocation72_spill] sm:$0xff] %v7052_v8 }
 0x157   : > { %v7056_v40 = vpop.f32.mrf.mxu0  ;;  %v7060_v5 = vpop.f32.mrf.mxu1 }
 0x158   : > { %7751 = vst [vmem:[#allocation73_spill] sm:$0xff] %v7056_v40  ;;  %7752 = vst [vmem:[#allocation74_spill] sm:$0xff] %v7060_v5 }
 0x159   : > { %v7064_v46 = vpop.f32.mrf.mxu0  ;;  %v7068_v29 = vpop.f32.mrf.mxu1 }
 0x15a   : > { %7754 = vst [vmem:[#allocation75_spill] sm:$0xff] %v7064_v46  ;;  %7756 = vst [vmem:[#allocation76_spill] sm:$0xff] %v7068_v29 }
 0x15b   : > { %v7072_v8 = vpop.f32.mrf.mxu0  ;;  %v7076_v63 = vpop.f32.mrf.mxu1 }
 0x15c   : > { %7757 = vst [vmem:[#allocation77_spill] sm:$0xff] %v7072_v8  ;;  %7759 = vst [vmem:[#allocation78_spill] sm:$0xff] %v7076_v63 }
 0x15d   : > { %v7080_v5 = vpop.f32.mrf.mxu0  ;;  %v7084_v46 = vpop.f32.mrf.mxu1 }
 0x15e   : > { %7761 = vst [vmem:[#allocation79_spill] sm:$0xff] %v7080_v5  ;;  %7763 = vst [vmem:[#allocation80_spill] sm:$0xff] %v7084_v46 }
 0x15f   : > { %v3046_v29 = vpop.f32.mrf.mxu0  ;;  %v3089_v8 = vpop.f32.mrf.mxu1 }
 0x160   : > { %v7091_v0 = vmax.f32 %v7766_v37, %v3046_v29  ;;  %v7096_v63 = vmax.f32 %v7768_v14, %v3089_v8 }
 0x161   : > { %v7098_v40 = vpop.f32.mrf.mxu0  ;;  %v7100_v22 = vpop.f32.mrf.mxu1 }
 0x163   : > { %v3050_v5 = vpop.f32.mrf.mxu0  ;;  %v3093_v12 = vpop.f32.mrf.mxu1 }
 0x164   : > { %v7105_v46 = vmax.f32 %v7769_v49, %v3050_v5  ;;  %v7110_v29 = vmax.f32 %v7770_v43, %v3093_v12  ;;  %v7773_v49 = vmax.f32 %v6643_v24, %v6880_v60  ;;  %v7776_v24 = vmax.f32 %v6661_v39, %v6900_v19 }
 0x165   : > { %v7112_v37 = vpop.f32.mrf.mxu0  ;;  %v7114_v44 = vpop.f32.mrf.mxu1 }
 0x167   : > { %v3132_v8 = vpop.f32.mrf.mxu0  ;;  %v3175_v14 = vpop.f32.mrf.mxu1 }
 0x168   : > { %v7119_v25 = vmax.f32 %v7771_v21, %v3132_v8  ;;  %v7124_v5 = vmax.f32 %v7772_v57, %v3175_v14  ;;  %v7775_v21 = vmax.f32 %v6657_v38, %v6896_v23  ;;  %v7778_v38 = vmax.f32 %v6683_v62, %v6916_v35 }
 0x169   : > { %v7126_v33 = vpop.f32.mrf.mxu0  ;;  %v7128_v61 = vpop.f32.mrf.mxu1 }
 0x16b   : > { %v3136_v12 = vpop.f32.mrf.mxu0  ;;  %v3179_v43 = vpop.f32.mrf.mxu1 }
 0x16c   : > { %v7133_v2 = vmax.f32 %v7773_v49, %v3136_v12  ;;  %v7138_v32 = vmax.f32 %v7774_v9, %v3179_v43  ;;  %v7777_v49 = vmax.f32 %v6677_v56, %v6912_v47  ;;  %v7780_v47 = vmax.f32 %v6695_v16, %v6932_v31 }
 0x16d   : > { %v7140_v8 = vpop.f32.mrf.mxu0  ;;  %v7142_v52 = vpop.f32.mrf.mxu1 }
 0x16f   : > { %v3218_v10 = vpop.f32.mrf.mxu0  ;;  %v3261_v57 = vpop.f32.mrf.mxu1 }
 0x170   : > { %v7147_v14 = vmax.f32 %v7775_v21, %v3218_v10  ;;  %v7152_v60 = vmax.f32 %v7776_v24, %v3261_v57  ;;  %v7779_v21 = vmax.f32 %v6691_v15, %v6928_v1  ;;  %v7782_v1 = vmax.f32 %v6717_v45, %v6948_v11 }
 0x171   : > { %v7154_v12 = vpop.f32.mrf.mxu0  ;;  %v7156_v6 = vpop.f32.mrf.mxu1 }
 0x173   : > { %v3222_v28 = vpop.f32.mrf.mxu0  ;;  %v3265_v9 = vpop.f32.mrf.mxu1 }
 0x174   : > { %v7161_v43 = vmax.f32 %v7777_v49, %v3222_v28  ;;  %v7166_v23 = vmax.f32 %v7778_v38, %v3265_v9  ;;  %v7781_v49 = vmax.f32 %v6711_v36, %v6944_v13  ;;  %v7785_v13 = vmax.f32 %v6729_v59, %v6964_v27 }
 0x175   : > { %v7168_v10 = vpop.f32.mrf.mxu0  ;;  %v7170_v19 = vpop.f32.mrf.mxu1 }
 0x177   : > { %v3304_v39 = vpop.f32.mrf.mxu0  ;;  %v3347_v24 = vpop.f32.mrf.mxu1 }
 0x178   : > { %v7175_v57 = vmax.f32 %v7779_v21, %v3304_v39  ;;  %v7180_v56 = vmax.f32 %v7780_v47, %v3347_v24  ;;  %v7784_v21 = vmax.f32 %v6725_v58, %v6960_v30  ;;  %v7790_v30 = vld [vmem:[#allocation63_spill] sm:$0xff] }
 0x179   : > { %v7182_v28 = vpop.f32.mrf.mxu0  ;;  %v7184_v35 = vpop.f32.mrf.mxu1  ;;  %v7791_v58 = vmax.f32 %v6751_v34, %v7790_v30 }
 0x17b   : > { %v3308_v62 = vpop.f32.mrf.mxu0  ;;  %v3351_v38 = vpop.f32.mrf.mxu1 }
 0x17c   : > { %v7189_v9 = vmax.f32 %v7781_v49, %v3308_v62  ;;  %v7194_v15 = vmax.f32 %v7782_v1, %v3351_v38  ;;  %v7787_v49 = vld [vmem:[#allocation20_spill] sm:$0xff]  ;;  %v7788_v38 = vld [vmem:[#allocation62_spill] sm:$0xff] }
 0x17d   : > { %v7196_v39 = vpop.f32.mrf.mxu0  ;;  %v7198_v31 = vpop.f32.mrf.mxu1  ;;  %v7789_v1 = vmax.f32 %v7787_v49, %v7788_v38 }
 0x17e   : > { %7783 = vst [vmem:[#allocation42_spill] sm:$0xff] %v7194_v15 }
 0x17f   : > { %v3390_v16 = vpop.f32.mrf.mxu0  ;;  %v3433_v47 = vpop.f32.mrf.mxu1 }
 0x180   : > { %v7203_v24 = vmax.f32 %v7784_v21, %v3390_v16  ;;  %v7208_v36 = vmax.f32 %v7785_v13, %v3433_v47  ;;  %v7792_v47 = vmax.f32 %v7740_v18, %v6992_v3  ;;  %v7795_v3 = vmax.f32 %v6781_v41, %v7012_v4 }
 0x181   : > { %v7210_v62 = vpop.f32.mrf.mxu0  ;;  %v7212_v11 = vpop.f32.mrf.mxu1 }
 0x182   : > { %7786 = vst [vmem:[#allocation43_spill] sm:$0xff] %v7208_v36 }
 0x183   : > { %v3394_v45 = vpop.f32.mrf.mxu0  ;;  %v3437_v15 = vpop.f32.mrf.mxu1 }
 0x184   : > { %v7217_v7 = vmax.f32 %v7789_v1, %v3394_v45  ;;  %v7222_v16 = vmax.f32 %v7791_v58, %v3437_v15  ;;  %v7793_v45 = vmax.f32 %v7741_v26, %v6996_v42  ;;  %v7794_v1 = vmax.f32 %v6776_v17, %v7008_v20 }
 0x185   : > { %v7224_v21 = vpop.f32.mrf.mxu0  ;;  %v7226_v27 = vpop.f32.mrf.mxu1  ;;  %v7799_v20 = vmax.f32 %v6793_v54, %v7028_v55 }
 0x187   : > { %v3476_v59 = vpop.f32.mrf.mxu0  ;;  %v3519_v36 = vpop.f32.mrf.mxu1 }
 0x188   : > { %v7231_v13 = vmax.f32 %v7792_v47, %v3476_v59  ;;  %v7236_v49 = vmax.f32 %v7793_v45, %v3519_v36  ;;  %v7797_v36 = vmax.f32 %v6789_v51, %v7024_v48  ;;  %v7805_v48 = vld [vmem:[#allocation31_spill] sm:$0xff]  ;;  %v7806_v51 = vld [vmem:[#allocation70_spill] sm:$0xff] }
 0x189   : > { %v7238_v38 = vpop.f32.mrf.mxu0  ;;  %v7240_v34 = vpop.f32.mrf.mxu1 }
 0x18b   : > { %v3480_v15 = vpop.f32.mrf.mxu0  ;;  %v3523_v58 = vpop.f32.mrf.mxu1 }
 0x18c   : > { %v7245_v30 = vmax.f32 %v7794_v1, %v3480_v15  ;;  %v7250_v18 = vmax.f32 %v7795_v3, %v3523_v58  ;;  %v7803_v1 = vmax.f32 %v6802_v50, %v7040_v53  ;;  %v7815_v53 = vld [vmem:[#allocation35_spill] sm:$0xff]  ;;  %v7816_v50 = vld [vmem:[#allocation74_spill] sm:$0xff] }
 0x18d   : > { %v7252_v59 = vpop.f32.mrf.mxu0  ;;  %v7254_v42 = vpop.f32.mrf.mxu1 }
 0x18e   : > { %7796 = vst [vmem:[#allocation20_spill] sm:$0xff] %v7250_v18 }
 0x18f   : > { %v3562_v26 = vpop.f32.mrf.mxu0  ;;  %v3605_v45 = vpop.f32.mrf.mxu1 }
 0x190   : > { %v7259_v47 = vmax.f32 %v7797_v36, %v3562_v26  ;;  %v7264_v17 = vmax.f32 %v7799_v20, %v3605_v45  ;;  %v7807_v26 = vmax.f32 %v7805_v48, %v7806_v51  ;;  %v7811_v45 = vld [vmem:[#allocation34_spill] sm:$0xff]  ;;  %v7812_v20 = vld [vmem:[#allocation73_spill] sm:$0xff] }
 0x191   : > { %v7266_v15 = vpop.f32.mrf.mxu0  ;;  %v7268_v4 = vpop.f32.mrf.mxu1  ;;  %v7821_v51 = vld [vmem:[#allocation38_spill] sm:$0xff] }
 0x192   : > { %7798 = vst [vmem:[#allocation62_spill] sm:$0xff] %v7259_v47  ;;  %7800 = vst [vmem:[#allocation63_spill] sm:$0xff] %v7264_v17  ;;  %v7813_v17 = vmax.f32 %v7811_v45, %v7812_v20  ;;  %v7825_v45 = vld [vmem:[#allocation39_spill] sm:$0xff] }
 0x193   : > { %7801 = vst [vmem:[#allocation81_spill] sm:$0xff] %v7266_v15  ;;  %7802 = vst [vmem:[#allocation82_spill] sm:$0xff] %v7268_v4  ;;  %v3566_v41 = vpop.f32.mrf.mxu0  ;;  %v3609_v3 = vpop.f32.mrf.mxu1 }
 0x194   : > { %v7273_v58 = vmax.f32 %v7803_v1, %v3566_v41  ;;  %v7278_v36 = vmax.f32 %v7807_v26, %v3609_v3  ;;  %v7817_v41 = vmax.f32 %v7815_v53, %v7816_v50  ;;  %v7822_v26 = vld [vmem:[#allocation77_spill] sm:$0xff] }
 0x195   : > { %v7280_v47 = vpop.f32.mrf.mxu0  ;;  %v7282_v55 = vpop.f32.mrf.mxu1 }
 0x196   : > { %7804 = vst [vmem:[#allocation83_spill] sm:$0xff] %v7273_v58  ;;  %7808 = vst [vmem:[#allocation31_spill] sm:$0xff] %v7278_v36  ;;  %v7823_v36 = vmax.f32 %v7821_v51, %v7822_v26 }
 0x197   : > { %7809 = vst [vmem:[#allocation70_spill] sm:$0xff] %v7280_v47  ;;  %7810 = vst [vmem:[#allocation84_spill] sm:$0xff] %v7282_v55  ;;  %v3648_v54 = vpop.f32.mrf.mxu0  ;;  %v3691_v15 = vpop.f32.mrf.mxu1 }
 0x198   : > { %v7287_v4 = vmax.f32 %v7813_v17, %v3648_v54  ;;  %v7292_v1 = vmax.f32 %v7817_v41, %v3691_v15  ;;  %v7826_v17 = vld [vmem:[#allocation78_spill] sm:$0xff]  ;;  %v7310_v15 = vpop.permute.xlu0 %4969 }
 0x199   : > { %v7294_v58 = vpop.f32.mrf.mxu0  ;;  %v7296_v3 = vpop.f32.mrf.mxu1  ;;  %v7827_v54 = vmax.f32 %v7825_v45, %v7826_v17  ;;  %v7831_v41 = vld [vmem:[#allocation2_spill] sm:$0xff]  ;;  %v7834_v45 = vld [vmem:[#allocation3_spill] sm:$0xff] }
 0x19a   : > { %7814 = vst [vmem:[#allocation34_spill] sm:$0xff] %v7287_v4  ;;  %7818 = vst [vmem:[#allocation73_spill] sm:$0xff] %v7292_v1  ;;  %v7832_v1 = vld [vmem:[#allocation44_spill] sm:$0xff] }
 0x19b   : > { %7819 = vst [vmem:[#allocation35_spill] sm:$0xff] %v7294_v58  ;;  %7820 = vst [vmem:[#allocation74_spill] sm:$0xff] %v7296_v3  ;;  %v3652_v48 = vpop.f32.mrf.mxu0  ;;  %v3695_v47 = vpop.f32.mrf.mxu1  ;;  %v7833_v51 = vmax.f32 %v7831_v41, %v7832_v1 }
 0x19c   : > { %v7301_v55 = vmax.f32 %v7823_v36, %v3652_v48  ;;  %v7306_v20 = vmax.f32 %v7827_v54, %v3695_v47  ;;  %v7835_v47 = vld [vmem:[#allocation45_spill] sm:$0xff] }
 0x19d   : > { %v7308_v4 = vpop.f32.mrf.mxu0  ;;  %v7312_v53 = vpop.f32.mrf.mxu1  ;;  %v3701_v36 = vmax.f32 %v7833_v51, %v7098_v40  ;;  %v7836_v17 = vmax.f32 %v7834_v45, %v7835_v47 }
 0x19e   : > { %7824 = vst [vmem:[#allocation38_spill] sm:$0xff] %v7301_v55  ;;  %7828 = vst [vmem:[#allocation77_spill] sm:$0xff] %v7306_v20  ;;  %v7326_v40 = vpop.permute.xlu0 %4974 }
 0x19f   : > { %7829 = vst [vmem:[#allocation39_spill] sm:$0xff] %v7308_v4  ;;  %7830 = vst [vmem:[#allocation78_spill] sm:$0xff] %v7312_v53  ;;  %v4247_v50 = vpop.f32.mrf.mxu0  ;;  %v4290_v26 = vpop.f32.mrf.mxu1  ;;  %v3703_v54 = vmax.f32 %v7836_v17, %v7100_v22 }
 0x1a0   : > { %v4901_v48 = vmax.f32 %v7091_v0, %v4247_v50  ;;  %v4903_v20 = vmax.f32 %v7096_v63, %v4290_v26  ;;  %v7837_v0 = vld [vmem:[#allocation4_spill] sm:$0xff]  ;;  %v7838_v50 = vld [vmem:[#allocation46_spill] sm:$0xff] }
 0x1a1   : > { %v4249_v55 = vpop.f32.mrf.mxu0  ;;  %v4292_v3 = vpop.f32.mrf.mxu1  ;;  %v7839_v41 = vmax.f32 %v7837_v0, %v7838_v50 }
 0x1a2   : > { %v4902_v4 = vmax.f32 %v3701_v36, %v4249_v55  ;;  %v4977_v53 = vadd.f32 %v7310_v15, %v4901_v48  ;;  %v4904_v58 = vmax.f32 %v3703_v54, %v4292_v3  ;;  %v4979_v18 = vadd.f32 %v7310_v15, %v4903_v20  ;;  %v7840_v36 = vld [vmem:[#allocation5_spill] sm:$0xff]  ;;  %v7841_v48 = vld [vmem:[#allocation47_spill] sm:$0xff] }
 0x1a3   : > { %v4251_v1 = vpop.f32.mrf.mxu0  ;;  %v3733_v51 = vmax.f32 %v7839_v41, %v7112_v37  ;;  %v4294_v55 = vpop.f32.mrf.mxu1  ;;  %v7842_v3 = vmax.f32 %v7840_v36, %v7841_v48  ;;  %v7846_v48 = vld [vmem:[#allocation7_spill] sm:$0xff] }
 0x1a4   : > { %v4978_v22 = vadd.f32 %v7310_v15, %v4902_v4  ;;  %v4933_v63 = vmax.f32 %v7105_v46, %v4251_v1  ;;  %v4980_v20 = vadd.f32 %v7310_v15, %v4904_v58  ;;  %v4935_v45 = vmax.f32 %v7110_v29, %v4294_v55  ;;  %v7843_v29 = vld [vmem:[#allocation6_spill] sm:$0xff] }
 0x1a5   : > { %v3735_v26 = vmax.f32 %v7842_v3, %v7114_v44  ;;  %v4253_v47 = vpop.f32.mrf.mxu0  ;;  %v5041_v17 = vmax.f32 %v4977_v53, 0.0  ;;  %v4296_v50 = vpop.f32.mrf.mxu1  ;;  %v5043_v46 = vmax.f32 %v4979_v18, 0.0  ;;  %v7844_v53 = vld [vmem:[#allocation48_spill] sm:$0xff]  ;;  %v7847_v18 = vld [vmem:[#allocation49_spill] sm:$0xff] }
 0x1a6   : > { %v5042_v54 = vmax.f32 %v4978_v22, 0.0  ;;  %v4934_v0 = vmax.f32 %v3733_v51, %v4253_v47  ;;  %v5009_v37 = vadd.f32 %v7326_v40, %v4933_v63  ;;  %v5044_v4 = vmax.f32 %v4980_v20, 0.0 }
 0x1a7   : > { %v4936_v44 = vmax.f32 %v3735_v26, %v4296_v50  ;;  %v5011_v58 = vadd.f32 %v7326_v40, %v4935_v45  ;;  %v4333_v1 = vpop.f32.mrf.mxu0  ;;  %v7845_v41 = vmax.f32 %v7843_v29, %v7844_v53  ;;  %v4376_v36 = vpop.f32.mrf.mxu1  ;;  %v7848_v3 = vmax.f32 %v7846_v48, %v7847_v18 }
 0x1a8   : > { %v5974_v22 = vpack.c.bf16 %v5042_v54, %v5041_v17  ;;  %v5010_v63 = vadd.f32 %v7326_v40, %v4934_v0  ;;  %v4905_v55 = vmax.f32 %v7119_v25, %v4333_v1  ;;  %v5975_v20 = vpack.c.bf16 %v5044_v4, %v5043_v46  ;;  %v7849_v4 = vld [vmem:[#allocation8_spill] sm:$0xff] }
 0x1a9   : > { %v3705_v51 = vmax.f32 %v7845_v41, %v7126_v33  ;;  %v3707_v26 = vmax.f32 %v7848_v3, %v7128_v61  ;;  %v5012_v45 = vadd.f32 %v7326_v40, %v4936_v44  ;;  %v4907_v47 = vmax.f32 %v7124_v5, %v4376_v36  ;;  %v4335_v50 = vpop.f32.mrf.mxu0  ;;  %v4378_v0 = vpop.f32.mrf.mxu1  ;;  %v7850_v44 = vld [vmem:[#allocation50_spill] sm:$0xff] }
 0x1aa   : > { %5297 = vst [vmem:[%s7345_s6] sm:$0xff] %v5974_v22  ;;  %v5073_v33 = vmax.f32 %v5009_v37, 0.0  ;;  %v5074_v29 = vmax.f32 %v5010_v63, 0.0  ;;  %v4981_v17 = vadd.f32 %v7310_v15, %v4905_v55  ;;  %5298 = vst [vmem:[%s7345_s6 + $0x8] sm:$0xff] %v5975_v20  ;;  %v5075_v25 = vmax.f32 %v5011_v58, 0.0  ;;  %v7852_v55 = vld [vmem:[#allocation9_spill] sm:$0xff]  ;;  %v7853_v58 = vld [vmem:[#allocation51_spill] sm:$0xff] }
 0x1ab   : > { %v4906_v54 = vmax.f32 %v3705_v51, %v4335_v50  ;;  %v5076_v1 = vmax.f32 %v5012_v45, 0.0  ;;  %v4983_v53 = vadd.f32 %v7310_v15, %v4907_v47  ;;  %v4908_v61 = vmax.f32 %v3707_v26, %v4378_v0  ;;  %v4337_v46 = vpop.f32.mrf.mxu0  ;;  %v4380_v63 = vpop.f32.mrf.mxu1 }
 0x1ac   : > { %v7851_v5 = vmax.f32 %v7849_v4, %v7850_v44  ;;  %v5990_v37 = vpack.c.bf16 %v5074_v29, %v5073_v33  ;;  %v4937_v51 = vmax.f32 %v7133_v2, %v4337_v46  ;;  %v7854_v36 = vmax.f32 %v7852_v55, %v7853_v58 }
 0x1ad   : > { %v4982_v22 = vadd.f32 %v7310_v15, %v4906_v54  ;;  %v5991_v18 = vpack.c.bf16 %v5076_v1, %v5075_v25  ;;  %v4984_v3 = vadd.f32 %v7310_v15, %v4908_v61  ;;  %v4939_v26 = vmax.f32 %v7138_v32, %v4380_v63  ;;  %v4339_v20 = vpop.f32.mrf.mxu0  ;;  %v4382_v33 = vpop.f32.mrf.mxu1  ;;  %v7855_v25 = vld [vmem:[#allocation10_spill] sm:$0xff]  ;;  %v7856_v1 = vld [vmem:[#allocation52_spill] sm:$0xff] }
 0x1ae   : > { %v3737_v41 = vmax.f32 %v7851_v5, %v7140_v8  ;;  %v3739_v48 = vmax.f32 %v7854_v36, %v7142_v52  ;;  %5313 = vst [vmem:[%s7345_s6 + $0x80] sm:$0xff] %v5990_v37  ;;  %v5045_v8 = vmax.f32 %v4981_v17, 0.0  ;;  %v5013_v47 = vadd.f32 %v7326_v40, %v4937_v51  ;;  %v7858_v5 = vld [vmem:[#allocation11_spill] sm:$0xff] }
 0x1af   : > { %v5046_v45 = vmax.f32 %v4982_v22, 0.0  ;;  %5314 = vst [vmem:[%s7345_s6 + $0x88] sm:$0xff] %v5991_v18  ;;  %v5047_v2 = vmax.f32 %v4983_v53, 0.0  ;;  %v5048_v29 = vmax.f32 %v4984_v3, 0.0  ;;  %v5015_v54 = vadd.f32 %v7326_v40, %v4939_v26  ;;  %v4419_v0 = vpop.f32.mrf.mxu0  ;;  %v4462_v44 = vpop.f32.mrf.mxu1  ;;  %v7859_v53 = vld [vmem:[#allocation53_spill] sm:$0xff] }
 0x1b0   : > { %v4938_v50 = vmax.f32 %v3737_v41, %v4339_v20  ;;  %v4940_v52 = vmax.f32 %v3739_v48, %v4382_v33  ;;  %v7857_v32 = vmax.f32 %v7855_v25, %v7856_v1  ;;  %v4909_v4 = vmax.f32 %v7147_v14, %v4419_v0 }
 0x1b1   : > { %v5976_v17 = vpack.c.bf16 %v5046_v45, %v5045_v8  ;;  %v7860_v41 = vmax.f32 %v7858_v5, %v7859_v53  ;;  %v5977_v22 = vpack.c.bf16 %v5048_v29, %v5047_v2  ;;  %v4911_v63 = vmax.f32 %v7152_v60, %v4462_v44  ;;  %v4421_v55 = vpop.f32.mrf.mxu0  ;;  %v4464_v18 = vpop.f32.mrf.mxu1  ;;  %v7861_v8 = vld [vmem:[#allocation12_spill] sm:$0xff]  ;;  %v7862_v45 = vld [vmem:[#allocation54_spill] sm:$0xff] }
 0x1b2   : > { %v3709_v61 = vmax.f32 %v7857_v32, %v7154_v12  ;;  %v5014_v46 = vadd.f32 %v7326_v40, %v4938_v50  ;;  %v5016_v51 = vadd.f32 %v7326_v40, %v4940_v52  ;;  %v5077_v12 = vmax.f32 %v5013_v47, 0.0  ;;  %v7864_v52 = vld [vmem:[#allocation13_spill] sm:$0xff] }
 0x1b3   : > { %v3711_v37 = vmax.f32 %v7860_v41, %v7156_v6  ;;  %5299 = vst [vmem:[%s7345_s6 + $0x10] sm:$0xff] %v5976_v17  ;;  %v4985_v36 = vadd.f32 %v7310_v15, %v4909_v4  ;;  %5300 = vst [vmem:[%s7345_s6 + $0x18] sm:$0xff] %v5977_v22  ;;  %v5079_v14 = vmax.f32 %v5015_v54, 0.0  ;;  %v4987_v26 = vadd.f32 %v7310_v15, %v4911_v63  ;;  %v4423_v20 = vpop.f32.mrf.mxu0  ;;  %v4466_v29 = vpop.f32.mrf.mxu1  ;;  %v7865_v54 = vld [vmem:[#allocation55_spill] sm:$0xff]  ;;  %v7867_v22 = vld [vmem:[#allocation14_spill] sm:$0xff] }
 0x1b4   : > { %v5078_v58 = vmax.f32 %v5014_v46, 0.0  ;;  %v4910_v48 = vmax.f32 %v3709_v61, %v4421_v55  ;;  %v5080_v3 = vmax.f32 %v5016_v51, 0.0  ;;  %v7863_v60 = vmax.f32 %v7861_v8, %v7862_v45  ;;  %v7868_v51 = vld [vmem:[#allocation56_spill] sm:$0xff] }
 0x1b5   : > { %v4912_v6 = vmax.f32 %v3711_v37, %v4464_v18  ;;  %v4941_v2 = vmax.f32 %v7161_v43, %v4423_v20  ;;  %v7866_v0 = vmax.f32 %v7864_v52, %v7865_v54  ;;  %v4943_v61 = vmax.f32 %v7166_v23, %v4466_v29  ;;  %v4425_v17 = vpop.f32.mrf.mxu0  ;;  %v4468_v5 = vpop.f32.mrf.mxu1  ;;  %v7871_v18 = vld [vmem:[#allocation57_spill] sm:$0xff]  ;;  %v7873_v52 = vld [vmem:[#allocation16_spill] sm:$0xff]  ;;  %v7874_v54 = vld [vmem:[#allocation58_spill] sm:$0xff] }
 0x1b6   : > { %v3741_v50 = vmax.f32 %v7863_v60, %v7168_v10  ;;  %v5992_v47 = vpack.c.bf16 %v5078_v58, %v5077_v12  ;;  %v4986_v33 = vadd.f32 %v7310_v15, %v4910_v48  ;;  %v5993_v1 = vpack.c.bf16 %v5080_v3, %v5079_v14  ;;  %v7870_v48 = vld [vmem:[#allocation15_spill] sm:$0xff] }
 0x1b7   : > { %v3743_v25 = vmax.f32 %v7866_v0, %v7170_v19  ;;  %v4988_v32 = vadd.f32 %v7310_v15, %v4912_v6  ;;  %v5049_v10 = vmax.f32 %v4985_v36, 0.0  ;;  %v5017_v4 = vadd.f32 %v7326_v40, %v4941_v2  ;;  %v4505_v37 = vpop.f32.mrf.mxu0  ;;  %v4548_v36 = vpop.f32.mrf.mxu1 }
 0x1b8   : > { %5315 = vst [vmem:[%s7345_s6 + $0x90] sm:$0xff] %v5992_v47  ;;  %v5050_v46 = vmax.f32 %v4986_v33, 0.0  ;;  %v4942_v44 = vmax.f32 %v3741_v50, %v4425_v17  ;;  %5316 = vst [vmem:[%s7345_s6 + $0x98] sm:$0xff] %v5993_v1  ;;  %v5051_v43 = vmax.f32 %v4987_v26, 0.0  ;;  %v5019_v41 = vadd.f32 %v7326_v40, %v4943_v61  ;;  %v7876_v17 = vld [vmem:[#allocation17_spill] sm:$0xff] }
 0x1b9   : > { %v5052_v53 = vmax.f32 %v4988_v32, 0.0  ;;  %v4944_v19 = vmax.f32 %v3743_v25, %v4468_v5  ;;  %v7869_v23 = vmax.f32 %v7867_v22, %v7868_v51  ;;  %v4913_v58 = vmax.f32 %v7175_v57, %v4505_v37  ;;  %v4507_v8 = vpop.f32.mrf.mxu0  ;;  %v4550_v47 = vpop.f32.mrf.mxu1 }
 0x1ba   : > { %v5978_v55 = vpack.c.bf16 %v5050_v46, %v5049_v10  ;;  %v5018_v12 = vadd.f32 %v7326_v40, %v4942_v44  ;;  %v7872_v14 = vmax.f32 %v7870_v48, %v7871_v18  ;;  %v4915_v20 = vmax.f32 %v7180_v56, %v4548_v36  ;;  %v7877_v10 = vld [vmem:[#allocation59_spill] sm:$0xff] }
 0x1bb   : > { %v3713_v63 = vmax.f32 %v7869_v23, %v7182_v28  ;;  %v5979_v26 = vpack.c.bf16 %v5052_v53, %v5051_v43  ;;  %v5020_v6 = vadd.f32 %v7326_v40, %v4944_v19  ;;  %v5081_v28 = vmax.f32 %v5017_v4, 0.0  ;;  %v4509_v29 = vpop.f32.mrf.mxu0  ;;  %v4552_v61 = vpop.f32.mrf.mxu1  ;;  %v7879_v43 = vld [vmem:[#allocation42_spill] sm:$0xff] }
 0x1bc   : > { %v3715_v3 = vmax.f32 %v7872_v14, %v7184_v35  ;;  %5301 = vst [vmem:[%s7345_s6 + $0x20] sm:$0xff] %v5978_v55  ;;  %v5082_v45 = vmax.f32 %v5018_v12, 0.0  ;;  %v4989_v60 = vadd.f32 %v7310_v15, %v4913_v58  ;;  %v5083_v57 = vmax.f32 %v5019_v41, 0.0  ;;  %v7880_v12 = vld [vmem:[#allocation18_spill] sm:$0xff]  ;;  %v7881_v58 = vld [vmem:[#allocation60_spill] sm:$0xff] }
 0x1bd   : > { %v4914_v50 = vmax.f32 %v3713_v63, %v4507_v8  ;;  %5302 = vst [vmem:[%s7345_s6 + $0x28] sm:$0xff] %v5979_v26  ;;  %v5084_v33 = vmax.f32 %v5020_v6, 0.0  ;;  %v4991_v2 = vadd.f32 %v7310_v15, %v4915_v20  ;;  %v7875_v56 = vmax.f32 %v7873_v52, %v7874_v54  ;;  %v4511_v41 = vpop.f32.mrf.mxu0  ;;  %v4554_v51 = vpop.f32.mrf.mxu1  ;;  %v7883_v6 = vld [vmem:[#allocation19_spill] sm:$0xff]  ;;  %v7884_v20 = vld [vmem:[#allocation61_spill] sm:$0xff] }
 0x1be   : > { %v4916_v35 = vmax.f32 %v3715_v3, %v4550_v47  ;;  %v5994_v25 = vpack.c.bf16 %v5082_v45, %v5081_v28  ;;  %v4945_v32 = vmax.f32 %v7189_v9, %v4509_v29  ;;  %v7878_v46 = vmax.f32 %v7876_v17, %v7877_v10 }
 0x1bf   : > { %v3745_v0 = vmax.f32 %v7875_v56, %v7196_v39  ;;  %v4990_v1 = vadd.f32 %v7310_v15, %v4914_v50  ;;  %v5995_v44 = vpack.c.bf16 %v5084_v33, %v5083_v57  ;;  %v4947_v53 = vmax.f32 %v7879_v43, %v4552_v61  ;;  %v4591_v55 = vpop.f32.mrf.mxu0  ;;  %v4634_v26 = vpop.f32.mrf.mxu1  ;;  %v7886_v50 = vld [vmem:[#allocation43_spill] sm:$0xff] }
 0x1c0   : > { %v3747_v4 = vmax.f32 %v7878_v46, %v7198_v31  ;;  %v4992_v5 = vadd.f32 %v7310_v15, %v4916_v35  ;;  %5317 = vst [vmem:[%s7345_s6 + $0xa0] sm:$0xff] %v5994_v25  ;;  %v5053_v39 = vmax.f32 %v4989_v60, 0.0  ;;  %v5021_v37 = vadd.f32 %v7326_v40, %v4945_v32  ;;  %v7888_v25 = vld [vmem:[#allocation64_spill] sm:$0xff] }
 0x1c1   : > { %v5054_v19 = vmax.f32 %v4990_v1, 0.0  ;;  %v4946_v22 = vmax.f32 %v3745_v0, %v4511_v41  ;;  %5318 = vst [vmem:[%s7345_s6 + $0xa8] sm:$0xff] %v5995_v44  ;;  %v5055_v9 = vmax.f32 %v4991_v2, 0.0  ;;  %v5023_v63 = vadd.f32 %v7326_v40, %v4947_v53  ;;  %v4593_v57 = vpop.f32.mrf.mxu0  ;;  %v4636_v29 = vpop.f32.mrf.mxu1  ;;  %v7887_v0 = vld [vmem:[#allocation21_spill] sm:$0xff] }
 0x1c2   : > { %v5056_v23 = vmax.f32 %v4992_v5, 0.0  ;;  %v4948_v31 = vmax.f32 %v3747_v4, %v4554_v51  ;;  %v7882_v36 = vmax.f32 %v7880_v12, %v7881_v58  ;;  %v4917_v3 = vmax.f32 %v7203_v24, %v4591_v55  ;;  %v7890_v4 = vld [vmem:[#allocation22_spill] sm:$0xff]  ;;  %v7891_v44 = vld [vmem:[#allocation65_spill] sm:$0xff]  ;;  %v7894_v12 = vld [vmem:[#allocation23_spill] sm:$0xff] }
 0x1c3   : > { %v5980_v18 = vpack.c.bf16 %v5054_v19, %v5053_v39  ;;  %v5022_v14 = vadd.f32 %v7326_v40, %v4946_v22  ;;  %v7885_v8 = vmax.f32 %v7883_v6, %v7884_v20  ;;  %v4919_v47 = vmax.f32 %v7886_v50, %v4634_v26  ;;  %v4595_v56 = vpop.f32.mrf.mxu0  ;;  %v4638_v46 = vpop.f32.mrf.mxu1  ;;  %v7893_v55 = vld [vmem:[#allocation25_spill] sm:$0xff]  ;;  %v7897_v26 = vld [vmem:[#allocation24_spill] sm:$0xff] }
 0x1c4   : > { %v3717_v48 = vmax.f32 %v7882_v36, %v7210_v62  ;;  %v5981_v45 = vpack.c.bf16 %v5056_v23, %v5055_v9  ;;  %v5024_v60 = vadd.f32 %v7326_v40, %v4948_v31  ;;  %v5085_v62 = vmax.f32 %v5021_v37, 0.0 }
 0x1c5   : > { %v3719_v28 = vmax.f32 %v7885_v8, %v7212_v11  ;;  %5303 = vst [vmem:[%s7345_s6 + $0x30] sm:$0xff] %v5980_v18  ;;  %v5086_v33 = vmax.f32 %v5022_v14, 0.0  ;;  %v4993_v2 = vadd.f32 %v7310_v15, %v4917_v3  ;;  %v5087_v24 = vmax.f32 %v5023_v63, 0.0  ;;  %v4597_v19 = vpop.f32.mrf.mxu0  ;;  %v4640_v9 = vpop.f32.mrf.mxu1  ;;  %v7896_v3 = vld [vmem:[#allocation26_spill] sm:$0xff] }
 0x1c6   : > { %v4918_v35 = vmax.f32 %v3717_v48, %v4593_v57  ;;  %5304 = vst [vmem:[%s7345_s6 + $0x38] sm:$0xff] %v5981_v45  ;;  %v5088_v52 = vmax.f32 %v5024_v60, 0.0  ;;  %v4995_v54 = vadd.f32 %v7310_v15, %v4919_v47  ;;  %v7889_v1 = vmax.f32 %v7887_v0, %v7888_v25  ;;  %v7902_v25 = vld [vmem:[#allocation28_spill] sm:$0xff] }
 0x1c7   : > { %v4920_v11 = vmax.f32 %v3719_v28, %v4636_v29  ;;  %v5996_v61 = vpack.c.bf16 %v5086_v33, %v5085_v62  ;;  %v4949_v10 = vmax.f32 %v7217_v7, %v4595_v56  ;;  %v7892_v5 = vmax.f32 %v7890_v4, %v7891_v44  ;;  %v4677_v31 = vpop.f32.mrf.mxu0  ;;  %v4720_v14 = vpop.f32.mrf.mxu1  ;;  %v7899_v29 = vld [vmem:[#allocation27_spill] sm:$0xff] }
 0x1c8   : > { %v3749_v32 = vmax.f32 %v7889_v1, %v7224_v21  ;;  %v4994_v17 = vadd.f32 %v7310_v15, %v4918_v35  ;;  %v5997_v53 = vpack.c.bf16 %v5088_v52, %v5087_v24  ;;  %v4951_v39 = vmax.f32 %v7222_v16, %v4638_v46  ;;  %v7900_v24 = vld [vmem:[#allocation66_spill] sm:$0xff]  ;;  %v7903_v1 = vld [vmem:[#allocation67_spill] sm:$0xff]  ;;  %v7905_v46 = vld [vmem:[#allocation20_spill] sm:$0xff] }
 0x1c9   : > { %v3751_v43 = vmax.f32 %v7892_v5, %v7226_v27  ;;  %v4996_v41 = vadd.f32 %v7310_v15, %v4920_v11  ;;  %5319 = vst [vmem:[%s7345_s6 + $0xb0] sm:$0xff] %v5996_v61  ;;  %v5057_v21 = vmax.f32 %v4993_v2, 0.0  ;;  %v5025_v22 = vadd.f32 %v7326_v40, %v4949_v10  ;;  %v4679_v60 = vpop.f32.mrf.mxu0  ;;  %v4722_v62 = vpop.f32.mrf.mxu1 }
 0x1ca   : > { %v5058_v37 = vmax.f32 %v4994_v17, 0.0  ;;  %v4950_v51 = vmax.f32 %v3749_v32, %v4597_v19  ;;  %5320 = vst [vmem:[%s7345_s6 + $0xb8] sm:$0xff] %v5997_v53  ;;  %v5059_v7 = vmax.f32 %v4995_v54, 0.0  ;;  %v5027_v63 = vadd.f32 %v7326_v40, %v4951_v39 }
 0x1cb   : > { %v5060_v23 = vmax.f32 %v4996_v41, 0.0  ;;  %v4952_v27 = vmax.f32 %v3751_v43, %v4640_v9  ;;  %v7895_v16 = vmax.f32 %v7893_v55, %v7894_v12  ;;  %v4921_v18 = vmax.f32 %v7231_v13, %v4677_v31  ;;  %v4681_v35 = vpop.f32.mrf.mxu0  ;;  %v4724_v0 = vpop.f32.mrf.mxu1  ;;  %v7911_v12 = vld [vmem:[#allocation82_spill] sm:$0xff] }
 0x1cc   : > { %v5982_v36 = vpack.c.bf16 %v5058_v37, %v5057_v21  ;;  %v5026_v48 = vadd.f32 %v7326_v40, %v4950_v51  ;;  %v7898_v6 = vmax.f32 %v7896_v3, %v7897_v26  ;;  %v4923_v45 = vmax.f32 %v7236_v49, %v4720_v14  ;;  %v7906_v37 = vld [vmem:[#allocation81_spill] sm:$0xff]  ;;  %v7908_v51 = vld [vmem:[#allocation68_spill] sm:$0xff]  ;;  %v7915_v3 = vld [vmem:[#allocation63_spill] sm:$0xff] }
 0x1cd   : > { %v3721_v58 = vmax.f32 %v7895_v16, %v7238_v38  ;;  %v5983_v8 = vpack.c.bf16 %v5060_v23, %v5059_v7  ;;  %v5028_v28 = vadd.f32 %v7326_v40, %v4952_v27  ;;  %v5089_v38 = vmax.f32 %v5025_v22, 0.0  ;;  %v4683_v44 = vpop.f32.mrf.mxu0  ;;  %v4726_v41 = vpop.f32.mrf.mxu1  ;;  %v7907_v22 = vld [vmem:[#allocation29_spill] sm:$0xff]  ;;  %v7910_v27 = vld [vmem:[#allocation62_spill] sm:$0xff] }
 0x1ce   : > { %v3723_v20 = vmax.f32 %v7898_v6, %v7240_v34  ;;  %5305 = vst [vmem:[%s7345_s6 + $0x40] sm:$0xff] %v5982_v36  ;;  %v5090_v50 = vmax.f32 %v5026_v48, 0.0  ;;  %v4997_v47 = vadd.f32 %v7310_v15, %v4921_v18  ;;  %v5091_v13 = vmax.f32 %v5027_v63, 0.0  ;;  %v7912_v16 = vld [vmem:[#allocation30_spill] sm:$0xff] }
 0x1cf   : > { %v4922_v57 = vmax.f32 %v3721_v58, %v4679_v60  ;;  %5306 = vst [vmem:[%s7345_s6 + $0x48] sm:$0xff] %v5983_v8  ;;  %v5092_v33 = vmax.f32 %v5028_v28, 0.0  ;;  %v4999_v2 = vadd.f32 %v7310_v15, %v4923_v45  ;;  %v7901_v49 = vmax.f32 %v7899_v29, %v7900_v24  ;;  %v4763_v21 = vpop.f32.mrf.mxu0  ;;  %v4806_v55 = vpop.f32.mrf.mxu1  ;;  %v7913_v58 = vld [vmem:[#allocation69_spill] sm:$0xff] }
 0x1d0   : > { %v4924_v34 = vmax.f32 %v3723_v20, %v4722_v62  ;;  %v5998_v54 = vpack.c.bf16 %v5090_v50, %v5089_v38  ;;  %v4953_v56 = vmax.f32 %v7245_v30, %v4681_v35  ;;  %v7904_v32 = vmax.f32 %v7902_v25, %v7903_v1 }
 0x1d1   : > { %v3753_v52 = vmax.f32 %v7901_v49, %v7252_v59  ;;  %v4998_v11 = vadd.f32 %v7310_v15, %v4922_v57  ;;  %v5999_v17 = vpack.c.bf16 %v5092_v33, %v5091_v13  ;;  %v4955_v4 = vmax.f32 %v7905_v46, %v4724_v0  ;;  %v4765_v6 = vpop.f32.mrf.mxu0  ;;  %v4808_v60 = vpop.f32.mrf.mxu1  ;;  %v7916_v13 = vld [vmem:[#allocation70_spill] sm:$0xff]  ;;  %v7917_v33 = vld [vmem:[#allocation32_spill] sm:$0xff]  ;;  %v7920_v49 = vld [vmem:[#allocation83_spill] sm:$0xff] }
 0x1d2   : > { %v3755_v61 = vmax.f32 %v7904_v32, %v7254_v42  ;;  %v5000_v10 = vadd.f32 %v7310_v15, %v4924_v34  ;;  %5321 = vst [vmem:[%s7345_s6 + $0xc0] sm:$0xff] %v5998_v54  ;;  %v5061_v59 = vmax.f32 %v4997_v47, 0.0  ;;  %v5029_v43 = vadd.f32 %v7326_v40, %v4953_v56  ;;  %v7922_v56 = vld [vmem:[#allocation33_spill] sm:$0xff]  ;;  %v7923_v0 = vld [vmem:[#allocation72_spill] sm:$0xff] }
 0x1d3   : > { %v5062_v5 = vmax.f32 %v4998_v11, 0.0  ;;  %v4954_v53 = vmax.f32 %v3753_v52, %v4683_v44  ;;  %5322 = vst [vmem:[%s7345_s6 + $0xc8] sm:$0xff] %v5999_v17  ;;  %v5063_v30 = vmax.f32 %v4999_v2, 0.0  ;;  %v5031_v19 = vadd.f32 %v7326_v40, %v4955_v4  ;;  %v4767_v62 = vpop.f32.mrf.mxu0  ;;  %v7918_v2 = vld [vmem:[#allocation71_spill] sm:$0xff]  ;;  %v4810_v54 = vpop.f32.mrf.mxu1  ;;  %v7921_v11 = vld [vmem:[#allocation84_spill] sm:$0xff] }
 0x1d4   : > { %v5064_v39 = vmax.f32 %v5000_v10, 0.0  ;;  %v4956_v42 = vmax.f32 %v3755_v61, %v4726_v41  ;;  %v7909_v9 = vmax.f32 %v7907_v22, %v7908_v51  ;;  %v4925_v31 = vmax.f32 %v7910_v27, %v4763_v21  ;;  %v7925_v17 = vld [vmem:[#allocation31_spill] sm:$0xff]  ;;  %v7927_v21 = vld [vmem:[#allocation36_spill] sm:$0xff] }
 0x1d5   : > { %v5984_v23 = vpack.c.bf16 %v5062_v5, %v5061_v59  ;;  %v5030_v63 = vadd.f32 %v7326_v40, %v4954_v53  ;;  %v7914_v36 = vmax.f32 %v7912_v16, %v7913_v58  ;;  %v4927_v26 = vmax.f32 %v7915_v3, %v4806_v55  ;;  %v4769_v46 = vpop.f32.mrf.mxu0  ;;  %v7932_v55 = vld [vmem:[#allocation37_spill] sm:$0xff] }
 0x1d6   : > { %v3725_v7 = vmax.f32 %v7909_v9, %v7906_v37  ;;  %v5985_v18 = vpack.c.bf16 %v5064_v39, %v5063_v30  ;;  %v5032_v14 = vadd.f32 %v7326_v40, %v4956_v42  ;;  %v5093_v20 = vmax.f32 %v5029_v43, 0.0  ;;  %v4812_v43 = vpop.f32.mrf.mxu1  ;;  %v7926_v42 = vld [vmem:[#allocation35_spill] sm:$0xff] }
 0x1d7   : > { %v3727_v48 = vmax.f32 %v7914_v36, %v7911_v12  ;;  %5307 = vst [vmem:[%s7345_s6 + $0x50] sm:$0xff] %v5984_v23  ;;  %v5094_v8 = vmax.f32 %v5030_v63, 0.0  ;;  %v5001_v28 = vadd.f32 %v7310_v15, %v4925_v31  ;;  %v5095_v38 = vmax.f32 %v5031_v19, 0.0  ;;  %v4849_v19 = vpop.f32.mrf.mxu0  ;;  %v7928_v37 = vld [vmem:[#allocation75_spill] sm:$0xff]  ;;  %v7930_v23 = vld [vmem:[#allocation34_spill] sm:$0xff]  ;;  %v7933_v12 = vld [vmem:[#allocation76_spill] sm:$0xff] }
 0x1d8   : > { %v4926_v45 = vmax.f32 %v3725_v7, %v4765_v6  ;;  %5308 = vst [vmem:[%s7345_s6 + $0x58] sm:$0xff] %v5985_v18  ;;  %v5096_v50 = vmax.f32 %v5032_v14, 0.0  ;;  %v5003_v47 = vadd.f32 %v7310_v15, %v4927_v26  ;;  %v7919_v34 = vmax.f32 %v7917_v33, %v7918_v2  ;;  %v4892_v27 = vpop.f32.mrf.mxu1  ;;  %v7931_v31 = vld [vmem:[#allocation74_spill] sm:$0xff]  ;;  %v7935_v18 = vld [vmem:[#allocation73_spill] sm:$0xff] }
 0x1d9   : > { %v4928_v57 = vmax.f32 %v3727_v48, %v4808_v60  ;;  %v6000_v29 = vpack.c.bf16 %v5094_v8, %v5093_v20  ;;  %v4957_v52 = vmax.f32 %v7920_v49, %v4767_v62  ;;  %v7924_v25 = vmax.f32 %v7922_v56, %v7923_v0  ;;  %v4851_v3 = vpop.f32.mrf.mxu0  ;;  %v7937_v62 = vld [vmem:[#allocation40_spill] sm:$0xff] }
 0x1da   : > { %v3757_v35 = vmax.f32 %v7919_v34, %v7916_v13  ;;  %v5002_v24 = vadd.f32 %v7310_v15, %v4926_v45  ;;  %v6001_v32 = vpack.c.bf16 %v5096_v50, %v5095_v38  ;;  %v4959_v10 = vmax.f32 %v7925_v17, %v4810_v54  ;;  %v7938_v13 = vld [vmem:[#allocation79_spill] sm:$0xff]  ;;  %v7942_v54 = vld [vmem:[#allocation41_spill] sm:$0xff] }
 0x1db   : > { %v3759_v1 = vmax.f32 %v7924_v25, %v7921_v11  ;;  %v5004_v61 = vadd.f32 %v7310_v15, %v4928_v57  ;;  %5323 = vst [vmem:[%s7345_s6 + $0xd0] sm:$0xff] %v6000_v29  ;;  %v5065_v4 = vmax.f32 %v5001_v28, 0.0  ;;  %v5033_v59 = vadd.f32 %v7326_v40, %v4957_v52  ;;  %v4894_v28 = vpop.f32.mrf.mxu1  ;;  %v7936_v57 = vld [vmem:[#allocation39_spill] sm:$0xff]  ;;  %v7940_v29 = vld [vmem:[#allocation38_spill] sm:$0xff]  ;;  %v7943_v11 = vld [vmem:[#allocation80_spill] sm:$0xff] }
 0x1dc   : > { %v5066_v44 = vmax.f32 %v5002_v24, 0.0  ;;  %v4958_v5 = vmax.f32 %v3757_v35, %v4769_v46  ;;  %5324 = vst [vmem:[%s7345_s6 + $0xd8] sm:$0xff] %v6001_v32  ;;  %v5067_v53 = vmax.f32 %v5003_v47, 0.0  ;;  %v5035_v30 = vadd.f32 %v7326_v40, %v4959_v10  ;;  %v4853_v47 = vpop.f32.mrf.mxu0  ;;  %v7941_v52 = vld [vmem:[#allocation78_spill] sm:$0xff]  ;;  %v7945_v32 = vld [vmem:[#allocation77_spill] sm:$0xff] }
 0x1dd   : > { %v5068_v41 = vmax.f32 %v5004_v61, 0.0  ;;  %v4960_v39 = vmax.f32 %v3759_v1, %v4812_v43  ;;  %v7929_v22 = vmax.f32 %v7927_v21, %v7928_v37  ;;  %v4929_v63 = vmax.f32 %v7930_v23, %v4849_v19  ;;  %v4896_v49 = vpop.f32.mrf.mxu1 }
 0x1de   : > { %v5986_v9 = vpack.c.bf16 %v5066_v44, %v5065_v4  ;;  %v5034_v7 = vadd.f32 %v7326_v40, %v4958_v5  ;;  %v7934_v16 = vmax.f32 %v7932_v55, %v7933_v12  ;;  %v4931_v14 = vmax.f32 %v7935_v18, %v4892_v27  ;;  %v4855_v17 = vpop.f32.mrf.mxu0 }
 0x1df   : > { %v3729_v51 = vmax.f32 %v7929_v22, %v7926_v42  ;;  %v5987_v36 = vpack.c.bf16 %v5068_v41, %v5067_v53  ;;  %v5036_v48 = vadd.f32 %v7326_v40, %v4960_v39  ;;  %v5097_v26 = vmax.f32 %v5033_v59, 0.0  ;;  %v4898_v59 = vpop.f32.mrf.mxu1 }
 0x1e0   : > { %v3731_v58 = vmax.f32 %v7934_v16, %v7931_v31  ;;  %5309 = vst [vmem:[%s7345_s6 + $0x60] sm:$0xff] %v5986_v9  ;;  %v5098_v6 = vmax.f32 %v5034_v7, 0.0  ;;  %v5005_v20 = vadd.f32 %v7310_v15, %v4929_v63  ;;  %v5099_v45 = vmax.f32 %v5035_v30, 0.0 }
 0x1e1   : > { %v4930_v8 = vmax.f32 %v3729_v51, %v4851_v3  ;;  %5310 = vst [vmem:[%s7345_s6 + $0x68] sm:$0xff] %v5987_v36  ;;  %v5100_v60 = vmax.f32 %v5036_v48, 0.0  ;;  %v5007_v38 = vadd.f32 %v7310_v15, %v4931_v14  ;;  %v7939_v33 = vmax.f32 %v7937_v62, %v7938_v13 }
 0x1e2   : > { %v4932_v50 = vmax.f32 %v3731_v58, %v4894_v28  ;;  %v6002_v34 = vpack.c.bf16 %v5098_v6, %v5097_v26  ;;  %v4961_v24 = vmax.f32 %v7940_v29, %v4853_v47  ;;  %v7944_v56 = vmax.f32 %v7942_v54, %v7943_v11 }
 0x1e3   : > { %v3761_v2 = vmax.f32 %v7939_v33, %v7936_v57  ;;  %v5006_v35 = vadd.f32 %v7310_v15, %v4930_v8  ;;  %v6003_v25 = vpack.c.bf16 %v5100_v60, %v5099_v45  ;;  %v4963_v61 = vmax.f32 %v7945_v32, %v4896_v49 }
 0x1e4   : > { %v3763_v0 = vmax.f32 %v7944_v56, %v7941_v52  ;;  %v5008_v1 = vadd.f32 %v7310_v15, %v4932_v50  ;;  %5325 = vst [vmem:[%s7345_s6 + $0xe0] sm:$0xff] %v6002_v34  ;;  %v5069_v10 = vmax.f32 %v5005_v20, 0.0  ;;  %v5037_v4 = vadd.f32 %v7326_v40, %v4961_v24 }
 0x1e5   : > { %v5070_v46 = vmax.f32 %v5006_v35, 0.0  ;;  %v4962_v44 = vmax.f32 %v3761_v2, %v4855_v17  ;;  %5326 = vst [vmem:[%s7345_s6 + $0xe8] sm:$0xff] %v6003_v25  ;;  %v5071_v5 = vmax.f32 %v5007_v38, 0.0  ;;  %v5039_v53 = vadd.f32 %v7326_v40, %v4963_v61 }
 0x1e6   : > { %v5072_v43 = vmax.f32 %v5008_v1, 0.0  ;;  %v4964_v15 = vmax.f32 %v3763_v0, %v4898_v59  ;;  %v5101_v42 = vmax.f32 %v5037_v4, 0.0 }
 0x1e7   : > { %v5988_v41 = vpack.c.bf16 %v5070_v46, %v5069_v10  ;;  %v5038_v30 = vadd.f32 %v7326_v40, %v4962_v44  ;;  %v5103_v37 = vmax.f32 %v5039_v53, 0.0 }
 0x1e8   : > { %v5989_v39 = vpack.c.bf16 %v5072_v43, %v5071_v5  ;;  %v5040_v19 = vadd.f32 %v7326_v40, %v4964_v15 }
 0x1e9   : > { %5311 = vst [vmem:[%s7345_s6 + $0x70] sm:$0xff] %v5988_v41  ;;  %v5102_v21 = vmax.f32 %v5038_v30, 0.0 }
 0x1ea   : > { %5312 = vst [vmem:[%s7345_s6 + $0x78] sm:$0xff] %v5989_v39  ;;  %v5104_v22 = vmax.f32 %v5040_v19, 0.0 }
 0x1eb   : > { %v6004_v51 = vpack.c.bf16 %v5102_v21, %v5101_v42 }
 0x1ec   : > { %v6005_v9 = vpack.c.bf16 %v5104_v22, %v5103_v37 }
 0x1ed   : > { %5327 = vst [vmem:[%s7345_s6 + $0xf0] sm:$0xff] %v6004_v51 }
 0x1ee   : > { %5328 = vst [vmem:[%s7345_s6 + $0xf8] sm:$0xff] %v6005_v9 }
 0x1ef PF: > { %s13_s14 = sadd.s32 1, %s6058_s14   ;;  %s7946_s12 = smov %s6054_s13 }
 0x1f0   : > { %p10_p5 = scmp.ge.s32.totalorder %s13_s14, 4   ;;  %s7947_s13 = smov %s7949_s15 }
 0x1f2   :  { %12 = sbr.rel (!%p10_p5) target bundleno = 2 (0x2), region = 65 }

// kernel: simple_cnn_forward.5
= control target key start
LH: loop header
LB: loop body
LE: loop exit
PB: predicated region body
PF: predicated region fallthrough
CT: control target
= control target key end

     0   :  { %s3868_s12 = smov 0   ;;  %s3870_s13 = smov 0   ;;  %s4668_s0 = inlined_call_operand.vmem [shape: bf16[2,4,144,1024], index: 0, kind: input, shape index: {}]   ;;  %s4669_s1 = inlined_call_operand.vmem [shape: bf16[32,144], index: 1, kind: input, shape index: {}]   ;;  %s4670_s2 = inlined_call_operand.vmem [shape: f32[32,1], index: 2, kind: input, shape index: {}]   ;;  %s4671_s3 = inlined_call_operand.vmem [shape: bf16[2,32,1024], index: 3, kind: output, shape index: {}]  }
   0x1   :  { %s3872_s14 = smov 0  }
   0x2 LB: > { %s25_s15 = sadd.s32 1, %s3841_s13  ;;  %p3206_p0 = scmp.ge.s32.totalorder %s3845_s14, 1  ;;  %s3845_s14 = sphi %s3872_s14, %s13_s14   ;;  %s3841_s13 = sphi %s3870_s13, %s4755_s13   ;;  %s3837_s12 = sphi %s3868_s12, %s4754_s12  }
   0x3   : > { %p27_p1 = scmp.ge.s32.totalorder %s25_s15, 2  ;;  %p158_p2 = scmp.lt.s32.totalorder %s3845_s14, 3 }
   0x5   : > { %s4757_s15 = smov (%p27_p1, %s25_s15), 0  ;;  %p159_p3 = pnand %p3206_p0, %p158_p2 }
   0x7   : > { %162 = sbr.rel (%p159_p3) target bundleno = 527 (0x20f), region = 32 }
   0xc   : > { %p191_p4 = scmp.lt.s32.totalorder %s3837_s12, 1  ;;  %v3889_v0 = vld [vmem:[%s4669_s1 + $0x4] ss:$8 sps:$4 sm:$0xff]   ;;  %vm665_vm0 = vcmask 130048  }
   0xd   : > { %3286 = vmatprep.mubr.msk.bf16.mxu0 %vm665_vm0, %v3889_v0  ;;  %3288 = vmatprep.mubr.msk.bf16.mxu1 %vm665_vm0, %v3889_v0 }
   0xe   : > { %s4759_s12 = smov (!%p191_p4, %s3837_s12), 1 }
   0xf   : > { %s3785_s18 = smul.u32 2304, %s4759_s12 }
  0x11   : > { %s3901_s21 = scalar_lea.vmem %s4668_s0, %s3785_s18 }
  0x12   : > { %v271_v1 = vld [vmem:[%s3901_s21 + $0x1c0] sm:$0xff]  ;;  %v272_v3 = vld [vmem:[%s3901_s21 + $0x1c8] sm:$0xff] }
  0x13   : > { %v275_v2 = vld [vmem:[%s3901_s21 + $0x1e0] sm:$0xff]  ;;  %v276_v5 = vld [vmem:[%s3901_s21 + $0x1e8] sm:$0xff] }
  0x14   : > { %v3271_v4 = vcombine.high %v271_v1, %v275_v2  ;;  %v3270_v6 = vcombine.low %v271_v1, %v275_v2  ;;  %v263_v7 = vld [vmem:[%s3901_s21 + $0x180] sm:$0xff]  ;;  %v3273_v9 = vcombine.high %v272_v3, %v276_v5  ;;  %v3272_v10 = vcombine.low %v272_v3, %v276_v5  ;;  %v264_v12 = vld [vmem:[%s3901_s21 + $0x188] sm:$0xff] }
  0x15   : > { %v267_v8 = vld [vmem:[%s3901_s21 + $0x1a0] sm:$0xff]  ;;  %v268_v13 = vld [vmem:[%s3901_s21 + $0x1a8] sm:$0xff] }
  0x16   : > { %v3263_v11 = vcombine.high %v263_v7, %v267_v8  ;;  %v255_v14 = vld [vmem:[%s3901_s21 + $0x140] sm:$0xff]  ;;  %672 = vmatprep.subr.bf16.mxu0 %v3271_v4  ;;  %v3265_v15 = vcombine.high %v264_v12, %v268_v13  ;;  %v256_v17 = vld [vmem:[%s3901_s21 + $0x148] sm:$0xff]  ;;  %725 = vmatprep.subr.bf16.mxu1 %v3273_v9  ;;  %v3262_v19 = vcombine.low %v263_v7, %v267_v8  ;;  %v273_v8 = vld [vmem:[%s3901_s21 + $0x1d0] sm:$0xff] }
  0x17   : > { %v259_v16 = vld [vmem:[%s3901_s21 + $0x160] sm:$0xff]  ;;  %v260_v18 = vld [vmem:[%s3901_s21 + $0x168] sm:$0xff]  ;;  %673 = vmatpush1.bf16.msra.mxu0 %v3270_v6  ;;  %726 = vmatpush1.bf16.msra.mxu1 %v3272_v10  ;;  %v3264_v20 = vcombine.low %v264_v12, %v268_v13  ;;  %v277_v9 = vld [vmem:[%s3901_s21 + $0x1f0] sm:$0xff] }
  0x18   : > { %674 = vmatprep.subr.bf16.mxu0 %v3263_v11  ;;  %v3255_v21 = vcombine.high %v255_v14, %v259_v16  ;;  %727 = vmatprep.subr.bf16.mxu1 %v3265_v15  ;;  %v3257_v22 = vcombine.high %v256_v17, %v260_v18  ;;  %v247_v23 = vld [vmem:[%s3901_s21 + $0x100] sm:$0xff]  ;;  %v248_v25 = vld [vmem:[%s3901_s21 + $0x108] sm:$0xff]  ;;  %v3254_v27 = vcombine.low %v255_v14, %v259_v16  ;;  %v274_v10 = vld [vmem:[%s3901_s21 + $0x1d8] sm:$0xff] }
  0x19   : > { %v251_v24 = vld [vmem:[%s3901_s21 + $0x120] sm:$0xff]  ;;  %v252_v26 = vld [vmem:[%s3901_s21 + $0x128] sm:$0xff]  ;;  %v3256_v28 = vcombine.low %v256_v17, %v260_v18  ;;  %v278_v11 = vld [vmem:[%s3901_s21 + $0x1f8] sm:$0xff]  ;;  %v3275_v14 = vcombine.high %v273_v8, %v277_v9 }
  0x1a   : > { %v3247_v29 = vcombine.high %v247_v23, %v251_v24  ;;  %v3249_v30 = vcombine.high %v248_v25, %v252_v26  ;;  %v239_v31 = vld [vmem:[%s3901_s21 + $0xc0] sm:$0xff]  ;;  %v240_v33 = vld [vmem:[%s3901_s21 + $0xc8] sm:$0xff]  ;;  %v3246_v35 = vcombine.low %v247_v23, %v251_v24  ;;  %v3248_v36 = vcombine.low %v248_v25, %v252_v26  ;;  %v265_v16 = vld [vmem:[%s3901_s21 + $0x190] sm:$0xff] }
  0x1b   : > { %675 = vmatpush1.bf16.msra.mxu0 %v3262_v19  ;;  %728 = vmatpush1.bf16.msra.mxu1 %v3264_v20  ;;  %v243_v32 = vld [vmem:[%s3901_s21 + $0xe0] sm:$0xff]  ;;  %v244_v34 = vld [vmem:[%s3901_s21 + $0xe8] sm:$0xff]  ;;  %v3277_v15 = vcombine.high %v274_v10, %v278_v11  ;;  %v269_v17 = vld [vmem:[%s3901_s21 + $0x1b0] sm:$0xff] }
  0x1c   : > { %676 = vmatprep.subr.bf16.mxu0 %v3255_v21  ;;  %729 = vmatprep.subr.bf16.mxu1 %v3257_v22  ;;  %v3239_v37 = vcombine.high %v239_v31, %v243_v32  ;;  %v3241_v38 = vcombine.high %v240_v33, %v244_v34  ;;  %v231_v39 = vld [vmem:[%s3901_s21 + $0x80] sm:$0xff]  ;;  %v232_v41 = vld [vmem:[%s3901_s21 + $0x88] sm:$0xff]  ;;  %v3238_v43 = vcombine.low %v239_v31, %v243_v32  ;;  %v266_v19 = vld [vmem:[%s3901_s21 + $0x198] sm:$0xff] }
  0x1d   : > { %v235_v40 = vld [vmem:[%s3901_s21 + $0xa0] sm:$0xff]  ;;  %v236_v42 = vld [vmem:[%s3901_s21 + $0xa8] sm:$0xff]  ;;  %v3240_v44 = vcombine.low %v240_v33, %v244_v34  ;;  %v270_v20 = vld [vmem:[%s3901_s21 + $0x1b8] sm:$0xff]  ;;  %v3274_v21 = vcombine.low %v273_v8, %v277_v9  ;;  %v3276_v22 = vcombine.low %v274_v10, %v278_v11  ;;  %v3267_v23 = vcombine.high %v265_v16, %v269_v17 }
  0x1e   : > { %v3231_v45 = vcombine.high %v231_v39, %v235_v40  ;;  %v3233_v46 = vcombine.high %v232_v41, %v236_v42  ;;  %v223_v47 = vld [vmem:[%s3901_s21 + $0x40] sm:$0xff]  ;;  %v224_v49 = vld [vmem:[%s3901_s21 + $0x48] sm:$0xff]  ;;  %v3230_v51 = vcombine.low %v231_v39, %v235_v40  ;;  %v3232_v52 = vcombine.low %v232_v41, %v236_v42  ;;  %v257_v25 = vld [vmem:[%s3901_s21 + $0x150] sm:$0xff] }
  0x1f   : > { %677 = vmatpush1.bf16.msra.mxu0 %v3254_v27  ;;  %730 = vmatpush1.bf16.msra.mxu1 %v3256_v28  ;;  %v227_v48 = vld [vmem:[%s3901_s21 + $0x60] sm:$0xff]  ;;  %v228_v50 = vld [vmem:[%s3901_s21 + $0x68] sm:$0xff]  ;;  %v3269_v24 = vcombine.high %v266_v19, %v270_v20  ;;  %v261_v26 = vld [vmem:[%s3901_s21 + $0x170] sm:$0xff]  ;;  %v3268_v31 = vcombine.low %v266_v19, %v270_v20 }
  0x20   : > { %678 = vmatprep.subr.bf16.mxu0 %v3247_v29  ;;  %731 = vmatprep.subr.bf16.mxu1 %v3249_v30  ;;  %v3223_v53 = vcombine.high %v223_v47, %v227_v48  ;;  %v3225_v54 = vcombine.high %v224_v49, %v228_v50  ;;  %v215_v55 = vld [vmem:[%s3901_s21] sm:$0xff]  ;;  %v216_v57 = vld [vmem:[%s3901_s21 + $0x8] sm:$0xff]  ;;  %v3222_v59 = vcombine.low %v223_v47, %v227_v48  ;;  %v3957_v27 = vld [vmem:[%s4669_s1 + $0x14] ss:$8 sps:$4 sm:$0xff]  }
  0x21   : > { %v219_v56 = vld [vmem:[%s3901_s21 + $0x20] sm:$0xff]  ;;  %v220_v58 = vld [vmem:[%s3901_s21 + $0x28] sm:$0xff]  ;;  %v3224_v60 = vcombine.low %v224_v49, %v228_v50  ;;  %v258_v28 = vld [vmem:[%s3901_s21 + $0x158] sm:$0xff]  ;;  %v3266_v30 = vcombine.low %v265_v16, %v269_v17  ;;  %v3259_v32 = vcombine.high %v257_v25, %v261_v26  ;;  %v3258_v39 = vcombine.low %v257_v25, %v261_v26 }
  0x22   : > { %v3215_v61 = vcombine.high %v215_v55, %v219_v56  ;;  %v3217_v62 = vcombine.high %v216_v57, %v220_v58  ;;  %v279_v63 = vld [vmem:[%s3901_s21 + $0x200] sm:$0xff]  ;;  %v280_v2 = vld [vmem:[%s3901_s21 + $0x208] sm:$0xff]  ;;  %v3214_v4 = vcombine.low %v215_v55, %v219_v56  ;;  %v3216_v5 = vcombine.low %v216_v57, %v220_v58  ;;  %v262_v29 = vld [vmem:[%s3901_s21 + $0x178] sm:$0xff] }
  0x23   : > { %679 = vmatpush1.bf16.msra.mxu0 %v3246_v35  ;;  %732 = vmatpush1.bf16.msra.mxu1 %v3248_v36  ;;  %v283_v1 = vld [vmem:[%s3901_s21 + $0x220] sm:$0xff]  ;;  %v284_v3 = vld [vmem:[%s3901_s21 + $0x228] sm:$0xff]  ;;  %v3261_v33 = vcombine.high %v258_v28, %v262_v29  ;;  %v249_v34 = vld [vmem:[%s3901_s21 + $0x110] sm:$0xff]  ;;  %v3260_v40 = vcombine.low %v258_v28, %v262_v29 }
  0x24   : > { %680 = vmatprep.subr.bf16.mxu0 %v3239_v37  ;;  %733 = vmatprep.subr.bf16.mxu1 %v3241_v38  ;;  %v3279_v6 = vcombine.high %v279_v63, %v283_v1  ;;  %v3281_v7 = vcombine.high %v280_v2, %v284_v3  ;;  %v3278_v12 = vcombine.low %v279_v63, %v283_v1  ;;  %v3948_v18 = vld [vmem:[%s4669_s1] ss:$8 sps:$4 sm:$0xff]   ;;  %v253_v35 = vld [vmem:[%s3901_s21 + $0x130] sm:$0xff]  ;;  %v250_v36 = vld [vmem:[%s3901_s21 + $0x118] sm:$0xff] }
  0x25   : > { %v3280_v13 = vcombine.low %v280_v2, %v284_v3  ;;  %v254_v37 = vld [vmem:[%s3901_s21 + $0x138] sm:$0xff]  ;;  %v3251_v41 = vcombine.high %v249_v34, %v253_v35  ;;  %v3250_v47 = vcombine.low %v249_v34, %v253_v35 }
  0x26   : > { %v3974_v38 = vld [vmem:[%s4669_s1 + $0x10] ss:$8 sps:$4 sm:$0xff]   ;;  %v3253_v42 = vcombine.high %v250_v36, %v254_v37  ;;  %v3252_v48 = vcombine.low %v250_v36, %v254_v37 }
  0x27   : > { %681 = vmatpush1.bf16.msra.mxu0 %v3238_v43  ;;  %734 = vmatpush1.bf16.msra.mxu1 %v3240_v44  ;;  %v241_v43 = vld [vmem:[%s3901_s21 + $0xd0] sm:$0xff] }
  0x28   : > { %682 = vmatprep.subr.bf16.mxu0 %v3231_v45  ;;  %735 = vmatprep.subr.bf16.mxu1 %v3233_v46  ;;  %v245_v44 = vld [vmem:[%s3901_s21 + $0xf0] sm:$0xff]  ;;  %v242_v45 = vld [vmem:[%s3901_s21 + $0xd8] sm:$0xff] }
  0x29   : > { %v246_v46 = vld [vmem:[%s3901_s21 + $0xf8] sm:$0xff]  ;;  %v3243_v49 = vcombine.high %v241_v43, %v245_v44  ;;  %v3242_v55 = vcombine.low %v241_v43, %v245_v44 }
  0x2a   : > { %v3245_v50 = vcombine.high %v242_v45, %v246_v46  ;;  %v3244_v56 = vcombine.low %v242_v45, %v246_v46 }
  0x2b   : > { %683 = vmatpush1.bf16.msra.mxu0 %v3230_v51  ;;  %736 = vmatpush1.bf16.msra.mxu1 %v3232_v52  ;;  %v233_v51 = vld [vmem:[%s3901_s21 + $0x90] sm:$0xff] }
  0x2c   : > { %684 = vmatprep.subr.bf16.mxu0 %v3223_v53  ;;  %737 = vmatprep.subr.bf16.mxu1 %v3225_v54  ;;  %v237_v52 = vld [vmem:[%s3901_s21 + $0xb0] sm:$0xff]  ;;  %v234_v53 = vld [vmem:[%s3901_s21 + $0x98] sm:$0xff] }
  0x2d   : > { %v238_v54 = vld [vmem:[%s3901_s21 + $0xb8] sm:$0xff]  ;;  %v3235_v57 = vcombine.high %v233_v51, %v237_v52  ;;  %v3234_v63 = vcombine.low %v233_v51, %v237_v52 }
  0x2e   : > { %v3237_v58 = vcombine.high %v234_v53, %v238_v54  ;;  %v3236_v1 = vcombine.low %v234_v53, %v238_v54 }
  0x2f   : > { %685 = vmatpush1.bf16.msra.mxu0 %v3222_v59  ;;  %738 = vmatpush1.bf16.msra.mxu1 %v3224_v60  ;;  %v225_v59 = vld [vmem:[%s3901_s21 + $0x50] sm:$0xff] }
  0x30   : > { %686 = vmatprep.subr.bf16.mxu0 %v3215_v61  ;;  %739 = vmatprep.subr.bf16.mxu1 %v3217_v62  ;;  %v229_v60 = vld [vmem:[%s3901_s21 + $0x70] sm:$0xff]  ;;  %v226_v61 = vld [vmem:[%s3901_s21 + $0x58] sm:$0xff] }
  0x31   : > { %v230_v62 = vld [vmem:[%s3901_s21 + $0x78] sm:$0xff]  ;;  %v3227_v2 = vcombine.high %v225_v59, %v229_v60  ;;  %v3226_v8 = vcombine.low %v225_v59, %v229_v60 }
  0x32   : > { %v3229_v3 = vcombine.high %v226_v61, %v230_v62  ;;  %v3228_v9 = vcombine.low %v226_v61, %v230_v62 }
  0x33   : > { %687 = vmatpush1.bf16.msra.mxu0 %v3214_v4  ;;  %740 = vmatpush1.bf16.msra.mxu1 %v3216_v5  ;;  %v217_v4 = vld [vmem:[%s3901_s21 + $0x10] sm:$0xff] }
  0x34   : > { %702 = vmatprep.subr.bf16.mxu0 %v3279_v6  ;;  %755 = vmatprep.subr.bf16.mxu1 %v3281_v7  ;;  %v221_v5 = vld [vmem:[%s3901_s21 + $0x30] sm:$0xff]  ;;  %v218_v6 = vld [vmem:[%s3901_s21 + $0x18] sm:$0xff] }
  0x35   : > { %v222_v7 = vld [vmem:[%s3901_s21 + $0x38] sm:$0xff]  ;;  %v3219_v10 = vcombine.high %v217_v4, %v221_v5  ;;  %v3218_v16 = vcombine.low %v217_v4, %v221_v5 }
  0x36   : > { %v3221_v11 = vcombine.high %v218_v6, %v222_v7  ;;  %v3220_v17 = vcombine.low %v218_v6, %v222_v7 }
  0x37   : > { %703 = vmatpush2.bf16.msra.mxu0 %v3278_v12  ;;  %756 = vmatpush2.bf16.msra.mxu1 %v3280_v13  ;;  %v281_v12 = vld [vmem:[%s3901_s21 + $0x210] sm:$0xff] }
  0x38   : > { %778 = vmatprep.subr.bf16.mxu0 %v3275_v14  ;;  %831 = vmatprep.subr.bf16.mxu1 %v3277_v15  ;;  %v285_v13 = vld [vmem:[%s3901_s21 + $0x230] sm:$0xff]  ;;  %v282_v14 = vld [vmem:[%s3901_s21 + $0x218] sm:$0xff] }
  0x39   : > { %v286_v15 = vld [vmem:[%s3901_s21 + $0x238] sm:$0xff]  ;;  %v3283_v19 = vcombine.high %v281_v12, %v285_v13  ;;  %v3282_v25 = vcombine.low %v281_v12, %v285_v13 }
  0x3a   : > { %705 = vmatmul.mubr.bf16.vlgmr.msra.gmra.mxu0 %v3948_v18  ;;  %758 = vmatmul.mubr.bf16.vlgmr.msra.gmra.mxu1 %v3948_v18  ;;  %v3285_v20 = vcombine.high %v282_v14, %v286_v15  ;;  %v3284_v26 = vcombine.low %v282_v14, %v286_v15 }
  0x3b   : > { %779 = vmatpush1.bf16.msra.mxu0 %v3274_v21  ;;  %832 = vmatpush1.bf16.msra.mxu1 %v3276_v22  ;;  %v3350_v21 = vld [vmem:[%s3901_s21 + $0x400] sm:$0xff] }
  0x3c   : > { %780 = vmatprep.subr.bf16.mxu0 %v3267_v23  ;;  %833 = vmatprep.subr.bf16.mxu1 %v3269_v24  ;;  %v3354_v22 = vld [vmem:[%s3901_s21 + $0x420] sm:$0xff]  ;;  %v3351_v23 = vld [vmem:[%s3901_s21 + $0x408] sm:$0xff] }
  0x3d   : > { %3287 = vmatprep.mubr.msk.bf16.mxu0 %vm665_vm0, %v3957_v27  ;;  %3289 = vmatprep.mubr.msk.bf16.mxu1 %vm665_vm0, %v3957_v27  ;;  %v3355_v24 = vld [vmem:[%s3901_s21 + $0x428] sm:$0xff]  ;;  %v3423_v28 = vcombine.high %v3350_v21, %v3354_v22  ;;  %v3422_v34 = vcombine.low %v3350_v21, %v3354_v22 }
  0x3e   : > { %v3425_v29 = vcombine.high %v3351_v23, %v3355_v24  ;;  %v3424_v35 = vcombine.low %v3351_v23, %v3355_v24 }
  0x3f   : > { %781 = vmatpush1.bf16.msra.mxu0 %v3266_v30  ;;  %834 = vmatpush1.bf16.msra.mxu1 %v3268_v31  ;;  %v3342_v30 = vld [vmem:[%s3901_s21 + $0x3c0] sm:$0xff] }
  0x40   : > { %782 = vmatprep.subr.bf16.mxu0 %v3259_v32  ;;  %835 = vmatprep.subr.bf16.mxu1 %v3261_v33  ;;  %v3346_v31 = vld [vmem:[%s3901_s21 + $0x3e0] sm:$0xff]  ;;  %v3343_v32 = vld [vmem:[%s3901_s21 + $0x3c8] sm:$0xff] }
  0x41   : > { %v3347_v33 = vld [vmem:[%s3901_s21 + $0x3e8] sm:$0xff]  ;;  %v3415_v36 = vcombine.high %v3342_v30, %v3346_v31  ;;  %v3414_v43 = vcombine.low %v3342_v30, %v3346_v31 }
  0x42   : > { %715 = vmatmul.mubr.bf16.gmra.mxu0 %v3974_v38  ;;  %768 = vmatmul.mubr.bf16.gmra.mxu1 %v3974_v38  ;;  %v3417_v37 = vcombine.high %v3343_v32, %v3347_v33  ;;  %v3416_v44 = vcombine.low %v3343_v32, %v3347_v33 }
  0x43   : > { %783 = vmatpush1.bf16.msra.mxu0 %v3258_v39  ;;  %836 = vmatpush1.bf16.msra.mxu1 %v3260_v40  ;;  %v3334_v39 = vld [vmem:[%s3901_s21 + $0x380] sm:$0xff] }
  0x44   : > { %784 = vmatprep.subr.bf16.mxu0 %v3251_v41  ;;  %837 = vmatprep.subr.bf16.mxu1 %v3253_v42  ;;  %v3338_v40 = vld [vmem:[%s3901_s21 + $0x3a0] sm:$0xff]  ;;  %v3335_v41 = vld [vmem:[%s3901_s21 + $0x388] sm:$0xff] }
  0x45   : > { %3290 = vmatprep.mubr.msk.bf16.mxu0 %vm665_vm0, %v3889_v0  ;;  %3292 = vmatprep.mubr.msk.bf16.mxu1 %vm665_vm0, %v3889_v0  ;;  %v3339_v42 = vld [vmem:[%s3901_s21 + $0x3a8] sm:$0xff]  ;;  %v3407_v45 = vcombine.high %v3334_v39, %v3338_v40  ;;  %v3406_v51 = vcombine.low %v3334_v39, %v3338_v40 }
  0x46   : > { %v3409_v46 = vcombine.high %v3335_v41, %v3339_v42  ;;  %v3408_v52 = vcombine.low %v3335_v41, %v3339_v42 }
  0x47   : > { %785 = vmatpush1.bf16.msra.mxu0 %v3250_v47  ;;  %838 = vmatpush1.bf16.msra.mxu1 %v3252_v48  ;;  %v3326_v47 = vld [vmem:[%s3901_s21 + $0x340] sm:$0xff] }
  0x48   : > { %786 = vmatprep.subr.bf16.mxu0 %v3243_v49  ;;  %839 = vmatprep.subr.bf16.mxu1 %v3245_v50  ;;  %v3330_v48 = vld [vmem:[%s3901_s21 + $0x360] sm:$0xff]  ;;  %v3327_v49 = vld [vmem:[%s3901_s21 + $0x348] sm:$0xff] }
  0x49   : > { %v3331_v50 = vld [vmem:[%s3901_s21 + $0x368] sm:$0xff]  ;;  %v3399_v53 = vcombine.high %v3326_v47, %v3330_v48  ;;  %v3398_v59 = vcombine.low %v3326_v47, %v3330_v48 }
  0x4a   : > { %v3401_v54 = vcombine.high %v3327_v49, %v3331_v50  ;;  %v3400_v60 = vcombine.low %v3327_v49, %v3331_v50 }
  0x4b   : > { %787 = vmatpush1.bf16.msra.mxu0 %v3242_v55  ;;  %840 = vmatpush1.bf16.msra.mxu1 %v3244_v56  ;;  %v3318_v55 = vld [vmem:[%s3901_s21 + $0x300] sm:$0xff] }
  0x4c   : > { %788 = vmatprep.subr.bf16.mxu0 %v3235_v57  ;;  %841 = vmatprep.subr.bf16.mxu1 %v3237_v58  ;;  %v3322_v56 = vld [vmem:[%s3901_s21 + $0x320] sm:$0xff]  ;;  %v3319_v57 = vld [vmem:[%s3901_s21 + $0x308] sm:$0xff] }
  0x4d   : > { %v3323_v58 = vld [vmem:[%s3901_s21 + $0x328] sm:$0xff]  ;;  %v3391_v61 = vcombine.high %v3318_v55, %v3322_v56  ;;  %v3390_v4 = vcombine.low %v3318_v55, %v3322_v56 }
  0x4e   : > { %v3393_v62 = vcombine.high %v3319_v57, %v3323_v58  ;;  %v3392_v5 = vcombine.low %v3319_v57, %v3323_v58 }
  0x4f   : > { %789 = vmatpush1.bf16.msra.mxu0 %v3234_v63  ;;  %842 = vmatpush1.bf16.msra.mxu1 %v3236_v1  ;;  %v3310_v63 = vld [vmem:[%s3901_s21 + $0x2c0] sm:$0xff] }
  0x50   : > { %790 = vmatprep.subr.bf16.mxu0 %v3227_v2  ;;  %843 = vmatprep.subr.bf16.mxu1 %v3229_v3  ;;  %v3314_v1 = vld [vmem:[%s3901_s21 + $0x2e0] sm:$0xff]  ;;  %v3311_v2 = vld [vmem:[%s3901_s21 + $0x2c8] sm:$0xff] }
  0x51   : > { %v3315_v3 = vld [vmem:[%s3901_s21 + $0x2e8] sm:$0xff]  ;;  %v3383_v6 = vcombine.high %v3310_v63, %v3314_v1  ;;  %v3382_v12 = vcombine.low %v3310_v63, %v3314_v1 }
  0x52   : > { %v3385_v7 = vcombine.high %v3311_v2, %v3315_v3  ;;  %v3384_v13 = vcombine.low %v3311_v2, %v3315_v3 }
  0x53   : > { %791 = vmatpush1.bf16.msra.mxu0 %v3226_v8  ;;  %844 = vmatpush1.bf16.msra.mxu1 %v3228_v9  ;;  %v3302_v8 = vld [vmem:[%s3901_s21 + $0x280] sm:$0xff] }
  0x54   : > { %792 = vmatprep.subr.bf16.mxu0 %v3219_v10  ;;  %845 = vmatprep.subr.bf16.mxu1 %v3221_v11  ;;  %v3306_v9 = vld [vmem:[%s3901_s21 + $0x2a0] sm:$0xff]  ;;  %v3303_v10 = vld [vmem:[%s3901_s21 + $0x288] sm:$0xff] }
  0x55   : > { %v3307_v11 = vld [vmem:[%s3901_s21 + $0x2a8] sm:$0xff]  ;;  %v3375_v14 = vcombine.high %v3302_v8, %v3306_v9  ;;  %v3374_v21 = vcombine.low %v3302_v8, %v3306_v9 }
  0x56   : > { %v3377_v15 = vcombine.high %v3303_v10, %v3307_v11  ;;  %v3376_v22 = vcombine.low %v3303_v10, %v3307_v11 }
  0x57   : > { %793 = vmatpush1.bf16.msra.mxu0 %v3218_v16  ;;  %846 = vmatpush1.bf16.msra.mxu1 %v3220_v17  ;;  %v3294_v16 = vld [vmem:[%s3901_s21 + $0x240] sm:$0xff] }
  0x58   : > { %808 = vmatprep.subr.bf16.mxu0 %v3283_v19  ;;  %861 = vmatprep.subr.bf16.mxu1 %v3285_v20  ;;  %v3298_v17 = vld [vmem:[%s3901_s21 + $0x260] sm:$0xff]  ;;  %v3295_v19 = vld [vmem:[%s3901_s21 + $0x248] sm:$0xff] }
  0x59   : > { %v3299_v20 = vld [vmem:[%s3901_s21 + $0x268] sm:$0xff]  ;;  %v3367_v23 = vcombine.high %v3294_v16, %v3298_v17  ;;  %v3366_v30 = vcombine.low %v3294_v16, %v3298_v17 }
  0x5a   : > { %v3369_v24 = vcombine.high %v3295_v19, %v3299_v20  ;;  %v3368_v31 = vcombine.low %v3295_v19, %v3299_v20 }
  0x5b   : > { %809 = vmatpush2.bf16.msra.mxu0 %v3282_v25  ;;  %862 = vmatpush2.bf16.msra.mxu1 %v3284_v26  ;;  %v3358_v25 = vld [vmem:[%s3901_s21 + $0x440] sm:$0xff] }
  0x5c   : > { %1317 = vmatprep.subr.bf16.mxu0 %v3423_v28  ;;  %1370 = vmatprep.subr.bf16.mxu1 %v3425_v29  ;;  %v3362_v26 = vld [vmem:[%s3901_s21 + $0x460] sm:$0xff]  ;;  %v3359_v28 = vld [vmem:[%s3901_s21 + $0x448] sm:$0xff] }
  0x5d   : > { %v3363_v29 = vld [vmem:[%s3901_s21 + $0x468] sm:$0xff]  ;;  %v3431_v32 = vcombine.high %v3358_v25, %v3362_v26  ;;  %v3430_v39 = vcombine.low %v3358_v25, %v3362_v26 }
  0x5e   : > { %811 = vmatmul.mubr.bf16.vlgmr.msra.gmra.mxu0 %v3948_v18  ;;  %864 = vmatmul.mubr.bf16.vlgmr.msra.gmra.mxu1 %v3948_v18  ;;  %v3433_v33 = vcombine.high %v3359_v28, %v3363_v29  ;;  %v3432_v40 = vcombine.low %v3359_v28, %v3363_v29  ;;  %v3296_v29 = vld [vmem:[%s3901_s21 + $0x250] sm:$0xff] }
  0x5f   : > { %1318 = vmatpush1.bf16.msra.mxu0 %v3422_v34  ;;  %1371 = vmatpush1.bf16.msra.mxu1 %v3424_v35  ;;  %v3352_v34 = vld [vmem:[%s3901_s21 + $0x410] sm:$0xff] }
  0x60   : > { %1319 = vmatprep.subr.bf16.mxu0 %v3415_v36  ;;  %1372 = vmatprep.subr.bf16.mxu1 %v3417_v37  ;;  %v3356_v35 = vld [vmem:[%s3901_s21 + $0x430] sm:$0xff]  ;;  %v3353_v36 = vld [vmem:[%s3901_s21 + $0x418] sm:$0xff] }
  0x61   : > { %3291 = vmatprep.mubr.msk.bf16.mxu0 %vm665_vm0, %v3957_v27  ;;  %3293 = vmatprep.mubr.msk.bf16.mxu1 %vm665_vm0, %v3957_v27  ;;  %v3357_v37 = vld [vmem:[%s3901_s21 + $0x438] sm:$0xff]  ;;  %v3427_v41 = vcombine.high %v3352_v34, %v3356_v35  ;;  %v3426_v47 = vcombine.low %v3352_v34, %v3356_v35 }
  0x62   : > { %v3429_v42 = vcombine.high %v3353_v36, %v3357_v37  ;;  %v3428_v48 = vcombine.low %v3353_v36, %v3357_v37  ;;  %v3360_v37 = vld [vmem:[%s3901_s21 + $0x450] sm:$0xff] }
  0x63   : > { %1320 = vmatpush1.bf16.msra.mxu0 %v3414_v43  ;;  %1373 = vmatpush1.bf16.msra.mxu1 %v3416_v44  ;;  %v3344_v43 = vld [vmem:[%s3901_s21 + $0x3d0] sm:$0xff] }
  0x64   : > { %1321 = vmatprep.subr.bf16.mxu0 %v3407_v45  ;;  %1374 = vmatprep.subr.bf16.mxu1 %v3409_v46  ;;  %v3348_v44 = vld [vmem:[%s3901_s21 + $0x3f0] sm:$0xff]  ;;  %v3345_v45 = vld [vmem:[%s3901_s21 + $0x3d8] sm:$0xff] }
  0x65   : > { %v3349_v46 = vld [vmem:[%s3901_s21 + $0x3f8] sm:$0xff]  ;;  %v3419_v49 = vcombine.high %v3344_v43, %v3348_v44  ;;  %v3418_v55 = vcombine.low %v3344_v43, %v3348_v44 }
  0x66   : > { %821 = vmatmul.mubr.bf16.gmra.mxu0 %v3974_v38  ;;  %874 = vmatmul.mubr.bf16.gmra.mxu1 %v3974_v38  ;;  %v3421_v50 = vcombine.high %v3345_v45, %v3349_v46  ;;  %v3420_v56 = vcombine.low %v3345_v45, %v3349_v46  ;;  %v3502_v46 = vld [vmem:[%s3901_s21 + $0x640] sm:$0xff] }
  0x67   : > { %1322 = vmatpush1.bf16.msra.mxu0 %v3406_v51  ;;  %1375 = vmatpush1.bf16.msra.mxu1 %v3408_v52  ;;  %v3336_v51 = vld [vmem:[%s3901_s21 + $0x390] sm:$0xff] }
  0x68   : > { %1323 = vmatprep.subr.bf16.mxu0 %v3399_v53  ;;  %1376 = vmatprep.subr.bf16.mxu1 %v3401_v54  ;;  %v3340_v52 = vld [vmem:[%s3901_s21 + $0x3b0] sm:$0xff]  ;;  %v3337_v53 = vld [vmem:[%s3901_s21 + $0x398] sm:$0xff] }
  0x69   : > { %3438 = vmatprep.mubr.msk.bf16.mxu0 %vm665_vm0, %v3889_v0  ;;  %3440 = vmatprep.mubr.msk.bf16.mxu1 %vm665_vm0, %v3889_v0  ;;  %v3341_v54 = vld [vmem:[%s3901_s21 + $0x3b8] sm:$0xff]  ;;  %v3411_v57 = vcombine.high %v3336_v51, %v3340_v52  ;;  %v3410_v63 = vcombine.low %v3336_v51, %v3340_v52 }
  0x6a   : > { %v3413_v58 = vcombine.high %v3337_v53, %v3341_v54  ;;  %v3412_v1 = vcombine.low %v3337_v53, %v3341_v54  ;;  %v3494_v54 = vld [vmem:[%s3901_s21 + $0x600] sm:$0xff] }
  0x6b   : > { %1324 = vmatpush1.bf16.msra.mxu0 %v3398_v59  ;;  %1377 = vmatpush1.bf16.msra.mxu1 %v3400_v60  ;;  %v3328_v59 = vld [vmem:[%s3901_s21 + $0x350] sm:$0xff] }
  0x6c   : > { %1325 = vmatprep.subr.bf16.mxu0 %v3391_v61  ;;  %1378 = vmatprep.subr.bf16.mxu1 %v3393_v62  ;;  %v3332_v60 = vld [vmem:[%s3901_s21 + $0x370] sm:$0xff]  ;;  %v3329_v61 = vld [vmem:[%s3901_s21 + $0x358] sm:$0xff] }
  0x6d   : > { %v3333_v62 = vld [vmem:[%s3901_s21 + $0x378] sm:$0xff]  ;;  %v3403_v2 = vcombine.high %v3328_v59, %v3332_v60  ;;  %v3402_v8 = vcombine.low %v3328_v59, %v3332_v60 }
  0x6e   : > { %v3405_v3 = vcombine.high %v3329_v61, %v3333_v62  ;;  %v3404_v9 = vcombine.low %v3329_v61, %v3333_v62  ;;  %v3486_v62 = vld [vmem:[%s3901_s21 + $0x5c0] sm:$0xff] }
  0x6f   : > { %1326 = vmatpush1.bf16.msra.mxu0 %v3390_v4  ;;  %1379 = vmatpush1.bf16.msra.mxu1 %v3392_v5  ;;  %v3320_v4 = vld [vmem:[%s3901_s21 + $0x310] sm:$0xff] }
  0x70   : > { %1327 = vmatprep.subr.bf16.mxu0 %v3383_v6  ;;  %1380 = vmatprep.subr.bf16.mxu1 %v3385_v7  ;;  %v3324_v5 = vld [vmem:[%s3901_s21 + $0x330] sm:$0xff]  ;;  %v3321_v6 = vld [vmem:[%s3901_s21 + $0x318] sm:$0xff] }
  0x71   : > { %v3325_v7 = vld [vmem:[%s3901_s21 + $0x338] sm:$0xff]  ;;  %v3395_v10 = vcombine.high %v3320_v4, %v3324_v5  ;;  %v3394_v16 = vcombine.low %v3320_v4, %v3324_v5 }
  0x72   : > { %v3397_v11 = vcombine.high %v3321_v6, %v3325_v7  ;;  %v3396_v17 = vcombine.low %v3321_v6, %v3325_v7  ;;  %v3478_v7 = vld [vmem:[%s3901_s21 + $0x580] sm:$0xff] }
  0x73   : > { %1328 = vmatpush1.bf16.msra.mxu0 %v3382_v12  ;;  %1381 = vmatpush1.bf16.msra.mxu1 %v3384_v13  ;;  %v3312_v12 = vld [vmem:[%s3901_s21 + $0x2d0] sm:$0xff] }
  0x74   : > { %1329 = vmatprep.subr.bf16.mxu0 %v3375_v14  ;;  %1382 = vmatprep.subr.bf16.mxu1 %v3377_v15  ;;  %v3316_v13 = vld [vmem:[%s3901_s21 + $0x2f0] sm:$0xff]  ;;  %v3313_v14 = vld [vmem:[%s3901_s21 + $0x2d8] sm:$0xff] }
  0x75   : > { %v3317_v15 = vld [vmem:[%s3901_s21 + $0x2f8] sm:$0xff]  ;;  %v3387_v19 = vcombine.high %v3312_v12, %v3316_v13  ;;  %v3386_v25 = vcombine.low %v3312_v12, %v3316_v13 }
  0x76   : > { %v3389_v20 = vcombine.high %v3313_v14, %v3317_v15 }
  0x77   : > { %1330 = vmatpush1.bf16.msra.mxu0 %v3374_v21  ;;  %1383 = vmatpush1.bf16.msra.mxu1 %v3376_v22  ;;  %v3304_v21 = vld [vmem:[%s3901_s21 + $0x290] sm:$0xff] }
  0x78   : > { %1331 = vmatprep.subr.bf16.mxu0 %v3367_v23  ;;  %1384 = vmatprep.subr.bf16.mxu1 %v3369_v24  ;;  %v3308_v22 = vld [vmem:[%s3901_s21 + $0x2b0] sm:$0xff]  ;;  %v3305_v23 = vld [vmem:[%s3901_s21 + $0x298] sm:$0xff] }
  0x79   : > { %v3309_v24 = vld [vmem:[%s3901_s21 + $0x2b8] sm:$0xff]  ;;  %v3379_v26 = vcombine.high %v3304_v21, %v3308_v22 }
  0x7a   : > { %v3381_v28 = vcombine.high %v3305_v23, %v3309_v24  ;;  %v3380_v34 = vcombine.low %v3305_v23, %v3309_v24  ;;  %v3462_v24 = vld [vmem:[%s3901_s21 + $0x500] sm:$0xff] }
  0x7b   : > { %1332 = vmatpush1.bf16.msra.mxu0 %v3366_v30  ;;  %1385 = vmatpush1.bf16.msra.mxu1 %v3368_v31  ;;  %v3300_v30 = vld [vmem:[%s3901_s21 + $0x270] sm:$0xff]  ;;  %v3297_v31 = vld [vmem:[%s3901_s21 + $0x258] sm:$0xff] }
  0x7c   : > { %1347 = vmatprep.subr.bf16.mxu0 %v3431_v32  ;;  %1400 = vmatprep.subr.bf16.mxu1 %v3433_v33  ;;  %v3301_v32 = vld [vmem:[%s3901_s21 + $0x278] sm:$0xff]  ;;  %v3378_v33 = vcombine.low %v3304_v21, %v3308_v22  ;;  %v3371_v35 = vcombine.high %v3296_v29, %v3300_v30 }
  0x7d   : > { %v3373_v36 = vcombine.high %v3297_v31, %v3301_v32  ;;  %v3372_v43 = vcombine.low %v3297_v31, %v3301_v32 }
  0x7f   : > { %1348 = vmatpush2.bf16.msra.mxu0 %v3430_v39  ;;  %1401 = vmatpush2.bf16.msra.mxu1 %v3432_v40  ;;  %v3364_v39 = vld [vmem:[%s3901_s21 + $0x470] sm:$0xff]  ;;  %v3361_v40 = vld [vmem:[%s3901_s21 + $0x458] sm:$0xff] }
  0x80   : > { %1423 = vmatprep.subr.bf16.mxu0 %v3427_v41  ;;  %1476 = vmatprep.subr.bf16.mxu1 %v3429_v42  ;;  %v3365_v41 = vld [vmem:[%s3901_s21 + $0x478] sm:$0xff]  ;;  %v3370_v42 = vcombine.low %v3296_v29, %v3300_v30  ;;  %v3435_v44 = vcombine.high %v3360_v37, %v3364_v39 }
  0x81   : > { %v3437_v45 = vcombine.high %v3361_v40, %v3365_v41  ;;  %v3436_v51 = vcombine.low %v3361_v40, %v3365_v41 }
  0x82   : > { %1350 = vmatmul.mubr.bf16.vlgmr.msra.gmra.mxu0 %v3948_v18  ;;  %1403 = vmatmul.mubr.bf16.vlgmr.msra.gmra.mxu1 %v3948_v18 }
  0x83   : > { %1424 = vmatpush1.bf16.msra.mxu0 %v3426_v47  ;;  %1477 = vmatpush1.bf16.msra.mxu1 %v3428_v48  ;;  %v3506_v47 = vld [vmem:[%s3901_s21 + $0x660] sm:$0xff]  ;;  %v3503_v48 = vld [vmem:[%s3901_s21 + $0x648] sm:$0xff] }
  0x84   : > { %1425 = vmatprep.subr.bf16.mxu0 %v3419_v49  ;;  %1478 = vmatprep.subr.bf16.mxu1 %v3421_v50  ;;  %v3507_v49 = vld [vmem:[%s3901_s21 + $0x668] sm:$0xff]  ;;  %v3434_v50 = vcombine.low %v3360_v37, %v3364_v39  ;;  %v3575_v52 = vcombine.high %v3502_v46, %v3506_v47 }
  0x85   : > { %3439 = vmatprep.mubr.msk.bf16.mxu0 %vm665_vm0, %v3957_v27  ;;  %3441 = vmatprep.mubr.msk.bf16.mxu1 %vm665_vm0, %v3957_v27  ;;  %v3577_v53 = vcombine.high %v3503_v48, %v3507_v49  ;;  %v3576_v59 = vcombine.low %v3503_v48, %v3507_v49 }
  0x87   : > { %1426 = vmatpush1.bf16.msra.mxu0 %v3418_v55  ;;  %1479 = vmatpush1.bf16.msra.mxu1 %v3420_v56  ;;  %v3498_v55 = vld [vmem:[%s3901_s21 + $0x620] sm:$0xff]  ;;  %v3495_v56 = vld [vmem:[%s3901_s21 + $0x608] sm:$0xff] }
  0x88   : > { %1427 = vmatprep.subr.bf16.mxu0 %v3411_v57  ;;  %1480 = vmatprep.subr.bf16.mxu1 %v3413_v58  ;;  %v3499_v57 = vld [vmem:[%s3901_s21 + $0x628] sm:$0xff]  ;;  %v3574_v58 = vcombine.low %v3502_v46, %v3506_v47  ;;  %v3567_v60 = vcombine.high %v3494_v54, %v3498_v55 }
  0x89   : > { %v3569_v61 = vcombine.high %v3495_v56, %v3499_v57  ;;  %v3568_v4 = vcombine.low %v3495_v56, %v3499_v57 }
  0x8a   : > { %1360 = vmatmul.mubr.bf16.gmra.mxu0 %v3974_v38  ;;  %1413 = vmatmul.mubr.bf16.gmra.mxu1 %v3974_v38 }
  0x8b   : > { %1428 = vmatpush1.bf16.msra.mxu0 %v3410_v63  ;;  %1481 = vmatpush1.bf16.msra.mxu1 %v3412_v1  ;;  %v3490_v63 = vld [vmem:[%s3901_s21 + $0x5e0] sm:$0xff]  ;;  %v3487_v1 = vld [vmem:[%s3901_s21 + $0x5c8] sm:$0xff] }
  0x8c   : > { %1429 = vmatprep.subr.bf16.mxu0 %v3403_v2  ;;  %1482 = vmatprep.subr.bf16.mxu1 %v3405_v3  ;;  %v3491_v2 = vld [vmem:[%s3901_s21 + $0x5e8] sm:$0xff]  ;;  %v3566_v3 = vcombine.low %v3494_v54, %v3498_v55  ;;  %v3559_v5 = vcombine.high %v3486_v62, %v3490_v63 }
  0x8d   : > { %3442 = vmatprep.mubr.msk.bf16.mxu0 %vm665_vm0, %v3889_v0  ;;  %3444 = vmatprep.mubr.msk.bf16.mxu1 %vm665_vm0, %v3889_v0  ;;  %v3388_v0 = vcombine.low %v3313_v14, %v3317_v15  ;;  %v3561_v6 = vcombine.high %v3487_v1, %v3491_v2  ;;  %v3560_v12 = vcombine.low %v3487_v1, %v3491_v2  ;;  %v3470_v15 = vld [vmem:[%s3901_s21 + $0x540] sm:$0xff] }
  0x8f   : > { %1430 = vmatpush1.bf16.msra.mxu0 %v3402_v8  ;;  %1483 = vmatpush1.bf16.msra.mxu1 %v3404_v9  ;;  %v3482_v8 = vld [vmem:[%s3901_s21 + $0x5a0] sm:$0xff]  ;;  %v3479_v9 = vld [vmem:[%s3901_s21 + $0x588] sm:$0xff] }
  0x90   : > { %1431 = vmatprep.subr.bf16.mxu0 %v3395_v10  ;;  %1484 = vmatprep.subr.bf16.mxu1 %v3397_v11  ;;  %v3483_v10 = vld [vmem:[%s3901_s21 + $0x5a8] sm:$0xff]  ;;  %v3558_v11 = vcombine.low %v3486_v62, %v3490_v63  ;;  %v3551_v13 = vcombine.high %v3478_v7, %v3482_v8 }
  0x91   : > { %v3553_v14 = vcombine.high %v3479_v9, %v3483_v10  ;;  %v3552_v21 = vcombine.low %v3479_v9, %v3483_v10 }
  0x93   : > { %1432 = vmatpush1.bf16.msra.mxu0 %v3394_v16  ;;  %1485 = vmatpush1.bf16.msra.mxu1 %v3396_v17  ;;  %v3474_v16 = vld [vmem:[%s3901_s21 + $0x560] sm:$0xff]  ;;  %v3471_v17 = vld [vmem:[%s3901_s21 + $0x548] sm:$0xff] }
  0x94   : > { %1433 = vmatprep.subr.bf16.mxu0 %v3387_v19  ;;  %1486 = vmatprep.subr.bf16.mxu1 %v3389_v20  ;;  %v3475_v19 = vld [vmem:[%s3901_s21 + $0x568] sm:$0xff]  ;;  %v3550_v20 = vcombine.low %v3478_v7, %v3482_v8  ;;  %v3543_v22 = vcombine.high %v3470_v15, %v3474_v16  ;;  %v3542_v29 = vcombine.low %v3470_v15, %v3474_v16 }
  0x95   : > { %v3545_v23 = vcombine.high %v3471_v17, %v3475_v19  ;;  %v3544_v30 = vcombine.low %v3471_v17, %v3475_v19 }
  0x97   : > { %1434 = vmatpush1.bf16.msra.mxu0 %v3386_v25  ;;  %1487 = vmatpush1.bf16.msra.mxu1 %v3388_v0  ;;  %v3466_v25 = vld [vmem:[%s3901_s21 + $0x520] sm:$0xff] }
  0x98   : > { %1435 = vmatprep.subr.bf16.mxu0 %v3379_v26  ;;  %1488 = vmatprep.subr.bf16.mxu1 %v3381_v28  ;;  %v4131_v0 = vld [vmem:[%s4669_s1 + $0x4] ss:$8 sps:$4 sm:$0xff]   ;;  %v3535_v31 = vcombine.high %v3462_v24, %v3466_v25  ;;  %v3534_v37 = vcombine.low %v3462_v24, %v3466_v25 }
  0x99   : > { %v3463_v26 = vld [vmem:[%s3901_s21 + $0x508] sm:$0xff] }
  0x9a   : > { %v3467_v28 = vld [vmem:[%s3901_s21 + $0x528] sm:$0xff] }
  0x9b   : > { %1436 = vmatpush1.bf16.msra.mxu0 %v3378_v33  ;;  %1489 = vmatpush1.bf16.msra.mxu1 %v3380_v34  ;;  %v3537_v32 = vcombine.high %v3463_v26, %v3467_v28  ;;  %v3454_v33 = vld [vmem:[%s3901_s21 + $0x4c0] sm:$0xff]  ;;  %v3536_v39 = vcombine.low %v3463_v26, %v3467_v28  ;;  %v3472_v28 = vld [vmem:[%s3901_s21 + $0x550] sm:$0xff] }
  0x9c   : > { %1437 = vmatprep.subr.bf16.mxu0 %v3371_v35  ;;  %1490 = vmatprep.subr.bf16.mxu1 %v3373_v36  ;;  %v3458_v34 = vld [vmem:[%s3901_s21 + $0x4e0] sm:$0xff]  ;;  %v3455_v35 = vld [vmem:[%s3901_s21 + $0x4c8] sm:$0xff] }
  0x9d   : > { %v3459_v36 = vld [vmem:[%s3901_s21 + $0x4e8] sm:$0xff]  ;;  %v3527_v40 = vcombine.high %v3454_v33, %v3458_v34  ;;  %v3526_v46 = vcombine.low %v3454_v33, %v3458_v34  ;;  %v2915_v34 = vld [vmem:[%s4670_s2] sm:$0xff] }
  0x9e   : > { %v3529_v41 = vcombine.high %v3455_v35, %v3459_v36  ;;  %v3528_v47 = vcombine.low %v3455_v35, %v3459_v36  ;;  %v3464_v36 = vld [vmem:[%s3901_s21 + $0x510] sm:$0xff] }
  0x9f   : > { %1438 = vmatpush1.bf16.msra.mxu0 %v3370_v42  ;;  %1491 = vmatpush1.bf16.msra.mxu1 %v3372_v43  ;;  %v3446_v42 = vld [vmem:[%s3901_s21 + $0x480] sm:$0xff] }
  0xa0   : > { %1453 = vmatprep.subr.bf16.mxu0 %v3435_v44  ;;  %1506 = vmatprep.subr.bf16.mxu1 %v3437_v45  ;;  %v3450_v43 = vld [vmem:[%s3901_s21 + $0x4a0] sm:$0xff]  ;;  %v3447_v44 = vld [vmem:[%s3901_s21 + $0x488] sm:$0xff] }
  0xa1   : > { %v3451_v45 = vld [vmem:[%s3901_s21 + $0x4a8] sm:$0xff]  ;;  %v3519_v48 = vcombine.high %v3446_v42, %v3450_v43  ;;  %v3518_v54 = vcombine.low %v3446_v42, %v3450_v43  ;;  %v2917_v42 = vld [vmem:[%s4670_s2 + $0x10] sm:$0xff] }
  0xa2   : > { %v3521_v49 = vcombine.high %v3447_v44, %v3451_v45  ;;  %v3520_v55 = vcombine.low %v3447_v44, %v3451_v45  ;;  %v2916_v45 = vld [vmem:[%s4670_s2 + $0x8] sm:$0xff] }
  0xa3   : > { %1454 = vmatpush2.bf16.msra.mxu0 %v3434_v50  ;;  %1507 = vmatpush2.bf16.msra.mxu1 %v3436_v51  ;;  %v3510_v50 = vld [vmem:[%s3901_s21 + $0x680] sm:$0xff] }
  0xa4   : > { %1994 = vmatprep.subr.bf16.mxu0 %v3575_v52  ;;  %2047 = vmatprep.subr.bf16.mxu1 %v3577_v53  ;;  %v3514_v51 = vld [vmem:[%s3901_s21 + $0x6a0] sm:$0xff]  ;;  %v3511_v52 = vld [vmem:[%s3901_s21 + $0x688] sm:$0xff] }
  0xa5   : > { %v3515_v53 = vld [vmem:[%s3901_s21 + $0x6a8] sm:$0xff]  ;;  %v3583_v56 = vcombine.high %v3510_v50, %v3514_v51  ;;  %v3582_v62 = vcombine.low %v3510_v50, %v3514_v51  ;;  %v3461_v50 = vld [vmem:[%s3901_s21 + $0x4f8] sm:$0xff] }
  0xa6   : > { %1456 = vmatmul.mubr.bf16.vlgmr.msra.gmra.mxu0 %v3948_v18  ;;  %1509 = vmatmul.mubr.bf16.vlgmr.msra.gmra.mxu1 %v3948_v18  ;;  %v3585_v57 = vcombine.high %v3511_v52, %v3515_v53  ;;  %v3584_v63 = vcombine.low %v3511_v52, %v3515_v53  ;;  %v2918_v52 = vld [vmem:[%s4670_s2 + $0x18] sm:$0xff] }
  0xa7   : > { %1995 = vmatpush1.bf16.msra.mxu0 %v3574_v58  ;;  %2048 = vmatpush1.bf16.msra.mxu1 %v3576_v59  ;;  %v3504_v58 = vld [vmem:[%s3901_s21 + $0x650] sm:$0xff] }
  0xa8   : > { %1996 = vmatprep.subr.bf16.mxu0 %v3567_v60  ;;  %2049 = vmatprep.subr.bf16.mxu1 %v3569_v61  ;;  %v3508_v59 = vld [vmem:[%s3901_s21 + $0x670] sm:$0xff]  ;;  %v3505_v60 = vld [vmem:[%s3901_s21 + $0x658] sm:$0xff] }
  0xa9   : > { %3443 = vmatprep.mubr.msk.bf16.mxu0 %vm665_vm0, %v3957_v27  ;;  %3445 = vmatprep.mubr.msk.bf16.mxu1 %vm665_vm0, %v3957_v27  ;;  %v3509_v61 = vld [vmem:[%s3901_s21 + $0x678] sm:$0xff]  ;;  %v3579_v1 = vcombine.high %v3504_v58, %v3508_v59  ;;  %v3578_v7 = vcombine.low %v3504_v58, %v3508_v59 }
  0xaa   : > { %v3581_v2 = vcombine.high %v3505_v60, %v3509_v61  ;;  %v3580_v8 = vcombine.low %v3505_v60, %v3509_v61  ;;  %v3449_v58 = vld [vmem:[%s3901_s21 + $0x498] sm:$0xff] }
  0xab   : > { %1997 = vmatpush1.bf16.msra.mxu0 %v3566_v3  ;;  %2050 = vmatpush1.bf16.msra.mxu1 %v3568_v4  ;;  %v3496_v3 = vld [vmem:[%s3901_s21 + $0x610] sm:$0xff]  ;;  %v3453_v59 = vld [vmem:[%s3901_s21 + $0x4b8] sm:$0xff] }
  0xac   : > { %1998 = vmatprep.subr.bf16.mxu0 %v3559_v5  ;;  %2051 = vmatprep.subr.bf16.mxu1 %v3561_v6  ;;  %v3500_v4 = vld [vmem:[%s3901_s21 + $0x630] sm:$0xff]  ;;  %v3497_v5 = vld [vmem:[%s3901_s21 + $0x618] sm:$0xff] }
  0xad   : > { %v3501_v6 = vld [vmem:[%s3901_s21 + $0x638] sm:$0xff]  ;;  %v3571_v9 = vcombine.high %v3496_v3, %v3500_v4  ;;  %v3570_v15 = vcombine.low %v3496_v3, %v3500_v4 }
  0xae   : > { %1466 = vmatmul.mubr.bf16.gmra.mxu0 %v3974_v38  ;;  %1519 = vmatmul.mubr.bf16.gmra.mxu1 %v3974_v38  ;;  %v3573_v10 = vcombine.high %v3497_v5, %v3501_v6  ;;  %v3572_v16 = vcombine.low %v3497_v5, %v3501_v6  ;;  %v3513_v3 = vld [vmem:[%s3901_s21 + $0x698] sm:$0xff]  ;;  %v3524_v6 = vcombine.low %v3449_v58, %v3453_v59 }
  0xaf   : > { %1999 = vmatpush1.bf16.msra.mxu0 %v3558_v11  ;;  %2052 = vmatpush1.bf16.msra.mxu1 %v3560_v12  ;;  %v3488_v11 = vld [vmem:[%s3901_s21 + $0x5d0] sm:$0xff]  ;;  %v3517_v4 = vld [vmem:[%s3901_s21 + $0x6b8] sm:$0xff] }
  0xb0   : > { %2000 = vmatprep.subr.bf16.mxu0 %v3551_v13  ;;  %2053 = vmatprep.subr.bf16.mxu1 %v3553_v14  ;;  %v3492_v12 = vld [vmem:[%s3901_s21 + $0x5f0] sm:$0xff]  ;;  %v3489_v13 = vld [vmem:[%s3901_s21 + $0x5d8] sm:$0xff] }
  0xb1   : > { %3590 = vmatprep.mubr.msk.bf16.mxu0 %vm665_vm0, %v4131_v0  ;;  %3592 = vmatprep.mubr.msk.bf16.mxu1 %vm665_vm0, %v4131_v0  ;;  %v3493_v14 = vld [vmem:[%s3901_s21 + $0x5f8] sm:$0xff]  ;;  %v3563_v17 = vcombine.high %v3488_v11, %v3492_v12 }
  0xb2   : > { %v3565_v19 = vcombine.high %v3489_v13, %v3493_v14  ;;  %v3564_v24 = vcombine.low %v3489_v13, %v3493_v14  ;;  %v3588_v14 = vcombine.low %v3513_v3, %v3517_v4 }
  0xb3   : > { %2001 = vmatpush1.bf16.msra.mxu0 %v3550_v20  ;;  %2054 = vmatpush1.bf16.msra.mxu1 %v3552_v21  ;;  %v3480_v20 = vld [vmem:[%s3901_s21 + $0x590] sm:$0xff] }
  0xb4   : > { %2002 = vmatprep.subr.bf16.mxu0 %v3543_v22  ;;  %2055 = vmatprep.subr.bf16.mxu1 %v3545_v23  ;;  %v3484_v21 = vld [vmem:[%s3901_s21 + $0x5b0] sm:$0xff]  ;;  %v3485_v22 = vld [vmem:[%s3901_s21 + $0x5b8] sm:$0xff]  ;;  %v3562_v23 = vcombine.low %v3488_v11, %v3492_v12  ;;  %v3655_v11 = vld [vmem:[%s3901_s21 + $0x888] sm:$0xff] }
  0xb5   : > { %v3555_v25 = vcombine.high %v3480_v20, %v3484_v21  ;;  %v3659_v12 = vld [vmem:[%s3901_s21 + $0x8a8] sm:$0xff] }
  0xb7   : > { %2003 = vmatpush1.bf16.msra.mxu0 %v3542_v29  ;;  %2056 = vmatpush1.bf16.msra.mxu1 %v3544_v30  ;;  %v3476_v29 = vld [vmem:[%s3901_s21 + $0x570] sm:$0xff]  ;;  %v3473_v30 = vld [vmem:[%s3901_s21 + $0x558] sm:$0xff] }
  0xb8   : > { %2004 = vmatprep.subr.bf16.mxu0 %v3535_v31  ;;  %2057 = vmatprep.subr.bf16.mxu1 %v3537_v32  ;;  %v3554_v31 = vcombine.low %v3480_v20, %v3484_v21  ;;  %v3547_v33 = vcombine.high %v3472_v28, %v3476_v29  ;;  %v3647_v20 = vld [vmem:[%s3901_s21 + $0x848] sm:$0xff] }
  0xb9   : > { %v3651_v21 = vld [vmem:[%s3901_s21 + $0x868] sm:$0xff] }
  0xbb   : > { %2005 = vmatpush1.bf16.msra.mxu0 %v3534_v37  ;;  %2058 = vmatpush1.bf16.msra.mxu1 %v3536_v39  ;;  %v3468_v37 = vld [vmem:[%s3901_s21 + $0x530] sm:$0xff]  ;;  %v3465_v39 = vld [vmem:[%s3901_s21 + $0x518] sm:$0xff] }
  0xbc   : > { %2006 = vmatprep.subr.bf16.mxu0 %v3527_v40  ;;  %2059 = vmatprep.subr.bf16.mxu1 %v3529_v41  ;;  %v3847_v40 = vmov 0   ;;  %v3546_v41 = vcombine.low %v3472_v28, %v3476_v29  ;;  %v3539_v44 = vcombine.high %v3464_v36, %v3468_v37  ;;  %v3538_v51 = vcombine.low %v3464_v36, %v3468_v37  ;;  %v4224_v28 = vld [vmem:[%s4669_s1] ss:$8 sps:$4 sm:$0xff]  }
  0xbd   : > { %3811 = vset.pattern.permute.xlu0 %v3847_v40  ;;  %3812 = vset.pattern.permute.xlu1 %v3847_v40  ;;  %v3639_v29 = vld [vmem:[%s3901_s21 + $0x808] sm:$0xff]  ;;  %v3634_v36 = vld [vmem:[%s3901_s21 + $0x7e0] sm:$0xff] }
  0xbe   : > { %2921 = vperm.xlu0 %3811, %v2915_v34   ;;  %2931 = vperm.xlu1 %3812, %v2917_v42   ;;  %v3631_v37 = vld [vmem:[%s3901_s21 + $0x7c8] sm:$0xff] }
  0xbf   : > { %2007 = vmatpush1.bf16.msra.mxu0 %v3526_v46  ;;  %2060 = vmatpush1.bf16.msra.mxu1 %v3528_v47  ;;  %v3456_v47 = vld [vmem:[%s3901_s21 + $0x4d0] sm:$0xff] }
  0xc0   : > { %2008 = vmatprep.subr.bf16.mxu0 %v3519_v48  ;;  %2061 = vmatprep.subr.bf16.mxu1 %v3521_v49  ;;  %v3460_v48 = vld [vmem:[%s3901_s21 + $0x4f0] sm:$0xff]  ;;  %v3457_v49 = vld [vmem:[%s3901_s21 + $0x4d8] sm:$0xff] }
  0xc1   : > { %v3530_v60 = vcombine.low %v3456_v47, %v3460_v48  ;;  %v3532_v61 = vcombine.low %v3457_v49, %v3461_v50 }
  0xc2   : > { %2926 = vperm.xlu0 %3811, %v2916_v45   ;;  %2936 = vperm.xlu1 %3812, %v2918_v52   ;;  %v4248_v45 = vld [vmem:[%s4669_s1 + $0x10] ss:$8 sps:$4 sm:$0xff]   ;;  %v3614_v52 = vld [vmem:[%s3901_s21 + $0x740] sm:$0xff] }
  0xc3   : > { %2009 = vmatpush1.bf16.msra.mxu0 %v3518_v54  ;;  %2062 = vmatpush1.bf16.msra.mxu1 %v3520_v55  ;;  %v3531_v54 = vcombine.high %v3456_v47, %v3460_v48  ;;  %v3533_v55 = vcombine.high %v3457_v49, %v3461_v50  ;;  %v3627_v47 = vld [vmem:[%s3901_s21 + $0x7a8] sm:$0xff] }
  0xc4   : > { %2024 = vmatprep.subr.bf16.mxu0 %v3583_v56  ;;  %2077 = vmatprep.subr.bf16.mxu1 %v3585_v57  ;;  %v3448_v56 = vld [vmem:[%s3901_s21 + $0x490] sm:$0xff] }
  0xc5   : > { %v3452_v57 = vld [vmem:[%s3901_s21 + $0x4b0] sm:$0xff] }
  0xc6   : > { %v3522_v5 = vcombine.low %v3448_v56, %v3452_v57 }
  0xc7   : > { %2025 = vmatpush2.bf16.msra.mxu0 %v3582_v62  ;;  %2078 = vmatpush2.bf16.msra.mxu1 %v3584_v63  ;;  %v3523_v62 = vcombine.high %v3448_v56, %v3452_v57  ;;  %v3525_v63 = vcombine.high %v3449_v58, %v3453_v59 }
  0xc8   : > { %2100 = vmatprep.subr.bf16.mxu0 %v3579_v1  ;;  %2153 = vmatprep.subr.bf16.mxu1 %v3581_v2  ;;  %v3512_v1 = vld [vmem:[%s3901_s21 + $0x690] sm:$0xff] }
  0xc9   : > { %v3516_v2 = vld [vmem:[%s3901_s21 + $0x6b0] sm:$0xff] }
  0xca   : > { %2027 = vmatmul.mubr.bf16.vlgmr.msra.gmra.mxu0 %v3948_v18  ;;  %2080 = vmatmul.mubr.bf16.vlgmr.msra.gmra.mxu1 %v3948_v18  ;;  %v3481_v18 = vld [vmem:[%s3901_s21 + $0x598] sm:$0xff]  ;;  %v3586_v13 = vcombine.low %v3512_v1, %v3516_v2 }
  0xcb   : > { %2101 = vmatpush1.bf16.msra.mxu0 %v3578_v7  ;;  %2154 = vmatpush1.bf16.msra.mxu1 %v3580_v8  ;;  %v3557_v26 = vcombine.high %v3481_v18, %v3485_v22  ;;  %v3556_v32 = vcombine.low %v3481_v18, %v3485_v22  ;;  %v3587_v7 = vcombine.high %v3512_v1, %v3516_v2 }
  0xcc   : > { %2102 = vmatprep.subr.bf16.mxu0 %v3571_v9  ;;  %2155 = vmatprep.subr.bf16.mxu1 %v3573_v10  ;;  %v3589_v8 = vcombine.high %v3513_v3, %v3517_v4  ;;  %v3654_v9 = vld [vmem:[%s3901_s21 + $0x880] sm:$0xff]  ;;  %v3728_v22 = vcombine.low %v3655_v11, %v3659_v12 }
  0xcd   : > { %3591 = vmatprep.mubr.msk.bf16.mxu0 %vm665_vm0, %v3957_v27  ;;  %3593 = vmatprep.mubr.msk.bf16.mxu1 %vm665_vm0, %v3957_v27  ;;  %v3477_v27 = vld [vmem:[%s3901_s21 + $0x578] sm:$0xff]  ;;  %v3658_v10 = vld [vmem:[%s3901_s21 + $0x8a0] sm:$0xff] }
  0xce   : > { %v3549_v35 = vcombine.high %v3473_v30, %v3477_v27  ;;  %v3548_v43 = vcombine.low %v3473_v30, %v3477_v27  ;;  %v3726_v18 = vcombine.low %v3654_v9, %v3658_v10  ;;  %v3643_v30 = vld [vmem:[%s3901_s21 + $0x828] sm:$0xff] }
  0xcf   : > { %2103 = vmatpush1.bf16.msra.mxu0 %v3570_v15  ;;  %2156 = vmatpush1.bf16.msra.mxu1 %v3572_v16  ;;  %v3727_v15 = vcombine.high %v3654_v9, %v3658_v10  ;;  %v3729_v16 = vcombine.high %v3655_v11, %v3659_v12  ;;  %v3713_v34 = vcombine.high %v3639_v29, %v3643_v30 }
  0xd0   : > { %2104 = vmatprep.subr.bf16.mxu0 %v3563_v17  ;;  %2157 = vmatprep.subr.bf16.mxu1 %v3565_v19  ;;  %v3646_v17 = vld [vmem:[%s3901_s21 + $0x840] sm:$0xff]  ;;  %v3712_v40 = vcombine.low %v3639_v29, %v3643_v30 }
  0xd1   : > { %v3650_v19 = vld [vmem:[%s3901_s21 + $0x860] sm:$0xff] }
  0xd2   : > { %2037 = vmatmul.mubr.bf16.gmra.mxu0 %v3974_v38  ;;  %2090 = vmatmul.mubr.bf16.gmra.mxu1 %v3974_v38  ;;  %v3469_v38 = vld [vmem:[%s3901_s21 + $0x538] sm:$0xff]  ;;  %v3718_v27 = vcombine.low %v3646_v17, %v3650_v19 }
  0xd3   : > { %2105 = vmatpush1.bf16.msra.mxu0 %v3562_v23  ;;  %2158 = vmatpush1.bf16.msra.mxu1 %v3564_v24  ;;  %v3541_v46 = vcombine.high %v3465_v39, %v3469_v38  ;;  %v3540_v53 = vcombine.low %v3465_v39, %v3469_v38  ;;  %v3719_v23 = vcombine.high %v3646_v17, %v3650_v19  ;;  %v3635_v39 = vld [vmem:[%s3901_s21 + $0x7e8] sm:$0xff] }
  0xd4   : > { %2106 = vmatprep.subr.bf16.mxu0 %v3555_v25  ;;  %2159 = vmatprep.subr.bf16.mxu1 %v3557_v26  ;;  %v3721_v24 = vcombine.high %v3647_v20, %v3651_v21  ;;  %v3638_v25 = vld [vmem:[%s3901_s21 + $0x800] sm:$0xff]  ;;  %v3705_v42 = vcombine.high %v3631_v37, %v3635_v39  ;;  %v3704_v49 = vcombine.low %v3631_v37, %v3635_v39 }
  0xd5   : > { %3594 = vmatprep.mubr.msk.bf16.mxu0 %vm665_vm0, %v4131_v0  ;;  %3596 = vmatprep.mubr.msk.bf16.mxu1 %vm665_vm0, %v4131_v0  ;;  %v3642_v26 = vld [vmem:[%s3901_s21 + $0x820] sm:$0xff] }
  0xd6   : > { %v3710_v38 = vcombine.low %v3638_v25, %v3642_v26 }
  0xd7   : > { %2107 = vmatpush1.bf16.msra.mxu0 %v3554_v31  ;;  %2160 = vmatpush1.bf16.msra.mxu1 %v3556_v32  ;;  %v3720_v31 = vcombine.low %v3647_v20, %v3651_v21  ;;  %v3711_v32 = vcombine.high %v3638_v25, %v3642_v26 }
  0xd8   : > { %2108 = vmatprep.subr.bf16.mxu0 %v3547_v33  ;;  %2161 = vmatprep.subr.bf16.mxu1 %v3549_v35  ;;  %v4233_v33 = vld [vmem:[%s4669_s1 + $0x14] ss:$8 sps:$4 sm:$0xff]   ;;  %v3630_v35 = vld [vmem:[%s3901_s21 + $0x7c0] sm:$0xff] }
  0xd9   : > { %v3702_v48 = vcombine.low %v3630_v35, %v3634_v36 }
  0xdb   : > { %2109 = vmatpush1.bf16.msra.mxu0 %v3546_v41  ;;  %2162 = vmatpush1.bf16.msra.mxu1 %v3548_v43  ;;  %v3703_v41 = vcombine.high %v3630_v35, %v3634_v36  ;;  %v3622_v43 = vld [vmem:[%s3901_s21 + $0x780] sm:$0xff] }
  0xdc   : > { %2110 = vmatprep.subr.bf16.mxu0 %v3539_v44  ;;  %2163 = vmatprep.subr.bf16.mxu1 %v3541_v46  ;;  %v3626_v44 = vld [vmem:[%s3901_s21 + $0x7a0] sm:$0xff]  ;;  %v3623_v46 = vld [vmem:[%s3901_s21 + $0x788] sm:$0xff] }
  0xdd   : > { %v3695_v50 = vcombine.high %v3622_v43, %v3626_v44  ;;  %v3694_v56 = vcombine.low %v3622_v43, %v3626_v44  ;;  %v3696_v57 = vcombine.low %v3623_v46, %v3627_v47  ;;  %v3641_v43 = vld [vmem:[%s3901_s21 + $0x818] sm:$0xff] }
  0xde   : > { %v3645_v44 = vld [vmem:[%s3901_s21 + $0x838] sm:$0xff] }
  0xdf   : > { %2111 = vmatpush1.bf16.msra.mxu0 %v3538_v51  ;;  %2164 = vmatpush1.bf16.msra.mxu1 %v3540_v53  ;;  %v3697_v51 = vcombine.high %v3623_v46, %v3627_v47  ;;  %v3618_v53 = vld [vmem:[%s3901_s21 + $0x760] sm:$0xff] }
  0xe0   : > { %2112 = vmatprep.subr.bf16.mxu0 %v3531_v54  ;;  %2165 = vmatprep.subr.bf16.mxu1 %v3533_v55  ;;  %v3615_v54 = vld [vmem:[%s3901_s21 + $0x748] sm:$0xff]  ;;  %v3687_v58 = vcombine.high %v3614_v52, %v3618_v53  ;;  %v3686_v1 = vcombine.low %v3614_v52, %v3618_v53  ;;  %v3632_v52 = vld [vmem:[%s3901_s21 + $0x7d0] sm:$0xff] }
  0xe1   : > { %v3619_v55 = vld [vmem:[%s3901_s21 + $0x768] sm:$0xff]  ;;  %v3636_v53 = vld [vmem:[%s3901_s21 + $0x7f0] sm:$0xff] }
  0xe2   : > { %v3689_v59 = vcombine.high %v3615_v54, %v3619_v55  ;;  %v3688_v2 = vcombine.low %v3615_v54, %v3619_v55  ;;  %v3633_v54 = vld [vmem:[%s3901_s21 + $0x7d8] sm:$0xff] }
  0xe3   : > { %2113 = vmatpush1.bf16.msra.mxu0 %v3530_v60  ;;  %2166 = vmatpush1.bf16.msra.mxu1 %v3532_v61  ;;  %v3606_v60 = vld [vmem:[%s3901_s21 + $0x700] sm:$0xff]  ;;  %v3637_v55 = vld [vmem:[%s3901_s21 + $0x7f8] sm:$0xff] }
  0xe4   : > { %2114 = vmatprep.subr.bf16.mxu0 %v3523_v62  ;;  %2167 = vmatprep.subr.bf16.mxu1 %v3525_v63  ;;  %v3610_v61 = vld [vmem:[%s3901_s21 + $0x720] sm:$0xff]  ;;  %v3607_v62 = vld [vmem:[%s3901_s21 + $0x708] sm:$0xff] }
  0xe5   : > { %v3611_v63 = vld [vmem:[%s3901_s21 + $0x728] sm:$0xff]  ;;  %v3679_v3 = vcombine.high %v3606_v60, %v3610_v61  ;;  %v3678_v9 = vcombine.low %v3606_v60, %v3610_v61  ;;  %v3709_v61 = vcombine.high %v3633_v54, %v3637_v55 }
  0xe6   : > { %v3681_v4 = vcombine.high %v3607_v62, %v3611_v63  ;;  %v3680_v10 = vcombine.low %v3607_v62, %v3611_v63  ;;  %v3624_v62 = vld [vmem:[%s3901_s21 + $0x790] sm:$0xff] }
  0xe7   : > { %2115 = vmatpush1.bf16.msra.mxu0 %v3522_v5  ;;  %2168 = vmatpush1.bf16.msra.mxu1 %v3524_v6  ;;  %v3598_v5 = vld [vmem:[%s3901_s21 + $0x6c0] sm:$0xff]  ;;  %v3628_v63 = vld [vmem:[%s3901_s21 + $0x7b0] sm:$0xff] }
  0xe8   : > { %2130 = vmatprep.subr.bf16.mxu0 %v3587_v7  ;;  %2183 = vmatprep.subr.bf16.mxu1 %v3589_v8  ;;  %v3602_v6 = vld [vmem:[%s3901_s21 + $0x6e0] sm:$0xff]  ;;  %v3599_v7 = vld [vmem:[%s3901_s21 + $0x6c8] sm:$0xff] }
  0xe9   : > { %v3603_v8 = vld [vmem:[%s3901_s21 + $0x6e8] sm:$0xff]  ;;  %v3671_v11 = vcombine.high %v3598_v5, %v3602_v6  ;;  %v3670_v17 = vcombine.low %v3598_v5, %v3602_v6  ;;  %v3708_v5 = vcombine.low %v3633_v54, %v3637_v55  ;;  %v3699_v6 = vcombine.high %v3624_v62, %v3628_v63 }
  0xea   : > { %v3673_v12 = vcombine.high %v3599_v7, %v3603_v8  ;;  %v3672_v19 = vcombine.low %v3599_v7, %v3603_v8 }
  0xeb   : > { %2131 = vmatpush2.bf16.msra.mxu0 %v3586_v13  ;;  %2184 = vmatpush2.bf16.msra.mxu1 %v3588_v14  ;;  %v3662_v13 = vld [vmem:[%s3901_s21 + $0x8c0] sm:$0xff] }
  0xec   : > { %2671 = vmatprep.subr.bf16.mxu0 %v3727_v15  ;;  %2724 = vmatprep.subr.bf16.mxu1 %v3729_v16  ;;  %v3666_v14 = vld [vmem:[%s3901_s21 + $0x8e0] sm:$0xff]  ;;  %v3663_v15 = vld [vmem:[%s3901_s21 + $0x8c8] sm:$0xff] }
  0xed   : > { %v3667_v16 = vld [vmem:[%s3901_s21 + $0x8e8] sm:$0xff]  ;;  %v3735_v20 = vcombine.high %v3662_v13, %v3666_v14  ;;  %v3734_v25 = vcombine.low %v3662_v13, %v3666_v14  ;;  %v3621_v13 = vld [vmem:[%s3901_s21 + $0x778] sm:$0xff] }
  0xee   : > { %2133 = vmatmul.mubr.bf16.vlgmr.msra.gmra.mxu0 %v4224_v28  ;;  %2186 = vmatmul.mubr.bf16.vlgmr.msra.gmra.mxu1 %v4224_v28  ;;  %v3737_v21 = vcombine.high %v3663_v15, %v3667_v16  ;;  %v3736_v26 = vcombine.low %v3663_v15, %v3667_v16  ;;  %v3698_v15 = vcombine.low %v3624_v62, %v3628_v63 }
  0xef   : > { %2672 = vmatpush1.bf16.msra.mxu0 %v3726_v18  ;;  %2725 = vmatpush1.bf16.msra.mxu1 %v3728_v22  ;;  %v3656_v18 = vld [vmem:[%s3901_s21 + $0x890] sm:$0xff] }
  0xf0   : > { %2673 = vmatprep.subr.bf16.mxu0 %v3719_v23  ;;  %2726 = vmatprep.subr.bf16.mxu1 %v3721_v24  ;;  %v3660_v22 = vld [vmem:[%s3901_s21 + $0x8b0] sm:$0xff]  ;;  %v3657_v23 = vld [vmem:[%s3901_s21 + $0x898] sm:$0xff] }
  0xf1   : > { %3595 = vmatprep.mubr.msk.bf16.mxu0 %vm665_vm0, %v4233_v33  ;;  %3597 = vmatprep.mubr.msk.bf16.mxu1 %vm665_vm0, %v4233_v33  ;;  %v3661_v24 = vld [vmem:[%s3901_s21 + $0x8b8] sm:$0xff]  ;;  %v3731_v29 = vcombine.high %v3656_v18, %v3660_v22  ;;  %v3730_v35 = vcombine.low %v3656_v18, %v3660_v22 }
  0xf2   : > { %v3733_v30 = vcombine.high %v3657_v23, %v3661_v24  ;;  %v3732_v37 = vcombine.low %v3657_v23, %v3661_v24  ;;  %v3609_v22 = vld [vmem:[%s3901_s21 + $0x718] sm:$0xff] }
  0xf3   : > { %2674 = vmatpush1.bf16.msra.mxu0 %v3718_v27  ;;  %2727 = vmatpush1.bf16.msra.mxu1 %v3720_v31  ;;  %v3648_v27 = vld [vmem:[%s3901_s21 + $0x850] sm:$0xff] }
  0xf4   : > { %2675 = vmatprep.subr.bf16.mxu0 %v3711_v32  ;;  %2728 = vmatprep.subr.bf16.mxu1 %v3713_v34  ;;  %v3652_v31 = vld [vmem:[%s3901_s21 + $0x870] sm:$0xff]  ;;  %v3649_v32 = vld [vmem:[%s3901_s21 + $0x858] sm:$0xff] }
  0xf5   : > { %v3653_v34 = vld [vmem:[%s3901_s21 + $0x878] sm:$0xff]  ;;  %v3723_v39 = vcombine.high %v3648_v27, %v3652_v31  ;;  %v3722_v46 = vcombine.low %v3648_v27, %v3652_v31  ;;  %v3604_v27 = vld [vmem:[%s3901_s21 + $0x6f0] sm:$0xff] }
  0xf6   : > { %2143 = vmatmul.mubr.bf16.gmra.mxu0 %v4248_v45  ;;  %2196 = vmatmul.mubr.bf16.gmra.mxu1 %v4248_v45 }
  0xf7   : > { %2676 = vmatpush1.bf16.msra.mxu0 %v3710_v38  ;;  %2729 = vmatpush1.bf16.msra.mxu1 %v3712_v40  ;;  %v3725_v40 = vcombine.high %v3649_v32, %v3653_v34 }
  0xf8   : > { %2677 = vmatprep.subr.bf16.mxu0 %v3703_v41  ;;  %2730 = vmatprep.subr.bf16.mxu1 %v3705_v42  ;;  %v3640_v41 = vld [vmem:[%s3901_s21 + $0x810] sm:$0xff] }
  0xf9   : > { %3742 = vmatprep.mubr.msk.bf16.mxu0 %vm665_vm0, %v4131_v0  ;;  %3744 = vmatprep.mubr.msk.bf16.mxu1 %vm665_vm0, %v4131_v0  ;;  %v3644_v42 = vld [vmem:[%s3901_s21 + $0x830] sm:$0xff] }
  0xfa   : > { %v4282_v36 = vpop.f32.mrf.mxu0  ;;  %v4284_v38 = vpop.f32.mrf.mxu1 }
  0xfb   : > { %2678 = vmatpush1.bf16.msra.mxu0 %v3702_v48  ;;  %2731 = vmatpush1.bf16.msra.mxu1 %v3704_v49  ;;  %v3724_v48 = vcombine.low %v3649_v32, %v3653_v34  ;;  %v3715_v49 = vcombine.high %v3640_v41, %v3644_v42  ;;  %v3601_v32 = vld [vmem:[%s3901_s21 + $0x6d8] sm:$0xff] }
  0xfc   : > { %2679 = vmatprep.subr.bf16.mxu0 %v3695_v50  ;;  %2732 = vmatprep.subr.bf16.mxu1 %v3697_v51  ;;  %v4292_v47 = vpop.f32.mrf.mxu0  ;;  %v4294_v50 = vpop.f32.mrf.mxu1  ;;  %v3717_v51 = vcombine.high %v3641_v43, %v3645_v44  ;;  %v3605_v34 = vld [vmem:[%s3901_s21 + $0x6f8] sm:$0xff] }
  0xfe   : > { %v4306_v60 = vpop.f32.mrf.mxu1 }
  0xff   : > { %2680 = vmatpush1.bf16.msra.mxu0 %v3694_v56  ;;  %2733 = vmatpush1.bf16.msra.mxu1 %v3696_v57  ;;  %v3714_v56 = vcombine.low %v3640_v41, %v3644_v42  ;;  %v4304_v57 = vpop.f32.mrf.mxu0  ;;  %v3677_v41 = vcombine.high %v3601_v32, %v3605_v34  ;;  %v3664_v42 = vld [vmem:[%s3901_s21 + $0x8d0] sm:$0xff] }
 0x100   : > { %2681 = vmatprep.subr.bf16.mxu0 %v3687_v58  ;;  %2734 = vmatprep.subr.bf16.mxu1 %v3689_v59  ;;  %v3716_v58 = vcombine.low %v3641_v43, %v3645_v44  ;;  %v3707_v59 = vcombine.high %v3632_v52, %v3636_v53  ;;  %v4316_v7 = vpop.f32.mrf.mxu1  ;;  %v3668_v43 = vld [vmem:[%s3901_s21 + $0x8f0] sm:$0xff] }
 0x101   : > { %v3739_v54 = vcombine.high %v3664_v42, %v3668_v43 }
 0x102   : > { %v4328_v14 = vpop.f32.mrf.mxu1 }
 0x103   : > { %2682 = vmatpush1.bf16.msra.mxu0 %v3686_v1  ;;  %2735 = vmatpush1.bf16.msra.mxu1 %v3688_v2  ;;  %v3625_v1 = vld [vmem:[%s3901_s21 + $0x798] sm:$0xff] }
 0x104   : > { %2683 = vmatprep.subr.bf16.mxu0 %v3679_v3  ;;  %2736 = vmatprep.subr.bf16.mxu1 %v3681_v4  ;;  %v3629_v2 = vld [vmem:[%s3901_s21 + $0x7b8] sm:$0xff]  ;;  %v3706_v3 = vcombine.low %v3632_v52, %v3636_v53  ;;  %v4314_v4 = vpop.f32.mrf.mxu0  ;;  %v4336_v23 = vpop.f32.mrf.mxu1  ;;  %v3676_v53 = vcombine.low %v3601_v32, %v3605_v34 }
 0x105   : > { %v3701_v8 = vcombine.high %v3625_v1, %v3629_v2  ;;  %v3700_v16 = vcombine.low %v3625_v1, %v3629_v2 }
 0x107   : > { %2684 = vmatpush1.bf16.msra.mxu0 %v3678_v9  ;;  %2737 = vmatpush1.bf16.msra.mxu1 %v3680_v10  ;;  %v3616_v9 = vld [vmem:[%s3901_s21 + $0x750] sm:$0xff] }
 0x108   : > { %2685 = vmatprep.subr.bf16.mxu0 %v3671_v11  ;;  %2738 = vmatprep.subr.bf16.mxu1 %v3673_v12  ;;  %v3620_v10 = vld [vmem:[%s3901_s21 + $0x770] sm:$0xff]  ;;  %v4322_v11 = vpop.f32.mrf.mxu0  ;;  %v3617_v12 = vld [vmem:[%s3901_s21 + $0x758] sm:$0xff] }
 0x109   : > { %v3690_v24 = vcombine.low %v3616_v9, %v3620_v10 }
 0x10a   : > { %v4332_v18 = vpop.f32.mrf.mxu0 }
 0x10b   : > { %2686 = vmatpush1.bf16.msra.mxu0 %v3670_v17  ;;  %2739 = vmatpush1.bf16.msra.mxu1 %v3672_v19  ;;  %v3691_v17 = vcombine.high %v3616_v9, %v3620_v10  ;;  %v3693_v19 = vcombine.high %v3617_v12, %v3621_v13 }
 0x10c   : > { %2701 = vmatprep.subr.bf16.mxu0 %v3735_v20  ;;  %2754 = vmatprep.subr.bf16.mxu1 %v3737_v21  ;;  %v3608_v20 = vld [vmem:[%s3901_s21 + $0x710] sm:$0xff]  ;;  %v4340_v31 = vpop.f32.mrf.mxu0 }
 0x10d   : > { %v3612_v21 = vld [vmem:[%s3901_s21 + $0x730] sm:$0xff] }
 0x10e   : > { %v4348_v44 = vpop.f32.mrf.mxu0 }
 0x10f   : > { %2702 = vmatpush2.bf16.msra.mxu0 %v3734_v25  ;;  %2755 = vmatpush2.bf16.msra.mxu1 %v3736_v26  ;;  %v3692_v25 = vcombine.low %v3617_v12, %v3621_v13  ;;  %v3683_v26 = vcombine.high %v3608_v20, %v3612_v21 }
 0x110   : > { %2777 = vmatprep.subr.bf16.mxu0 %v3731_v29  ;;  %2830 = vmatprep.subr.bf16.mxu1 %v3733_v30  ;;  %v3600_v30 = vld [vmem:[%s3901_s21 + $0x6d0] sm:$0xff] }
 0x112   : > { %2704 = vmatmul.mubr.bf16.vlgmr.msra.gmra.mxu0 %v4224_v28  ;;  %2757 = vmatmul.mubr.bf16.vlgmr.msra.gmra.mxu1 %v4224_v28 }
 0x113   : > { %2778 = vmatpush1.bf16.msra.mxu0 %v3730_v35  ;;  %2831 = vmatpush1.bf16.msra.mxu1 %v3732_v37  ;;  %v4344_v35 = vpop.f32.mrf.mxu1  ;;  %v3682_v37 = vcombine.low %v3608_v20, %v3612_v21 }
 0x114   : > { %2779 = vmatprep.subr.bf16.mxu0 %v3723_v39  ;;  %2832 = vmatprep.subr.bf16.mxu1 %v3725_v40  ;;  %v3675_v40 = vcombine.high %v3600_v30, %v3604_v27 }
 0x115   : > { %3743 = vmatprep.mubr.msk.bf16.mxu0 %vm665_vm0, %v4233_v33  ;;  %3745 = vmatprep.mubr.msk.bf16.mxu1 %vm665_vm0, %v4233_v33 }
 0x117   : > { %2780 = vmatpush1.bf16.msra.mxu0 %v3722_v46  ;;  %2833 = vmatpush1.bf16.msra.mxu1 %v3724_v48  ;;  %v3665_v46 = vld [vmem:[%s3901_s21 + $0x8d8] sm:$0xff] }
 0x118   : > { %2781 = vmatprep.subr.bf16.mxu0 %v3715_v49  ;;  %2834 = vmatprep.subr.bf16.mxu1 %v3717_v51  ;;  %v3669_v48 = vld [vmem:[%s3901_s21 + $0x8f8] sm:$0xff]  ;;  %v4352_v49 = vpop.f32.mrf.mxu1  ;;  %v3674_v51 = vcombine.low %v3600_v30, %v3604_v27 }
 0x11a   : > { %2714 = vmatmul.mubr.bf16.gmra.mxu0 %v4248_v45  ;;  %2767 = vmatmul.mubr.bf16.gmra.mxu1 %v4248_v45 }
 0x11b   : > { %2782 = vmatpush1.bf16.msra.mxu0 %v3714_v56  ;;  %2835 = vmatpush1.bf16.msra.mxu1 %v3716_v58  ;;  %v3741_v56 = vcombine.high %v3665_v46, %v3669_v48  ;;  %v3738_v58 = vcombine.low %v3664_v42, %v3668_v43 }
 0x11c   : > { %2783 = vmatprep.subr.bf16.mxu0 %v3707_v59  ;;  %2836 = vmatprep.subr.bf16.mxu1 %v3709_v61  ;;  %v3740_v61 = vcombine.low %v3665_v46, %v3669_v48 }
 0x11d   : > { %3746 = vmatprep.mubr.msk.bf16.mxu0 %vm665_vm0, %v4131_v0  ;;  %3748 = vmatprep.mubr.msk.bf16.mxu1 %vm665_vm0, %v4131_v0  ;;  %v3613_v0 = vld [vmem:[%s3901_s21 + $0x738] sm:$0xff]  ;;  %s3768_s21 = sshll.u32 %s4759_s12, 7 }
 0x11e   : > { %v3685_v29 = vcombine.high %v3609_v22, %v3613_v0  ;;  %v3684_v39 = vcombine.low %v3609_v22, %v3613_v0  ;;  %v4354_v52 = vpop.f32.mrf.mxu0  ;;  %v4356_v55 = vpop.f32.mrf.mxu1  ;;  %s4555_s23 = scalar_lea.vmem %s4671_s3, %s3768_s21 }
 0x11f   : > { %2784 = vmatpush1.bf16.msra.mxu0 %v3706_v3  ;;  %2837 = vmatpush1.bf16.msra.mxu1 %v3708_v5 }
 0x120   : > { %2785 = vmatprep.subr.bf16.mxu0 %v3699_v6  ;;  %2838 = vmatprep.subr.bf16.mxu1 %v3701_v8  ;;  %v4358_v59 = vpop.f32.mrf.mxu0  ;;  %v4360_v62 = vpop.f32.mrf.mxu1 }
 0x121   : > { %4676 = vst [vmem:[#allocation2_spill] sm:$0xff] %v4358_v59  ;;  %4677 = vst [vmem:[#allocation3_spill] sm:$0xff] %v4360_v62 }
 0x122   : > { %v4362_v63 = vpop.f32.mrf.mxu0  ;;  %v4364_v1 = vpop.f32.mrf.mxu1 }
 0x123   : > { %2786 = vmatpush1.bf16.msra.mxu0 %v3698_v15  ;;  %2839 = vmatpush1.bf16.msra.mxu1 %v3700_v16  ;;  %4678 = vst [vmem:[#allocation4_spill] sm:$0xff] %v4362_v63  ;;  %4679 = vst [vmem:[#allocation5_spill] sm:$0xff] %v4364_v1 }
 0x124   : > { %2787 = vmatprep.subr.bf16.mxu0 %v3691_v17  ;;  %2840 = vmatprep.subr.bf16.mxu1 %v3693_v19  ;;  %v4370_v2 = vpop.f32.mrf.mxu0  ;;  %v4374_v3 = vpop.f32.mrf.mxu1 }
 0x125   : > { %4680 = vst [vmem:[#allocation6_spill] sm:$0xff] %v4370_v2  ;;  %4681 = vst [vmem:[#allocation7_spill] sm:$0xff] %v4374_v3 }
 0x126   : > { %v4376_v5 = vpop.f32.mrf.mxu0  ;;  %v4378_v6 = vpop.f32.mrf.mxu1 }
 0x127   : > { %2788 = vmatpush1.bf16.msra.mxu0 %v3690_v24  ;;  %2841 = vmatpush1.bf16.msra.mxu1 %v3692_v25  ;;  %4682 = vst [vmem:[#allocation8_spill] sm:$0xff] %v4376_v5  ;;  %4683 = vst [vmem:[#allocation9_spill] sm:$0xff] %v4378_v6 }
 0x128   : > { %2789 = vmatprep.subr.bf16.mxu0 %v3683_v26  ;;  %2842 = vmatprep.subr.bf16.mxu1 %v3685_v29  ;;  %v4380_v8 = vpop.f32.mrf.mxu0  ;;  %v4383_v9 = vpop.f32.mrf.mxu1 }
 0x129   : > { %4684 = vst [vmem:[#allocation10_spill] sm:$0xff] %v4380_v8  ;;  %4685 = vst [vmem:[#allocation11_spill] sm:$0xff] %v4383_v9 }
 0x12a   : > { %v4388_v10 = vpop.f32.mrf.mxu1 }
 0x12b   : > { %2790 = vmatpush1.bf16.msra.mxu0 %v3682_v37  ;;  %2843 = vmatpush1.bf16.msra.mxu1 %v3684_v39  ;;  %4687 = vst [vmem:[#allocation13_spill] sm:$0xff] %v4388_v10 }
 0x12c   : > { %2791 = vmatprep.subr.bf16.mxu0 %v3675_v40  ;;  %2844 = vmatprep.subr.bf16.mxu1 %v3677_v41 }
 0x12f   : > { %2792 = vmatpush1.bf16.msra.mxu0 %v3674_v51  ;;  %2845 = vmatpush1.bf16.msra.mxu1 %v3676_v53 }
 0x130   : > { %2807 = vmatprep.subr.bf16.mxu0 %v3739_v54  ;;  %2860 = vmatprep.subr.bf16.mxu1 %v3741_v56 }
 0x133   : > { %2808 = vmatpush2.bf16.msra.mxu0 %v3738_v58  ;;  %2861 = vmatpush2.bf16.msra.mxu1 %v3740_v61 }
 0x136   : > { %2810 = vmatmul.mubr.bf16.vlgmr.msra.gmra.mxu0 %v4224_v28  ;;  %2863 = vmatmul.mubr.bf16.vlgmr.msra.gmra.mxu1 %v4224_v28  ;;  %v4386_v28 = vpop.f32.mrf.mxu0 }
 0x137   : > { %3747 = vmatprep.mubr.msk.bf16.mxu0 %vm665_vm0, %v4233_v33  ;;  %3749 = vmatprep.mubr.msk.bf16.mxu1 %vm665_vm0, %v4233_v33  ;;  %4686 = vst [vmem:[#allocation12_spill] sm:$0xff] %v4386_v28  ;;  %v4392_v33 = vpop.f32.mrf.mxu1 }
 0x138   : > { %v4390_v12 = vpop.f32.mrf.mxu0  ;;  %4689 = vst [vmem:[#allocation15_spill] sm:$0xff] %v4392_v33 }
 0x139   : > { %4688 = vst [vmem:[#allocation14_spill] sm:$0xff] %v4390_v12 }
 0x13e   : > { %2820 = vmatmul.mubr.bf16.gmra.mxu0 %v4248_v45  ;;  %2873 = vmatmul.mubr.bf16.gmra.mxu1 %v4248_v45 }
 0x142   : > { %v4394_v13 = vpop.f32.mrf.mxu0  ;;  %v4396_v15 = vpop.f32.mrf.mxu1 }
 0x144   : > { %v4398_v16 = vpop.f32.mrf.mxu0  ;;  %v4400_v17 = vpop.f32.mrf.mxu1 }
 0x146   : > { %v4402_v19 = vpop.f32.mrf.mxu0  ;;  %v4404_v20 = vpop.f32.mrf.mxu1 }
 0x148   : > { %v4406_v45 = vpop.f32.mrf.mxu0  ;;  %v4408_v21 = vpop.f32.mrf.mxu1 }
 0x14a   : > { %v4410_v22 = vpop.f32.mrf.mxu0  ;;  %v4412_v0 = vpop.f32.mrf.mxu1 }
 0x14c   : > { %v4414_v24 = vpop.f32.mrf.mxu0  ;;  %v4416_v25 = vpop.f32.mrf.mxu1 }
 0x14e   : > { %v4418_v26 = vpop.f32.mrf.mxu0  ;;  %v4420_v29 = vpop.f32.mrf.mxu1 }
 0x150   : > { %v4422_v30 = vpop.f32.mrf.mxu0  ;;  %v4424_v27 = vpop.f32.mrf.mxu1 }
 0x166   : > { %v4426_v32 = vpop.f32.mrf.mxu0  ;;  %v4428_v34 = vpop.f32.mrf.mxu1 }
 0x168   : > { %v4430_v37 = vpop.f32.mrf.mxu0  ;;  %v4432_v39 = vpop.f32.mrf.mxu1 }
 0x169   : > { %4690 = vst [vmem:[#allocation16_spill] sm:$0xff] %v4432_v39 }
 0x16a   : > { %v4434_v40 = vpop.f32.mrf.mxu0  ;;  %v4436_v41 = vpop.f32.mrf.mxu1 }
 0x16b   : > { %4691 = vst [vmem:[#allocation17_spill] sm:$0xff] %v4434_v40  ;;  %4692 = vst [vmem:[#allocation18_spill] sm:$0xff] %v4436_v41 }
 0x16c   : > { %v4438_v42 = vpop.f32.mrf.mxu0  ;;  %v4440_v43 = vpop.f32.mrf.mxu1 }
 0x16d   : > { %4693 = vst [vmem:[#allocation19_spill] sm:$0xff] %v4438_v42  ;;  %4694 = vst [vmem:[#allocation20_spill] sm:$0xff] %v4440_v43 }
 0x16e   : > { %v4442_v46 = vpop.f32.mrf.mxu0  ;;  %v4444_v48 = vpop.f32.mrf.mxu1 }
 0x16f   : > { %4695 = vst [vmem:[#allocation21_spill] sm:$0xff] %v4442_v46  ;;  %4696 = vst [vmem:[#allocation22_spill] sm:$0xff] %v4444_v48 }
 0x170   : > { %v4446_v51 = vpop.f32.mrf.mxu0  ;;  %v4448_v53 = vpop.f32.mrf.mxu1 }
 0x171   : > { %4697 = vst [vmem:[#allocation23_spill] sm:$0xff] %v4446_v51  ;;  %4698 = vst [vmem:[#allocation24_spill] sm:$0xff] %v4448_v53 }
 0x172   : > { %v4450_v54 = vpop.f32.mrf.mxu0  ;;  %v4452_v56 = vpop.f32.mrf.mxu1 }
 0x173   : > { %4699 = vst [vmem:[#allocation25_spill] sm:$0xff] %v4450_v54  ;;  %4700 = vst [vmem:[#allocation26_spill] sm:$0xff] %v4452_v56 }
 0x174   : > { %v4454_v58 = vpop.f32.mrf.mxu0  ;;  %v4458_v10 = vpop.f32.mrf.mxu1 }
 0x175   : > { %4701 = vst [vmem:[#allocation27_spill] sm:$0xff] %v4454_v58  ;;  %4702 = vst [vmem:[#allocation28_spill] sm:$0xff] %v4458_v10 }
 0x18a   : > { %v2028_v9 = vpop.f32.mrf.mxu0  ;;  %v2081_v8 = vpop.f32.mrf.mxu1 }
 0x18c   : > { %v2030_v6 = vpop.f32.mrf.mxu0  ;;  %v2083_v51 = vpop.f32.mrf.mxu1 }
 0x18e   : > { %v2032_v48 = vpop.f32.mrf.mxu0  ;;  %v2085_v53 = vpop.f32.mrf.mxu1 }
 0x190   : > { %v2034_v5 = vpop.f32.mrf.mxu0  ;;  %v2087_v54 = vpop.f32.mrf.mxu1 }
 0x192   : > { %v2038_v46 = vpop.f32.mrf.mxu0  ;;  %v2091_v56 = vpop.f32.mrf.mxu1 }
 0x194   : > { %v4462_v3 = vpop.f32.mrf.mxu0  ;;  %v4464_v43 = vpop.f32.mrf.mxu1 }
 0x196   : > { %v4466_v61 = vpop.f32.mrf.mxu0  ;;  %v4468_v58 = vpop.f32.mrf.mxu1 }
 0x198   : > { %v4470_v12 = vpop.f32.mrf.mxu0  ;;  %v4472_v28 = vpop.f32.mrf.mxu1 }
 0x1ae   : > { %v4474_v10 = vpop.f32.mrf.mxu0  ;;  %v4476_v33 = vpop.f32.mrf.mxu1 }
 0x1af   : > { %4703 = vst [vmem:[#allocation29_spill] sm:$0xff] %v4474_v10  ;;  %4704 = vst [vmem:[#allocation30_spill] sm:$0xff] %v4476_v33 }
 0x1b0   : > { %v4478_v2 = vpop.f32.mrf.mxu0  ;;  %v4480_v42 = vpop.f32.mrf.mxu1 }
 0x1b1   : > { %4705 = vst [vmem:[#allocation31_spill] sm:$0xff] %v4478_v2 }
 0x1b2   : > { %v4482_v1 = vpop.f32.mrf.mxu0  ;;  %v4484_v41 = vpop.f32.mrf.mxu1 }
 0x1b3   : > { %4706 = vst [vmem:[#allocation32_spill] sm:$0xff] %v4482_v1  ;;  %v1529_v1 = vmax.f32 %v4282_v36, %v4394_v13  ;;  %v1538_v36 = vmax.f32 %v4314_v4, %v4406_v45 }
 0x1b4   : > { %v4486_v63 = vpop.f32.mrf.mxu0  ;;  %v4488_v40 = vpop.f32.mrf.mxu1 }
 0x1b5   : > { %4707 = vst [vmem:[#allocation33_spill] sm:$0xff] %v4486_v63  ;;  %4708 = vst [vmem:[#allocation34_spill] sm:$0xff] %v4488_v40  ;;  %v1531_v63 = vmax.f32 %v4284_v38, %v4396_v15  ;;  %v1530_v40 = vmax.f32 %v4292_v47, %v4398_v16  ;;  %v1540_v38 = vmax.f32 %v4316_v7, %v4408_v21 }
 0x1b6   : > { %v4490_v62 = vpop.f32.mrf.mxu0  ;;  %v4492_v39 = vpop.f32.mrf.mxu1  ;;  %v1545_v47 = vmax.f32 %v4322_v11, %v4410_v22  ;;  %v1548_v15 = vmax.f32 %v4336_v23, %v4416_v25  ;;  %v1553_v7 = vmax.f32 %v4340_v31, %v4418_v26  ;;  %v1555_v11 = vmax.f32 %v4344_v35, %v4420_v29 }
 0x1b7   : > { %4709 = vst [vmem:[#allocation35_spill] sm:$0xff] %v4492_v39  ;;  %v1532_v39 = vmax.f32 %v4294_v50, %v4400_v17  ;;  %v2206_v50 = vmax.f32 %v1529_v1, %v2028_v9  ;;  %v2208_v16 = vmax.f32 %v1531_v63, %v2081_v8  ;;  %v2207_v1 = vmax.f32 %v1530_v40, %v2030_v6 }
 0x1b8   : > { %v4494_v59 = vpop.f32.mrf.mxu0  ;;  %v4496_v10 = vpop.f32.mrf.mxu1  ;;  %v2215_v35 = vmax.f32 %v1538_v36, %v2034_v5  ;;  %v2217_v6 = vmax.f32 %v1540_v38, %v2087_v54  ;;  %v2222_v25 = vmax.f32 %v1545_v47, %v2038_v46 }
 0x1b9   : > { %4710 = vst [vmem:[#allocation36_spill] sm:$0xff] %v4494_v59  ;;  %4711 = vst [vmem:[#allocation37_spill] sm:$0xff] %v4496_v10  ;;  %v1537_v59 = vmax.f32 %v4304_v57, %v4402_v19  ;;  %v1547_v57 = vmax.f32 %v4328_v14, %v4412_v0  ;;  %v1554_v14 = vmax.f32 %v4348_v44, %v4422_v30 }
 0x1ba   : > { %v4498_v33 = vpop.f32.mrf.mxu0  ;;  %v4500_v2 = vpop.f32.mrf.mxu1  ;;  %v2209_v19 = vmax.f32 %v1532_v39, %v2083_v51  ;;  %v2225_v39 = vmax.f32 %v1548_v15, %v4464_v43 }
 0x1bb   : > { %4712 = vst [vmem:[#allocation38_spill] sm:$0xff] %v4498_v33  ;;  %4713 = vst [vmem:[#allocation39_spill] sm:$0xff] %v4500_v2  ;;  %v1539_v33 = vmax.f32 %v4306_v60, %v4404_v20  ;;  %v4516_v2 = vpop.permute.xlu0 %2921  ;;  %v1546_v60 = vmax.f32 %v4332_v18, %v4414_v24  ;;  %v1556_v18 = vmax.f32 %v4352_v49, %v4424_v27  ;;  %v4549_v51 = vpop.permute.xlu1 %2931 }
 0x1bc   : > { %v4514_v10 = vpop.f32.mrf.mxu0  ;;  %v4524_v13 = vpop.f32.mrf.mxu1  ;;  %v2214_v8 = vmax.f32 %v1537_v59, %v2032_v48  ;;  %v2224_v26 = vmax.f32 %v1547_v57, %v2091_v56  ;;  %v2230_v57 = vmax.f32 %v1553_v7, %v4466_v61 }
 0x1bd   : > { %v2216_v20 = vmax.f32 %v1539_v33, %v2085_v53  ;;  %v2223_v33 = vmax.f32 %v1546_v60, %v4462_v3 }
 0x1bf   : > { %v4542_v44 = vpop.permute.xlu0 %2926 }
 0x1d2   : > { %v2705_v4 = vpop.f32.mrf.mxu0  ;;  %v2758_v17 = vpop.f32.mrf.mxu1 }
 0x1d3   : > { %v2883_v9 = vmax.f32 %v2206_v50, %v2705_v4  ;;  %v2885_v23 = vmax.f32 %v2208_v16, %v2758_v17 }
 0x1d4   : > { %v2707_v63 = vpop.f32.mrf.mxu0  ;;  %v2760_v21 = vpop.f32.mrf.mxu1 }
 0x1d5   : > { %v2884_v45 = vmax.f32 %v2207_v1, %v2707_v63  ;;  %v2939_v31 = vadd.f32 %v4516_v2, %v2883_v9  ;;  %v2886_v22 = vmax.f32 %v2209_v19, %v2760_v21  ;;  %v2941_v0 = vadd.f32 %v4516_v2, %v2885_v23 }
 0x1d6   : > { %v2709_v24 = vpop.f32.mrf.mxu0  ;;  %v2762_v59 = vpop.f32.mrf.mxu1  ;;  %v2232_v1 = vmax.f32 %v1555_v11, %v4468_v58 }
 0x1d7   : > { %v2940_v29 = vadd.f32 %v4516_v2, %v2884_v45  ;;  %v2891_v30 = vmax.f32 %v2214_v8, %v2709_v24  ;;  %v2942_v5 = vadd.f32 %v4516_v2, %v2886_v22  ;;  %v2893_v40 = vmax.f32 %v2216_v20, %v2762_v59  ;;  %v4566_v11 = vpop.permute.xlu1 %2936 }
 0x1d8   : > { %v2711_v48 = vpop.f32.mrf.mxu0  ;;  %v2971_v53 = vmax.f32 %v2939_v31, 0.0  ;;  %v2764_v56 = vpop.f32.mrf.mxu1  ;;  %v2973_v3 = vmax.f32 %v2941_v0, 0.0 }
 0x1d9   : > { %v2972_v54 = vmax.f32 %v2940_v29, 0.0  ;;  %v2892_v36 = vmax.f32 %v2215_v35, %v2711_v48  ;;  %v2947_v46 = vadd.f32 %v4542_v44, %v2891_v30  ;;  %v2974_v43 = vmax.f32 %v2942_v5, 0.0 }
 0x1da   : > { %v2894_v38 = vmax.f32 %v2217_v6, %v2764_v56  ;;  %v2949_v47 = vadd.f32 %v4542_v44, %v2893_v40  ;;  %v2715_v50 = vpop.f32.mrf.mxu0  ;;  %v2768_v4 = vpop.f32.mrf.mxu1  ;;  %v2231_v6 = vmax.f32 %v1554_v14, %v4470_v12 }
 0x1db   : > { %v3769_v60 = vpack.c.bf16 %v2972_v54, %v2971_v53  ;;  %v2948_v15 = vadd.f32 %v4542_v44, %v2892_v36  ;;  %v2899_v16 = vmax.f32 %v2222_v25, %v2715_v50  ;;  %v3770_v9 = vpack.c.bf16 %v2974_v43, %v2973_v3 }
 0x1dc   : > { %v2950_v17 = vadd.f32 %v4542_v44, %v2894_v38  ;;  %v2901_v19 = vmax.f32 %v2224_v26, %v2768_v4  ;;  %v2717_v23 = vpop.f32.mrf.mxu0  ;;  %v2979_v63 = vmax.f32 %v2947_v46, 0.0  ;;  %v2770_v61 = vpop.f32.mrf.mxu1  ;;  %v2981_v7 = vmax.f32 %v2949_v47, 0.0  ;;  %v4716_v4 = vld [vmem:[#allocation3_spill] sm:$0xff] }
 0x1dd   : > { %3099 = vst [vmem:[%s4555_s23] sm:$0xff] %v3769_v60  ;;  %v2980_v8 = vmax.f32 %v2948_v15, 0.0  ;;  %v2900_v20 = vmax.f32 %v2223_v33, %v2717_v23  ;;  %v2955_v45 = vadd.f32 %v4549_v51, %v2899_v16  ;;  %3100 = vst [vmem:[%s4555_s23 + $0x8] sm:$0xff] %v3770_v9  ;;  %v2902_v21 = vmax.f32 %v2225_v39, %v2770_v61  ;;  %v4714_v60 = vld [vmem:[#allocation2_spill] sm:$0xff]  ;;  %v4715_v16 = vld [vmem:[#allocation16_spill] sm:$0xff] }
 0x1de   : > { %v2982_v31 = vmax.f32 %v2950_v17, 0.0  ;;  %v2957_v35 = vadd.f32 %v4549_v51, %v2901_v19  ;;  %v2719_v58 = vpop.f32.mrf.mxu0  ;;  %v2772_v25 = vpop.f32.mrf.mxu1  ;;  %v2233_v26 = vmax.f32 %v1556_v18, %v4472_v28  ;;  %v1533_v50 = vmax.f32 %v4354_v52, %v4426_v32  ;;  %v4717_v9 = vld [vmem:[#allocation17_spill] sm:$0xff]  ;;  %v4718_v17 = vld [vmem:[#allocation4_spill] sm:$0xff]  ;;  %v4719_v23 = vld [vmem:[#allocation18_spill] sm:$0xff] }
 0x1df   : > { %v3773_v22 = vpack.c.bf16 %v2980_v8, %v2979_v63  ;;  %v2956_v0 = vadd.f32 %v4549_v51, %v2900_v20  ;;  %v2907_v24 = vmax.f32 %v2230_v57, %v2719_v58  ;;  %v2958_v30 = vadd.f32 %v4549_v51, %v2902_v21  ;;  %v4720_v63 = vld [vmem:[#allocation5_spill] sm:$0xff]  ;;  %v4721_v20 = vld [vmem:[#allocation19_spill] sm:$0xff]  ;;  %v4724_v32 = vld [vmem:[#allocation20_spill] sm:$0xff] }
 0x1e0   : > { %v3774_v29 = vpack.c.bf16 %v2982_v31, %v2981_v7  ;;  %v2909_v59 = vmax.f32 %v2232_v1, %v2772_v25  ;;  %v2721_v33 = vpop.f32.mrf.mxu0  ;;  %v2987_v39 = vmax.f32 %v2955_v45, 0.0  ;;  %v2774_v40 = vpop.f32.mrf.mxu1  ;;  %v2989_v48 = vmax.f32 %v2957_v35, 0.0  ;;  %v4722_v45 = vld [vmem:[#allocation6_spill] sm:$0xff]  ;;  %v4723_v7 = vld [vmem:[#allocation29_spill] sm:$0xff]  ;;  %v4725_v31 = vld [vmem:[#allocation7_spill] sm:$0xff] }
 0x1e1   : > { %3103 = vst [vmem:[%s4555_s23 + $0x20] sm:$0xff] %v3773_v22  ;;  %v2988_v12 = vmax.f32 %v2956_v0, 0.0  ;;  %v2908_v14 = vmax.f32 %v2231_v6, %v2721_v33  ;;  %v2963_v5 = vadd.f32 %v4566_v11, %v2907_v24  ;;  %v2990_v53 = vmax.f32 %v2958_v30, 0.0  ;;  %v4727_v21 = vld [vmem:[#allocation8_spill] sm:$0xff]  ;;  %v4728_v35 = vld [vmem:[#allocation22_spill] sm:$0xff]  ;;  %v4729_v58 = vld [vmem:[#allocation9_spill] sm:$0xff] }
 0x1e2   : > { %3104 = vst [vmem:[%s4555_s23 + $0x28] sm:$0xff] %v3774_v29  ;;  %v2910_v49 = vmax.f32 %v2233_v26, %v2774_v40  ;;  %v2965_v28 = vadd.f32 %v4566_v11, %v2909_v59  ;;  %v1535_v57 = vmax.f32 %v4356_v55, %v4428_v34  ;;  %v1534_v15 = vmax.f32 %v4714_v60, %v4430_v37  ;;  %v4726_v34 = vld [vmem:[#allocation21_spill] sm:$0xff]  ;;  %v4730_v22 = vld [vmem:[#allocation30_spill] sm:$0xff]  ;;  %v4731_v25 = vld [vmem:[#allocation23_spill] sm:$0xff] }
 0x1e3   : > { %v3777_v27 = vpack.c.bf16 %v2988_v12, %v2987_v39  ;;  %v2964_v18 = vadd.f32 %v4566_v11, %v2908_v14  ;;  %v3778_v54 = vpack.c.bf16 %v2990_v53, %v2989_v48  ;;  %v2995_v46 = vmax.f32 %v2963_v5, 0.0  ;;  %v4732_v26 = vld [vmem:[#allocation10_spill] sm:$0xff]  ;;  %v4733_v30 = vld [vmem:[#allocation24_spill] sm:$0xff]  ;;  %v4734_v59 = vld [vmem:[#allocation11_spill] sm:$0xff] }
 0x1e4   : > { %v2966_v36 = vadd.f32 %v4566_v11, %v2910_v49  ;;  %v2997_v3 = vmax.f32 %v2965_v28, 0.0  ;;  %v1536_v1 = vmax.f32 %v4716_v4, %v4715_v16  ;;  %v1541_v19 = vmax.f32 %v4718_v17, %v4717_v9  ;;  %v4735_v39 = vld [vmem:[#allocation31_spill] sm:$0xff]  ;;  %v4736_v40 = vld [vmem:[#allocation25_spill] sm:$0xff]  ;;  %v4737_v48 = vld [vmem:[#allocation12_spill] sm:$0xff] }
 0x1e5   : > { %3107 = vst [vmem:[%s4555_s23 + $0x40] sm:$0xff] %v3777_v27  ;;  %v2996_v56 = vmax.f32 %v2964_v18, 0.0  ;;  %3108 = vst [vmem:[%s4555_s23 + $0x48] sm:$0xff] %v3778_v54  ;;  %v1543_v8 = vmax.f32 %v4720_v63, %v4719_v23  ;;  %v1542_v61 = vmax.f32 %v4722_v45, %v4721_v20  ;;  %v2210_v52 = vmax.f32 %v1533_v50, %v4723_v7  ;;  %v4738_v49 = vld [vmem:[#allocation26_spill] sm:$0xff]  ;;  %v4739_v28 = vld [vmem:[#allocation13_spill] sm:$0xff] }
 0x1e6   : > { %v2998_v43 = vmax.f32 %v2966_v36, 0.0  ;;  %v1544_v55 = vmax.f32 %v4725_v31, %v4724_v32  ;;  %v1549_v37 = vmax.f32 %v4727_v21, %v4726_v34  ;;  %v1551_v6 = vmax.f32 %v4729_v58, %v4728_v35  ;;  %v4741_v50 = vld [vmem:[#allocation33_spill] sm:$0xff]  ;;  %v4742_v60 = vld [vmem:[#allocation34_spill] sm:$0xff]  ;;  %v4744_v63 = vld [vmem:[#allocation36_spill] sm:$0xff] }
 0x1e7   : > { %v3781_v38 = vpack.c.bf16 %v2996_v56, %v2995_v46  ;;  %v2212_v0 = vmax.f32 %v1535_v57, %v4730_v22  ;;  %v1550_v29 = vmax.f32 %v4732_v26, %v4731_v25  ;;  %v1552_v33 = vmax.f32 %v4734_v59, %v4733_v30  ;;  %v4740_v46 = vld [vmem:[#allocation32_spill] sm:$0xff]  ;;  %v4745_v20 = vld [vmem:[#allocation37_spill] sm:$0xff]  ;;  %v4746_v22 = vld [vmem:[#allocation38_spill] sm:$0xff] }
 0x1e8   : > { %v3782_v47 = vpack.c.bf16 %v2998_v43, %v2997_v3  ;;  %v2211_v12 = vmax.f32 %v1534_v15, %v4735_v39  ;;  %v1557_v53 = vmax.f32 %v4737_v48, %v4736_v40  ;;  %v1559_v27 = vmax.f32 %v4739_v28, %v4738_v49 }
 0x1e9   : > { %3111 = vst [vmem:[%s4555_s23 + $0x60] sm:$0xff] %v3781_v38  ;;  %v2213_v18 = vmax.f32 %v1536_v1, %v4480_v42  ;;  %v2218_v56 = vmax.f32 %v1541_v19, %v4740_v46  ;;  %v2220_v3 = vmax.f32 %v1543_v8, %v4484_v41  ;;  %v2219_v57 = vmax.f32 %v1542_v61, %v4741_v50  ;;  %v4743_v1 = vld [vmem:[#allocation35_spill] sm:$0xff] }
 0x1ea   : > { %3112 = vst [vmem:[%s4555_s23 + $0x68] sm:$0xff] %v3782_v47  ;;  %v2221_v15 = vmax.f32 %v1544_v55, %v4742_v60  ;;  %v2226_v42 = vmax.f32 %v1549_v37, %v4490_v62  ;;  %v2228_v17 = vmax.f32 %v1551_v6, %v4743_v1  ;;  %v2227_v8 = vmax.f32 %v1550_v29, %v4744_v63  ;;  %v4747_v29 = vld [vmem:[#allocation39_spill] sm:$0xff] }
 0x1eb   : > { %v2229_v45 = vmax.f32 %v1552_v33, %v4745_v20  ;;  %v2236_v30 = vmax.f32 %v1559_v27, %v4747_v29  ;;  %v4751_v50 = vld [vmem:[#allocation15_spill] sm:$0xff] }
 0x1f6   : > { %v2811_v24 = vpop.f32.mrf.mxu0  ;;  %v2864_v5 = vpop.f32.mrf.mxu1 }
 0x1f7   : > { %v2887_v14 = vmax.f32 %v2210_v52, %v2811_v24  ;;  %v2889_v54 = vmax.f32 %v2212_v0, %v2864_v5  ;;  %v2234_v0 = vmax.f32 %v1557_v53, %v4746_v22 }
 0x1f8   : > { %v2813_v36 = vpop.f32.mrf.mxu0  ;;  %v2866_v47 = vpop.f32.mrf.mxu1 }
 0x1f9   : > { %v2943_v43 = vadd.f32 %v4516_v2, %v2887_v14  ;;  %v2888_v38 = vmax.f32 %v2211_v12, %v2813_v36  ;;  %v2945_v16 = vadd.f32 %v4516_v2, %v2889_v54  ;;  %v2890_v4 = vmax.f32 %v2213_v18, %v2866_v47  ;;  %v4748_v36 = vld [vmem:[#allocation14_spill] sm:$0xff] }
 0x1fa   : > { %v2815_v9 = vpop.f32.mrf.mxu0  ;;  %v2868_v41 = vpop.f32.mrf.mxu1 }
 0x1fb   : > { %v2944_v19 = vadd.f32 %v4516_v2, %v2888_v38  ;;  %v2895_v23 = vmax.f32 %v2218_v56, %v2815_v9  ;;  %v2946_v61 = vadd.f32 %v4516_v2, %v2890_v4  ;;  %v2897_v7 = vmax.f32 %v2220_v3, %v2868_v41 }
 0x1fc   : > { %v2817_v52 = vpop.f32.mrf.mxu0  ;;  %v2975_v32 = vmax.f32 %v2943_v43, 0.0  ;;  %v2870_v62 = vpop.f32.mrf.mxu1  ;;  %v2977_v21 = vmax.f32 %v2945_v16, 0.0 }
 0x1fd   : > { %v2976_v31 = vmax.f32 %v2944_v19, 0.0  ;;  %v2951_v55 = vadd.f32 %v4542_v44, %v2895_v23  ;;  %v2896_v34 = vmax.f32 %v2219_v57, %v2817_v52  ;;  %v2978_v37 = vmax.f32 %v2946_v61, 0.0  ;;  %v4752_v57 = vld [vmem:[#allocation28_spill] sm:$0xff] }
 0x1fe   : > { %v2953_v35 = vadd.f32 %v4542_v44, %v2897_v7  ;;  %v2898_v58 = vmax.f32 %v2221_v15, %v2870_v62  ;;  %v2821_v6 = vpop.f32.mrf.mxu0  ;;  %v2874_v26 = vpop.f32.mrf.mxu1  ;;  %v4753_v60 = vmax.f32 %v4751_v50, %v4752_v57 }
 0x1ff   : > { %v3771_v24 = vpack.c.bf16 %v2976_v31, %v2975_v32  ;;  %v2952_v2 = vadd.f32 %v4542_v44, %v2896_v34  ;;  %v2903_v25 = vmax.f32 %v2226_v42, %v2821_v6  ;;  %v3772_v59 = vpack.c.bf16 %v2978_v37, %v2977_v21 }
 0x200   : > { %v2954_v33 = vadd.f32 %v4542_v44, %v2898_v58  ;;  %v2905_v39 = vmax.f32 %v2228_v17, %v2874_v26  ;;  %v2823_v12 = vpop.f32.mrf.mxu0  ;;  %v2983_v14 = vmax.f32 %v2951_v55, 0.0  ;;  %v2876_v53 = vpop.f32.mrf.mxu1  ;;  %v2985_v49 = vmax.f32 %v2953_v35, 0.0  ;;  %v4749_v44 = vld [vmem:[#allocation27_spill] sm:$0xff] }
 0x201   : > { %3101 = vst [vmem:[%s4555_s23 + $0x10] sm:$0xff] %v3771_v24  ;;  %v2984_v5 = vmax.f32 %v2952_v2, 0.0  ;;  %v2959_v40 = vadd.f32 %v4549_v51, %v2903_v25  ;;  %v2904_v48 = vmax.f32 %v2227_v8, %v2823_v12  ;;  %3102 = vst [vmem:[%s4555_s23 + $0x18] sm:$0xff] %v3772_v59  ;;  %v2906_v54 = vmax.f32 %v2229_v45, %v2876_v53 }
 0x202   : > { %v2986_v28 = vmax.f32 %v2954_v33, 0.0  ;;  %v2961_v18 = vadd.f32 %v4549_v51, %v2905_v39  ;;  %v2825_v27 = vpop.f32.mrf.mxu0  ;;  %v4750_v46 = vmax.f32 %v4748_v36, %v4749_v44  ;;  %v2878_v47 = vpop.f32.mrf.mxu1  ;;  %v2237_v15 = vmax.f32 %v4753_v60, %v4524_v13 }
 0x203   : > { %v3775_v3 = vpack.c.bf16 %v2984_v5, %v2983_v14  ;;  %v2960_v43 = vadd.f32 %v4549_v51, %v2904_v48  ;;  %v2911_v38 = vmax.f32 %v2234_v0, %v2825_v27  ;;  %v2962_v4 = vadd.f32 %v4549_v51, %v2906_v54 }
 0x204   : > { %v2235_v56 = vmax.f32 %v4750_v46, %v4514_v10  ;;  %v3776_v16 = vpack.c.bf16 %v2986_v28, %v2985_v49  ;;  %v2913_v9 = vmax.f32 %v2236_v30, %v2878_v47  ;;  %v2827_v42 = vpop.f32.mrf.mxu0  ;;  %v2991_v1 = vmax.f32 %v2959_v40, 0.0  ;;  %v2880_v23 = vpop.f32.mrf.mxu1 }
 0x205   : > { %3105 = vst [vmem:[%s4555_s23 + $0x30] sm:$0xff] %v3775_v3  ;;  %v2992_v10 = vmax.f32 %v2960_v43, 0.0  ;;  %v2967_v17 = vadd.f32 %v4566_v11, %v2911_v38  ;;  %v2993_v41 = vmax.f32 %v2961_v18, 0.0  ;;  %v2994_v63 = vmax.f32 %v2962_v4, 0.0 }
 0x206   : > { %v2912_v19 = vmax.f32 %v2235_v56, %v2827_v42  ;;  %3106 = vst [vmem:[%s4555_s23 + $0x38] sm:$0xff] %v3776_v16  ;;  %v2969_v13 = vadd.f32 %v4566_v11, %v2913_v9  ;;  %v2914_v8 = vmax.f32 %v2237_v15, %v2880_v23 }
 0x207   : > { %v3779_v51 = vpack.c.bf16 %v2992_v10, %v2991_v1  ;;  %v3780_v45 = vpack.c.bf16 %v2994_v63, %v2993_v41  ;;  %v2999_v7 = vmax.f32 %v2967_v17, 0.0 }
 0x208   : > { %v2968_v20 = vadd.f32 %v4566_v11, %v2912_v19  ;;  %v2970_v61 = vadd.f32 %v4566_v11, %v2914_v8  ;;  %v3001_v32 = vmax.f32 %v2969_v13, 0.0 }
 0x209   : > { %3109 = vst [vmem:[%s4555_s23 + $0x50] sm:$0xff] %v3779_v51  ;;  %3110 = vst [vmem:[%s4555_s23 + $0x58] sm:$0xff] %v3780_v45 }
 0x20a   : > { %v3000_v52 = vmax.f32 %v2968_v20, 0.0  ;;  %v3002_v31 = vmax.f32 %v2970_v61, 0.0 }
 0x20c   : > { %v3783_v55 = vpack.c.bf16 %v3000_v52, %v2999_v7  ;;  %v3784_v34 = vpack.c.bf16 %v3002_v31, %v3001_v32 }
 0x20e   : > { %3113 = vst [vmem:[%s4555_s23 + $0x70] sm:$0xff] %v3783_v55  ;;  %3114 = vst [vmem:[%s4555_s23 + $0x78] sm:$0xff] %v3784_v34 }
 0x20f PF: > { %s13_s14 = sadd.s32 1, %s3845_s14   ;;  %s4754_s12 = smov %s3841_s13 }
 0x210   : > { %p10_p5 = scmp.ge.s32.totalorder %s13_s14, 4   ;;  %s4755_s13 = smov %s4757_s15 }
 0x212   :  { %12 = sbr.rel (!%p10_p5) target bundleno = 2 (0x2), region = 65 }

// kernel: simple_cnn_forward.7
= control target key start
LH: loop header
LB: loop body
LE: loop exit
PB: predicated region body
PF: predicated region fallthrough
CT: control target
= control target key end

     0   :  { %v221_v1 = vmov 0.0   ;;  %vm222_vm0 = vmmov 0   ;;  %s312_s0 = inlined_call_operand.vmem [shape: f32[2,2,128], index: 0, kind: input, shape index: {}]   ;;  %s313_s1 = inlined_call_operand.vmem [shape: f32[1,128], index: 1, kind: input, shape index: {}]   ;;  %s314_s2 = inlined_call_operand.vmem [shape: f32[128,2], index: 2, kind: input, shape index: {}]   ;;  %s315_s3 = inlined_call_operand.vmem [shape: f32[1,2], index: 3, kind: input, shape index: {}]   ;;  %s316_s4 = inlined_call_operand.hbm [shape: f32[2,2], index: 4, kind: output, shape index: {}]  }
   0x1   :  { %v48_v0 = vld [vmem:[%s314_s2 + $0x78] sm:$0xff]  ;;  %161 = vmatprep.subr.mxu0 %v221_v1  ;;  %v47_v2 = vld [vmem:[%s314_s2 + $0x70] sm:$0xff]  ;;  %193 = vmatprep.mubr.msk.f32.mxu0 %vm222_vm0, %v221_v1  ;;  %v46_v3 = vld [vmem:[%s314_s2 + $0x68] sm:$0xff] }
   0x2   :  { %162 = vmatpush3.msra.mxu0 %v48_v0  ;;  %v45_v4 = vld [vmem:[%s314_s2 + $0x60] sm:$0xff]  ;;  %v44_v5 = vld [vmem:[%s314_s2 + $0x58] sm:$0xff] }
   0x3   :  { %163 = vmatprep.subr.mxu0 %v221_v1 }
   0x4   :  { %164 = vmatpush3.msra.mxu0 %v47_v2 }
   0x5   :  { %165 = vmatprep.subr.mxu0 %v221_v1 }
   0x6   :  { %166 = vmatpush3.msra.mxu0 %v46_v3 }
   0x7   :  { %167 = vmatprep.subr.mxu0 %v221_v1 }
   0x8   :  { %9 = vsyncpa [#allocation3], 0  ;;  %168 = vmatpush3.msra.mxu0 %v45_v4  ;;  %v43_v6 = vld [vmem:[%s314_s2 + $0x50] sm:$0xff]  ;;  %v42_v7 = vld [vmem:[%s314_s2 + $0x48] sm:$0xff]  ;;  %vm20_vm1 = vcmask 1041408   ;;  %s223_s27 = smov [#allocation2]  }
   0x9   :  { %169 = vmatprep.subr.mxu0 %v221_v1  ;;  %v41_v8 = vld [vmem:[%s314_s2 + $0x40] sm:$0xff]  ;;  %v40_v9 = vld [vmem:[%s314_s2 + $0x38] sm:$0xff]  ;;  %v39_v12 = vld [vmem:[%s314_s2 + $0x30] sm:$0xff]  ;;  %s134_s28 = sshll.u32 %s223_s27, 4  ;;  %vm126_vm2 = vcmask 9216   ;;  %s135_s28 = int_to_ptr.vmem [resolvable:$true] %s134_s28 }
   0xa   :  { %170 = vmatpush3.msra.mxu0 %v44_v5  ;;  %v18_v10 = vld [vmem:[%s312_s0] sm:$0x3]  ;;  %v19_v11 = vld [vmem:[%s312_s0 + $0x2] sm:$0x3]  ;;  %v38_v15 = vld [vmem:[%s314_s2 + $0x28] sm:$0xff]  ;;  %s199_s29 = scalar_lea.vmem %s135_s28, 32  ;;  %p204_p1 = scmp.lt.s32.totalorder %s135_s28, %s135_s28 }
   0xb   :  { %171 = vmatprep.subr.mxu0 %v221_v1  ;;  %v21_v13 = vsel %vm20_vm1, %v18_v10, 0.0  ;;  %v22_v14 = vsel %vm20_vm1, %v19_v11, 0.0  ;;  %v37_v16 = vld [vmem:[%s314_s2 + $0x20] sm:$0xff]  ;;  %v36_v19 = vld [vmem:[%s314_s2 + $0x18] sm:$0xff]  ;;  %v35_v20 = vld [vmem:[%s314_s2 + $0x10] sm:$0xff]  ;;  %p200_p0 = scmp.ne.s32.totalorder %s135_s28, %s199_s29  ;;  %p205_p2 = scmp.lt.s32.totalorder %s199_s29, %s199_s29 }
   0xc   :  { %172 = vmatpush3.msra.mxu0 %v43_v6  ;;  %v23_v17 = vadd.f32 %v22_v14, %v21_v13  ;;  %v142_v18 = vld [vmem:[%s313_s1] ss:$0 sm:$0xff]  ;;  %v34_v22 = vld [vmem:[%s314_s2 + $0x8] sm:$0xff] }
   0xd   :  { %173 = vmatprep.subr.mxu0 %v221_v1  ;;  %v33_v23 = vld [vmem:[%s314_s2] sm:$0xff]  ;;  %p206_p3 = por %p205_p2, %p204_p1 }
   0xe   :  { %174 = vmatpush3.msra.mxu0 %v42_v7  ;;  %v31_v21 = vadd.f32 %v142_v18, %v23_v17  ;;  %v143_v25 = vld [vmem:[%s315_s3] ss:$0 sm:$0xff] }
   0xf   :  { %175 = vmatprep.subr.mxu0 %v221_v1  ;;  %p207_p4 = pnand %p206_p3, %p200_p0 }
  0x10   :  { %176 = vmatpush3.msra.mxu0 %v41_v8  ;;  %v32_v24 = vmax.f32 %v31_v21, 0.0 }
  0x11   :  { %177 = vmatprep.subr.mxu0 %v221_v1 }
  0x12   :  { %178 = vmatpush3.msra.mxu0 %v40_v9 }
  0x13   :  { %179 = vmatprep.subr.mxu0 %v221_v1 }
  0x14   :  { %180 = vmatpush3.msra.mxu0 %v39_v12 }
  0x15   :  { %181 = vmatprep.subr.mxu0 %v221_v1 }
  0x16   :  { %182 = vmatpush3.msra.mxu0 %v38_v15 }
  0x17   :  { %183 = vmatprep.subr.mxu0 %v221_v1 }
  0x18   :  { %184 = vmatpush3.msra.mxu0 %v37_v16 }
  0x19   :  { %185 = vmatprep.subr.mxu0 %v221_v1 }
  0x1a   :  { %186 = vmatpush3.msra.mxu0 %v36_v19 }
  0x1b   :  { %187 = vmatprep.subr.mxu0 %v221_v1 }
  0x1c   :  { %188 = vmatpush3.msra.mxu0 %v35_v20 }
  0x1d   :  { %189 = vmatprep.subr.mxu0 %v221_v1 }
  0x1e   :  { %190 = vmatpush3.msra.mxu0 %v34_v22 }
  0x1f   :  { %191 = vmatprep.subr.mxu0 %v221_v1 }
  0x20   :  { %192 = vmatpush3.msra.mxu0 %v33_v23 }
  0x21   :  { %194 = vmatmul.mubr.f32.vlgmr.msra.gmra.mxu0 %v32_v24 }
  0xe1   :  { %v122_v26 = vpop.f32.mrf.mxu0 }
  0xe2   :  { %v123_v27 = vadd.f32 %v143_v25, %v122_v26 }
  0xe3   :  { %v195_v28 = vpop.f32.mrf.mxu0 }
  0xe4   :  { %127 = vst.msk [vmem:[#allocation2] sm:$0x3] %vm126_vm2, %v123_v27 }
  0xe5   :  { %210 = shalt.err (!%p207_p4)
}
  0xe6   :  { %137 = dma.vmem_to_hbm [thread:$0]  %s135_s28, 32, %s316_s4, [#allocation3]  }
  0xe7   :  { %219 = dma.done.wait [#allocation3], 32  }
  0xe8   :  { %220 = vsyncadd [#allocation3], 4294967264 }
  0xe9   :  { %141 = vsyncpa [#allocation3], 1 }

// kernel: simple_cnn_forward.6
= control target key start
LH: loop header
LB: loop body
LE: loop exit
PB: predicated region body
PF: predicated region fallthrough
CT: control target
= control target key end

     0   :  { %s15439_s9 = smov 0   ;;  %s16759_s0 = inlined_call_operand.vmem [shape: bf16[2,32768], index: 0, kind: input, shape index: {}]   ;;  %s16760_s1 = inlined_call_operand.vmem [shape: bf16[32768,128], index: 1, kind: input, shape index: {}]   ;;  %s16761_s2 = inlined_call_operand.vmem [shape: f32[2,2,128], index: 2, kind: output, shape index: {}]  }
   0x1 LB: > { %s15445_s10 = sadd.s32 4294967295, %s15421_s9   ;;  %p11927_p0 = scmp.ge.s32.totalorder %s15421_s9, 1  ;;  %s15421_s9 = sphi %s15439_s9, %s12_s9  }
   0x2   : > { %p123_p1 = scmp.lt.s32.totalorder %s15421_s9, 3 }
   0x4   : > { %p124_p2 = pnand %p11927_p0, %p123_p1 }
   0x5   : > { %s11929_s11 = sshll.u32 (!%p124_p2), %s15445_s10, 11  ;;  %s11928_s16 = sshll.u32 (!%p124_p2), %s15445_s10, 7 }
   0x6   : > { %127 = sbr.rel (%p124_p2) target bundleno = 1242 (0x4da), region = 28  ;;  %p154_p3 = scmp.lt.s32.totalorder (!%p124_p2), %s11929_s11, 4095 }
   0x7   : > { %p149_p4 = scmp.lt.s32.totalorder (!%p124_p2), %s11928_s16, 255  ;;  %p159_p5 = scmp.lt.s32.totalorder (!%p124_p2), %s15445_s10, 1 }
   0xb   : > { %s16763_s11 = smov (!%p154_p3, %s11929_s11), 4095  ;;  %v2248_v21 = vlaneseq  ;;  %v15423_v23 = vmov 1966171168   ;;  %s16765_s16 = smov (!%p149_p4, %s11928_s16), 255 }
   0xc   : > { %s11930_s12 = sshll.u32 %s16763_s11, 2  ;;  %v2246_v24 = vunpack.c.l.s4 %v15423_v23  ;;  %s15489_s19 = scalar_lea.vmem %s16759_s0, %s16765_s16 }
   0xd   : > { %s15453_s15 = scalar_lea.vmem %s16760_s1, %s11930_s12  ;;  %v2249_v28 = vshrl.u32 %v2248_v21, 7  ;;  %v164_v38 = vld [vmem:[%s15489_s19] sm:$0xff]  ;;  %s16767_s10 = smov (!%p159_p5, %s15445_s10), 1 }
   0xe   : > { %v14375_v0 = vld [vmem:[%s15453_s15 + $0x78] sm:$0xff]   ;;  %v14379_v4 = vld [vmem:[%s15453_s15 + $0x70] sm:$0xff]   ;;  %v14383_v8 = vld [vmem:[%s15453_s15 + $0x68] sm:$0xff]   ;;  %v2247_v30 = vunpack.c.0.s8 %v2246_v24  ;;  %v2244_v39 = vcombine.high %v164_v38, %v164_v38  ;;  %s11931_s20 = sshll.u32 %s16767_s10, 1 }
   0xf   : > { %v14376_v1 = vld [vmem:[%s15453_s15 + $0xf8] sm:$0xff]   ;;  %12958 = vmatprep.subr.bf16.mxu0 %v14375_v0  ;;  %v14380_v5 = vld [vmem:[%s15453_s15 + $0xf0] sm:$0xff]   ;;  %v14384_v9 = vld [vmem:[%s15453_s15 + $0xe8] sm:$0xff]   ;;  %s162_s23 = scalar_lea.vmem %s16761_s2, %s11931_s20 }
  0x10   : > { %v14377_v2 = vld [vmem:[%s15453_s15 + $0x38] sm:$0xff]   ;;  %12980 = vmatprep.subr.bf16.mxu1 %v14376_v1  ;;  %v14381_v6 = vld [vmem:[%s15453_s15 + $0x30] sm:$0xff]   ;;  %v14385_v10 = vld [vmem:[%s15453_s15 + $0x28] sm:$0xff]   ;;  %v15491_v35 = vsub.s32 %v2247_v30, %v2249_v28 }
  0x11   : > { %v14378_v3 = vld [vmem:[%s15453_s15 + $0xb8] sm:$0xff]   ;;  %12959 = vmatpush3.bf16.msra.mxu0 %v14377_v2  ;;  %v14382_v7 = vld [vmem:[%s15453_s15 + $0xb0] sm:$0xff]   ;;  %v14386_v11 = vld [vmem:[%s15453_s15 + $0xa8] sm:$0xff]  }
  0x12   : > { %12981 = vmatpush3.bf16.msra.mxu1 %v14378_v3  ;;  %12960 = vmatprep.subr.bf16.mxu0 %v14379_v4  ;;  %v14387_v12 = vld [vmem:[%s15453_s15 + $0x60] sm:$0xff]   ;;  %v14391_v16 = vld [vmem:[%s15453_s15 + $0x58] sm:$0xff]   ;;  %v14395_v20 = vld [vmem:[%s15453_s15 + $0x50] sm:$0xff]   ;;  %v2251_v40 = vrot.slane %v164_v38, %v15491_v35  ;;  %v15501_v45 = vrot.slane %v2244_v39, %v15491_v35 }
  0x13   : > { %12982 = vmatprep.subr.bf16.mxu1 %v14380_v5  ;;  %v14388_v13 = vld [vmem:[%s15453_s15 + $0xe0] sm:$0xff]   ;;  %v14392_v17 = vld [vmem:[%s15453_s15 + $0xd8] sm:$0xff]   ;;  %v14396_v22 = vld [vmem:[%s15453_s15 + $0xd0] sm:$0xff]  }
  0x14   : > { %v14389_v14 = vld [vmem:[%s15453_s15 + $0x20] sm:$0xff]   ;;  %v14393_v18 = vld [vmem:[%s15453_s15 + $0x18] sm:$0xff]   ;;  %v14397_v25 = vld [vmem:[%s15453_s15 + $0x10] sm:$0xff]   ;;  %v2259_v43 = vcombine.high %v2251_v40, %v2251_v40  ;;  %v2267_v44 = vrot.slane %v2251_v40, %v15491_v35  ;;  %v2260_v49 = vcombine.high %v15501_v45, %v15501_v45 }
  0x15   : > { %12961 = vmatpush3.bf16.msra.mxu0 %v14381_v6  ;;  %v14390_v15 = vld [vmem:[%s15453_s15 + $0xa0] sm:$0xff]   ;;  %v14394_v19 = vld [vmem:[%s15453_s15 + $0x98] sm:$0xff]   ;;  %v14398_v26 = vld [vmem:[%s15453_s15 + $0x90] sm:$0xff]  }
  0x16   : > { %12983 = vmatpush3.bf16.msra.mxu1 %v14382_v7  ;;  %12962 = vmatprep.subr.bf16.mxu0 %v14383_v8  ;;  %v14399_v27 = vld [vmem:[%s15453_s15 + $0x48] sm:$0xff]   ;;  %v14403_v33 = vld [vmem:[%s15453_s15 + $0x40] sm:$0xff]   ;;  %v14408_v41 = vld [vmem:[%s15453_s15 + $0x178] sm:$0xff]   ;;  %v2281_v47 = vrot.slane %v2259_v43, %v15491_v35  ;;  %v2289_v50 = vcombine.high %v2267_v44, %v2267_v44  ;;  %v2288_v54 = vrot.slane %v2260_v49, %v15491_v35 }
  0x17   : > { %12984 = vmatprep.subr.bf16.mxu1 %v14384_v9  ;;  %v14400_v29 = vld [vmem:[%s15453_s15 + $0xc8] sm:$0xff]   ;;  %v14404_v34 = vld [vmem:[%s15453_s15 + $0xc0] sm:$0xff]   ;;  %v14409_v42 = vld [vmem:[%s15453_s15 + $0x1f8] sm:$0xff]  }
  0x18   : > { %v14401_v31 = vld [vmem:[%s15453_s15 + $0x8] sm:$0xff]   ;;  %v14405_v36 = vld [vmem:[%s15453_s15] sm:$0xff]   ;;  %v14410_v46 = vld [vmem:[%s15453_s15 + $0x138] sm:$0xff]   ;;  %9332 = vmatprep.mubr.bf16.mxu0 %v2281_v47  ;;  %v2291_v52 = vcombine.high %v2281_v47, %v2281_v47  ;;  %v2292_v57 = vcombine.high %v2288_v54, %v2288_v54 }
  0x19   : > { %12963 = vmatpush3.bf16.msra.mxu0 %v14385_v10  ;;  %v14402_v32 = vld [vmem:[%s15453_s15 + $0x88] sm:$0xff]   ;;  %v14406_v37 = vld [vmem:[%s15453_s15 + $0x80] sm:$0xff]   ;;  %v14411_v48 = vld [vmem:[%s15453_s15 + $0x1b8] sm:$0xff]  }
  0x1a   : > { %12985 = vmatpush3.bf16.msra.mxu1 %v14386_v11  ;;  %12964 = vmatprep.subr.bf16.mxu0 %v14387_v12  ;;  %v14412_v51 = vld [vmem:[%s15453_s15 + $0x170] sm:$0xff]   ;;  %v14416_v58 = vld [vmem:[%s15453_s15 + $0x168] sm:$0xff]   ;;  %v14420_v62 = vld [vmem:[%s15453_s15 + $0x160] sm:$0xff]  }
  0x1b   : > { %12986 = vmatprep.subr.bf16.mxu1 %v14388_v13  ;;  %v14413_v53 = vld [vmem:[%s15453_s15 + $0x1f0] sm:$0xff]   ;;  %9372 = vmatprep.mubr.bf16.mxu1 %v2291_v52  ;;  %v14417_v59 = vld [vmem:[%s15453_s15 + $0x1e8] sm:$0xff]   ;;  %v14421_v63 = vld [vmem:[%s15453_s15 + $0x1e0] sm:$0xff]  }
  0x1c   : > { %v14414_v55 = vld [vmem:[%s15453_s15 + $0x130] sm:$0xff]   ;;  %v14418_v60 = vld [vmem:[%s15453_s15 + $0x128] sm:$0xff]   ;;  %v14422_v0 = vld [vmem:[%s15453_s15 + $0x120] sm:$0xff]  }
  0x1d   : > { %12965 = vmatpush3.bf16.msra.mxu0 %v14389_v14  ;;  %v14415_v56 = vld [vmem:[%s15453_s15 + $0x1b0] sm:$0xff]   ;;  %v14419_v61 = vld [vmem:[%s15453_s15 + $0x1a8] sm:$0xff]   ;;  %v14423_v1 = vld [vmem:[%s15453_s15 + $0x1a0] sm:$0xff]  }
  0x1e   : > { %12987 = vmatpush3.bf16.msra.mxu1 %v14390_v15  ;;  %12966 = vmatprep.subr.bf16.mxu0 %v14391_v16  ;;  %v14424_v2 = vld [vmem:[%s15453_s15 + $0x158] sm:$0xff]   ;;  %v14428_v6 = vld [vmem:[%s15453_s15 + $0x150] sm:$0xff]   ;;  %v14432_v10 = vld [vmem:[%s15453_s15 + $0x148] sm:$0xff]  }
  0x1f   : > { %12988 = vmatprep.subr.bf16.mxu1 %v14392_v17  ;;  %v14425_v3 = vld [vmem:[%s15453_s15 + $0x1d8] sm:$0xff]   ;;  %v14429_v7 = vld [vmem:[%s15453_s15 + $0x1d0] sm:$0xff]   ;;  %v14433_v11 = vld [vmem:[%s15453_s15 + $0x1c8] sm:$0xff]  }
  0x20   : > { %v14426_v4 = vld [vmem:[%s15453_s15 + $0x118] sm:$0xff]   ;;  %v14430_v8 = vld [vmem:[%s15453_s15 + $0x110] sm:$0xff]   ;;  %v14434_v12 = vld [vmem:[%s15453_s15 + $0x108] sm:$0xff]  }
  0x21   : > { %12967 = vmatpush3.bf16.msra.mxu0 %v14393_v18  ;;  %v14427_v5 = vld [vmem:[%s15453_s15 + $0x198] sm:$0xff]   ;;  %v14431_v9 = vld [vmem:[%s15453_s15 + $0x190] sm:$0xff]   ;;  %v14435_v13 = vld [vmem:[%s15453_s15 + $0x188] sm:$0xff]   ;;  %v2274_v18 = vrot.slane %v15501_v45, %v15491_v35 }
  0x22   : > { %12989 = vmatpush3.bf16.msra.mxu1 %v14394_v19  ;;  %12968 = vmatprep.subr.bf16.mxu0 %v14395_v20  ;;  %v14436_v14 = vld [vmem:[%s15453_s15 + $0x140] sm:$0xff]   ;;  %v14440_v19 = vld [vmem:[%s15453_s15 + $0x278] sm:$0xff]   ;;  %v14444_v24 = vld [vmem:[%s15453_s15 + $0x270] sm:$0xff]  }
  0x23   : > { %12990 = vmatprep.subr.bf16.mxu1 %v14396_v22  ;;  %v14437_v15 = vld [vmem:[%s15453_s15 + $0x1c0] sm:$0xff]   ;;  %v14441_v20 = vld [vmem:[%s15453_s15 + $0x2f8] sm:$0xff]   ;;  %v2290_v23 = vcombine.high %v2274_v18, %v2274_v18  ;;  %v14448_v28 = vld [vmem:[%s15453_s15 + $0x268] sm:$0xff]  }
  0x24   : > { %v14438_v16 = vld [vmem:[%s15453_s15 + $0x100] sm:$0xff]   ;;  %v14442_v21 = vld [vmem:[%s15453_s15 + $0x238] sm:$0xff]   ;;  %v14450_v30 = vld [vmem:[%s15453_s15 + $0x228] sm:$0xff]  }
  0x25   : > { %12969 = vmatpush3.bf16.msra.mxu0 %v14397_v25  ;;  %v14439_v17 = vld [vmem:[%s15453_s15 + $0x180] sm:$0xff]   ;;  %v14443_v22 = vld [vmem:[%s15453_s15 + $0x2b8] sm:$0xff]   ;;  %v14445_v25 = vld [vmem:[%s15453_s15 + $0x2f0] sm:$0xff]  }
  0x26   : > { %12991 = vmatpush3.bf16.msra.mxu1 %v14398_v26  ;;  %12970 = vmatprep.subr.bf16.mxu0 %v14399_v27  ;;  %v14446_v26 = vld [vmem:[%s15453_s15 + $0x230] sm:$0xff]   ;;  %v14457_v38 = vld [vmem:[%s15453_s15 + $0x2d8] sm:$0xff]   ;;  %v14464_v45 = vld [vmem:[%s15453_s15 + $0x248] sm:$0xff]  }
  0x27   : > { %12992 = vmatprep.subr.bf16.mxu1 %v14400_v29  ;;  %v14447_v27 = vld [vmem:[%s15453_s15 + $0x2b0] sm:$0xff]   ;;  %v14449_v29 = vld [vmem:[%s15453_s15 + $0x2e8] sm:$0xff]   ;;  %v14458_v39 = vld [vmem:[%s15453_s15 + $0x218] sm:$0xff]  }
  0x28   : > { %v14459_v40 = vld [vmem:[%s15453_s15 + $0x298] sm:$0xff]   ;;  %v14462_v43 = vld [vmem:[%s15453_s15 + $0x210] sm:$0xff]   ;;  %v14466_v47 = vld [vmem:[%s15453_s15 + $0x208] sm:$0xff]  }
  0x29   : > { %12971 = vmatpush3.bf16.msra.mxu0 %v14401_v31  ;;  %v14451_v31 = vld [vmem:[%s15453_s15 + $0x2a8] sm:$0xff]   ;;  %v14468_v49 = vld [vmem:[%s15453_s15 + $0x240] sm:$0xff]  }
  0x2a   : > { %12993 = vmatpush3.bf16.msra.mxu1 %v14402_v32  ;;  %12972 = vmatprep.subr.bf16.mxu0 %v14403_v33  ;;  %v14452_v32 = vld [vmem:[%s15453_s15 + $0x260] sm:$0xff]   ;;  %v165_v52 = vld [vmem:[%s15489_s19 + $0x8] sm:$0xff] }
  0x2b   : > { %12994 = vmatprep.subr.bf16.mxu1 %v14404_v34  ;;  %v14453_v33 = vld [vmem:[%s15453_s15 + $0x2e0] sm:$0xff]  }
  0x2c   : > { %v14454_v34 = vld [vmem:[%s15453_s15 + $0x220] sm:$0xff]  }
  0x2d   : > { %12973 = vmatpush3.bf16.msra.mxu0 %v14405_v36  ;;  %v14455_v36 = vld [vmem:[%s15453_s15 + $0x2a0] sm:$0xff]  }
  0x2e   : > { %12995 = vmatpush3.bf16.msra.mxu1 %v14406_v37  ;;  %13002 = vmatprep.subr.bf16.mxu0 %v14408_v41  ;;  %v14456_v37 = vld [vmem:[%s15453_s15 + $0x258] sm:$0xff]   ;;  %v14460_v41 = vld [vmem:[%s15453_s15 + $0x250] sm:$0xff]  }
  0x2f   : > { %13024 = vmatprep.subr.bf16.mxu1 %v14409_v42  ;;  %v14461_v42 = vld [vmem:[%s15453_s15 + $0x2d0] sm:$0xff]  }
  0x30   : > { %9333 = vmatmul.mubr.bf16.vlgmr.msra.gmra.mxu0 %v2267_v44  ;;  %v14463_v44 = vld [vmem:[%s15453_s15 + $0x290] sm:$0xff]  }
  0x31   : > { %13003 = vmatpush3.bf16.msra.mxu0 %v14410_v46  ;;  %9373 = vmatmul.mubr.bf16.vlgmr.msra.gmra.mxu1 %v2289_v50  ;;  %v14465_v46 = vld [vmem:[%s15453_s15 + $0x2c8] sm:$0xff]   ;;  %v14469_v50 = vld [vmem:[%s15453_s15 + $0x2c0] sm:$0xff]  }
  0x32   : > { %13004 = vmatprep.subr.bf16.mxu0 %v14412_v51  ;;  %13025 = vmatpush3.bf16.msra.mxu1 %v14411_v48  ;;  %v14467_v48 = vld [vmem:[%s15453_s15 + $0x288] sm:$0xff]   ;;  %v14470_v51 = vld [vmem:[%s15453_s15 + $0x200] sm:$0xff]  }
  0x33   : > { %9412 = vmatprep.mubr.bf16.mxu0 %v2288_v54  ;;  %13026 = vmatprep.subr.bf16.mxu1 %v14413_v53  ;;  %v14471_v53 = vld [vmem:[%s15453_s15 + $0x280] sm:$0xff]   ;;  %v2300_v54 = vrot.slane %v165_v52, %v15491_v35 }
  0x34   : > { %9452 = vmatprep.mubr.bf16.mxu1 %v2292_v57 }
  0x35   : > { %13005 = vmatpush3.bf16.msra.mxu0 %v14414_v55  ;;  %v2293_v55 = vcombine.high %v165_v52, %v165_v52  ;;  %v2308_v57 = vcombine.high %v2300_v54, %v2300_v54  ;;  %v14521_v52 = vld [vmem:[%s15453_s15 + $0x458] sm:$0xff]  }
  0x36   : > { %13006 = vmatprep.subr.bf16.mxu0 %v14416_v58  ;;  %13027 = vmatpush3.bf16.msra.mxu1 %v14415_v56  ;;  %v14472_v56 = vld [vmem:[%s15453_s15 + $0x378] sm:$0xff]   ;;  %v2316_v58 = vrot.slane %v2300_v54, %v15491_v35 }
  0x37   : > { %13028 = vmatprep.subr.bf16.mxu1 %v14417_v59  ;;  %v14473_v59 = vld [vmem:[%s15453_s15 + $0x3f8] sm:$0xff]  }
  0x38   : > { %v14523_v54 = vld [vmem:[%s15453_s15 + $0x418] sm:$0xff]  }
  0x39   : > { %13007 = vmatpush3.bf16.msra.mxu0 %v14418_v60  ;;  %v15577_v60 = vrot.slane %v2293_v55, %v15491_v35  ;;  %v14524_v55 = vld [vmem:[%s15453_s15 + $0x498] sm:$0xff]  }
  0x3a   : > { %13008 = vmatprep.subr.bf16.mxu0 %v14420_v62  ;;  %13029 = vmatpush3.bf16.msra.mxu1 %v14419_v61  ;;  %v14474_v61 = vld [vmem:[%s15453_s15 + $0x338] sm:$0xff]   ;;  %v2330_v62 = vrot.slane %v2308_v57, %v15491_v35  ;;  %v14526_v57 = vld [vmem:[%s15453_s15 + $0x4d0] sm:$0xff]  }
  0x3b   : > { %13030 = vmatprep.subr.bf16.mxu1 %v14421_v63  ;;  %v14475_v63 = vld [vmem:[%s15453_s15 + $0x3b8] sm:$0xff]  }
  0x3d   : > { %13009 = vmatpush3.bf16.msra.mxu0 %v14422_v0  ;;  %v2309_v0 = vcombine.high %v15577_v60, %v15577_v60 }
  0x3e   : > { %13010 = vmatprep.subr.bf16.mxu0 %v14424_v2  ;;  %13031 = vmatpush3.bf16.msra.mxu1 %v14423_v1  ;;  %v2338_v1 = vcombine.high %v2316_v58, %v2316_v58  ;;  %v14476_v2 = vld [vmem:[%s15453_s15 + $0x370] sm:$0xff]  }
  0x3f   : > { %13032 = vmatprep.subr.bf16.mxu1 %v14425_v3  ;;  %v2340_v3 = vcombine.high %v2330_v62, %v2330_v62 }
  0x41   : > { %13011 = vmatpush3.bf16.msra.mxu0 %v14426_v4  ;;  %v14477_v4 = vld [vmem:[%s15453_s15 + $0x3f0] sm:$0xff]  }
  0x42   : > { %13012 = vmatprep.subr.bf16.mxu0 %v14428_v6  ;;  %13033 = vmatpush3.bf16.msra.mxu1 %v14427_v5  ;;  %v2337_v5 = vrot.slane %v2309_v0, %v15491_v35  ;;  %v14478_v6 = vld [vmem:[%s15453_s15 + $0x330] sm:$0xff]   ;;  %v14533_v0 = vld [vmem:[%s15453_s15 + $0x440] sm:$0xff]  }
  0x43   : > { %13034 = vmatprep.subr.bf16.mxu1 %v14429_v7  ;;  %v14479_v7 = vld [vmem:[%s15453_s15 + $0x3b0] sm:$0xff]  }
  0x45   : > { %13013 = vmatpush3.bf16.msra.mxu0 %v14430_v8  ;;  %v2341_v8 = vcombine.high %v2337_v5, %v2337_v5 }
  0x46   : > { %13014 = vmatprep.subr.bf16.mxu0 %v14432_v10  ;;  %13035 = vmatpush3.bf16.msra.mxu1 %v14431_v9  ;;  %v14480_v9 = vld [vmem:[%s15453_s15 + $0x368] sm:$0xff]  }
  0x47   : > { %13036 = vmatprep.subr.bf16.mxu1 %v14433_v11  ;;  %v14481_v10 = vld [vmem:[%s15453_s15 + $0x3e8] sm:$0xff]  }
  0x48   : > { %v14482_v11 = vld [vmem:[%s15453_s15 + $0x328] sm:$0xff]  }
  0x49   : > { %13015 = vmatpush3.bf16.msra.mxu0 %v14434_v12  ;;  %v14483_v12 = vld [vmem:[%s15453_s15 + $0x3a8] sm:$0xff]  }
  0x4a   : > { %13016 = vmatprep.subr.bf16.mxu0 %v14436_v14  ;;  %13037 = vmatpush3.bf16.msra.mxu1 %v14435_v13  ;;  %v14484_v13 = vld [vmem:[%s15453_s15 + $0x360] sm:$0xff]  }
  0x4b   : > { %13038 = vmatprep.subr.bf16.mxu1 %v14437_v15  ;;  %v14485_v14 = vld [vmem:[%s15453_s15 + $0x3e0] sm:$0xff]  }
  0x4c   : > { %v14486_v15 = vld [vmem:[%s15453_s15 + $0x320] sm:$0xff]  }
  0x4d   : > { %13017 = vmatpush3.bf16.msra.mxu0 %v14438_v16  ;;  %v14487_v16 = vld [vmem:[%s15453_s15 + $0x3a0] sm:$0xff]  }
  0x4e   : > { %13046 = vmatprep.subr.bf16.mxu0 %v14440_v19  ;;  %13039 = vmatpush3.bf16.msra.mxu1 %v14439_v17  ;;  %v14488_v17 = vld [vmem:[%s15453_s15 + $0x358] sm:$0xff]  }
  0x4f   : > { %13068 = vmatprep.subr.bf16.mxu1 %v14441_v20  ;;  %v14490_v19 = vld [vmem:[%s15453_s15 + $0x318] sm:$0xff]  }
  0x50   : > { %9413 = vmatmul.mubr.bf16.vlgmr.msra.gmra.mxu0 %v2274_v18  ;;  %v14489_v18 = vld [vmem:[%s15453_s15 + $0x3d8] sm:$0xff]  }
  0x51   : > { %13047 = vmatpush3.bf16.msra.mxu0 %v14442_v21  ;;  %9453 = vmatmul.mubr.bf16.vlgmr.msra.gmra.mxu1 %v2290_v23  ;;  %v14491_v20 = vld [vmem:[%s15453_s15 + $0x398] sm:$0xff]   ;;  %v14492_v21 = vld [vmem:[%s15453_s15 + $0x350] sm:$0xff]  }
  0x52   : > { %13048 = vmatprep.subr.bf16.mxu0 %v14444_v24  ;;  %13069 = vmatpush3.bf16.msra.mxu1 %v14443_v22  ;;  %v14493_v22 = vld [vmem:[%s15453_s15 + $0x3d0] sm:$0xff]  }
  0x53   : > { %13070 = vmatprep.subr.bf16.mxu1 %v14445_v25  ;;  %9492 = vmatprep.mubr.bf16.mxu0 %v2330_v62  ;;  %v14494_v23 = vld [vmem:[%s15453_s15 + $0x310] sm:$0xff]   ;;  %v14496_v25 = vld [vmem:[%s15453_s15 + $0x348] sm:$0xff]  }
  0x54   : > { %9532 = vmatprep.mubr.bf16.mxu1 %v2340_v3  ;;  %v14495_v24 = vld [vmem:[%s15453_s15 + $0x390] sm:$0xff]   ;;  %v14531_v62 = vld [vmem:[%s15453_s15 + $0x408] sm:$0xff]  }
  0x55   : > { %13049 = vmatpush3.bf16.msra.mxu0 %v14446_v26  ;;  %v14497_v26 = vld [vmem:[%s15453_s15 + $0x3c8] sm:$0xff]   ;;  %v166_v3 = vld [vmem:[%s15489_s19 + $0x10] sm:$0xff] }
  0x56   : > { %13050 = vmatprep.subr.bf16.mxu0 %v14448_v28  ;;  %13071 = vmatpush3.bf16.msra.mxu1 %v14447_v27  ;;  %v14498_v27 = vld [vmem:[%s15453_s15 + $0x308] sm:$0xff]  }
  0x57   : > { %13072 = vmatprep.subr.bf16.mxu1 %v14449_v29  ;;  %v14499_v28 = vld [vmem:[%s15453_s15 + $0x388] sm:$0xff]   ;;  %v14500_v29 = vld [vmem:[%s15453_s15 + $0x340] sm:$0xff]  }
  0x59   : > { %13051 = vmatpush3.bf16.msra.mxu0 %v14450_v30  ;;  %v14501_v30 = vld [vmem:[%s15453_s15 + $0x3c0] sm:$0xff]  }
  0x5a   : > { %13052 = vmatprep.subr.bf16.mxu0 %v14452_v32  ;;  %13073 = vmatpush3.bf16.msra.mxu1 %v14451_v31  ;;  %v14502_v31 = vld [vmem:[%s15453_s15 + $0x300] sm:$0xff]  }
  0x5b   : > { %13074 = vmatprep.subr.bf16.mxu1 %v14453_v33  ;;  %v14503_v32 = vld [vmem:[%s15453_s15 + $0x380] sm:$0xff]   ;;  %v2323_v33 = vrot.slane %v15577_v60, %v15491_v35  ;;  %v14529_v60 = vld [vmem:[%s15453_s15 + $0x448] sm:$0xff]  }
  0x5d   : > { %13053 = vmatpush3.bf16.msra.mxu0 %v14454_v34  ;;  %v14505_v34 = vld [vmem:[%s15453_s15 + $0x478] sm:$0xff]  }
  0x5e   : > { %13054 = vmatprep.subr.bf16.mxu0 %v14456_v37  ;;  %13075 = vmatpush3.bf16.msra.mxu1 %v14455_v36  ;;  %v14506_v36 = vld [vmem:[%s15453_s15 + $0x4f8] sm:$0xff]  }
  0x5f   : > { %13076 = vmatprep.subr.bf16.mxu1 %v14457_v38  ;;  %v14507_v37 = vld [vmem:[%s15453_s15 + $0x438] sm:$0xff]  }
  0x60   : > { %v14508_v38 = vld [vmem:[%s15453_s15 + $0x4b8] sm:$0xff]  }
  0x61   : > { %13055 = vmatpush3.bf16.msra.mxu0 %v14458_v39  ;;  %v2339_v39 = vcombine.high %v2323_v33, %v2323_v33 }
  0x62   : > { %13056 = vmatprep.subr.bf16.mxu0 %v14460_v41  ;;  %13077 = vmatpush3.bf16.msra.mxu1 %v14459_v40  ;;  %v14509_v40 = vld [vmem:[%s15453_s15 + $0x470] sm:$0xff]  }
  0x63   : > { %13078 = vmatprep.subr.bf16.mxu1 %v14461_v42  ;;  %v14510_v41 = vld [vmem:[%s15453_s15 + $0x4f0] sm:$0xff]  }
  0x64   : > { %v14511_v42 = vld [vmem:[%s15453_s15 + $0x430] sm:$0xff]  }
  0x65   : > { %13057 = vmatpush3.bf16.msra.mxu0 %v14462_v43  ;;  %v14512_v43 = vld [vmem:[%s15453_s15 + $0x4b0] sm:$0xff]  }
  0x66   : > { %13058 = vmatprep.subr.bf16.mxu0 %v14464_v45  ;;  %13079 = vmatpush3.bf16.msra.mxu1 %v14463_v44  ;;  %v14513_v44 = vld [vmem:[%s15453_s15 + $0x468] sm:$0xff]  }
  0x67   : > { %13080 = vmatprep.subr.bf16.mxu1 %v14465_v46  ;;  %v14514_v45 = vld [vmem:[%s15453_s15 + $0x4e8] sm:$0xff]  }
  0x68   : > { %v14515_v46 = vld [vmem:[%s15453_s15 + $0x428] sm:$0xff]  }
  0x69   : > { %13059 = vmatpush3.bf16.msra.mxu0 %v14466_v47  ;;  %v14516_v47 = vld [vmem:[%s15453_s15 + $0x4a8] sm:$0xff]  }
  0x6a   : > { %13060 = vmatprep.subr.bf16.mxu0 %v14468_v49  ;;  %13081 = vmatpush3.bf16.msra.mxu1 %v14467_v48  ;;  %v14517_v48 = vld [vmem:[%s15453_s15 + $0x460] sm:$0xff]  }
  0x6b   : > { %13082 = vmatprep.subr.bf16.mxu1 %v14469_v50  ;;  %v14518_v49 = vld [vmem:[%s15453_s15 + $0x4e0] sm:$0xff]  }
  0x6c   : > { %v14519_v50 = vld [vmem:[%s15453_s15 + $0x420] sm:$0xff]  }
  0x6d   : > { %13061 = vmatpush3.bf16.msra.mxu0 %v14470_v51  ;;  %v14520_v51 = vld [vmem:[%s15453_s15 + $0x4a0] sm:$0xff]  }
  0x6e   : > { %13090 = vmatprep.subr.bf16.mxu0 %v14472_v56  ;;  %13083 = vmatpush3.bf16.msra.mxu1 %v14471_v53  ;;  %v14522_v53 = vld [vmem:[%s15453_s15 + $0x4d8] sm:$0xff]   ;;  %v14525_v56 = vld [vmem:[%s15453_s15 + $0x450] sm:$0xff]  }
  0x6f   : > { %13112 = vmatprep.subr.bf16.mxu1 %v14473_v59  ;;  %v14528_v59 = vld [vmem:[%s15453_s15 + $0x490] sm:$0xff]  }
  0x70   : > { %9493 = vmatmul.mubr.bf16.vlgmr.msra.gmra.mxu0 %v2316_v58  ;;  %v14527_v58 = vld [vmem:[%s15453_s15 + $0x410] sm:$0xff]  }
  0x71   : > { %13091 = vmatpush3.bf16.msra.mxu0 %v14474_v61  ;;  %9533 = vmatmul.mubr.bf16.vlgmr.msra.gmra.mxu1 %v2338_v1  ;;  %v14530_v61 = vld [vmem:[%s15453_s15 + $0x4c8] sm:$0xff]   ;;  %v14534_v1 = vld [vmem:[%s15453_s15 + $0x4c0] sm:$0xff]  }
  0x72   : > { %13092 = vmatprep.subr.bf16.mxu0 %v14476_v2  ;;  %13113 = vmatpush3.bf16.msra.mxu1 %v14475_v63  ;;  %v14532_v63 = vld [vmem:[%s15453_s15 + $0x488] sm:$0xff]   ;;  %v14535_v2 = vld [vmem:[%s15453_s15 + $0x400] sm:$0xff]  }
  0x73   : > { %9572 = vmatprep.mubr.bf16.mxu0 %v2337_v5  ;;  %13114 = vmatprep.subr.bf16.mxu1 %v14477_v4  ;;  %v14536_v4 = vld [vmem:[%s15453_s15 + $0x480] sm:$0xff]   ;;  %v2349_v5 = vrot.slane %v166_v3, %v15491_v35 }
  0x74   : > { %9612 = vmatprep.mubr.bf16.mxu1 %v2341_v8 }
  0x75   : > { %13093 = vmatpush3.bf16.msra.mxu0 %v14478_v6  ;;  %v2342_v6 = vcombine.high %v166_v3, %v166_v3  ;;  %v2357_v8 = vcombine.high %v2349_v5, %v2349_v5  ;;  %v14586_v3 = vld [vmem:[%s15453_s15 + $0x658] sm:$0xff]  }
  0x76   : > { %13094 = vmatprep.subr.bf16.mxu0 %v14480_v9  ;;  %13115 = vmatpush3.bf16.msra.mxu1 %v14479_v7  ;;  %v14537_v7 = vld [vmem:[%s15453_s15 + $0x578] sm:$0xff]   ;;  %v2365_v9 = vrot.slane %v2349_v5, %v15491_v35 }
  0x77   : > { %13116 = vmatprep.subr.bf16.mxu1 %v14481_v10  ;;  %v14538_v10 = vld [vmem:[%s15453_s15 + $0x5f8] sm:$0xff]  }
  0x78   : > { %v14588_v5 = vld [vmem:[%s15453_s15 + $0x618] sm:$0xff]  }
  0x79   : > { %13095 = vmatpush3.bf16.msra.mxu0 %v14482_v11  ;;  %v15653_v11 = vrot.slane %v2342_v6, %v15491_v35  ;;  %v14589_v6 = vld [vmem:[%s15453_s15 + $0x698] sm:$0xff]  }
  0x7a   : > { %13096 = vmatprep.subr.bf16.mxu0 %v14484_v13  ;;  %13117 = vmatpush3.bf16.msra.mxu1 %v14483_v12  ;;  %v14539_v12 = vld [vmem:[%s15453_s15 + $0x538] sm:$0xff]   ;;  %v2379_v13 = vrot.slane %v2357_v8, %v15491_v35  ;;  %v14591_v8 = vld [vmem:[%s15453_s15 + $0x6d0] sm:$0xff]  }
  0x7b   : > { %13118 = vmatprep.subr.bf16.mxu1 %v14485_v14  ;;  %v14540_v14 = vld [vmem:[%s15453_s15 + $0x5b8] sm:$0xff]  }
  0x7d   : > { %13097 = vmatpush3.bf16.msra.mxu0 %v14486_v15  ;;  %v2358_v15 = vcombine.high %v15653_v11, %v15653_v11 }
  0x7e   : > { %13098 = vmatprep.subr.bf16.mxu0 %v14488_v17  ;;  %13119 = vmatpush3.bf16.msra.mxu1 %v14487_v16  ;;  %v2387_v16 = vcombine.high %v2365_v9, %v2365_v9  ;;  %v14541_v17 = vld [vmem:[%s15453_s15 + $0x570] sm:$0xff]  }
  0x7f   : > { %13120 = vmatprep.subr.bf16.mxu1 %v14489_v18  ;;  %v2389_v18 = vcombine.high %v2379_v13, %v2379_v13 }
  0x81   : > { %13099 = vmatpush3.bf16.msra.mxu0 %v14490_v19  ;;  %v14542_v19 = vld [vmem:[%s15453_s15 + $0x5f0] sm:$0xff]  }
  0x82   : > { %13100 = vmatprep.subr.bf16.mxu0 %v14492_v21  ;;  %13121 = vmatpush3.bf16.msra.mxu1 %v14491_v20  ;;  %v2386_v20 = vrot.slane %v2358_v15, %v15491_v35  ;;  %v14543_v21 = vld [vmem:[%s15453_s15 + $0x530] sm:$0xff]   ;;  %v14598_v15 = vld [vmem:[%s15453_s15 + $0x640] sm:$0xff]  }
  0x83   : > { %13122 = vmatprep.subr.bf16.mxu1 %v14493_v22  ;;  %v14544_v22 = vld [vmem:[%s15453_s15 + $0x5b0] sm:$0xff]  }
  0x85   : > { %13101 = vmatpush3.bf16.msra.mxu0 %v14494_v23  ;;  %v2390_v23 = vcombine.high %v2386_v20, %v2386_v20 }
  0x86   : > { %13102 = vmatprep.subr.bf16.mxu0 %v14496_v25  ;;  %13123 = vmatpush3.bf16.msra.mxu1 %v14495_v24  ;;  %v14545_v24 = vld [vmem:[%s15453_s15 + $0x568] sm:$0xff]  }
  0x87   : > { %13124 = vmatprep.subr.bf16.mxu1 %v14497_v26  ;;  %v14546_v25 = vld [vmem:[%s15453_s15 + $0x5e8] sm:$0xff]  }
  0x88   : > { %v14547_v26 = vld [vmem:[%s15453_s15 + $0x528] sm:$0xff]  }
  0x89   : > { %13103 = vmatpush3.bf16.msra.mxu0 %v14498_v27  ;;  %v14548_v27 = vld [vmem:[%s15453_s15 + $0x5a8] sm:$0xff]  }
  0x8a   : > { %13104 = vmatprep.subr.bf16.mxu0 %v14500_v29  ;;  %13125 = vmatpush3.bf16.msra.mxu1 %v14499_v28  ;;  %v14549_v28 = vld [vmem:[%s15453_s15 + $0x560] sm:$0xff]  }
  0x8b   : > { %13126 = vmatprep.subr.bf16.mxu1 %v14501_v30  ;;  %v14550_v29 = vld [vmem:[%s15453_s15 + $0x5e0] sm:$0xff]  }
  0x8c   : > { %v14551_v30 = vld [vmem:[%s15453_s15 + $0x520] sm:$0xff]  }
  0x8d   : > { %13105 = vmatpush3.bf16.msra.mxu0 %v14502_v31  ;;  %v14552_v31 = vld [vmem:[%s15453_s15 + $0x5a0] sm:$0xff]  }
  0x8e   : > { %13134 = vmatprep.subr.bf16.mxu0 %v14505_v34  ;;  %13127 = vmatpush3.bf16.msra.mxu1 %v14503_v32  ;;  %v14553_v32 = vld [vmem:[%s15453_s15 + $0x558] sm:$0xff]  }
  0x8f   : > { %13156 = vmatprep.subr.bf16.mxu1 %v14506_v36  ;;  %v14555_v34 = vld [vmem:[%s15453_s15 + $0x518] sm:$0xff]  }
  0x90   : > { %9573 = vmatmul.mubr.bf16.vlgmr.msra.gmra.mxu0 %v2323_v33  ;;  %v14554_v33 = vld [vmem:[%s15453_s15 + $0x5d8] sm:$0xff]  }
  0x91   : > { %13135 = vmatpush3.bf16.msra.mxu0 %v14507_v37  ;;  %9613 = vmatmul.mubr.bf16.vlgmr.msra.gmra.mxu1 %v2339_v39  ;;  %v14556_v36 = vld [vmem:[%s15453_s15 + $0x598] sm:$0xff]   ;;  %v14557_v37 = vld [vmem:[%s15453_s15 + $0x550] sm:$0xff]  }
  0x92   : > { %13136 = vmatprep.subr.bf16.mxu0 %v14509_v40  ;;  %13157 = vmatpush3.bf16.msra.mxu1 %v14508_v38  ;;  %v14558_v38 = vld [vmem:[%s15453_s15 + $0x5d0] sm:$0xff]  }
  0x93   : > { %13158 = vmatprep.subr.bf16.mxu1 %v14510_v41  ;;  %9652 = vmatprep.mubr.bf16.mxu0 %v2379_v13  ;;  %v14559_v39 = vld [vmem:[%s15453_s15 + $0x510] sm:$0xff]   ;;  %v14561_v41 = vld [vmem:[%s15453_s15 + $0x548] sm:$0xff]  }
  0x94   : > { %9692 = vmatprep.mubr.bf16.mxu1 %v2389_v18  ;;  %v14560_v40 = vld [vmem:[%s15453_s15 + $0x590] sm:$0xff]   ;;  %v14596_v13 = vld [vmem:[%s15453_s15 + $0x608] sm:$0xff]   ;;  %v167_v18 = vld [vmem:[%s15489_s19 + $0x18] sm:$0xff] }
  0x95   : > { %13137 = vmatpush3.bf16.msra.mxu0 %v14511_v42  ;;  %v14562_v42 = vld [vmem:[%s15453_s15 + $0x5c8] sm:$0xff]  }
  0x96   : > { %13138 = vmatprep.subr.bf16.mxu0 %v14513_v44  ;;  %13159 = vmatpush3.bf16.msra.mxu1 %v14512_v43  ;;  %v14563_v43 = vld [vmem:[%s15453_s15 + $0x508] sm:$0xff]  }
  0x97   : > { %13160 = vmatprep.subr.bf16.mxu1 %v14514_v45  ;;  %v14564_v44 = vld [vmem:[%s15453_s15 + $0x588] sm:$0xff]   ;;  %v14565_v45 = vld [vmem:[%s15453_s15 + $0x540] sm:$0xff]  }
  0x99   : > { %13139 = vmatpush3.bf16.msra.mxu0 %v14515_v46  ;;  %v14566_v46 = vld [vmem:[%s15453_s15 + $0x5c0] sm:$0xff]  }
  0x9a   : > { %13140 = vmatprep.subr.bf16.mxu0 %v14517_v48  ;;  %13161 = vmatpush3.bf16.msra.mxu1 %v14516_v47  ;;  %v14567_v47 = vld [vmem:[%s15453_s15 + $0x500] sm:$0xff]  }
  0x9b   : > { %13162 = vmatprep.subr.bf16.mxu1 %v14518_v49  ;;  %v14568_v48 = vld [vmem:[%s15453_s15 + $0x580] sm:$0xff]   ;;  %v2372_v49 = vrot.slane %v15653_v11, %v15491_v35  ;;  %v14594_v11 = vld [vmem:[%s15453_s15 + $0x648] sm:$0xff]  }
  0x9d   : > { %13141 = vmatpush3.bf16.msra.mxu0 %v14519_v50  ;;  %v14570_v50 = vld [vmem:[%s15453_s15 + $0x678] sm:$0xff]  }
  0x9e   : > { %13142 = vmatprep.subr.bf16.mxu0 %v14521_v52  ;;  %13163 = vmatpush3.bf16.msra.mxu1 %v14520_v51  ;;  %v14571_v51 = vld [vmem:[%s15453_s15 + $0x6f8] sm:$0xff]  }
  0x9f   : > { %13164 = vmatprep.subr.bf16.mxu1 %v14522_v53  ;;  %v14572_v52 = vld [vmem:[%s15453_s15 + $0x638] sm:$0xff]  }
  0xa0   : > { %v14573_v53 = vld [vmem:[%s15453_s15 + $0x6b8] sm:$0xff]  }
  0xa1   : > { %13143 = vmatpush3.bf16.msra.mxu0 %v14523_v54  ;;  %v2388_v54 = vcombine.high %v2372_v49, %v2372_v49 }
  0xa2   : > { %13144 = vmatprep.subr.bf16.mxu0 %v14525_v56  ;;  %13165 = vmatpush3.bf16.msra.mxu1 %v14524_v55  ;;  %v14574_v55 = vld [vmem:[%s15453_s15 + $0x670] sm:$0xff]  }
  0xa3   : > { %13166 = vmatprep.subr.bf16.mxu1 %v14526_v57  ;;  %v14575_v56 = vld [vmem:[%s15453_s15 + $0x6f0] sm:$0xff]  }
  0xa4   : > { %v14576_v57 = vld [vmem:[%s15453_s15 + $0x630] sm:$0xff]  }
  0xa5   : > { %13145 = vmatpush3.bf16.msra.mxu0 %v14527_v58  ;;  %v14577_v58 = vld [vmem:[%s15453_s15 + $0x6b0] sm:$0xff]  }
  0xa6   : > { %13146 = vmatprep.subr.bf16.mxu0 %v14529_v60  ;;  %13167 = vmatpush3.bf16.msra.mxu1 %v14528_v59  ;;  %v14578_v59 = vld [vmem:[%s15453_s15 + $0x668] sm:$0xff]  }
  0xa7   : > { %13168 = vmatprep.subr.bf16.mxu1 %v14530_v61  ;;  %v14579_v60 = vld [vmem:[%s15453_s15 + $0x6e8] sm:$0xff]  }
  0xa8   : > { %v14580_v61 = vld [vmem:[%s15453_s15 + $0x628] sm:$0xff]  }
  0xa9   : > { %13147 = vmatpush3.bf16.msra.mxu0 %v14531_v62  ;;  %v14581_v62 = vld [vmem:[%s15453_s15 + $0x6a8] sm:$0xff]  }
  0xaa   : > { %13148 = vmatprep.subr.bf16.mxu0 %v14533_v0  ;;  %13169 = vmatpush3.bf16.msra.mxu1 %v14532_v63  ;;  %v14582_v63 = vld [vmem:[%s15453_s15 + $0x660] sm:$0xff]  }
  0xab   : > { %13170 = vmatprep.subr.bf16.mxu1 %v14534_v1  ;;  %v14583_v0 = vld [vmem:[%s15453_s15 + $0x6e0] sm:$0xff]  }
  0xac   : > { %v14584_v1 = vld [vmem:[%s15453_s15 + $0x620] sm:$0xff]  }
  0xad   : > { %13149 = vmatpush3.bf16.msra.mxu0 %v14535_v2  ;;  %v14585_v2 = vld [vmem:[%s15453_s15 + $0x6a0] sm:$0xff]  }
  0xae   : > { %13178 = vmatprep.subr.bf16.mxu0 %v14537_v7  ;;  %13171 = vmatpush3.bf16.msra.mxu1 %v14536_v4  ;;  %v14587_v4 = vld [vmem:[%s15453_s15 + $0x6d8] sm:$0xff]   ;;  %v14590_v7 = vld [vmem:[%s15453_s15 + $0x650] sm:$0xff]  }
  0xaf   : > { %13200 = vmatprep.subr.bf16.mxu1 %v14538_v10  ;;  %v14593_v10 = vld [vmem:[%s15453_s15 + $0x690] sm:$0xff]  }
  0xb0   : > { %9653 = vmatmul.mubr.bf16.vlgmr.msra.gmra.mxu0 %v2365_v9  ;;  %v14592_v9 = vld [vmem:[%s15453_s15 + $0x610] sm:$0xff]  }
  0xb1   : > { %13179 = vmatpush3.bf16.msra.mxu0 %v14539_v12  ;;  %9693 = vmatmul.mubr.bf16.vlgmr.msra.gmra.mxu1 %v2387_v16  ;;  %v14595_v12 = vld [vmem:[%s15453_s15 + $0x6c8] sm:$0xff]   ;;  %v14599_v16 = vld [vmem:[%s15453_s15 + $0x6c0] sm:$0xff]  }
  0xb2   : > { %13180 = vmatprep.subr.bf16.mxu0 %v14541_v17  ;;  %13201 = vmatpush3.bf16.msra.mxu1 %v14540_v14  ;;  %v14597_v14 = vld [vmem:[%s15453_s15 + $0x688] sm:$0xff]   ;;  %v14600_v17 = vld [vmem:[%s15453_s15 + $0x600] sm:$0xff]  }
  0xb3   : > { %9732 = vmatprep.mubr.bf16.mxu0 %v2386_v20  ;;  %13202 = vmatprep.subr.bf16.mxu1 %v14542_v19  ;;  %v2398_v19 = vrot.slane %v167_v18, %v15491_v35  ;;  %v14602_v20 = vld [vmem:[%s15453_s15 + $0x778] sm:$0xff]  }
  0xb4   : > { %9772 = vmatprep.mubr.bf16.mxu1 %v2390_v23 }
  0xb5   : > { %13181 = vmatpush3.bf16.msra.mxu0 %v14543_v21  ;;  %v2391_v21 = vcombine.high %v167_v18, %v167_v18  ;;  %v2406_v23 = vcombine.high %v2398_v19, %v2398_v19 }
  0xb6   : > { %13182 = vmatprep.subr.bf16.mxu0 %v14545_v24  ;;  %13203 = vmatpush3.bf16.msra.mxu1 %v14544_v22  ;;  %v14601_v22 = vld [vmem:[%s15453_s15 + $0x680] sm:$0xff]   ;;  %v2414_v24 = vrot.slane %v2398_v19, %v15491_v35  ;;  %v14640_v19 = vld [vmem:[%s15453_s15 + $0x8f0] sm:$0xff]  }
  0xb7   : > { %13204 = vmatprep.subr.bf16.mxu1 %v14546_v25  ;;  %v14603_v25 = vld [vmem:[%s15453_s15 + $0x7f8] sm:$0xff]  }
  0xb9   : > { %13183 = vmatpush3.bf16.msra.mxu0 %v14547_v26  ;;  %v15729_v26 = vrot.slane %v2391_v21, %v15491_v35 }
  0xba   : > { %13184 = vmatprep.subr.bf16.mxu0 %v14549_v28  ;;  %13205 = vmatpush3.bf16.msra.mxu1 %v14548_v27  ;;  %v14604_v27 = vld [vmem:[%s15453_s15 + $0x738] sm:$0xff]   ;;  %v2428_v28 = vrot.slane %v2406_v23, %v15491_v35  ;;  %v14642_v23 = vld [vmem:[%s15453_s15 + $0x8b0] sm:$0xff]  }
  0xbb   : > { %13206 = vmatprep.subr.bf16.mxu1 %v14550_v29  ;;  %v14605_v29 = vld [vmem:[%s15453_s15 + $0x7b8] sm:$0xff]  }
  0xbd   : > { %13185 = vmatpush3.bf16.msra.mxu0 %v14551_v30  ;;  %v2407_v30 = vcombine.high %v15729_v26, %v15729_v26 }
  0xbe   : > { %13186 = vmatprep.subr.bf16.mxu0 %v14553_v32  ;;  %13207 = vmatpush3.bf16.msra.mxu1 %v14552_v31  ;;  %v2436_v31 = vcombine.high %v2414_v24, %v2414_v24  ;;  %v14606_v32 = vld [vmem:[%s15453_s15 + $0x770] sm:$0xff]  }
  0xbf   : > { %13208 = vmatprep.subr.bf16.mxu1 %v14554_v33  ;;  %v2438_v33 = vcombine.high %v2428_v28, %v2428_v28 }
  0xc1   : > { %13187 = vmatpush3.bf16.msra.mxu0 %v14555_v34 }
  0xc2   : > { %13188 = vmatprep.subr.bf16.mxu0 %v14557_v37  ;;  %13209 = vmatpush3.bf16.msra.mxu1 %v14556_v36  ;;  %v14607_v36 = vld [vmem:[%s15453_s15 + $0x7f0] sm:$0xff]   ;;  %v2435_v37 = vrot.slane %v2407_v30, %v15491_v35 }
  0xc3   : > { %13210 = vmatprep.subr.bf16.mxu1 %v14558_v38  ;;  %v14608_v38 = vld [vmem:[%s15453_s15 + $0x730] sm:$0xff]  }
  0xc5   : > { %13189 = vmatpush3.bf16.msra.mxu0 %v14559_v39 }
  0xc6   : > { %13190 = vmatprep.subr.bf16.mxu0 %v14561_v41  ;;  %13211 = vmatpush3.bf16.msra.mxu1 %v14560_v40  ;;  %v14609_v41 = vld [vmem:[%s15453_s15 + $0x7b0] sm:$0xff]  }
  0xc7   : > { %13212 = vmatprep.subr.bf16.mxu1 %v14562_v42  ;;  %v2439_v42 = vcombine.high %v2435_v37, %v2435_v37 }
  0xc9   : > { %13191 = vmatpush3.bf16.msra.mxu0 %v14563_v43 }
  0xca   : > { %13192 = vmatprep.subr.bf16.mxu0 %v14565_v45  ;;  %13213 = vmatpush3.bf16.msra.mxu1 %v14564_v44  ;;  %v14610_v44 = vld [vmem:[%s15453_s15 + $0x768] sm:$0xff]  }
  0xcb   : > { %13214 = vmatprep.subr.bf16.mxu1 %v14566_v46 }
  0xcd   : > { %13193 = vmatpush3.bf16.msra.mxu0 %v14567_v47  ;;  %v14611_v47 = vld [vmem:[%s15453_s15 + $0x7e8] sm:$0xff]  }
  0xce   : > { %13222 = vmatprep.subr.bf16.mxu0 %v14570_v50  ;;  %13215 = vmatpush3.bf16.msra.mxu1 %v14568_v48 }
  0xcf   : > { %13244 = vmatprep.subr.bf16.mxu1 %v14571_v51 }
  0xd0   : > { %9733 = vmatmul.mubr.bf16.vlgmr.msra.gmra.mxu0 %v2372_v49  ;;  %v14612_v49 = vld [vmem:[%s15453_s15 + $0x728] sm:$0xff]  }
  0xd1   : > { %13223 = vmatpush3.bf16.msra.mxu0 %v14572_v52  ;;  %9773 = vmatmul.mubr.bf16.vlgmr.msra.gmra.mxu1 %v2388_v54  ;;  %v14613_v52 = vld [vmem:[%s15453_s15 + $0x7a8] sm:$0xff]   ;;  %v14614_v54 = vld [vmem:[%s15453_s15 + $0x760] sm:$0xff]  }
  0xd2   : > { %13224 = vmatprep.subr.bf16.mxu0 %v14574_v55  ;;  %13245 = vmatpush3.bf16.msra.mxu1 %v14573_v53 }
  0xd3   : > { %13246 = vmatprep.subr.bf16.mxu1 %v14575_v56  ;;  %9812 = vmatprep.mubr.bf16.mxu0 %v2428_v28  ;;  %v14615_v56 = vld [vmem:[%s15453_s15 + $0x7e0] sm:$0xff]   ;;  %v14644_v28 = vld [vmem:[%s15453_s15 + $0x8e8] sm:$0xff]  }
  0xd4   : > { %9852 = vmatprep.mubr.bf16.mxu1 %v2438_v33 }
  0xd5   : > { %13225 = vmatpush3.bf16.msra.mxu0 %v14576_v57  ;;  %v14616_v57 = vld [vmem:[%s15453_s15 + $0x720] sm:$0xff]  }
  0xd6   : > { %13226 = vmatprep.subr.bf16.mxu0 %v14578_v59  ;;  %13247 = vmatpush3.bf16.msra.mxu1 %v14577_v58  ;;  %v14617_v58 = vld [vmem:[%s15453_s15 + $0x7a0] sm:$0xff]   ;;  %v14618_v59 = vld [vmem:[%s15453_s15 + $0x758] sm:$0xff]  }
  0xd7   : > { %13248 = vmatprep.subr.bf16.mxu1 %v14579_v60  ;;  %v14619_v60 = vld [vmem:[%s15453_s15 + $0x7d8] sm:$0xff]  }
  0xd9   : > { %13227 = vmatpush3.bf16.msra.mxu0 %v14580_v61  ;;  %v14620_v61 = vld [vmem:[%s15453_s15 + $0x718] sm:$0xff]  }
  0xda   : > { %13228 = vmatprep.subr.bf16.mxu0 %v14582_v63  ;;  %13249 = vmatpush3.bf16.msra.mxu1 %v14581_v62  ;;  %v14621_v62 = vld [vmem:[%s15453_s15 + $0x798] sm:$0xff]   ;;  %v14622_v63 = vld [vmem:[%s15453_s15 + $0x750] sm:$0xff]  }
  0xdb   : > { %13250 = vmatprep.subr.bf16.mxu1 %v14583_v0  ;;  %v14623_v0 = vld [vmem:[%s15453_s15 + $0x7d0] sm:$0xff]  }
  0xdd   : > { %13229 = vmatpush3.bf16.msra.mxu0 %v14584_v1  ;;  %v14624_v1 = vld [vmem:[%s15453_s15 + $0x710] sm:$0xff]  }
  0xde   : > { %13230 = vmatprep.subr.bf16.mxu0 %v14586_v3  ;;  %13251 = vmatpush3.bf16.msra.mxu1 %v14585_v2  ;;  %v14625_v2 = vld [vmem:[%s15453_s15 + $0x790] sm:$0xff]   ;;  %v14626_v3 = vld [vmem:[%s15453_s15 + $0x748] sm:$0xff]  }
  0xdf   : > { %13252 = vmatprep.subr.bf16.mxu1 %v14587_v4  ;;  %v14627_v4 = vld [vmem:[%s15453_s15 + $0x7c8] sm:$0xff]  }
  0xe1   : > { %13231 = vmatpush3.bf16.msra.mxu0 %v14588_v5  ;;  %v14628_v5 = vld [vmem:[%s15453_s15 + $0x708] sm:$0xff]  }
  0xe2   : > { %13232 = vmatprep.subr.bf16.mxu0 %v14590_v7  ;;  %13253 = vmatpush3.bf16.msra.mxu1 %v14589_v6  ;;  %v14629_v6 = vld [vmem:[%s15453_s15 + $0x788] sm:$0xff]   ;;  %v14630_v7 = vld [vmem:[%s15453_s15 + $0x740] sm:$0xff]  }
  0xe3   : > { %13254 = vmatprep.subr.bf16.mxu1 %v14591_v8  ;;  %v14631_v8 = vld [vmem:[%s15453_s15 + $0x7c0] sm:$0xff]  }
  0xe5   : > { %13233 = vmatpush3.bf16.msra.mxu0 %v14592_v9  ;;  %v14632_v9 = vld [vmem:[%s15453_s15 + $0x700] sm:$0xff]  }
  0xe6   : > { %13234 = vmatprep.subr.bf16.mxu0 %v14594_v11  ;;  %13255 = vmatpush3.bf16.msra.mxu1 %v14593_v10  ;;  %v14633_v10 = vld [vmem:[%s15453_s15 + $0x780] sm:$0xff]   ;;  %v2421_v11 = vrot.slane %v15729_v26, %v15491_v35 }
  0xe7   : > { %13256 = vmatprep.subr.bf16.mxu1 %v14595_v12  ;;  %v14635_v12 = vld [vmem:[%s15453_s15 + $0x878] sm:$0xff]  }
  0xe9   : > { %13235 = vmatpush3.bf16.msra.mxu0 %v14596_v13  ;;  %v14636_v13 = vld [vmem:[%s15453_s15 + $0x8f8] sm:$0xff]  }
  0xea   : > { %13236 = vmatprep.subr.bf16.mxu0 %v14598_v15  ;;  %13257 = vmatpush3.bf16.msra.mxu1 %v14597_v14  ;;  %v14637_v14 = vld [vmem:[%s15453_s15 + $0x838] sm:$0xff]  }
  0xeb   : > { %13258 = vmatprep.subr.bf16.mxu1 %v14599_v16  ;;  %v14638_v15 = vld [vmem:[%s15453_s15 + $0x8b8] sm:$0xff]   ;;  %v2437_v16 = vcombine.high %v2421_v11, %v2421_v11 }
  0xed   : > { %13237 = vmatpush3.bf16.msra.mxu0 %v14600_v17  ;;  %v14639_v17 = vld [vmem:[%s15453_s15 + $0x870] sm:$0xff]  }
  0xee   : > { %13266 = vmatprep.subr.bf16.mxu0 %v14602_v20  ;;  %13259 = vmatpush3.bf16.msra.mxu1 %v14601_v22  ;;  %v14641_v20 = vld [vmem:[%s15453_s15 + $0x830] sm:$0xff]  }
  0xef   : > { %13288 = vmatprep.subr.bf16.mxu1 %v14603_v25  ;;  %v14643_v25 = vld [vmem:[%s15453_s15 + $0x868] sm:$0xff]  }
  0xf0   : > { %v12974_v34 = vpop.f32.mrf.mxu0  ;;  %9813 = vmatmul.mubr.bf16.vlgmr.msra.gmra.mxu0 %v2414_v24 }
  0xf1   : > { %v12996_v39 = vpop.f32.mrf.mxu1  ;;  %13267 = vmatpush3.bf16.msra.mxu0 %v14604_v27  ;;  %9853 = vmatmul.mubr.bf16.vlgmr.msra.gmra.mxu1 %v2436_v31  ;;  %v14645_v31 = vld [vmem:[%s15453_s15 + $0x828] sm:$0xff]  }
  0xf2   : > { %v12975_v40 = vpop.f32.mrf.mxu0  ;;  %13268 = vmatprep.subr.bf16.mxu0 %v14606_v32  ;;  %13289 = vmatpush3.bf16.msra.mxu1 %v14605_v29 }
  0xf3   : > { %v12976_v43 = vadd.f32 %v12975_v40, %v12974_v34  ;;  %v12997_v45 = vpop.f32.mrf.mxu1  ;;  %9892 = vmatprep.mubr.bf16.mxu0 %v2435_v37  ;;  %13290 = vmatprep.subr.bf16.mxu1 %v14607_v36  ;;  %v14646_v34 = vld [vmem:[%s15453_s15 + $0x8a8] sm:$0xff]   ;;  %v14647_v37 = vld [vmem:[%s15453_s15 + $0x860] sm:$0xff]  }
  0xf4   : > { %v12977_v46 = vpop.f32.mrf.mxu0  ;;  %v12998_v48 = vadd.f32 %v12997_v45, %v12996_v39  ;;  %9932 = vmatprep.mubr.bf16.mxu1 %v2439_v42  ;;  %v14648_v39 = vld [vmem:[%s15453_s15 + $0x8e0] sm:$0xff]   ;;  %v14651_v42 = vld [vmem:[%s15453_s15 + $0x858] sm:$0xff]  }
  0xf5   : > { %v12999_v50 = vpop.f32.mrf.mxu1  ;;  %13269 = vmatpush3.bf16.msra.mxu0 %v14608_v38  ;;  %v14649_v40 = vld [vmem:[%s15453_s15 + $0x820] sm:$0xff]   ;;  %v14654_v45 = vld [vmem:[%s15453_s15 + $0x898] sm:$0xff]   ;;  %v14655_v46 = vld [vmem:[%s15453_s15 + $0x850] sm:$0xff]  }
  0xf6   : > { %v12978_v51 = vpop.f32.mrf.mxu0  ;;  %v15745_v53 = vadd.f32 %v12998_v48, %v12976_v43  ;;  %13270 = vmatprep.subr.bf16.mxu0 %v14610_v44  ;;  %13291 = vmatpush3.bf16.msra.mxu1 %v14609_v41  ;;  %v14650_v41 = vld [vmem:[%s15453_s15 + $0x8a0] sm:$0xff]   ;;  %v14652_v43 = vld [vmem:[%s15453_s15 + $0x8d8] sm:$0xff]   ;;  %v14657_v48 = vld [vmem:[%s15453_s15 + $0x810] sm:$0xff]  }
  0xf7   : > { %v13000_v55 = vpop.f32.mrf.mxu1  ;;  %13292 = vmatprep.subr.bf16.mxu1 %v14611_v47  ;;  %v14653_v44 = vld [vmem:[%s15453_s15 + $0x818] sm:$0xff]   ;;  %v14656_v47 = vld [vmem:[%s15453_s15 + $0x8d0] sm:$0xff]   ;;  %v14659_v50 = vld [vmem:[%s15453_s15 + $0x848] sm:$0xff]  }
  0xf8   : > { %v14660_v51 = vld [vmem:[%s15453_s15 + $0x8c8] sm:$0xff]   ;;  %v14664_v55 = vld [vmem:[%s15453_s15 + $0x8c0] sm:$0xff]  }
  0xf9   : > { %13271 = vmatpush3.bf16.msra.mxu0 %v14612_v49  ;;  %v14658_v49 = vld [vmem:[%s15453_s15 + $0x890] sm:$0xff]  }
  0xfa   : > { %13272 = vmatprep.subr.bf16.mxu0 %v14614_v54  ;;  %13293 = vmatpush3.bf16.msra.mxu1 %v14613_v52  ;;  %v14661_v52 = vld [vmem:[%s15453_s15 + $0x808] sm:$0xff]   ;;  %v14663_v54 = vld [vmem:[%s15453_s15 + $0x840] sm:$0xff]  }
  0xfb   : > { %13294 = vmatprep.subr.bf16.mxu1 %v14615_v56  ;;  %v14665_v56 = vld [vmem:[%s15453_s15 + $0x800] sm:$0xff]  }
  0xfd   : > { %13273 = vmatpush3.bf16.msra.mxu0 %v14616_v57  ;;  %v168_v57 = vld [vmem:[%s15489_s19 + $0x20] sm:$0xff] }
  0xfe   : > { %13274 = vmatprep.subr.bf16.mxu0 %v14618_v59  ;;  %13295 = vmatpush3.bf16.msra.mxu1 %v14617_v58  ;;  %v14666_v58 = vld [vmem:[%s15453_s15 + $0x880] sm:$0xff]   ;;  %v2447_v59 = vrot.slane %v168_v57, %v15491_v35 }
  0xff   : > { %13296 = vmatprep.subr.bf16.mxu1 %v14619_v60  ;;  %v2440_v60 = vcombine.high %v168_v57, %v168_v57  ;;  %v14704_v57 = vld [vmem:[%s15453_s15 + $0xa70] sm:$0xff]  }
 0x101   : > { %13275 = vmatpush3.bf16.msra.mxu0 %v14620_v61  ;;  %v14667_v61 = vld [vmem:[%s15453_s15 + $0x978] sm:$0xff]  }
 0x102   : > { %13276 = vmatprep.subr.bf16.mxu0 %v14622_v63  ;;  %13297 = vmatpush3.bf16.msra.mxu1 %v14621_v62  ;;  %v2455_v62 = vcombine.high %v2447_v59, %v2447_v59  ;;  %v2463_v63 = vrot.slane %v2447_v59, %v15491_v35  ;;  %v14705_v59 = vld [vmem:[%s15453_s15 + $0xaf0] sm:$0xff]  }
 0x103   : > { %13298 = vmatprep.subr.bf16.mxu1 %v14623_v0  ;;  %v14668_v0 = vld [vmem:[%s15453_s15 + $0x9f8] sm:$0xff]  }
 0x105   : > { %13277 = vmatpush3.bf16.msra.mxu0 %v14624_v1  ;;  %v15810_v1 = vrot.slane %v2440_v60, %v15491_v35  ;;  %v14706_v60 = vld [vmem:[%s15453_s15 + $0xa30] sm:$0xff]  }
 0x106   : > { %13278 = vmatprep.subr.bf16.mxu0 %v14626_v3  ;;  %13299 = vmatpush3.bf16.msra.mxu1 %v14625_v2  ;;  %v14669_v2 = vld [vmem:[%s15453_s15 + $0x938] sm:$0xff]   ;;  %v2477_v3 = vrot.slane %v2455_v62, %v15491_v35 }
 0x107   : > { %13300 = vmatprep.subr.bf16.mxu1 %v14627_v4  ;;  %v14670_v4 = vld [vmem:[%s15453_s15 + $0x9b8] sm:$0xff]  }
 0x109   : > { %13279 = vmatpush3.bf16.msra.mxu0 %v14628_v5  ;;  %v2456_v5 = vcombine.high %v15810_v1, %v15810_v1 }
 0x10a   : > { %13280 = vmatprep.subr.bf16.mxu0 %v14630_v7  ;;  %13301 = vmatpush3.bf16.msra.mxu1 %v14629_v6  ;;  %v2485_v6 = vcombine.high %v2463_v63, %v2463_v63  ;;  %v14671_v7 = vld [vmem:[%s15453_s15 + $0x970] sm:$0xff]  }
 0x10b   : > { %13302 = vmatprep.subr.bf16.mxu1 %v14631_v8  ;;  %v2487_v8 = vcombine.high %v2477_v3, %v2477_v3 }
 0x10d   : > { %13281 = vmatpush3.bf16.msra.mxu0 %v14632_v9 }
 0x10e   : > { %13310 = vmatprep.subr.bf16.mxu0 %v14635_v12  ;;  %13303 = vmatpush3.bf16.msra.mxu1 %v14633_v10  ;;  %v14672_v10 = vld [vmem:[%s15453_s15 + $0x9f0] sm:$0xff]  }
 0x10f   : > { %13332 = vmatprep.subr.bf16.mxu1 %v14636_v13  ;;  %v14673_v12 = vld [vmem:[%s15453_s15 + $0x930] sm:$0xff]  }
 0x110   : > { %v13018_v18 = vpop.f32.mrf.mxu0  ;;  %9893 = vmatmul.mubr.bf16.vlgmr.msra.gmra.mxu0 %v2421_v11  ;;  %v2484_v11 = vrot.slane %v2456_v5, %v15491_v35 }
 0x111   : > { %v13040_v21 = vpop.f32.mrf.mxu1  ;;  %13311 = vmatpush3.bf16.msra.mxu0 %v14637_v14  ;;  %9933 = vmatmul.mubr.bf16.vlgmr.msra.gmra.mxu1 %v2437_v16 }
 0x112   : > { %v13019_v22 = vpop.f32.mrf.mxu0  ;;  %13312 = vmatprep.subr.bf16.mxu0 %v14639_v17  ;;  %13333 = vmatpush3.bf16.msra.mxu1 %v14638_v15  ;;  %v14674_v15 = vld [vmem:[%s15453_s15 + $0x9b0] sm:$0xff]   ;;  %v2488_v16 = vcombine.high %v2484_v11, %v2484_v11 }
 0x113   : > { %v13020_v24 = vadd.f32 %v13019_v22, %v13018_v18  ;;  %v13041_v26 = vpop.f32.mrf.mxu1  ;;  %13334 = vmatprep.subr.bf16.mxu1 %v14640_v19  ;;  %9972 = vmatprep.mubr.bf16.mxu0 %v2477_v3  ;;  %v14675_v18 = vld [vmem:[%s15453_s15 + $0x968] sm:$0xff]  }
 0x114   : > { %v13021_v27 = vpop.f32.mrf.mxu0  ;;  %v13042_v30 = vadd.f32 %v13041_v26, %v13040_v21  ;;  %10012 = vmatprep.mubr.bf16.mxu1 %v2487_v8  ;;  %v14676_v21 = vld [vmem:[%s15453_s15 + $0x9e8] sm:$0xff]  }
 0x115   : > { %v9415_v29 = vadd.f32 %v13020_v24, %v15745_v53  ;;  %v13043_v32 = vpop.f32.mrf.mxu1  ;;  %13313 = vmatpush3.bf16.msra.mxu0 %v14641_v20  ;;  %v14662_v53 = vld [vmem:[%s15453_s15 + $0x888] sm:$0xff]  }
 0x116   : > { %v13022_v33 = vpop.f32.mrf.mxu0  ;;  %13314 = vmatprep.subr.bf16.mxu0 %v14643_v25  ;;  %13335 = vmatpush3.bf16.msra.mxu1 %v14642_v23  ;;  %v14677_v24 = vld [vmem:[%s15453_s15 + $0x928] sm:$0xff]   ;;  %v14681_v32 = vld [vmem:[%s15453_s15 + $0x920] sm:$0xff]  }
 0x117   : > { %v15782_v36 = vadd.f32 %v13042_v30, %v9415_v29  ;;  %v13044_v38 = vpop.f32.mrf.mxu1  ;;  %13336 = vmatprep.subr.bf16.mxu1 %v14644_v28  ;;  %v14678_v27 = vld [vmem:[%s15453_s15 + $0x9a8] sm:$0xff]   ;;  %v14679_v29 = vld [vmem:[%s15453_s15 + $0x960] sm:$0xff]  }
 0x118   : > { %v14682_v33 = vld [vmem:[%s15453_s15 + $0x9a0] sm:$0xff]   ;;  %v14686_v38 = vld [vmem:[%s15453_s15 + $0x998] sm:$0xff]  }
 0x119   : > { %13315 = vmatpush3.bf16.msra.mxu0 %v14645_v31  ;;  %v14680_v31 = vld [vmem:[%s15453_s15 + $0x9e0] sm:$0xff]  }
 0x11a   : > { %13316 = vmatprep.subr.bf16.mxu0 %v14647_v37  ;;  %13337 = vmatpush3.bf16.msra.mxu1 %v14646_v34  ;;  %v14683_v34 = vld [vmem:[%s15453_s15 + $0x958] sm:$0xff]  }
 0x11b   : > { %13338 = vmatprep.subr.bf16.mxu1 %v14648_v39  ;;  %v14685_v37 = vld [vmem:[%s15453_s15 + $0x918] sm:$0xff]   ;;  %v14687_v39 = vld [vmem:[%s15453_s15 + $0x950] sm:$0xff]  }
 0x11d   : > { %13317 = vmatpush3.bf16.msra.mxu0 %v14649_v40  ;;  %v14688_v40 = vld [vmem:[%s15453_s15 + $0x9d0] sm:$0xff]  }
 0x11e   : > { %13318 = vmatprep.subr.bf16.mxu0 %v14651_v42  ;;  %13339 = vmatpush3.bf16.msra.mxu1 %v14650_v41  ;;  %v14689_v41 = vld [vmem:[%s15453_s15 + $0x910] sm:$0xff]  }
 0x11f   : > { %13340 = vmatprep.subr.bf16.mxu1 %v14652_v43  ;;  %v14690_v42 = vld [vmem:[%s15453_s15 + $0x990] sm:$0xff]   ;;  %v14691_v43 = vld [vmem:[%s15453_s15 + $0x948] sm:$0xff]  }
 0x121   : > { %13319 = vmatpush3.bf16.msra.mxu0 %v14653_v44  ;;  %v14692_v44 = vld [vmem:[%s15453_s15 + $0x9c8] sm:$0xff]  }
 0x122   : > { %13320 = vmatprep.subr.bf16.mxu0 %v14655_v46  ;;  %13341 = vmatpush3.bf16.msra.mxu1 %v14654_v45  ;;  %v14693_v45 = vld [vmem:[%s15453_s15 + $0x908] sm:$0xff]  }
 0x123   : > { %13342 = vmatprep.subr.bf16.mxu1 %v14656_v47  ;;  %v14694_v46 = vld [vmem:[%s15453_s15 + $0x988] sm:$0xff]   ;;  %v14695_v47 = vld [vmem:[%s15453_s15 + $0x940] sm:$0xff]  }
 0x125   : > { %13321 = vmatpush3.bf16.msra.mxu0 %v14657_v48  ;;  %v14696_v48 = vld [vmem:[%s15453_s15 + $0x9c0] sm:$0xff]  }
 0x126   : > { %13322 = vmatprep.subr.bf16.mxu0 %v14659_v50  ;;  %13343 = vmatpush3.bf16.msra.mxu1 %v14658_v49  ;;  %v14697_v49 = vld [vmem:[%s15453_s15 + $0x900] sm:$0xff]  }
 0x127   : > { %13344 = vmatprep.subr.bf16.mxu1 %v14660_v51  ;;  %v14698_v50 = vld [vmem:[%s15453_s15 + $0x980] sm:$0xff]   ;;  %v2470_v51 = vrot.slane %v15810_v1, %v15491_v35  ;;  %v14708_v1 = vld [vmem:[%s15453_s15 + $0xa68] sm:$0xff]  }
 0x129   : > { %13323 = vmatpush3.bf16.msra.mxu0 %v14661_v52  ;;  %v14700_v52 = vld [vmem:[%s15453_s15 + $0xa78] sm:$0xff]  }
 0x12a   : > { %13324 = vmatprep.subr.bf16.mxu0 %v14663_v54  ;;  %13345 = vmatpush3.bf16.msra.mxu1 %v14662_v53  ;;  %v14701_v53 = vld [vmem:[%s15453_s15 + $0xaf8] sm:$0xff]  }
 0x12b   : > { %13346 = vmatprep.subr.bf16.mxu1 %v14664_v55  ;;  %v14702_v54 = vld [vmem:[%s15453_s15 + $0xa38] sm:$0xff]  }
 0x12c   : > { %v14703_v55 = vld [vmem:[%s15453_s15 + $0xab8] sm:$0xff]  }
 0x12d   : > { %13325 = vmatpush3.bf16.msra.mxu0 %v14665_v56  ;;  %v2486_v56 = vcombine.high %v2470_v51, %v2470_v51 }
 0x12e   : > { %13354 = vmatprep.subr.bf16.mxu0 %v14667_v61  ;;  %13347 = vmatpush3.bf16.msra.mxu1 %v14666_v58 }
 0x12f   : > { %13376 = vmatprep.subr.bf16.mxu1 %v14668_v0 }
 0x130   : > { %v13062_v9 = vpop.f32.mrf.mxu0  ;;  %9973 = vmatmul.mubr.bf16.vlgmr.msra.gmra.mxu0 %v2463_v63  ;;  %v14707_v63 = vld [vmem:[%s15453_s15 + $0xab0] sm:$0xff]  }
 0x131   : > { %v13084_v13 = vpop.f32.mrf.mxu1  ;;  %13355 = vmatpush3.bf16.msra.mxu0 %v14669_v2  ;;  %10013 = vmatmul.mubr.bf16.vlgmr.msra.gmra.mxu1 %v2485_v6 }
 0x132   : > { %v13063_v14 = vpop.f32.mrf.mxu0  ;;  %13356 = vmatprep.subr.bf16.mxu0 %v14671_v7  ;;  %13377 = vmatpush3.bf16.msra.mxu1 %v14670_v4  ;;  %v14709_v4 = vld [vmem:[%s15453_s15 + $0xae8] sm:$0xff]  }
 0x133   : > { %v13064_v17 = vadd.f32 %v13063_v14, %v13062_v9  ;;  %v13085_v19 = vpop.f32.mrf.mxu1  ;;  %10052 = vmatprep.mubr.bf16.mxu0 %v2484_v11  ;;  %13378 = vmatprep.subr.bf16.mxu1 %v14672_v10  ;;  %v14710_v7 = vld [vmem:[%s15453_s15 + $0xa28] sm:$0xff]   ;;  %v14713_v14 = vld [vmem:[%s15453_s15 + $0xae0] sm:$0xff]  }
 0x134   : > { %v13065_v20 = vpop.f32.mrf.mxu0  ;;  %v13086_v23 = vadd.f32 %v13085_v19, %v13084_v13  ;;  %10092 = vmatprep.mubr.bf16.mxu1 %v2488_v16  ;;  %v14711_v10 = vld [vmem:[%s15453_s15 + $0xaa8] sm:$0xff]   ;;  %v14715_v16 = vld [vmem:[%s15453_s15 + $0xaa0] sm:$0xff]   ;;  %v14718_v19 = vld [vmem:[%s15453_s15 + $0xa18] sm:$0xff]  }
 0x135   : > { %v9495_v22 = vadd.f32 %v13064_v17, %v15782_v36  ;;  %v13087_v25 = vpop.f32.mrf.mxu1  ;;  %13357 = vmatpush3.bf16.msra.mxu0 %v14673_v12  ;;  %v14684_v36 = vld [vmem:[%s15453_s15 + $0x9d8] sm:$0xff]   ;;  %v14712_v12 = vld [vmem:[%s15453_s15 + $0xa60] sm:$0xff]  }
 0x136   : > { %v13066_v26 = vpop.f32.mrf.mxu0  ;;  %13358 = vmatprep.subr.bf16.mxu0 %v14675_v18  ;;  %13379 = vmatpush3.bf16.msra.mxu1 %v14674_v15  ;;  %v14714_v15 = vld [vmem:[%s15453_s15 + $0xa20] sm:$0xff]   ;;  %v14716_v17 = vld [vmem:[%s15453_s15 + $0xa58] sm:$0xff]   ;;  %v14724_v25 = vld [vmem:[%s15453_s15 + $0xa48] sm:$0xff]  }
 0x137   : > { %v15827_v28 = vadd.f32 %v13086_v23, %v9495_v22  ;;  %v13088_v30 = vpop.f32.mrf.mxu1  ;;  %13380 = vmatprep.subr.bf16.mxu1 %v14676_v21  ;;  %v14717_v18 = vld [vmem:[%s15453_s15 + $0xad8] sm:$0xff]   ;;  %v14720_v21 = vld [vmem:[%s15453_s15 + $0xa50] sm:$0xff]   ;;  %v14725_v26 = vld [vmem:[%s15453_s15 + $0xac8] sm:$0xff]  }
 0x138   : > { %v14719_v20 = vld [vmem:[%s15453_s15 + $0xa98] sm:$0xff]   ;;  %v14721_v22 = vld [vmem:[%s15453_s15 + $0xad0] sm:$0xff]   ;;  %v14729_v30 = vld [vmem:[%s15453_s15 + $0xac0] sm:$0xff]  }
 0x139   : > { %13359 = vmatpush3.bf16.msra.mxu0 %v14677_v24  ;;  %v14722_v23 = vld [vmem:[%s15453_s15 + $0xa10] sm:$0xff]  }
 0x13a   : > { %13360 = vmatprep.subr.bf16.mxu0 %v14679_v29  ;;  %13381 = vmatpush3.bf16.msra.mxu1 %v14678_v27  ;;  %v14723_v24 = vld [vmem:[%s15453_s15 + $0xa90] sm:$0xff]   ;;  %v14726_v27 = vld [vmem:[%s15453_s15 + $0xa08] sm:$0xff]   ;;  %v14728_v29 = vld [vmem:[%s15453_s15 + $0xa40] sm:$0xff]  }
 0x13b   : > { %13382 = vmatprep.subr.bf16.mxu1 %v14680_v31  ;;  %v14730_v31 = vld [vmem:[%s15453_s15 + $0xa00] sm:$0xff]  }
 0x13d   : > { %13361 = vmatpush3.bf16.msra.mxu0 %v14681_v32  ;;  %v169_v32 = vld [vmem:[%s15489_s19 + $0x28] sm:$0xff] }
 0x13e   : > { %13362 = vmatprep.subr.bf16.mxu0 %v14683_v34  ;;  %13383 = vmatpush3.bf16.msra.mxu1 %v14682_v33  ;;  %v14731_v33 = vld [vmem:[%s15453_s15 + $0xa80] sm:$0xff]   ;;  %v2496_v34 = vrot.slane %v169_v32, %v15491_v35 }
 0x13f   : > { %13384 = vmatprep.subr.bf16.mxu1 %v14684_v36  ;;  %v2489_v36 = vcombine.high %v169_v32, %v169_v32  ;;  %v14769_v32 = vld [vmem:[%s15453_s15 + $0xc70] sm:$0xff]  }
 0x141   : > { %13363 = vmatpush3.bf16.msra.mxu0 %v14685_v37  ;;  %v14732_v37 = vld [vmem:[%s15453_s15 + $0xb78] sm:$0xff]  }
 0x142   : > { %13364 = vmatprep.subr.bf16.mxu0 %v14687_v39  ;;  %13385 = vmatpush3.bf16.msra.mxu1 %v14686_v38  ;;  %v2504_v38 = vcombine.high %v2496_v34, %v2496_v34  ;;  %v2512_v39 = vrot.slane %v2496_v34, %v15491_v35  ;;  %v14770_v34 = vld [vmem:[%s15453_s15 + $0xcf0] sm:$0xff]  }
 0x143   : > { %13386 = vmatprep.subr.bf16.mxu1 %v14688_v40  ;;  %v14733_v40 = vld [vmem:[%s15453_s15 + $0xbf8] sm:$0xff]  }
 0x145   : > { %13365 = vmatpush3.bf16.msra.mxu0 %v14689_v41  ;;  %v15892_v41 = vrot.slane %v2489_v36, %v15491_v35  ;;  %v14771_v36 = vld [vmem:[%s15453_s15 + $0xc30] sm:$0xff]  }
 0x146   : > { %13366 = vmatprep.subr.bf16.mxu0 %v14691_v43  ;;  %13387 = vmatpush3.bf16.msra.mxu1 %v14690_v42  ;;  %v14734_v42 = vld [vmem:[%s15453_s15 + $0xb38] sm:$0xff]   ;;  %v2526_v43 = vrot.slane %v2504_v38, %v15491_v35 }
 0x147   : > { %13388 = vmatprep.subr.bf16.mxu1 %v14692_v44  ;;  %v14735_v44 = vld [vmem:[%s15453_s15 + $0xbb8] sm:$0xff]  }
 0x149   : > { %13367 = vmatpush3.bf16.msra.mxu0 %v14693_v45  ;;  %v2505_v45 = vcombine.high %v15892_v41, %v15892_v41 }
 0x14a   : > { %13368 = vmatprep.subr.bf16.mxu0 %v14695_v47  ;;  %13389 = vmatpush3.bf16.msra.mxu1 %v14694_v46  ;;  %v2534_v46 = vcombine.high %v2512_v39, %v2512_v39  ;;  %v14736_v47 = vld [vmem:[%s15453_s15 + $0xb70] sm:$0xff]  }
 0x14b   : > { %13390 = vmatprep.subr.bf16.mxu1 %v14696_v48  ;;  %v2536_v48 = vcombine.high %v2526_v43, %v2526_v43 }
 0x14d   : > { %13369 = vmatpush3.bf16.msra.mxu0 %v14697_v49 }
 0x14e   : > { %13398 = vmatprep.subr.bf16.mxu0 %v14700_v52  ;;  %13391 = vmatpush3.bf16.msra.mxu1 %v14698_v50  ;;  %v14737_v50 = vld [vmem:[%s15453_s15 + $0xbf0] sm:$0xff]  }
 0x14f   : > { %13420 = vmatprep.subr.bf16.mxu1 %v14701_v53  ;;  %v14738_v52 = vld [vmem:[%s15453_s15 + $0xb30] sm:$0xff]  }
 0x150   : > { %v13106_v58 = vpop.f32.mrf.mxu0  ;;  %10053 = vmatmul.mubr.bf16.vlgmr.msra.gmra.mxu0 %v2470_v51  ;;  %v2533_v51 = vrot.slane %v2505_v45, %v15491_v35 }
 0x151   : > { %v13128_v61 = vpop.f32.mrf.mxu1  ;;  %13399 = vmatpush3.bf16.msra.mxu0 %v14702_v54  ;;  %10093 = vmatmul.mubr.bf16.vlgmr.msra.gmra.mxu1 %v2486_v56 }
 0x152   : > { %v13107_v62 = vpop.f32.mrf.mxu0  ;;  %13400 = vmatprep.subr.bf16.mxu0 %v14704_v57  ;;  %13421 = vmatpush3.bf16.msra.mxu1 %v14703_v55  ;;  %v14739_v55 = vld [vmem:[%s15453_s15 + $0xbb0] sm:$0xff]   ;;  %v2537_v56 = vcombine.high %v2533_v51, %v2533_v51 }
 0x153   : > { %v13108_v0 = vadd.f32 %v13107_v62, %v13106_v58  ;;  %v13129_v2 = vpop.f32.mrf.mxu1  ;;  %13422 = vmatprep.subr.bf16.mxu1 %v14705_v59  ;;  %10132 = vmatprep.mubr.bf16.mxu0 %v2526_v43  ;;  %v14740_v58 = vld [vmem:[%s15453_s15 + $0xb68] sm:$0xff]  }
 0x154   : > { %v13109_v3 = vpop.f32.mrf.mxu0  ;;  %v13130_v6 = vadd.f32 %v13129_v2, %v13128_v61  ;;  %10172 = vmatprep.mubr.bf16.mxu1 %v2536_v48  ;;  %v14741_v61 = vld [vmem:[%s15453_s15 + $0xbe8] sm:$0xff]  }
 0x155   : > { %v9575_v5 = vadd.f32 %v13108_v0, %v15827_v28  ;;  %v13131_v8 = vpop.f32.mrf.mxu1  ;;  %13401 = vmatpush3.bf16.msra.mxu0 %v14706_v60  ;;  %v14727_v28 = vld [vmem:[%s15453_s15 + $0xa88] sm:$0xff]  }
 0x156   : > { %v13110_v9 = vpop.f32.mrf.mxu0  ;;  %13402 = vmatprep.subr.bf16.mxu0 %v14708_v1  ;;  %13423 = vmatpush3.bf16.msra.mxu1 %v14707_v63  ;;  %v14742_v0 = vld [vmem:[%s15453_s15 + $0xb28] sm:$0xff]   ;;  %v14746_v8 = vld [vmem:[%s15453_s15 + $0xb20] sm:$0xff]  }
 0x157   : > { %v15864_v11 = vadd.f32 %v13130_v6, %v9575_v5  ;;  %v13132_v13 = vpop.f32.mrf.mxu1  ;;  %13424 = vmatprep.subr.bf16.mxu1 %v14709_v4  ;;  %v14743_v3 = vld [vmem:[%s15453_s15 + $0xba8] sm:$0xff]   ;;  %v14744_v5 = vld [vmem:[%s15453_s15 + $0xb60] sm:$0xff]  }
 0x158   : > { %v14747_v9 = vld [vmem:[%s15453_s15 + $0xba0] sm:$0xff]   ;;  %v14751_v13 = vld [vmem:[%s15453_s15 + $0xb98] sm:$0xff]  }
 0x159   : > { %13403 = vmatpush3.bf16.msra.mxu0 %v14710_v7  ;;  %v14745_v7 = vld [vmem:[%s15453_s15 + $0xbe0] sm:$0xff]  }
 0x15a   : > { %13404 = vmatprep.subr.bf16.mxu0 %v14712_v12  ;;  %13425 = vmatpush3.bf16.msra.mxu1 %v14711_v10  ;;  %v14748_v10 = vld [vmem:[%s15453_s15 + $0xb58] sm:$0xff]  }
 0x15b   : > { %13426 = vmatprep.subr.bf16.mxu1 %v14713_v14  ;;  %v14750_v12 = vld [vmem:[%s15453_s15 + $0xb18] sm:$0xff]   ;;  %v14752_v14 = vld [vmem:[%s15453_s15 + $0xb50] sm:$0xff]  }
 0x15d   : > { %13405 = vmatpush3.bf16.msra.mxu0 %v14714_v15  ;;  %v14753_v15 = vld [vmem:[%s15453_s15 + $0xbd0] sm:$0xff]  }
 0x15e   : > { %13406 = vmatprep.subr.bf16.mxu0 %v14716_v17  ;;  %13427 = vmatpush3.bf16.msra.mxu1 %v14715_v16  ;;  %v14754_v16 = vld [vmem:[%s15453_s15 + $0xb10] sm:$0xff]  }
 0x15f   : > { %13428 = vmatprep.subr.bf16.mxu1 %v14717_v18  ;;  %v14755_v17 = vld [vmem:[%s15453_s15 + $0xb90] sm:$0xff]   ;;  %v14756_v18 = vld [vmem:[%s15453_s15 + $0xb48] sm:$0xff]  }
 0x161   : > { %13407 = vmatpush3.bf16.msra.mxu0 %v14718_v19  ;;  %v14757_v19 = vld [vmem:[%s15453_s15 + $0xbc8] sm:$0xff]  }
 0x162   : > { %13408 = vmatprep.subr.bf16.mxu0 %v14720_v21  ;;  %13429 = vmatpush3.bf16.msra.mxu1 %v14719_v20  ;;  %v14758_v20 = vld [vmem:[%s15453_s15 + $0xb08] sm:$0xff]  }
 0x163   : > { %13430 = vmatprep.subr.bf16.mxu1 %v14721_v22  ;;  %v14759_v21 = vld [vmem:[%s15453_s15 + $0xb88] sm:$0xff]   ;;  %v14760_v22 = vld [vmem:[%s15453_s15 + $0xb40] sm:$0xff]  }
 0x165   : > { %13409 = vmatpush3.bf16.msra.mxu0 %v14722_v23  ;;  %v14761_v23 = vld [vmem:[%s15453_s15 + $0xbc0] sm:$0xff]  }
 0x166   : > { %13410 = vmatprep.subr.bf16.mxu0 %v14724_v25  ;;  %13431 = vmatpush3.bf16.msra.mxu1 %v14723_v24  ;;  %v14762_v24 = vld [vmem:[%s15453_s15 + $0xb00] sm:$0xff]  }
 0x167   : > { %13432 = vmatprep.subr.bf16.mxu1 %v14725_v26  ;;  %v14763_v25 = vld [vmem:[%s15453_s15 + $0xb80] sm:$0xff]   ;;  %v2519_v26 = vrot.slane %v15892_v41, %v15491_v35  ;;  %v14773_v41 = vld [vmem:[%s15453_s15 + $0xc68] sm:$0xff]  }
 0x169   : > { %13411 = vmatpush3.bf16.msra.mxu0 %v14726_v27  ;;  %v14765_v27 = vld [vmem:[%s15453_s15 + $0xc78] sm:$0xff]  }
 0x16a   : > { %13412 = vmatprep.subr.bf16.mxu0 %v14728_v29  ;;  %13433 = vmatpush3.bf16.msra.mxu1 %v14727_v28  ;;  %v14766_v28 = vld [vmem:[%s15453_s15 + $0xcf8] sm:$0xff]  }
 0x16b   : > { %13434 = vmatprep.subr.bf16.mxu1 %v14729_v30  ;;  %v14767_v29 = vld [vmem:[%s15453_s15 + $0xc38] sm:$0xff]  }
 0x16c   : > { %v14768_v30 = vld [vmem:[%s15453_s15 + $0xcb8] sm:$0xff]  }
 0x16d   : > { %13413 = vmatpush3.bf16.msra.mxu0 %v14730_v31  ;;  %v2535_v31 = vcombine.high %v2519_v26, %v2519_v26 }
 0x16e   : > { %13442 = vmatprep.subr.bf16.mxu0 %v14732_v37  ;;  %13435 = vmatpush3.bf16.msra.mxu1 %v14731_v33 }
 0x16f   : > { %13464 = vmatprep.subr.bf16.mxu1 %v14733_v40 }
 0x170   : > { %v13150_v49 = vpop.f32.mrf.mxu0  ;;  %10133 = vmatmul.mubr.bf16.vlgmr.msra.gmra.mxu0 %v2512_v39  ;;  %v14772_v39 = vld [vmem:[%s15453_s15 + $0xcb0] sm:$0xff]  }
 0x171   : > { %v13172_v53 = vpop.f32.mrf.mxu1  ;;  %13443 = vmatpush3.bf16.msra.mxu0 %v14734_v42  ;;  %10173 = vmatmul.mubr.bf16.vlgmr.msra.gmra.mxu1 %v2534_v46 }
 0x172   : > { %v13151_v54 = vpop.f32.mrf.mxu0  ;;  %13444 = vmatprep.subr.bf16.mxu0 %v14736_v47  ;;  %13465 = vmatpush3.bf16.msra.mxu1 %v14735_v44  ;;  %v14774_v44 = vld [vmem:[%s15453_s15 + $0xce8] sm:$0xff]  }
 0x173   : > { %v13152_v57 = vadd.f32 %v13151_v54, %v13150_v49  ;;  %v13173_v59 = vpop.f32.mrf.mxu1  ;;  %10212 = vmatprep.mubr.bf16.mxu0 %v2533_v51  ;;  %13466 = vmatprep.subr.bf16.mxu1 %v14737_v50  ;;  %v14775_v47 = vld [vmem:[%s15453_s15 + $0xc28] sm:$0xff]   ;;  %v14778_v54 = vld [vmem:[%s15453_s15 + $0xce0] sm:$0xff]  }
 0x174   : > { %v13153_v60 = vpop.f32.mrf.mxu0  ;;  %v13174_v63 = vadd.f32 %v13173_v59, %v13172_v53  ;;  %10252 = vmatprep.mubr.bf16.mxu1 %v2537_v56  ;;  %v14776_v50 = vld [vmem:[%s15453_s15 + $0xca8] sm:$0xff]   ;;  %v14780_v56 = vld [vmem:[%s15453_s15 + $0xca0] sm:$0xff]   ;;  %v14783_v59 = vld [vmem:[%s15453_s15 + $0xc18] sm:$0xff]  }
 0x175   : > { %v9655_v62 = vadd.f32 %v13152_v57, %v15864_v11  ;;  %v13175_v1 = vpop.f32.mrf.mxu1  ;;  %13445 = vmatpush3.bf16.msra.mxu0 %v14738_v52  ;;  %v14749_v11 = vld [vmem:[%s15453_s15 + $0xbd8] sm:$0xff]   ;;  %v14777_v52 = vld [vmem:[%s15453_s15 + $0xc60] sm:$0xff]  }
 0x176   : > { %v13154_v2 = vpop.f32.mrf.mxu0  ;;  %13446 = vmatprep.subr.bf16.mxu0 %v14740_v58  ;;  %13467 = vmatpush3.bf16.msra.mxu1 %v14739_v55  ;;  %v14779_v55 = vld [vmem:[%s15453_s15 + $0xc20] sm:$0xff]   ;;  %v14781_v57 = vld [vmem:[%s15453_s15 + $0xc58] sm:$0xff]   ;;  %v14789_v1 = vld [vmem:[%s15453_s15 + $0xc48] sm:$0xff]  }
 0x177   : > { %v15909_v4 = vadd.f32 %v13174_v63, %v9655_v62  ;;  %v13176_v6 = vpop.f32.mrf.mxu1  ;;  %13468 = vmatprep.subr.bf16.mxu1 %v14741_v61  ;;  %v14782_v58 = vld [vmem:[%s15453_s15 + $0xcd8] sm:$0xff]   ;;  %v14785_v61 = vld [vmem:[%s15453_s15 + $0xc50] sm:$0xff]   ;;  %v14790_v2 = vld [vmem:[%s15453_s15 + $0xcc8] sm:$0xff]  }
 0x178   : > { %v14784_v60 = vld [vmem:[%s15453_s15 + $0xc98] sm:$0xff]   ;;  %v14786_v62 = vld [vmem:[%s15453_s15 + $0xcd0] sm:$0xff]   ;;  %v14794_v6 = vld [vmem:[%s15453_s15 + $0xcc0] sm:$0xff]  }
 0x179   : > { %13447 = vmatpush3.bf16.msra.mxu0 %v14742_v0  ;;  %v14787_v63 = vld [vmem:[%s15453_s15 + $0xc10] sm:$0xff]  }
 0x17a   : > { %13448 = vmatprep.subr.bf16.mxu0 %v14744_v5  ;;  %13469 = vmatpush3.bf16.msra.mxu1 %v14743_v3  ;;  %v14788_v0 = vld [vmem:[%s15453_s15 + $0xc90] sm:$0xff]   ;;  %v14791_v3 = vld [vmem:[%s15453_s15 + $0xc08] sm:$0xff]   ;;  %v14793_v5 = vld [vmem:[%s15453_s15 + $0xc40] sm:$0xff]  }
 0x17b   : > { %13470 = vmatprep.subr.bf16.mxu1 %v14745_v7  ;;  %v14795_v7 = vld [vmem:[%s15453_s15 + $0xc00] sm:$0xff]  }
 0x17d   : > { %13449 = vmatpush3.bf16.msra.mxu0 %v14746_v8  ;;  %v170_v8 = vld [vmem:[%s15489_s19 + $0x30] sm:$0xff] }
 0x17e   : > { %13450 = vmatprep.subr.bf16.mxu0 %v14748_v10  ;;  %13471 = vmatpush3.bf16.msra.mxu1 %v14747_v9  ;;  %v2545_v9 = vrot.slane %v170_v8, %v15491_v35  ;;  %v14797_v10 = vld [vmem:[%s15453_s15 + $0xd78] sm:$0xff]  }
 0x17f   : > { %13472 = vmatprep.subr.bf16.mxu1 %v14749_v11  ;;  %v2538_v11 = vcombine.high %v170_v8, %v170_v8  ;;  %v14834_v8 = vld [vmem:[%s15453_s15 + $0xe70] sm:$0xff]  }
 0x181   : > { %13451 = vmatpush3.bf16.msra.mxu0 %v14750_v12  ;;  %v14796_v12 = vld [vmem:[%s15453_s15 + $0xc80] sm:$0xff]  }
 0x182   : > { %13452 = vmatprep.subr.bf16.mxu0 %v14752_v14  ;;  %13473 = vmatpush3.bf16.msra.mxu1 %v14751_v13  ;;  %v2553_v13 = vcombine.high %v2545_v9, %v2545_v9  ;;  %v2561_v14 = vrot.slane %v2545_v9, %v15491_v35 }
 0x183   : > { %13474 = vmatprep.subr.bf16.mxu1 %v14753_v15  ;;  %v14798_v15 = vld [vmem:[%s15453_s15 + $0xdf8] sm:$0xff]  }
 0x185   : > { %13453 = vmatpush3.bf16.msra.mxu0 %v14754_v16  ;;  %v15974_v16 = vrot.slane %v2538_v11, %v15491_v35  ;;  %v14836_v11 = vld [vmem:[%s15453_s15 + $0xe30] sm:$0xff]  }
 0x186   : > { %13454 = vmatprep.subr.bf16.mxu0 %v14756_v18  ;;  %13475 = vmatpush3.bf16.msra.mxu1 %v14755_v17  ;;  %v14799_v17 = vld [vmem:[%s15453_s15 + $0xd38] sm:$0xff]   ;;  %v2575_v18 = vrot.slane %v2553_v13, %v15491_v35 }
 0x187   : > { %13476 = vmatprep.subr.bf16.mxu1 %v14757_v19  ;;  %v14800_v19 = vld [vmem:[%s15453_s15 + $0xdb8] sm:$0xff]  }
 0x189   : > { %13455 = vmatpush3.bf16.msra.mxu0 %v14758_v20  ;;  %v2554_v20 = vcombine.high %v15974_v16, %v15974_v16 }
 0x18a   : > { %13456 = vmatprep.subr.bf16.mxu0 %v14760_v22  ;;  %13477 = vmatpush3.bf16.msra.mxu1 %v14759_v21  ;;  %v2583_v21 = vcombine.high %v2561_v14, %v2561_v14  ;;  %v14801_v22 = vld [vmem:[%s15453_s15 + $0xd70] sm:$0xff]  }
 0x18b   : > { %13478 = vmatprep.subr.bf16.mxu1 %v14761_v23  ;;  %v2585_v23 = vcombine.high %v2575_v18, %v2575_v18 }
 0x18d   : > { %13457 = vmatpush3.bf16.msra.mxu0 %v14762_v24 }
 0x18e   : > { %13486 = vmatprep.subr.bf16.mxu0 %v14765_v27  ;;  %13479 = vmatpush3.bf16.msra.mxu1 %v14763_v25  ;;  %v14802_v25 = vld [vmem:[%s15453_s15 + $0xdf0] sm:$0xff]  }
 0x18f   : > { %13508 = vmatprep.subr.bf16.mxu1 %v14766_v28  ;;  %v14803_v27 = vld [vmem:[%s15453_s15 + $0xd30] sm:$0xff]  }
 0x190   : > { %v13194_v33 = vpop.f32.mrf.mxu0  ;;  %10213 = vmatmul.mubr.bf16.vlgmr.msra.gmra.mxu0 %v2519_v26  ;;  %v2582_v26 = vrot.slane %v2554_v20, %v15491_v35 }
 0x191   : > { %v13216_v37 = vpop.f32.mrf.mxu1  ;;  %13487 = vmatpush3.bf16.msra.mxu0 %v14767_v29  ;;  %10253 = vmatmul.mubr.bf16.vlgmr.msra.gmra.mxu1 %v2535_v31 }
 0x192   : > { %v13195_v38 = vpop.f32.mrf.mxu0  ;;  %13488 = vmatprep.subr.bf16.mxu0 %v14769_v32  ;;  %13509 = vmatpush3.bf16.msra.mxu1 %v14768_v30  ;;  %v14804_v30 = vld [vmem:[%s15453_s15 + $0xdb0] sm:$0xff]   ;;  %v2586_v31 = vcombine.high %v2582_v26, %v2582_v26 }
 0x193   : > { %v13196_v40 = vadd.f32 %v13195_v38, %v13194_v33  ;;  %v13217_v42 = vpop.f32.mrf.mxu1  ;;  %13510 = vmatprep.subr.bf16.mxu1 %v14770_v34  ;;  %10292 = vmatprep.mubr.bf16.mxu0 %v2575_v18  ;;  %v14805_v33 = vld [vmem:[%s15453_s15 + $0xd68] sm:$0xff]  }
 0x194   : > { %v13197_v43 = vpop.f32.mrf.mxu0  ;;  %v13218_v46 = vadd.f32 %v13217_v42, %v13216_v37  ;;  %10332 = vmatprep.mubr.bf16.mxu1 %v2585_v23  ;;  %v14806_v37 = vld [vmem:[%s15453_s15 + $0xde8] sm:$0xff]  }
 0x195   : > { %v9735_v45 = vadd.f32 %v13196_v40, %v15909_v4  ;;  %v13219_v48 = vpop.f32.mrf.mxu1  ;;  %13489 = vmatpush3.bf16.msra.mxu0 %v14771_v36  ;;  %v14792_v4 = vld [vmem:[%s15453_s15 + $0xc88] sm:$0xff]  }
 0x196   : > { %v13198_v49 = vpop.f32.mrf.mxu0  ;;  %13490 = vmatprep.subr.bf16.mxu0 %v14773_v41  ;;  %13511 = vmatpush3.bf16.msra.mxu1 %v14772_v39  ;;  %v14807_v40 = vld [vmem:[%s15453_s15 + $0xd28] sm:$0xff]   ;;  %v14811_v48 = vld [vmem:[%s15453_s15 + $0xd20] sm:$0xff]  }
 0x197   : > { %v15946_v51 = vadd.f32 %v13218_v46, %v9735_v45  ;;  %v13220_v53 = vpop.f32.mrf.mxu1  ;;  %13512 = vmatprep.subr.bf16.mxu1 %v14774_v44  ;;  %v14808_v43 = vld [vmem:[%s15453_s15 + $0xda8] sm:$0xff]   ;;  %v14809_v45 = vld [vmem:[%s15453_s15 + $0xd60] sm:$0xff]  }
 0x198   : > { %v14812_v49 = vld [vmem:[%s15453_s15 + $0xda0] sm:$0xff]   ;;  %v14816_v53 = vld [vmem:[%s15453_s15 + $0xd98] sm:$0xff]  }
 0x199   : > { %13491 = vmatpush3.bf16.msra.mxu0 %v14775_v47  ;;  %v14810_v47 = vld [vmem:[%s15453_s15 + $0xde0] sm:$0xff]  }
 0x19a   : > { %13492 = vmatprep.subr.bf16.mxu0 %v14777_v52  ;;  %13513 = vmatpush3.bf16.msra.mxu1 %v14776_v50  ;;  %v14813_v50 = vld [vmem:[%s15453_s15 + $0xd58] sm:$0xff]  }
 0x19b   : > { %13514 = vmatprep.subr.bf16.mxu1 %v14778_v54  ;;  %v14815_v52 = vld [vmem:[%s15453_s15 + $0xd18] sm:$0xff]   ;;  %v14817_v54 = vld [vmem:[%s15453_s15 + $0xd50] sm:$0xff]  }
 0x19d   : > { %13493 = vmatpush3.bf16.msra.mxu0 %v14779_v55  ;;  %v14818_v55 = vld [vmem:[%s15453_s15 + $0xdd0] sm:$0xff]  }
 0x19e   : > { %13494 = vmatprep.subr.bf16.mxu0 %v14781_v57  ;;  %13515 = vmatpush3.bf16.msra.mxu1 %v14780_v56  ;;  %v14819_v56 = vld [vmem:[%s15453_s15 + $0xd10] sm:$0xff]  }
 0x19f   : > { %13516 = vmatprep.subr.bf16.mxu1 %v14782_v58  ;;  %v14820_v57 = vld [vmem:[%s15453_s15 + $0xd90] sm:$0xff]   ;;  %v14821_v58 = vld [vmem:[%s15453_s15 + $0xd48] sm:$0xff]  }
 0x1a1   : > { %13495 = vmatpush3.bf16.msra.mxu0 %v14783_v59  ;;  %v14822_v59 = vld [vmem:[%s15453_s15 + $0xdc8] sm:$0xff]  }
 0x1a2   : > { %13496 = vmatprep.subr.bf16.mxu0 %v14785_v61  ;;  %13517 = vmatpush3.bf16.msra.mxu1 %v14784_v60  ;;  %v14823_v60 = vld [vmem:[%s15453_s15 + $0xd08] sm:$0xff]  }
 0x1a3   : > { %13518 = vmatprep.subr.bf16.mxu1 %v14786_v62  ;;  %v14824_v61 = vld [vmem:[%s15453_s15 + $0xd88] sm:$0xff]   ;;  %v14825_v62 = vld [vmem:[%s15453_s15 + $0xd40] sm:$0xff]  }
 0x1a5   : > { %13497 = vmatpush3.bf16.msra.mxu0 %v14787_v63  ;;  %v14826_v63 = vld [vmem:[%s15453_s15 + $0xdc0] sm:$0xff]  }
 0x1a6   : > { %13498 = vmatprep.subr.bf16.mxu0 %v14789_v1  ;;  %13519 = vmatpush3.bf16.msra.mxu1 %v14788_v0  ;;  %v14827_v0 = vld [vmem:[%s15453_s15 + $0xd00] sm:$0xff]  }
 0x1a7   : > { %13520 = vmatprep.subr.bf16.mxu1 %v14790_v2  ;;  %v14828_v1 = vld [vmem:[%s15453_s15 + $0xd80] sm:$0xff]   ;;  %v2568_v2 = vrot.slane %v15974_v16, %v15491_v35  ;;  %v14838_v16 = vld [vmem:[%s15453_s15 + $0xe68] sm:$0xff]  }
 0x1a9   : > { %13499 = vmatpush3.bf16.msra.mxu0 %v14791_v3  ;;  %v14830_v3 = vld [vmem:[%s15453_s15 + $0xe78] sm:$0xff]  }
 0x1aa   : > { %13500 = vmatprep.subr.bf16.mxu0 %v14793_v5  ;;  %13521 = vmatpush3.bf16.msra.mxu1 %v14792_v4  ;;  %v14831_v4 = vld [vmem:[%s15453_s15 + $0xef8] sm:$0xff]  }
 0x1ab   : > { %13522 = vmatprep.subr.bf16.mxu1 %v14794_v6  ;;  %v14832_v5 = vld [vmem:[%s15453_s15 + $0xe38] sm:$0xff]  }
 0x1ac   : > { %v14833_v6 = vld [vmem:[%s15453_s15 + $0xeb8] sm:$0xff]  }
 0x1ad   : > { %13501 = vmatpush3.bf16.msra.mxu0 %v14795_v7  ;;  %v2584_v7 = vcombine.high %v2568_v2, %v2568_v2 }
 0x1ae   : > { %13530 = vmatprep.subr.bf16.mxu0 %v14797_v10  ;;  %13523 = vmatpush3.bf16.msra.mxu1 %v14796_v12  ;;  %v14835_v10 = vld [vmem:[%s15453_s15 + $0xef0] sm:$0xff]  }
 0x1af   : > { %13552 = vmatprep.subr.bf16.mxu1 %v14798_v15 }
 0x1b0   : > { %v13238_v24 = vpop.f32.mrf.mxu0  ;;  %10293 = vmatmul.mubr.bf16.vlgmr.msra.gmra.mxu0 %v2561_v14  ;;  %v14837_v14 = vld [vmem:[%s15453_s15 + $0xeb0] sm:$0xff]  }
 0x1b1   : > { %v13260_v28 = vpop.f32.mrf.mxu1  ;;  %13531 = vmatpush3.bf16.msra.mxu0 %v14799_v17  ;;  %10333 = vmatmul.mubr.bf16.vlgmr.msra.gmra.mxu1 %v2583_v21 }
 0x1b2   : > { %v13239_v29 = vpop.f32.mrf.mxu0  ;;  %13532 = vmatprep.subr.bf16.mxu0 %v14801_v22  ;;  %13553 = vmatpush3.bf16.msra.mxu1 %v14800_v19  ;;  %v14839_v19 = vld [vmem:[%s15453_s15 + $0xee8] sm:$0xff]  }
 0x1b3   : > { %v13240_v32 = vadd.f32 %v13239_v29, %v13238_v24  ;;  %v13261_v34 = vpop.f32.mrf.mxu1  ;;  %10372 = vmatprep.mubr.bf16.mxu0 %v2582_v26  ;;  %13554 = vmatprep.subr.bf16.mxu1 %v14802_v25  ;;  %v14840_v22 = vld [vmem:[%s15453_s15 + $0xe28] sm:$0xff]   ;;  %v14843_v29 = vld [vmem:[%s15453_s15 + $0xee0] sm:$0xff]  }
 0x1b4   : > { %v13241_v36 = vpop.f32.mrf.mxu0  ;;  %v13262_v39 = vadd.f32 %v13261_v34, %v13260_v28  ;;  %10412 = vmatprep.mubr.bf16.mxu1 %v2586_v31  ;;  %v14841_v25 = vld [vmem:[%s15453_s15 + $0xea8] sm:$0xff]   ;;  %v14845_v31 = vld [vmem:[%s15453_s15 + $0xea0] sm:$0xff]   ;;  %v14848_v34 = vld [vmem:[%s15453_s15 + $0xe18] sm:$0xff]  }
 0x1b5   : > { %v9815_v38 = vadd.f32 %v13240_v32, %v15946_v51  ;;  %v13263_v41 = vpop.f32.mrf.mxu1  ;;  %13533 = vmatpush3.bf16.msra.mxu0 %v14803_v27  ;;  %v14814_v51 = vld [vmem:[%s15453_s15 + $0xdd8] sm:$0xff]   ;;  %v14842_v27 = vld [vmem:[%s15453_s15 + $0xe60] sm:$0xff]  }
 0x1b6   : > { %v13242_v42 = vpop.f32.mrf.mxu0  ;;  %13534 = vmatprep.subr.bf16.mxu0 %v14805_v33  ;;  %13555 = vmatpush3.bf16.msra.mxu1 %v14804_v30  ;;  %v14844_v30 = vld [vmem:[%s15453_s15 + $0xe20] sm:$0xff]   ;;  %v14846_v32 = vld [vmem:[%s15453_s15 + $0xe58] sm:$0xff]   ;;  %v14854_v41 = vld [vmem:[%s15453_s15 + $0xe48] sm:$0xff]  }
 0x1b7   : > { %v15991_v44 = vadd.f32 %v13262_v39, %v9815_v38  ;;  %v13264_v46 = vpop.f32.mrf.mxu1  ;;  %13556 = vmatprep.subr.bf16.mxu1 %v14806_v37  ;;  %v14847_v33 = vld [vmem:[%s15453_s15 + $0xed8] sm:$0xff]   ;;  %v14850_v37 = vld [vmem:[%s15453_s15 + $0xe50] sm:$0xff]   ;;  %v14855_v42 = vld [vmem:[%s15453_s15 + $0xec8] sm:$0xff]  }
 0x1b8   : > { %v14849_v36 = vld [vmem:[%s15453_s15 + $0xe98] sm:$0xff]   ;;  %v14851_v38 = vld [vmem:[%s15453_s15 + $0xed0] sm:$0xff]   ;;  %v14859_v46 = vld [vmem:[%s15453_s15 + $0xec0] sm:$0xff]  }
 0x1b9   : > { %13535 = vmatpush3.bf16.msra.mxu0 %v14807_v40  ;;  %v14852_v39 = vld [vmem:[%s15453_s15 + $0xe10] sm:$0xff]  }
 0x1ba   : > { %13536 = vmatprep.subr.bf16.mxu0 %v14809_v45  ;;  %13557 = vmatpush3.bf16.msra.mxu1 %v14808_v43  ;;  %v14853_v40 = vld [vmem:[%s15453_s15 + $0xe90] sm:$0xff]   ;;  %v14856_v43 = vld [vmem:[%s15453_s15 + $0xe08] sm:$0xff]   ;;  %v14858_v45 = vld [vmem:[%s15453_s15 + $0xe40] sm:$0xff]  }
 0x1bb   : > { %13558 = vmatprep.subr.bf16.mxu1 %v14810_v47  ;;  %v14860_v47 = vld [vmem:[%s15453_s15 + $0xe00] sm:$0xff]  }
 0x1bd   : > { %13537 = vmatpush3.bf16.msra.mxu0 %v14811_v48  ;;  %v171_v48 = vld [vmem:[%s15489_s19 + $0x38] sm:$0xff] }
 0x1be   : > { %13538 = vmatprep.subr.bf16.mxu0 %v14813_v50  ;;  %13559 = vmatpush3.bf16.msra.mxu1 %v14812_v49  ;;  %v14861_v49 = vld [vmem:[%s15453_s15 + $0xe80] sm:$0xff]   ;;  %v2594_v50 = vrot.slane %v171_v48, %v15491_v35 }
 0x1bf   : > { %13560 = vmatprep.subr.bf16.mxu1 %v14814_v51  ;;  %v2587_v51 = vcombine.high %v171_v48, %v171_v48  ;;  %v14899_v48 = vld [vmem:[%s15453_s15 + $0x1070] sm:$0xff]  }
 0x1c1   : > { %13539 = vmatpush3.bf16.msra.mxu0 %v14815_v52  ;;  %v14862_v52 = vld [vmem:[%s15453_s15 + $0xf78] sm:$0xff]  }
 0x1c2   : > { %13540 = vmatprep.subr.bf16.mxu0 %v14817_v54  ;;  %13561 = vmatpush3.bf16.msra.mxu1 %v14816_v53  ;;  %v2602_v53 = vcombine.high %v2594_v50, %v2594_v50  ;;  %v2610_v54 = vrot.slane %v2594_v50, %v15491_v35  ;;  %v14900_v50 = vld [vmem:[%s15453_s15 + $0x10f0] sm:$0xff]  }
 0x1c3   : > { %13562 = vmatprep.subr.bf16.mxu1 %v14818_v55  ;;  %v14863_v55 = vld [vmem:[%s15453_s15 + $0xff8] sm:$0xff]  }
 0x1c5   : > { %13541 = vmatpush3.bf16.msra.mxu0 %v14819_v56  ;;  %v16056_v56 = vrot.slane %v2587_v51, %v15491_v35  ;;  %v14901_v51 = vld [vmem:[%s15453_s15 + $0x1030] sm:$0xff]  }
 0x1c6   : > { %13542 = vmatprep.subr.bf16.mxu0 %v14821_v58  ;;  %13563 = vmatpush3.bf16.msra.mxu1 %v14820_v57  ;;  %v14864_v57 = vld [vmem:[%s15453_s15 + $0xf38] sm:$0xff]   ;;  %v2624_v58 = vrot.slane %v2602_v53, %v15491_v35 }
 0x1c7   : > { %13564 = vmatprep.subr.bf16.mxu1 %v14822_v59  ;;  %v14865_v59 = vld [vmem:[%s15453_s15 + $0xfb8] sm:$0xff]  }
 0x1c9   : > { %13543 = vmatpush3.bf16.msra.mxu0 %v14823_v60  ;;  %v2603_v60 = vcombine.high %v16056_v56, %v16056_v56 }
 0x1ca   : > { %13544 = vmatprep.subr.bf16.mxu0 %v14825_v62  ;;  %13565 = vmatpush3.bf16.msra.mxu1 %v14824_v61  ;;  %v2632_v61 = vcombine.high %v2610_v54, %v2610_v54  ;;  %v14866_v62 = vld [vmem:[%s15453_s15 + $0xf70] sm:$0xff]  }
 0x1cb   : > { %13566 = vmatprep.subr.bf16.mxu1 %v14826_v63  ;;  %v2634_v63 = vcombine.high %v2624_v58, %v2624_v58 }
 0x1cd   : > { %13545 = vmatpush3.bf16.msra.mxu0 %v14827_v0 }
 0x1ce   : > { %13574 = vmatprep.subr.bf16.mxu0 %v14830_v3  ;;  %13567 = vmatpush3.bf16.msra.mxu1 %v14828_v1  ;;  %v14867_v1 = vld [vmem:[%s15453_s15 + $0xff0] sm:$0xff]  }
 0x1cf   : > { %13596 = vmatprep.subr.bf16.mxu1 %v14831_v4  ;;  %v14868_v3 = vld [vmem:[%s15453_s15 + $0xf30] sm:$0xff]  }
 0x1d0   : > { %v13282_v9 = vpop.f32.mrf.mxu0  ;;  %10373 = vmatmul.mubr.bf16.vlgmr.msra.gmra.mxu0 %v2568_v2  ;;  %v2631_v2 = vrot.slane %v2603_v60, %v15491_v35 }
 0x1d1   : > { %v13304_v12 = vpop.f32.mrf.mxu1  ;;  %13575 = vmatpush3.bf16.msra.mxu0 %v14832_v5  ;;  %10413 = vmatmul.mubr.bf16.vlgmr.msra.gmra.mxu1 %v2584_v7 }
 0x1d2   : > { %v13283_v13 = vpop.f32.mrf.mxu0  ;;  %13576 = vmatprep.subr.bf16.mxu0 %v14834_v8  ;;  %13597 = vmatpush3.bf16.msra.mxu1 %v14833_v6  ;;  %v14869_v6 = vld [vmem:[%s15453_s15 + $0xfb0] sm:$0xff]   ;;  %v2635_v7 = vcombine.high %v2631_v2, %v2631_v2 }
 0x1d3   : > { %v13284_v15 = vadd.f32 %v13283_v13, %v13282_v9  ;;  %v13305_v17 = vpop.f32.mrf.mxu1  ;;  %13598 = vmatprep.subr.bf16.mxu1 %v14835_v10  ;;  %10452 = vmatprep.mubr.bf16.mxu0 %v2624_v58  ;;  %v14870_v9 = vld [vmem:[%s15453_s15 + $0xf68] sm:$0xff]  }
 0x1d4   : > { %v13285_v18 = vpop.f32.mrf.mxu0  ;;  %v13306_v21 = vadd.f32 %v13305_v17, %v13304_v12  ;;  %10492 = vmatprep.mubr.bf16.mxu1 %v2634_v63  ;;  %v14871_v12 = vld [vmem:[%s15453_s15 + $0xfe8] sm:$0xff]  }
 0x1d5   : > { %v9895_v20 = vadd.f32 %v13284_v15, %v15991_v44  ;;  %v13307_v23 = vpop.f32.mrf.mxu1  ;;  %13577 = vmatpush3.bf16.msra.mxu0 %v14836_v11  ;;  %v14857_v44 = vld [vmem:[%s15453_s15 + $0xe88] sm:$0xff]  }
 0x1d6   : > { %v13286_v24 = vpop.f32.mrf.mxu0  ;;  %13578 = vmatprep.subr.bf16.mxu0 %v14838_v16  ;;  %13599 = vmatpush3.bf16.msra.mxu1 %v14837_v14  ;;  %v14872_v15 = vld [vmem:[%s15453_s15 + $0xf28] sm:$0xff]   ;;  %v14876_v23 = vld [vmem:[%s15453_s15 + $0xf20] sm:$0xff]  }
 0x1d7   : > { %v16028_v26 = vadd.f32 %v13306_v21, %v9895_v20  ;;  %v13308_v28 = vpop.f32.mrf.mxu1  ;;  %13600 = vmatprep.subr.bf16.mxu1 %v14839_v19  ;;  %v14873_v18 = vld [vmem:[%s15453_s15 + $0xfa8] sm:$0xff]   ;;  %v14874_v20 = vld [vmem:[%s15453_s15 + $0xf60] sm:$0xff]  }
 0x1d8   : > { %v14877_v24 = vld [vmem:[%s15453_s15 + $0xfa0] sm:$0xff]   ;;  %v14881_v28 = vld [vmem:[%s15453_s15 + $0xf98] sm:$0xff]  }
 0x1d9   : > { %13579 = vmatpush3.bf16.msra.mxu0 %v14840_v22  ;;  %v14875_v22 = vld [vmem:[%s15453_s15 + $0xfe0] sm:$0xff]  }
 0x1da   : > { %13580 = vmatprep.subr.bf16.mxu0 %v14842_v27  ;;  %13601 = vmatpush3.bf16.msra.mxu1 %v14841_v25  ;;  %v14878_v25 = vld [vmem:[%s15453_s15 + $0xf58] sm:$0xff]  }
 0x1db   : > { %13602 = vmatprep.subr.bf16.mxu1 %v14843_v29  ;;  %v14880_v27 = vld [vmem:[%s15453_s15 + $0xf18] sm:$0xff]   ;;  %v14882_v29 = vld [vmem:[%s15453_s15 + $0xf50] sm:$0xff]  }
 0x1dd   : > { %13581 = vmatpush3.bf16.msra.mxu0 %v14844_v30  ;;  %v14883_v30 = vld [vmem:[%s15453_s15 + $0xfd0] sm:$0xff]  }
 0x1de   : > { %13582 = vmatprep.subr.bf16.mxu0 %v14846_v32  ;;  %13603 = vmatpush3.bf16.msra.mxu1 %v14845_v31  ;;  %v14884_v31 = vld [vmem:[%s15453_s15 + $0xf10] sm:$0xff]  }
 0x1df   : > { %13604 = vmatprep.subr.bf16.mxu1 %v14847_v33  ;;  %v14885_v32 = vld [vmem:[%s15453_s15 + $0xf90] sm:$0xff]   ;;  %v14886_v33 = vld [vmem:[%s15453_s15 + $0xf48] sm:$0xff]  }
 0x1e1   : > { %13583 = vmatpush3.bf16.msra.mxu0 %v14848_v34  ;;  %v14887_v34 = vld [vmem:[%s15453_s15 + $0xfc8] sm:$0xff]  }
 0x1e2   : > { %13584 = vmatprep.subr.bf16.mxu0 %v14850_v37  ;;  %13605 = vmatpush3.bf16.msra.mxu1 %v14849_v36  ;;  %v14888_v36 = vld [vmem:[%s15453_s15 + $0xf08] sm:$0xff]  }
 0x1e3   : > { %13606 = vmatprep.subr.bf16.mxu1 %v14851_v38  ;;  %v14889_v37 = vld [vmem:[%s15453_s15 + $0xf88] sm:$0xff]   ;;  %v14890_v38 = vld [vmem:[%s15453_s15 + $0xf40] sm:$0xff]  }
 0x1e5   : > { %13585 = vmatpush3.bf16.msra.mxu0 %v14852_v39  ;;  %v14891_v39 = vld [vmem:[%s15453_s15 + $0xfc0] sm:$0xff]  }
 0x1e6   : > { %13586 = vmatprep.subr.bf16.mxu0 %v14854_v41  ;;  %13607 = vmatpush3.bf16.msra.mxu1 %v14853_v40  ;;  %v14892_v40 = vld [vmem:[%s15453_s15 + $0xf00] sm:$0xff]  }
 0x1e7   : > { %13608 = vmatprep.subr.bf16.mxu1 %v14855_v42  ;;  %v14893_v41 = vld [vmem:[%s15453_s15 + $0xf80] sm:$0xff]   ;;  %v2617_v42 = vrot.slane %v16056_v56, %v15491_v35  ;;  %v14903_v56 = vld [vmem:[%s15453_s15 + $0x1068] sm:$0xff]  }
 0x1e9   : > { %13587 = vmatpush3.bf16.msra.mxu0 %v14856_v43  ;;  %v14895_v43 = vld [vmem:[%s15453_s15 + $0x1078] sm:$0xff]  }
 0x1ea   : > { %13588 = vmatprep.subr.bf16.mxu0 %v14858_v45  ;;  %13609 = vmatpush3.bf16.msra.mxu1 %v14857_v44  ;;  %v14896_v44 = vld [vmem:[%s15453_s15 + $0x10f8] sm:$0xff]  }
 0x1eb   : > { %13610 = vmatprep.subr.bf16.mxu1 %v14859_v46  ;;  %v14897_v45 = vld [vmem:[%s15453_s15 + $0x1038] sm:$0xff]  }
 0x1ec   : > { %v14898_v46 = vld [vmem:[%s15453_s15 + $0x10b8] sm:$0xff]  }
 0x1ed   : > { %13589 = vmatpush3.bf16.msra.mxu0 %v14860_v47  ;;  %v2633_v47 = vcombine.high %v2617_v42, %v2617_v42 }
 0x1ee   : > { %13618 = vmatprep.subr.bf16.mxu0 %v14862_v52  ;;  %13611 = vmatpush3.bf16.msra.mxu1 %v14861_v49 }
 0x1ef   : > { %13640 = vmatprep.subr.bf16.mxu1 %v14863_v55 }
 0x1f0   : > { %v13326_v0 = vpop.f32.mrf.mxu0  ;;  %10453 = vmatmul.mubr.bf16.vlgmr.msra.gmra.mxu0 %v2610_v54  ;;  %v14902_v54 = vld [vmem:[%s15453_s15 + $0x10b0] sm:$0xff]  }
 0x1f1   : > { %v13348_v4 = vpop.f32.mrf.mxu1  ;;  %13619 = vmatpush3.bf16.msra.mxu0 %v14864_v57  ;;  %10493 = vmatmul.mubr.bf16.vlgmr.msra.gmra.mxu1 %v2632_v61 }
 0x1f2   : > { %v13327_v5 = vpop.f32.mrf.mxu0  ;;  %13620 = vmatprep.subr.bf16.mxu0 %v14866_v62  ;;  %13641 = vmatpush3.bf16.msra.mxu1 %v14865_v59  ;;  %v14904_v59 = vld [vmem:[%s15453_s15 + $0x10e8] sm:$0xff]  }
 0x1f3   : > { %v13328_v8 = vadd.f32 %v13327_v5, %v13326_v0  ;;  %v13349_v10 = vpop.f32.mrf.mxu1  ;;  %10532 = vmatprep.mubr.bf16.mxu0 %v2631_v2  ;;  %13642 = vmatprep.subr.bf16.mxu1 %v14867_v1  ;;  %v14905_v62 = vld [vmem:[%s15453_s15 + $0x1028] sm:$0xff]   ;;  %v14908_v5 = vld [vmem:[%s15453_s15 + $0x10e0] sm:$0xff]  }
 0x1f4   : > { %v13329_v11 = vpop.f32.mrf.mxu0  ;;  %v13350_v14 = vadd.f32 %v13349_v10, %v13348_v4  ;;  %10572 = vmatprep.mubr.bf16.mxu1 %v2635_v7  ;;  %v14906_v1 = vld [vmem:[%s15453_s15 + $0x10a8] sm:$0xff]   ;;  %v14910_v7 = vld [vmem:[%s15453_s15 + $0x10a0] sm:$0xff]   ;;  %v14913_v10 = vld [vmem:[%s15453_s15 + $0x1018] sm:$0xff]  }
 0x1f5   : > { %v9975_v13 = vadd.f32 %v13328_v8, %v16028_v26  ;;  %v13351_v16 = vpop.f32.mrf.mxu1  ;;  %13621 = vmatpush3.bf16.msra.mxu0 %v14868_v3  ;;  %v14879_v26 = vld [vmem:[%s15453_s15 + $0xfd8] sm:$0xff]   ;;  %v14907_v3 = vld [vmem:[%s15453_s15 + $0x1060] sm:$0xff]  }
 0x1f6   : > { %v13330_v17 = vpop.f32.mrf.mxu0  ;;  %13622 = vmatprep.subr.bf16.mxu0 %v14870_v9  ;;  %13643 = vmatpush3.bf16.msra.mxu1 %v14869_v6  ;;  %v14909_v6 = vld [vmem:[%s15453_s15 + $0x1020] sm:$0xff]   ;;  %v14911_v8 = vld [vmem:[%s15453_s15 + $0x1058] sm:$0xff]   ;;  %v14919_v16 = vld [vmem:[%s15453_s15 + $0x1048] sm:$0xff]  }
 0x1f7   : > { %v16073_v19 = vadd.f32 %v13350_v14, %v9975_v13  ;;  %v13352_v21 = vpop.f32.mrf.mxu1  ;;  %13644 = vmatprep.subr.bf16.mxu1 %v14871_v12  ;;  %v14912_v9 = vld [vmem:[%s15453_s15 + $0x10d8] sm:$0xff]   ;;  %v14915_v12 = vld [vmem:[%s15453_s15 + $0x1050] sm:$0xff]   ;;  %v14920_v17 = vld [vmem:[%s15453_s15 + $0x10c8] sm:$0xff]  }
 0x1f8   : > { %v14914_v11 = vld [vmem:[%s15453_s15 + $0x1098] sm:$0xff]   ;;  %v14916_v13 = vld [vmem:[%s15453_s15 + $0x10d0] sm:$0xff]   ;;  %v14924_v21 = vld [vmem:[%s15453_s15 + $0x10c0] sm:$0xff]  }
 0x1f9   : > { %13623 = vmatpush3.bf16.msra.mxu0 %v14872_v15  ;;  %v14917_v14 = vld [vmem:[%s15453_s15 + $0x1010] sm:$0xff]  }
 0x1fa   : > { %13624 = vmatprep.subr.bf16.mxu0 %v14874_v20  ;;  %13645 = vmatpush3.bf16.msra.mxu1 %v14873_v18  ;;  %v14918_v15 = vld [vmem:[%s15453_s15 + $0x1090] sm:$0xff]   ;;  %v14921_v18 = vld [vmem:[%s15453_s15 + $0x1008] sm:$0xff]   ;;  %v14923_v20 = vld [vmem:[%s15453_s15 + $0x1040] sm:$0xff]  }
 0x1fb   : > { %13646 = vmatprep.subr.bf16.mxu1 %v14875_v22  ;;  %v14925_v22 = vld [vmem:[%s15453_s15 + $0x1000] sm:$0xff]  }
 0x1fd   : > { %13625 = vmatpush3.bf16.msra.mxu0 %v14876_v23  ;;  %v172_v23 = vld [vmem:[%s15489_s19 + $0x40] sm:$0xff] }
 0x1fe   : > { %13626 = vmatprep.subr.bf16.mxu0 %v14878_v25  ;;  %13647 = vmatpush3.bf16.msra.mxu1 %v14877_v24  ;;  %v14926_v24 = vld [vmem:[%s15453_s15 + $0x1080] sm:$0xff]   ;;  %v2643_v25 = vrot.slane %v172_v23, %v15491_v35 }
 0x1ff   : > { %13648 = vmatprep.subr.bf16.mxu1 %v14879_v26  ;;  %v2636_v26 = vcombine.high %v172_v23, %v172_v23  ;;  %v14964_v23 = vld [vmem:[%s15453_s15 + $0x1270] sm:$0xff]  }
 0x201   : > { %13627 = vmatpush3.bf16.msra.mxu0 %v14880_v27  ;;  %v14927_v27 = vld [vmem:[%s15453_s15 + $0x1178] sm:$0xff]  }
 0x202   : > { %13628 = vmatprep.subr.bf16.mxu0 %v14882_v29  ;;  %13649 = vmatpush3.bf16.msra.mxu1 %v14881_v28  ;;  %v2651_v28 = vcombine.high %v2643_v25, %v2643_v25  ;;  %v2659_v29 = vrot.slane %v2643_v25, %v15491_v35  ;;  %v14965_v25 = vld [vmem:[%s15453_s15 + $0x12f0] sm:$0xff]  }
 0x203   : > { %13650 = vmatprep.subr.bf16.mxu1 %v14883_v30  ;;  %v14928_v30 = vld [vmem:[%s15453_s15 + $0x11f8] sm:$0xff]  }
 0x205   : > { %13629 = vmatpush3.bf16.msra.mxu0 %v14884_v31  ;;  %v16138_v31 = vrot.slane %v2636_v26, %v15491_v35  ;;  %v14966_v26 = vld [vmem:[%s15453_s15 + $0x1230] sm:$0xff]  }
 0x206   : > { %13630 = vmatprep.subr.bf16.mxu0 %v14886_v33  ;;  %13651 = vmatpush3.bf16.msra.mxu1 %v14885_v32  ;;  %v14929_v32 = vld [vmem:[%s15453_s15 + $0x1138] sm:$0xff]   ;;  %v2673_v33 = vrot.slane %v2651_v28, %v15491_v35 }
 0x207   : > { %13652 = vmatprep.subr.bf16.mxu1 %v14887_v34  ;;  %v14930_v34 = vld [vmem:[%s15453_s15 + $0x11b8] sm:$0xff]  }
 0x209   : > { %13631 = vmatpush3.bf16.msra.mxu0 %v14888_v36  ;;  %v2652_v36 = vcombine.high %v16138_v31, %v16138_v31 }
 0x20a   : > { %13632 = vmatprep.subr.bf16.mxu0 %v14890_v38  ;;  %13653 = vmatpush3.bf16.msra.mxu1 %v14889_v37  ;;  %v2681_v37 = vcombine.high %v2659_v29, %v2659_v29  ;;  %v14931_v38 = vld [vmem:[%s15453_s15 + $0x1170] sm:$0xff]  }
 0x20b   : > { %13654 = vmatprep.subr.bf16.mxu1 %v14891_v39  ;;  %v2683_v39 = vcombine.high %v2673_v33, %v2673_v33 }
 0x20d   : > { %13633 = vmatpush3.bf16.msra.mxu0 %v14892_v40 }
 0x20e   : > { %13662 = vmatprep.subr.bf16.mxu0 %v14895_v43  ;;  %13655 = vmatpush3.bf16.msra.mxu1 %v14893_v41  ;;  %v14932_v41 = vld [vmem:[%s15453_s15 + $0x11f0] sm:$0xff]  }
 0x20f   : > { %13684 = vmatprep.subr.bf16.mxu1 %v14896_v44  ;;  %v14933_v43 = vld [vmem:[%s15453_s15 + $0x1130] sm:$0xff]  }
 0x210   : > { %v13370_v49 = vpop.f32.mrf.mxu0  ;;  %10533 = vmatmul.mubr.bf16.vlgmr.msra.gmra.mxu0 %v2617_v42  ;;  %v2680_v42 = vrot.slane %v2652_v36, %v15491_v35 }
 0x211   : > { %v13392_v52 = vpop.f32.mrf.mxu1  ;;  %13663 = vmatpush3.bf16.msra.mxu0 %v14897_v45  ;;  %10573 = vmatmul.mubr.bf16.vlgmr.msra.gmra.mxu1 %v2633_v47 }
 0x212   : > { %v13371_v53 = vpop.f32.mrf.mxu0  ;;  %13664 = vmatprep.subr.bf16.mxu0 %v14899_v48  ;;  %13685 = vmatpush3.bf16.msra.mxu1 %v14898_v46  ;;  %v14934_v46 = vld [vmem:[%s15453_s15 + $0x11b0] sm:$0xff]   ;;  %v2684_v47 = vcombine.high %v2680_v42, %v2680_v42 }
 0x213   : > { %v13372_v55 = vadd.f32 %v13371_v53, %v13370_v49  ;;  %v13393_v57 = vpop.f32.mrf.mxu1  ;;  %13686 = vmatprep.subr.bf16.mxu1 %v14900_v50  ;;  %10612 = vmatprep.mubr.bf16.mxu0 %v2673_v33  ;;  %v14935_v49 = vld [vmem:[%s15453_s15 + $0x1168] sm:$0xff]  }
 0x214   : > { %v13373_v58 = vpop.f32.mrf.mxu0  ;;  %v13394_v61 = vadd.f32 %v13393_v57, %v13392_v52  ;;  %10652 = vmatprep.mubr.bf16.mxu1 %v2683_v39  ;;  %v14936_v52 = vld [vmem:[%s15453_s15 + $0x11e8] sm:$0xff]  }
 0x215   : > { %v10055_v60 = vadd.f32 %v13372_v55, %v16073_v19  ;;  %v13395_v63 = vpop.f32.mrf.mxu1  ;;  %13665 = vmatpush3.bf16.msra.mxu0 %v14901_v51  ;;  %v14922_v19 = vld [vmem:[%s15453_s15 + $0x1088] sm:$0xff]  }
 0x216   : > { %v13374_v0 = vpop.f32.mrf.mxu0  ;;  %13666 = vmatprep.subr.bf16.mxu0 %v14903_v56  ;;  %13687 = vmatpush3.bf16.msra.mxu1 %v14902_v54  ;;  %v14937_v55 = vld [vmem:[%s15453_s15 + $0x1128] sm:$0xff]   ;;  %v14941_v63 = vld [vmem:[%s15453_s15 + $0x1120] sm:$0xff]  }
 0x217   : > { %v16110_v2 = vadd.f32 %v13394_v61, %v10055_v60  ;;  %v13396_v4 = vpop.f32.mrf.mxu1  ;;  %13688 = vmatprep.subr.bf16.mxu1 %v14904_v59  ;;  %v14938_v58 = vld [vmem:[%s15453_s15 + $0x11a8] sm:$0xff]   ;;  %v14939_v60 = vld [vmem:[%s15453_s15 + $0x1160] sm:$0xff]  }
 0x218   : > { %v14942_v0 = vld [vmem:[%s15453_s15 + $0x11a0] sm:$0xff]   ;;  %v14946_v4 = vld [vmem:[%s15453_s15 + $0x1198] sm:$0xff]  }
 0x219   : > { %13667 = vmatpush3.bf16.msra.mxu0 %v14905_v62  ;;  %v14940_v62 = vld [vmem:[%s15453_s15 + $0x11e0] sm:$0xff]  }
 0x21a   : > { %13668 = vmatprep.subr.bf16.mxu0 %v14907_v3  ;;  %13689 = vmatpush3.bf16.msra.mxu1 %v14906_v1  ;;  %v14943_v1 = vld [vmem:[%s15453_s15 + $0x1158] sm:$0xff]  }
 0x21b   : > { %13690 = vmatprep.subr.bf16.mxu1 %v14908_v5  ;;  %v14945_v3 = vld [vmem:[%s15453_s15 + $0x1118] sm:$0xff]   ;;  %v14947_v5 = vld [vmem:[%s15453_s15 + $0x1150] sm:$0xff]  }
 0x21d   : > { %13669 = vmatpush3.bf16.msra.mxu0 %v14909_v6  ;;  %v14948_v6 = vld [vmem:[%s15453_s15 + $0x11d0] sm:$0xff]  }
 0x21e   : > { %13670 = vmatprep.subr.bf16.mxu0 %v14911_v8  ;;  %13691 = vmatpush3.bf16.msra.mxu1 %v14910_v7  ;;  %v14949_v7 = vld [vmem:[%s15453_s15 + $0x1110] sm:$0xff]  }
 0x21f   : > { %13692 = vmatprep.subr.bf16.mxu1 %v14912_v9  ;;  %v14950_v8 = vld [vmem:[%s15453_s15 + $0x1190] sm:$0xff]   ;;  %v14951_v9 = vld [vmem:[%s15453_s15 + $0x1148] sm:$0xff]  }
 0x221   : > { %13671 = vmatpush3.bf16.msra.mxu0 %v14913_v10  ;;  %v14952_v10 = vld [vmem:[%s15453_s15 + $0x11c8] sm:$0xff]  }
 0x222   : > { %13672 = vmatprep.subr.bf16.mxu0 %v14915_v12  ;;  %13693 = vmatpush3.bf16.msra.mxu1 %v14914_v11  ;;  %v14953_v11 = vld [vmem:[%s15453_s15 + $0x1108] sm:$0xff]  }
 0x223   : > { %13694 = vmatprep.subr.bf16.mxu1 %v14916_v13  ;;  %v14954_v12 = vld [vmem:[%s15453_s15 + $0x1188] sm:$0xff]   ;;  %v14955_v13 = vld [vmem:[%s15453_s15 + $0x1140] sm:$0xff]  }
 0x225   : > { %13673 = vmatpush3.bf16.msra.mxu0 %v14917_v14  ;;  %v14956_v14 = vld [vmem:[%s15453_s15 + $0x11c0] sm:$0xff]  }
 0x226   : > { %13674 = vmatprep.subr.bf16.mxu0 %v14919_v16  ;;  %13695 = vmatpush3.bf16.msra.mxu1 %v14918_v15  ;;  %v14957_v15 = vld [vmem:[%s15453_s15 + $0x1100] sm:$0xff]  }
 0x227   : > { %13696 = vmatprep.subr.bf16.mxu1 %v14920_v17  ;;  %v14958_v16 = vld [vmem:[%s15453_s15 + $0x1180] sm:$0xff]   ;;  %v2666_v17 = vrot.slane %v16138_v31, %v15491_v35  ;;  %v14968_v31 = vld [vmem:[%s15453_s15 + $0x1268] sm:$0xff]  }
 0x229   : > { %13675 = vmatpush3.bf16.msra.mxu0 %v14921_v18  ;;  %v14960_v18 = vld [vmem:[%s15453_s15 + $0x1278] sm:$0xff]  }
 0x22a   : > { %13676 = vmatprep.subr.bf16.mxu0 %v14923_v20  ;;  %13697 = vmatpush3.bf16.msra.mxu1 %v14922_v19  ;;  %v14961_v19 = vld [vmem:[%s15453_s15 + $0x12f8] sm:$0xff]  }
 0x22b   : > { %13698 = vmatprep.subr.bf16.mxu1 %v14924_v21  ;;  %v14962_v20 = vld [vmem:[%s15453_s15 + $0x1238] sm:$0xff]  }
 0x22c   : > { %v14963_v21 = vld [vmem:[%s15453_s15 + $0x12b8] sm:$0xff]  }
 0x22d   : > { %13677 = vmatpush3.bf16.msra.mxu0 %v14925_v22  ;;  %v2682_v22 = vcombine.high %v2666_v17, %v2666_v17 }
 0x22e   : > { %13706 = vmatprep.subr.bf16.mxu0 %v14927_v27  ;;  %13699 = vmatpush3.bf16.msra.mxu1 %v14926_v24 }
 0x22f   : > { %13728 = vmatprep.subr.bf16.mxu1 %v14928_v30 }
 0x230   : > { %v13414_v40 = vpop.f32.mrf.mxu0  ;;  %10613 = vmatmul.mubr.bf16.vlgmr.msra.gmra.mxu0 %v2659_v29  ;;  %v14967_v29 = vld [vmem:[%s15453_s15 + $0x12b0] sm:$0xff]  }
 0x231   : > { %v13436_v44 = vpop.f32.mrf.mxu1  ;;  %13707 = vmatpush3.bf16.msra.mxu0 %v14929_v32  ;;  %10653 = vmatmul.mubr.bf16.vlgmr.msra.gmra.mxu1 %v2681_v37 }
 0x232   : > { %v13415_v45 = vpop.f32.mrf.mxu0  ;;  %13708 = vmatprep.subr.bf16.mxu0 %v14931_v38  ;;  %13729 = vmatpush3.bf16.msra.mxu1 %v14930_v34  ;;  %v14969_v34 = vld [vmem:[%s15453_s15 + $0x12e8] sm:$0xff]  }
 0x233   : > { %v13416_v48 = vadd.f32 %v13415_v45, %v13414_v40  ;;  %v13437_v50 = vpop.f32.mrf.mxu1  ;;  %10692 = vmatprep.mubr.bf16.mxu0 %v2680_v42  ;;  %13730 = vmatprep.subr.bf16.mxu1 %v14932_v41  ;;  %v14970_v38 = vld [vmem:[%s15453_s15 + $0x1228] sm:$0xff]   ;;  %v14973_v45 = vld [vmem:[%s15453_s15 + $0x12e0] sm:$0xff]  }
 0x234   : > { %v13417_v51 = vpop.f32.mrf.mxu0  ;;  %v13438_v54 = vadd.f32 %v13437_v50, %v13436_v44  ;;  %10732 = vmatprep.mubr.bf16.mxu1 %v2684_v47  ;;  %v14971_v41 = vld [vmem:[%s15453_s15 + $0x12a8] sm:$0xff]   ;;  %v14975_v47 = vld [vmem:[%s15453_s15 + $0x12a0] sm:$0xff]   ;;  %v14978_v50 = vld [vmem:[%s15453_s15 + $0x1218] sm:$0xff]  }
 0x235   : > { %v10135_v53 = vadd.f32 %v13416_v48, %v16110_v2  ;;  %v13439_v56 = vpop.f32.mrf.mxu1  ;;  %13709 = vmatpush3.bf16.msra.mxu0 %v14933_v43  ;;  %v14944_v2 = vld [vmem:[%s15453_s15 + $0x11d8] sm:$0xff]   ;;  %v14972_v43 = vld [vmem:[%s15453_s15 + $0x1260] sm:$0xff]  }
 0x236   : > { %v13418_v57 = vpop.f32.mrf.mxu0  ;;  %13710 = vmatprep.subr.bf16.mxu0 %v14935_v49  ;;  %13731 = vmatpush3.bf16.msra.mxu1 %v14934_v46  ;;  %v14974_v46 = vld [vmem:[%s15453_s15 + $0x1220] sm:$0xff]   ;;  %v14976_v48 = vld [vmem:[%s15453_s15 + $0x1258] sm:$0xff]   ;;  %v14984_v56 = vld [vmem:[%s15453_s15 + $0x1248] sm:$0xff]  }
 0x237   : > { %v16155_v59 = vadd.f32 %v13438_v54, %v10135_v53  ;;  %v13440_v61 = vpop.f32.mrf.mxu1  ;;  %13732 = vmatprep.subr.bf16.mxu1 %v14936_v52  ;;  %v14977_v49 = vld [vmem:[%s15453_s15 + $0x12d8] sm:$0xff]   ;;  %v14980_v52 = vld [vmem:[%s15453_s15 + $0x1250] sm:$0xff]   ;;  %v14985_v57 = vld [vmem:[%s15453_s15 + $0x12c8] sm:$0xff]  }
 0x238   : > { %v14979_v51 = vld [vmem:[%s15453_s15 + $0x1298] sm:$0xff]   ;;  %v14981_v53 = vld [vmem:[%s15453_s15 + $0x12d0] sm:$0xff]   ;;  %v14989_v61 = vld [vmem:[%s15453_s15 + $0x12c0] sm:$0xff]  }
 0x239   : > { %13711 = vmatpush3.bf16.msra.mxu0 %v14937_v55  ;;  %v14982_v54 = vld [vmem:[%s15453_s15 + $0x1210] sm:$0xff]  }
 0x23a   : > { %13712 = vmatprep.subr.bf16.mxu0 %v14939_v60  ;;  %13733 = vmatpush3.bf16.msra.mxu1 %v14938_v58  ;;  %v14983_v55 = vld [vmem:[%s15453_s15 + $0x1290] sm:$0xff]   ;;  %v14986_v58 = vld [vmem:[%s15453_s15 + $0x1208] sm:$0xff]   ;;  %v14988_v60 = vld [vmem:[%s15453_s15 + $0x1240] sm:$0xff]  }
 0x23b   : > { %13734 = vmatprep.subr.bf16.mxu1 %v14940_v62  ;;  %v14990_v62 = vld [vmem:[%s15453_s15 + $0x1200] sm:$0xff]  }
 0x23d   : > { %13713 = vmatpush3.bf16.msra.mxu0 %v14941_v63  ;;  %v173_v63 = vld [vmem:[%s15489_s19 + $0x48] sm:$0xff] }
 0x23e   : > { %13714 = vmatprep.subr.bf16.mxu0 %v14943_v1  ;;  %13735 = vmatpush3.bf16.msra.mxu1 %v14942_v0  ;;  %v2692_v0 = vrot.slane %v173_v63, %v15491_v35  ;;  %v14992_v1 = vld [vmem:[%s15453_s15 + $0x1378] sm:$0xff]  }
 0x23f   : > { %13736 = vmatprep.subr.bf16.mxu1 %v14944_v2  ;;  %v2685_v2 = vcombine.high %v173_v63, %v173_v63  ;;  %v15029_v63 = vld [vmem:[%s15453_s15 + $0x1470] sm:$0xff]  }
 0x241   : > { %13715 = vmatpush3.bf16.msra.mxu0 %v14945_v3  ;;  %v14991_v3 = vld [vmem:[%s15453_s15 + $0x1280] sm:$0xff]  }
 0x242   : > { %13716 = vmatprep.subr.bf16.mxu0 %v14947_v5  ;;  %13737 = vmatpush3.bf16.msra.mxu1 %v14946_v4  ;;  %v2700_v4 = vcombine.high %v2692_v0, %v2692_v0  ;;  %v2708_v5 = vrot.slane %v2692_v0, %v15491_v35 }
 0x243   : > { %13738 = vmatprep.subr.bf16.mxu1 %v14948_v6  ;;  %v14993_v6 = vld [vmem:[%s15453_s15 + $0x13f8] sm:$0xff]  }
 0x245   : > { %13717 = vmatpush3.bf16.msra.mxu0 %v14949_v7  ;;  %v16220_v7 = vrot.slane %v2685_v2, %v15491_v35  ;;  %v15031_v2 = vld [vmem:[%s15453_s15 + $0x1430] sm:$0xff]  }
 0x246   : > { %13718 = vmatprep.subr.bf16.mxu0 %v14951_v9  ;;  %13739 = vmatpush3.bf16.msra.mxu1 %v14950_v8  ;;  %v14994_v8 = vld [vmem:[%s15453_s15 + $0x1338] sm:$0xff]   ;;  %v2722_v9 = vrot.slane %v2700_v4, %v15491_v35 }
 0x247   : > { %13740 = vmatprep.subr.bf16.mxu1 %v14952_v10  ;;  %v14995_v10 = vld [vmem:[%s15453_s15 + $0x13b8] sm:$0xff]  }
 0x249   : > { %13719 = vmatpush3.bf16.msra.mxu0 %v14953_v11  ;;  %v2701_v11 = vcombine.high %v16220_v7, %v16220_v7 }
 0x24a   : > { %13720 = vmatprep.subr.bf16.mxu0 %v14955_v13  ;;  %13741 = vmatpush3.bf16.msra.mxu1 %v14954_v12  ;;  %v2730_v12 = vcombine.high %v2708_v5, %v2708_v5  ;;  %v14996_v13 = vld [vmem:[%s15453_s15 + $0x1370] sm:$0xff]  }
 0x24b   : > { %13742 = vmatprep.subr.bf16.mxu1 %v14956_v14  ;;  %v2732_v14 = vcombine.high %v2722_v9, %v2722_v9 }
 0x24d   : > { %13721 = vmatpush3.bf16.msra.mxu0 %v14957_v15 }
 0x24e   : > { %13750 = vmatprep.subr.bf16.mxu0 %v14960_v18  ;;  %13743 = vmatpush3.bf16.msra.mxu1 %v14958_v16  ;;  %v14997_v16 = vld [vmem:[%s15453_s15 + $0x13f0] sm:$0xff]  }
 0x24f   : > { %13772 = vmatprep.subr.bf16.mxu1 %v14961_v19  ;;  %v14998_v18 = vld [vmem:[%s15453_s15 + $0x1330] sm:$0xff]  }
 0x250   : > { %v13458_v24 = vpop.f32.mrf.mxu0  ;;  %10693 = vmatmul.mubr.bf16.vlgmr.msra.gmra.mxu0 %v2666_v17  ;;  %v2729_v17 = vrot.slane %v2701_v11, %v15491_v35 }
 0x251   : > { %v13480_v27 = vpop.f32.mrf.mxu1  ;;  %13751 = vmatpush3.bf16.msra.mxu0 %v14962_v20  ;;  %10733 = vmatmul.mubr.bf16.vlgmr.msra.gmra.mxu1 %v2682_v22 }
 0x252   : > { %v13459_v28 = vpop.f32.mrf.mxu0  ;;  %13752 = vmatprep.subr.bf16.mxu0 %v14964_v23  ;;  %13773 = vmatpush3.bf16.msra.mxu1 %v14963_v21  ;;  %v14999_v21 = vld [vmem:[%s15453_s15 + $0x13b0] sm:$0xff]   ;;  %v2733_v22 = vcombine.high %v2729_v17, %v2729_v17 }
 0x253   : > { %v13460_v30 = vadd.f32 %v13459_v28, %v13458_v24  ;;  %v13481_v32 = vpop.f32.mrf.mxu1  ;;  %13774 = vmatprep.subr.bf16.mxu1 %v14965_v25  ;;  %10772 = vmatprep.mubr.bf16.mxu0 %v2722_v9  ;;  %v15000_v24 = vld [vmem:[%s15453_s15 + $0x1368] sm:$0xff]  }
 0x254   : > { %v13461_v33 = vpop.f32.mrf.mxu0  ;;  %v13482_v37 = vadd.f32 %v13481_v32, %v13480_v27  ;;  %10812 = vmatprep.mubr.bf16.mxu1 %v2732_v14  ;;  %v15001_v27 = vld [vmem:[%s15453_s15 + $0x13e8] sm:$0xff]  }
 0x255   : > { %v10215_v36 = vadd.f32 %v13460_v30, %v16155_v59  ;;  %v13483_v39 = vpop.f32.mrf.mxu1  ;;  %13753 = vmatpush3.bf16.msra.mxu0 %v14966_v26  ;;  %v14987_v59 = vld [vmem:[%s15453_s15 + $0x1288] sm:$0xff]  }
 0x256   : > { %v13462_v40 = vpop.f32.mrf.mxu0  ;;  %13754 = vmatprep.subr.bf16.mxu0 %v14968_v31  ;;  %13775 = vmatpush3.bf16.msra.mxu1 %v14967_v29  ;;  %v15002_v30 = vld [vmem:[%s15453_s15 + $0x1328] sm:$0xff]   ;;  %v15006_v39 = vld [vmem:[%s15453_s15 + $0x1320] sm:$0xff]  }
 0x257   : > { %v16192_v42 = vadd.f32 %v13482_v37, %v10215_v36  ;;  %v13484_v44 = vpop.f32.mrf.mxu1  ;;  %13776 = vmatprep.subr.bf16.mxu1 %v14969_v34  ;;  %v15003_v33 = vld [vmem:[%s15453_s15 + $0x13a8] sm:$0xff]   ;;  %v15004_v36 = vld [vmem:[%s15453_s15 + $0x1360] sm:$0xff]  }
 0x258   : > { %v15007_v40 = vld [vmem:[%s15453_s15 + $0x13a0] sm:$0xff]   ;;  %v15011_v44 = vld [vmem:[%s15453_s15 + $0x1398] sm:$0xff]  }
 0x259   : > { %13755 = vmatpush3.bf16.msra.mxu0 %v14970_v38  ;;  %v15005_v38 = vld [vmem:[%s15453_s15 + $0x13e0] sm:$0xff]  }
 0x25a   : > { %13756 = vmatprep.subr.bf16.mxu0 %v14972_v43  ;;  %13777 = vmatpush3.bf16.msra.mxu1 %v14971_v41  ;;  %v15008_v41 = vld [vmem:[%s15453_s15 + $0x1358] sm:$0xff]  }
 0x25b   : > { %13778 = vmatprep.subr.bf16.mxu1 %v14973_v45  ;;  %v15010_v43 = vld [vmem:[%s15453_s15 + $0x1318] sm:$0xff]   ;;  %v15012_v45 = vld [vmem:[%s15453_s15 + $0x1350] sm:$0xff]  }
 0x25d   : > { %13757 = vmatpush3.bf16.msra.mxu0 %v14974_v46  ;;  %v15013_v46 = vld [vmem:[%s15453_s15 + $0x13d0] sm:$0xff]  }
 0x25e   : > { %13758 = vmatprep.subr.bf16.mxu0 %v14976_v48  ;;  %13779 = vmatpush3.bf16.msra.mxu1 %v14975_v47  ;;  %v15014_v47 = vld [vmem:[%s15453_s15 + $0x1310] sm:$0xff]  }
 0x25f   : > { %13780 = vmatprep.subr.bf16.mxu1 %v14977_v49  ;;  %v15015_v48 = vld [vmem:[%s15453_s15 + $0x1390] sm:$0xff]   ;;  %v15016_v49 = vld [vmem:[%s15453_s15 + $0x1348] sm:$0xff]  }
 0x261   : > { %13759 = vmatpush3.bf16.msra.mxu0 %v14978_v50  ;;  %v15017_v50 = vld [vmem:[%s15453_s15 + $0x13c8] sm:$0xff]  }
 0x262   : > { %13760 = vmatprep.subr.bf16.mxu0 %v14980_v52  ;;  %13781 = vmatpush3.bf16.msra.mxu1 %v14979_v51  ;;  %v15018_v51 = vld [vmem:[%s15453_s15 + $0x1308] sm:$0xff]  }
 0x263   : > { %13782 = vmatprep.subr.bf16.mxu1 %v14981_v53  ;;  %v15019_v52 = vld [vmem:[%s15453_s15 + $0x1388] sm:$0xff]   ;;  %v15020_v53 = vld [vmem:[%s15453_s15 + $0x1340] sm:$0xff]  }
 0x265   : > { %13761 = vmatpush3.bf16.msra.mxu0 %v14982_v54  ;;  %v15021_v54 = vld [vmem:[%s15453_s15 + $0x13c0] sm:$0xff]  }
 0x266   : > { %13762 = vmatprep.subr.bf16.mxu0 %v14984_v56  ;;  %13783 = vmatpush3.bf16.msra.mxu1 %v14983_v55  ;;  %v15022_v55 = vld [vmem:[%s15453_s15 + $0x1300] sm:$0xff]  }
 0x267   : > { %13784 = vmatprep.subr.bf16.mxu1 %v14985_v57  ;;  %v15023_v56 = vld [vmem:[%s15453_s15 + $0x1380] sm:$0xff]   ;;  %v2715_v57 = vrot.slane %v16220_v7, %v15491_v35  ;;  %v15033_v7 = vld [vmem:[%s15453_s15 + $0x1468] sm:$0xff]  }
 0x269   : > { %13763 = vmatpush3.bf16.msra.mxu0 %v14986_v58  ;;  %v15025_v58 = vld [vmem:[%s15453_s15 + $0x1478] sm:$0xff]  }
 0x26a   : > { %13764 = vmatprep.subr.bf16.mxu0 %v14988_v60  ;;  %13785 = vmatpush3.bf16.msra.mxu1 %v14987_v59  ;;  %v15026_v59 = vld [vmem:[%s15453_s15 + $0x14f8] sm:$0xff]  }
 0x26b   : > { %13786 = vmatprep.subr.bf16.mxu1 %v14989_v61  ;;  %v15027_v60 = vld [vmem:[%s15453_s15 + $0x1438] sm:$0xff]  }
 0x26c   : > { %v15028_v61 = vld [vmem:[%s15453_s15 + $0x14b8] sm:$0xff]  }
 0x26d   : > { %13765 = vmatpush3.bf16.msra.mxu0 %v14990_v62  ;;  %v2731_v62 = vcombine.high %v2715_v57, %v2715_v57 }
 0x26e   : > { %13794 = vmatprep.subr.bf16.mxu0 %v14992_v1  ;;  %13787 = vmatpush3.bf16.msra.mxu1 %v14991_v3  ;;  %v15030_v1 = vld [vmem:[%s15453_s15 + $0x14f0] sm:$0xff]  }
 0x26f   : > { %13816 = vmatprep.subr.bf16.mxu1 %v14993_v6 }
 0x270   : > { %v13502_v15 = vpop.f32.mrf.mxu0  ;;  %10773 = vmatmul.mubr.bf16.vlgmr.msra.gmra.mxu0 %v2708_v5  ;;  %v15032_v5 = vld [vmem:[%s15453_s15 + $0x14b0] sm:$0xff]  }
 0x271   : > { %v13524_v19 = vpop.f32.mrf.mxu1  ;;  %13795 = vmatpush3.bf16.msra.mxu0 %v14994_v8  ;;  %10813 = vmatmul.mubr.bf16.vlgmr.msra.gmra.mxu1 %v2730_v12 }
 0x272   : > { %v13503_v20 = vpop.f32.mrf.mxu0  ;;  %13796 = vmatprep.subr.bf16.mxu0 %v14996_v13  ;;  %13817 = vmatpush3.bf16.msra.mxu1 %v14995_v10  ;;  %v15034_v10 = vld [vmem:[%s15453_s15 + $0x14e8] sm:$0xff]  }
 0x273   : > { %v13504_v23 = vadd.f32 %v13503_v20, %v13502_v15  ;;  %v13525_v25 = vpop.f32.mrf.mxu1  ;;  %10852 = vmatprep.mubr.bf16.mxu0 %v2729_v17  ;;  %13818 = vmatprep.subr.bf16.mxu1 %v14997_v16  ;;  %v15035_v13 = vld [vmem:[%s15453_s15 + $0x1428] sm:$0xff]   ;;  %v15038_v20 = vld [vmem:[%s15453_s15 + $0x14e0] sm:$0xff]  }
 0x274   : > { %v13505_v26 = vpop.f32.mrf.mxu0  ;;  %v13526_v29 = vadd.f32 %v13525_v25, %v13524_v19  ;;  %10892 = vmatprep.mubr.bf16.mxu1 %v2733_v22  ;;  %v15036_v16 = vld [vmem:[%s15453_s15 + $0x14a8] sm:$0xff]   ;;  %v15040_v22 = vld [vmem:[%s15453_s15 + $0x14a0] sm:$0xff]   ;;  %v15043_v25 = vld [vmem:[%s15453_s15 + $0x1418] sm:$0xff]  }
 0x275   : > { %v10295_v28 = vadd.f32 %v13504_v23, %v16192_v42  ;;  %v13527_v31 = vpop.f32.mrf.mxu1  ;;  %13797 = vmatpush3.bf16.msra.mxu0 %v14998_v18  ;;  %v15009_v42 = vld [vmem:[%s15453_s15 + $0x13d8] sm:$0xff]   ;;  %v15037_v18 = vld [vmem:[%s15453_s15 + $0x1460] sm:$0xff]  }
 0x276   : > { %v13506_v32 = vpop.f32.mrf.mxu0  ;;  %13798 = vmatprep.subr.bf16.mxu0 %v15000_v24  ;;  %13819 = vmatpush3.bf16.msra.mxu1 %v14999_v21  ;;  %v15039_v21 = vld [vmem:[%s15453_s15 + $0x1420] sm:$0xff]   ;;  %v15041_v23 = vld [vmem:[%s15453_s15 + $0x1458] sm:$0xff]   ;;  %v15049_v31 = vld [vmem:[%s15453_s15 + $0x1448] sm:$0xff]  }
 0x277   : > { %v16237_v34 = vadd.f32 %v13526_v29, %v10295_v28  ;;  %v13528_v37 = vpop.f32.mrf.mxu1  ;;  %13820 = vmatprep.subr.bf16.mxu1 %v15001_v27  ;;  %v15042_v24 = vld [vmem:[%s15453_s15 + $0x14d8] sm:$0xff]   ;;  %v15045_v27 = vld [vmem:[%s15453_s15 + $0x1450] sm:$0xff]   ;;  %v15050_v32 = vld [vmem:[%s15453_s15 + $0x14c8] sm:$0xff]  }
 0x278   : > { %v15044_v26 = vld [vmem:[%s15453_s15 + $0x1498] sm:$0xff]   ;;  %v15046_v28 = vld [vmem:[%s15453_s15 + $0x14d0] sm:$0xff]   ;;  %v15054_v37 = vld [vmem:[%s15453_s15 + $0x14c0] sm:$0xff]  }
 0x279   : > { %13799 = vmatpush3.bf16.msra.mxu0 %v15002_v30  ;;  %v15047_v29 = vld [vmem:[%s15453_s15 + $0x1410] sm:$0xff]  }
 0x27a   : > { %13800 = vmatprep.subr.bf16.mxu0 %v15004_v36  ;;  %13821 = vmatpush3.bf16.msra.mxu1 %v15003_v33  ;;  %v15048_v30 = vld [vmem:[%s15453_s15 + $0x1490] sm:$0xff]   ;;  %v15051_v33 = vld [vmem:[%s15453_s15 + $0x1408] sm:$0xff]   ;;  %v15053_v36 = vld [vmem:[%s15453_s15 + $0x1440] sm:$0xff]  }
 0x27b   : > { %13822 = vmatprep.subr.bf16.mxu1 %v15005_v38  ;;  %v15055_v38 = vld [vmem:[%s15453_s15 + $0x1400] sm:$0xff]  }
 0x27d   : > { %13801 = vmatpush3.bf16.msra.mxu0 %v15006_v39  ;;  %v174_v39 = vld [vmem:[%s15489_s19 + $0x50] sm:$0xff] }
 0x27e   : > { %13802 = vmatprep.subr.bf16.mxu0 %v15008_v41  ;;  %13823 = vmatpush3.bf16.msra.mxu1 %v15007_v40  ;;  %v15056_v40 = vld [vmem:[%s15453_s15 + $0x1480] sm:$0xff]   ;;  %v2741_v41 = vrot.slane %v174_v39, %v15491_v35 }
 0x27f   : > { %13824 = vmatprep.subr.bf16.mxu1 %v15009_v42  ;;  %v2734_v42 = vcombine.high %v174_v39, %v174_v39  ;;  %v15094_v39 = vld [vmem:[%s15453_s15 + $0x1670] sm:$0xff]  }
 0x281   : > { %13803 = vmatpush3.bf16.msra.mxu0 %v15010_v43  ;;  %v15057_v43 = vld [vmem:[%s15453_s15 + $0x1578] sm:$0xff]  }
 0x282   : > { %13804 = vmatprep.subr.bf16.mxu0 %v15012_v45  ;;  %13825 = vmatpush3.bf16.msra.mxu1 %v15011_v44  ;;  %v2749_v44 = vcombine.high %v2741_v41, %v2741_v41  ;;  %v2757_v45 = vrot.slane %v2741_v41, %v15491_v35  ;;  %v15095_v41 = vld [vmem:[%s15453_s15 + $0x16f0] sm:$0xff]  }
 0x283   : > { %13826 = vmatprep.subr.bf16.mxu1 %v15013_v46  ;;  %v15058_v46 = vld [vmem:[%s15453_s15 + $0x15f8] sm:$0xff]  }
 0x285   : > { %13805 = vmatpush3.bf16.msra.mxu0 %v15014_v47  ;;  %v16302_v47 = vrot.slane %v2734_v42, %v15491_v35  ;;  %v15096_v42 = vld [vmem:[%s15453_s15 + $0x1630] sm:$0xff]  }
 0x286   : > { %13806 = vmatprep.subr.bf16.mxu0 %v15016_v49  ;;  %13827 = vmatpush3.bf16.msra.mxu1 %v15015_v48  ;;  %v15059_v48 = vld [vmem:[%s15453_s15 + $0x1538] sm:$0xff]   ;;  %v2771_v49 = vrot.slane %v2749_v44, %v15491_v35 }
 0x287   : > { %13828 = vmatprep.subr.bf16.mxu1 %v15017_v50  ;;  %v15060_v50 = vld [vmem:[%s15453_s15 + $0x15b8] sm:$0xff]  }
 0x289   : > { %13807 = vmatpush3.bf16.msra.mxu0 %v15018_v51  ;;  %v2750_v51 = vcombine.high %v16302_v47, %v16302_v47 }
 0x28a   : > { %13808 = vmatprep.subr.bf16.mxu0 %v15020_v53  ;;  %13829 = vmatpush3.bf16.msra.mxu1 %v15019_v52  ;;  %v2779_v52 = vcombine.high %v2757_v45, %v2757_v45  ;;  %v15061_v53 = vld [vmem:[%s15453_s15 + $0x1570] sm:$0xff]  }
 0x28b   : > { %13830 = vmatprep.subr.bf16.mxu1 %v15021_v54  ;;  %v2781_v54 = vcombine.high %v2771_v49, %v2771_v49 }
 0x28d   : > { %13809 = vmatpush3.bf16.msra.mxu0 %v15022_v55 }
 0x28e   : > { %13838 = vmatprep.subr.bf16.mxu0 %v15025_v58  ;;  %13831 = vmatpush3.bf16.msra.mxu1 %v15023_v56  ;;  %v15062_v56 = vld [vmem:[%s15453_s15 + $0x15f0] sm:$0xff]  }
 0x28f   : > { %13860 = vmatprep.subr.bf16.mxu1 %v15026_v59  ;;  %v15063_v58 = vld [vmem:[%s15453_s15 + $0x1530] sm:$0xff]  }
 0x290   : > { %v13546_v0 = vpop.f32.mrf.mxu0  ;;  %10853 = vmatmul.mubr.bf16.vlgmr.msra.gmra.mxu0 %v2715_v57  ;;  %v2778_v57 = vrot.slane %v2750_v51, %v15491_v35 }
 0x291   : > { %v13568_v3 = vpop.f32.mrf.mxu1  ;;  %13839 = vmatpush3.bf16.msra.mxu0 %v15027_v60  ;;  %10893 = vmatmul.mubr.bf16.vlgmr.msra.gmra.mxu1 %v2731_v62 }
 0x292   : > { %v13547_v4 = vpop.f32.mrf.mxu0  ;;  %13840 = vmatprep.subr.bf16.mxu0 %v15029_v63  ;;  %13861 = vmatpush3.bf16.msra.mxu1 %v15028_v61  ;;  %v15064_v61 = vld [vmem:[%s15453_s15 + $0x15b0] sm:$0xff]   ;;  %v2782_v62 = vcombine.high %v2778_v57, %v2778_v57 }
 0x293   : > { %v13548_v6 = vadd.f32 %v13547_v4, %v13546_v0  ;;  %v13569_v8 = vpop.f32.mrf.mxu1  ;;  %13862 = vmatprep.subr.bf16.mxu1 %v15030_v1  ;;  %10932 = vmatprep.mubr.bf16.mxu0 %v2771_v49  ;;  %v15065_v0 = vld [vmem:[%s15453_s15 + $0x1568] sm:$0xff]  }
 0x294   : > { %v13549_v9 = vpop.f32.mrf.mxu0  ;;  %v13570_v12 = vadd.f32 %v13569_v8, %v13568_v3  ;;  %10972 = vmatprep.mubr.bf16.mxu1 %v2781_v54  ;;  %v15066_v3 = vld [vmem:[%s15453_s15 + $0x15e8] sm:$0xff]  }
 0x295   : > { %v10375_v11 = vadd.f32 %v13548_v6, %v16237_v34  ;;  %v13571_v14 = vpop.f32.mrf.mxu1  ;;  %13841 = vmatpush3.bf16.msra.mxu0 %v15031_v2  ;;  %v15052_v34 = vld [vmem:[%s15453_s15 + $0x1488] sm:$0xff]  }
 0x296   : > { %v13550_v15 = vpop.f32.mrf.mxu0  ;;  %13842 = vmatprep.subr.bf16.mxu0 %v15033_v7  ;;  %13863 = vmatpush3.bf16.msra.mxu1 %v15032_v5  ;;  %v15067_v6 = vld [vmem:[%s15453_s15 + $0x1528] sm:$0xff]   ;;  %v15071_v14 = vld [vmem:[%s15453_s15 + $0x1520] sm:$0xff]  }
 0x297   : > { %v16274_v17 = vadd.f32 %v13570_v12, %v10375_v11  ;;  %v13572_v19 = vpop.f32.mrf.mxu1  ;;  %13864 = vmatprep.subr.bf16.mxu1 %v15034_v10  ;;  %v15068_v9 = vld [vmem:[%s15453_s15 + $0x15a8] sm:$0xff]   ;;  %v15069_v11 = vld [vmem:[%s15453_s15 + $0x1560] sm:$0xff]  }
 0x298   : > { %v15072_v15 = vld [vmem:[%s15453_s15 + $0x15a0] sm:$0xff]   ;;  %v15076_v19 = vld [vmem:[%s15453_s15 + $0x1598] sm:$0xff]  }
 0x299   : > { %13843 = vmatpush3.bf16.msra.mxu0 %v15035_v13  ;;  %v15070_v13 = vld [vmem:[%s15453_s15 + $0x15e0] sm:$0xff]  }
 0x29a   : > { %13844 = vmatprep.subr.bf16.mxu0 %v15037_v18  ;;  %13865 = vmatpush3.bf16.msra.mxu1 %v15036_v16  ;;  %v15073_v16 = vld [vmem:[%s15453_s15 + $0x1558] sm:$0xff]  }
 0x29b   : > { %13866 = vmatprep.subr.bf16.mxu1 %v15038_v20  ;;  %v15075_v18 = vld [vmem:[%s15453_s15 + $0x1518] sm:$0xff]   ;;  %v15077_v20 = vld [vmem:[%s15453_s15 + $0x1550] sm:$0xff]  }
 0x29d   : > { %13845 = vmatpush3.bf16.msra.mxu0 %v15039_v21  ;;  %v15078_v21 = vld [vmem:[%s15453_s15 + $0x15d0] sm:$0xff]  }
 0x29e   : > { %13846 = vmatprep.subr.bf16.mxu0 %v15041_v23  ;;  %13867 = vmatpush3.bf16.msra.mxu1 %v15040_v22  ;;  %v15079_v22 = vld [vmem:[%s15453_s15 + $0x1510] sm:$0xff]  }
 0x29f   : > { %13868 = vmatprep.subr.bf16.mxu1 %v15042_v24  ;;  %v15080_v23 = vld [vmem:[%s15453_s15 + $0x1590] sm:$0xff]   ;;  %v15081_v24 = vld [vmem:[%s15453_s15 + $0x1548] sm:$0xff]  }
 0x2a1   : > { %13847 = vmatpush3.bf16.msra.mxu0 %v15043_v25  ;;  %v15082_v25 = vld [vmem:[%s15453_s15 + $0x15c8] sm:$0xff]  }
 0x2a2   : > { %13848 = vmatprep.subr.bf16.mxu0 %v15045_v27  ;;  %13869 = vmatpush3.bf16.msra.mxu1 %v15044_v26  ;;  %v15083_v26 = vld [vmem:[%s15453_s15 + $0x1508] sm:$0xff]  }
 0x2a3   : > { %13870 = vmatprep.subr.bf16.mxu1 %v15046_v28  ;;  %v15084_v27 = vld [vmem:[%s15453_s15 + $0x1588] sm:$0xff]   ;;  %v15085_v28 = vld [vmem:[%s15453_s15 + $0x1540] sm:$0xff]  }
 0x2a5   : > { %13849 = vmatpush3.bf16.msra.mxu0 %v15047_v29  ;;  %v15086_v29 = vld [vmem:[%s15453_s15 + $0x15c0] sm:$0xff]  }
 0x2a6   : > { %13850 = vmatprep.subr.bf16.mxu0 %v15049_v31  ;;  %13871 = vmatpush3.bf16.msra.mxu1 %v15048_v30  ;;  %v15087_v30 = vld [vmem:[%s15453_s15 + $0x1500] sm:$0xff]  }
 0x2a7   : > { %13872 = vmatprep.subr.bf16.mxu1 %v15050_v32  ;;  %v15088_v31 = vld [vmem:[%s15453_s15 + $0x1580] sm:$0xff]   ;;  %v2764_v32 = vrot.slane %v16302_v47, %v15491_v35  ;;  %v15098_v47 = vld [vmem:[%s15453_s15 + $0x1668] sm:$0xff]  }
 0x2a9   : > { %13851 = vmatpush3.bf16.msra.mxu0 %v15051_v33  ;;  %v15090_v33 = vld [vmem:[%s15453_s15 + $0x1678] sm:$0xff]  }
 0x2aa   : > { %13852 = vmatprep.subr.bf16.mxu0 %v15053_v36  ;;  %13873 = vmatpush3.bf16.msra.mxu1 %v15052_v34  ;;  %v15091_v34 = vld [vmem:[%s15453_s15 + $0x16f8] sm:$0xff]  }
 0x2ab   : > { %13874 = vmatprep.subr.bf16.mxu1 %v15054_v37  ;;  %v15092_v36 = vld [vmem:[%s15453_s15 + $0x1638] sm:$0xff]  }
 0x2ac   : > { %v15093_v37 = vld [vmem:[%s15453_s15 + $0x16b8] sm:$0xff]  }
 0x2ad   : > { %13853 = vmatpush3.bf16.msra.mxu0 %v15055_v38  ;;  %v2780_v38 = vcombine.high %v2764_v32, %v2764_v32 }
 0x2ae   : > { %13882 = vmatprep.subr.bf16.mxu0 %v15057_v43  ;;  %13875 = vmatpush3.bf16.msra.mxu1 %v15056_v40 }
 0x2af   : > { %13904 = vmatprep.subr.bf16.mxu1 %v15058_v46 }
 0x2b0   : > { %v13590_v55 = vpop.f32.mrf.mxu0  ;;  %10933 = vmatmul.mubr.bf16.vlgmr.msra.gmra.mxu0 %v2757_v45  ;;  %v15097_v45 = vld [vmem:[%s15453_s15 + $0x16b0] sm:$0xff]  }
 0x2b1   : > { %v13612_v59 = vpop.f32.mrf.mxu1  ;;  %13883 = vmatpush3.bf16.msra.mxu0 %v15059_v48  ;;  %10973 = vmatmul.mubr.bf16.vlgmr.msra.gmra.mxu1 %v2779_v52 }
 0x2b2   : > { %v13591_v60 = vpop.f32.mrf.mxu0  ;;  %13884 = vmatprep.subr.bf16.mxu0 %v15061_v53  ;;  %13905 = vmatpush3.bf16.msra.mxu1 %v15060_v50  ;;  %v15099_v50 = vld [vmem:[%s15453_s15 + $0x16e8] sm:$0xff]  }
 0x2b3   : > { %v13592_v63 = vadd.f32 %v13591_v60, %v13590_v55  ;;  %v13613_v1 = vpop.f32.mrf.mxu1  ;;  %11012 = vmatprep.mubr.bf16.mxu0 %v2778_v57  ;;  %13906 = vmatprep.subr.bf16.mxu1 %v15062_v56  ;;  %v15100_v53 = vld [vmem:[%s15453_s15 + $0x1628] sm:$0xff]   ;;  %v15103_v60 = vld [vmem:[%s15453_s15 + $0x16e0] sm:$0xff]  }
 0x2b4   : > { %v13593_v2 = vpop.f32.mrf.mxu0  ;;  %v13614_v5 = vadd.f32 %v13613_v1, %v13612_v59  ;;  %11052 = vmatprep.mubr.bf16.mxu1 %v2782_v62  ;;  %v15101_v56 = vld [vmem:[%s15453_s15 + $0x16a8] sm:$0xff]   ;;  %v15105_v62 = vld [vmem:[%s15453_s15 + $0x16a0] sm:$0xff]   ;;  %v15108_v1 = vld [vmem:[%s15453_s15 + $0x1618] sm:$0xff]  }
 0x2b5   : > { %v10455_v4 = vadd.f32 %v13592_v63, %v16274_v17  ;;  %v13615_v7 = vpop.f32.mrf.mxu1  ;;  %13885 = vmatpush3.bf16.msra.mxu0 %v15063_v58  ;;  %v15074_v17 = vld [vmem:[%s15453_s15 + $0x15d8] sm:$0xff]   ;;  %v15102_v58 = vld [vmem:[%s15453_s15 + $0x1660] sm:$0xff]  }
 0x2b6   : > { %v13594_v8 = vpop.f32.mrf.mxu0  ;;  %13886 = vmatprep.subr.bf16.mxu0 %v15065_v0  ;;  %13907 = vmatpush3.bf16.msra.mxu1 %v15064_v61  ;;  %v15104_v61 = vld [vmem:[%s15453_s15 + $0x1620] sm:$0xff]   ;;  %v15106_v63 = vld [vmem:[%s15453_s15 + $0x1658] sm:$0xff]   ;;  %v15114_v7 = vld [vmem:[%s15453_s15 + $0x1648] sm:$0xff]  }
 0x2b7   : > { %v16319_v10 = vadd.f32 %v13614_v5, %v10455_v4  ;;  %v13616_v12 = vpop.f32.mrf.mxu1  ;;  %13908 = vmatprep.subr.bf16.mxu1 %v15066_v3  ;;  %v15107_v0 = vld [vmem:[%s15453_s15 + $0x16d8] sm:$0xff]   ;;  %v15110_v3 = vld [vmem:[%s15453_s15 + $0x1650] sm:$0xff]   ;;  %v15115_v8 = vld [vmem:[%s15453_s15 + $0x16c8] sm:$0xff]  }
 0x2b8   : > { %v15109_v2 = vld [vmem:[%s15453_s15 + $0x1698] sm:$0xff]   ;;  %v15111_v4 = vld [vmem:[%s15453_s15 + $0x16d0] sm:$0xff]   ;;  %v15119_v12 = vld [vmem:[%s15453_s15 + $0x16c0] sm:$0xff]  }
 0x2b9   : > { %13887 = vmatpush3.bf16.msra.mxu0 %v15067_v6  ;;  %v15112_v5 = vld [vmem:[%s15453_s15 + $0x1610] sm:$0xff]  }
 0x2ba   : > { %13888 = vmatprep.subr.bf16.mxu0 %v15069_v11  ;;  %13909 = vmatpush3.bf16.msra.mxu1 %v15068_v9  ;;  %v15113_v6 = vld [vmem:[%s15453_s15 + $0x1690] sm:$0xff]   ;;  %v15116_v9 = vld [vmem:[%s15453_s15 + $0x1608] sm:$0xff]   ;;  %v15118_v11 = vld [vmem:[%s15453_s15 + $0x1640] sm:$0xff]  }
 0x2bb   : > { %13910 = vmatprep.subr.bf16.mxu1 %v15070_v13  ;;  %v15120_v13 = vld [vmem:[%s15453_s15 + $0x1600] sm:$0xff]  }
 0x2bd   : > { %13889 = vmatpush3.bf16.msra.mxu0 %v15071_v14  ;;  %v175_v14 = vld [vmem:[%s15489_s19 + $0x58] sm:$0xff] }
 0x2be   : > { %13890 = vmatprep.subr.bf16.mxu0 %v15073_v16  ;;  %13911 = vmatpush3.bf16.msra.mxu1 %v15072_v15  ;;  %v15121_v15 = vld [vmem:[%s15453_s15 + $0x1680] sm:$0xff]   ;;  %v2790_v16 = vrot.slane %v175_v14, %v15491_v35 }
 0x2bf   : > { %13912 = vmatprep.subr.bf16.mxu1 %v15074_v17  ;;  %v2783_v17 = vcombine.high %v175_v14, %v175_v14  ;;  %v15159_v14 = vld [vmem:[%s15453_s15 + $0x1870] sm:$0xff]  }
 0x2c1   : > { %13891 = vmatpush3.bf16.msra.mxu0 %v15075_v18  ;;  %v15122_v18 = vld [vmem:[%s15453_s15 + $0x1778] sm:$0xff]  }
 0x2c2   : > { %13892 = vmatprep.subr.bf16.mxu0 %v15077_v20  ;;  %13913 = vmatpush3.bf16.msra.mxu1 %v15076_v19  ;;  %v2798_v19 = vcombine.high %v2790_v16, %v2790_v16  ;;  %v2806_v20 = vrot.slane %v2790_v16, %v15491_v35  ;;  %v15160_v16 = vld [vmem:[%s15453_s15 + $0x18f0] sm:$0xff]  }
 0x2c3   : > { %13914 = vmatprep.subr.bf16.mxu1 %v15078_v21  ;;  %v15123_v21 = vld [vmem:[%s15453_s15 + $0x17f8] sm:$0xff]  }
 0x2c5   : > { %13893 = vmatpush3.bf16.msra.mxu0 %v15079_v22  ;;  %v16384_v22 = vrot.slane %v2783_v17, %v15491_v35  ;;  %v15161_v17 = vld [vmem:[%s15453_s15 + $0x1830] sm:$0xff]  }
 0x2c6   : > { %13894 = vmatprep.subr.bf16.mxu0 %v15081_v24  ;;  %13915 = vmatpush3.bf16.msra.mxu1 %v15080_v23  ;;  %v15124_v23 = vld [vmem:[%s15453_s15 + $0x1738] sm:$0xff]   ;;  %v2820_v24 = vrot.slane %v2798_v19, %v15491_v35 }
 0x2c7   : > { %13916 = vmatprep.subr.bf16.mxu1 %v15082_v25  ;;  %v15125_v25 = vld [vmem:[%s15453_s15 + $0x17b8] sm:$0xff]  }
 0x2c9   : > { %13895 = vmatpush3.bf16.msra.mxu0 %v15083_v26  ;;  %v2799_v26 = vcombine.high %v16384_v22, %v16384_v22 }
 0x2ca   : > { %13896 = vmatprep.subr.bf16.mxu0 %v15085_v28  ;;  %13917 = vmatpush3.bf16.msra.mxu1 %v15084_v27  ;;  %v2828_v27 = vcombine.high %v2806_v20, %v2806_v20  ;;  %v15126_v28 = vld [vmem:[%s15453_s15 + $0x1770] sm:$0xff]  }
 0x2cb   : > { %13918 = vmatprep.subr.bf16.mxu1 %v15086_v29  ;;  %v2830_v29 = vcombine.high %v2820_v24, %v2820_v24 }
 0x2cd   : > { %13897 = vmatpush3.bf16.msra.mxu0 %v15087_v30 }
 0x2ce   : > { %13926 = vmatprep.subr.bf16.mxu0 %v15090_v33  ;;  %13919 = vmatpush3.bf16.msra.mxu1 %v15088_v31  ;;  %v15127_v31 = vld [vmem:[%s15453_s15 + $0x17f0] sm:$0xff]  }
 0x2cf   : > { %13948 = vmatprep.subr.bf16.mxu1 %v15091_v34  ;;  %v15128_v33 = vld [vmem:[%s15453_s15 + $0x1730] sm:$0xff]  }
 0x2d0   : > { %v13634_v40 = vpop.f32.mrf.mxu0  ;;  %11013 = vmatmul.mubr.bf16.vlgmr.msra.gmra.mxu0 %v2764_v32  ;;  %v2827_v32 = vrot.slane %v2799_v26, %v15491_v35 }
 0x2d1   : > { %v13656_v43 = vpop.f32.mrf.mxu1  ;;  %13927 = vmatpush3.bf16.msra.mxu0 %v15092_v36  ;;  %11053 = vmatmul.mubr.bf16.vlgmr.msra.gmra.mxu1 %v2780_v38 }
 0x2d2   : > { %v13635_v44 = vpop.f32.mrf.mxu0  ;;  %13928 = vmatprep.subr.bf16.mxu0 %v15094_v39  ;;  %13949 = vmatpush3.bf16.msra.mxu1 %v15093_v37  ;;  %v15129_v37 = vld [vmem:[%s15453_s15 + $0x17b0] sm:$0xff]   ;;  %v2831_v38 = vcombine.high %v2827_v32, %v2827_v32 }
 0x2d3   : > { %v13636_v46 = vadd.f32 %v13635_v44, %v13634_v40  ;;  %v13657_v48 = vpop.f32.mrf.mxu1  ;;  %13950 = vmatprep.subr.bf16.mxu1 %v15095_v41  ;;  %11092 = vmatprep.mubr.bf16.mxu0 %v2820_v24  ;;  %v15130_v40 = vld [vmem:[%s15453_s15 + $0x1768] sm:$0xff]  }
 0x2d4   : > { %v13637_v49 = vpop.f32.mrf.mxu0  ;;  %v13658_v52 = vadd.f32 %v13657_v48, %v13656_v43  ;;  %11132 = vmatprep.mubr.bf16.mxu1 %v2830_v29  ;;  %v15131_v43 = vld [vmem:[%s15453_s15 + $0x17e8] sm:$0xff]  }
 0x2d5   : > { %v10535_v51 = vadd.f32 %v13636_v46, %v16319_v10  ;;  %v13659_v54 = vpop.f32.mrf.mxu1  ;;  %13929 = vmatpush3.bf16.msra.mxu0 %v15096_v42  ;;  %v15117_v10 = vld [vmem:[%s15453_s15 + $0x1688] sm:$0xff]  }
 0x2d6   : > { %v13638_v55 = vpop.f32.mrf.mxu0  ;;  %13930 = vmatprep.subr.bf16.mxu0 %v15098_v47  ;;  %13951 = vmatpush3.bf16.msra.mxu1 %v15097_v45  ;;  %v15132_v46 = vld [vmem:[%s15453_s15 + $0x1728] sm:$0xff]   ;;  %v15136_v54 = vld [vmem:[%s15453_s15 + $0x1720] sm:$0xff]  }
 0x2d7   : > { %v16356_v57 = vadd.f32 %v13658_v52, %v10535_v51  ;;  %v13660_v59 = vpop.f32.mrf.mxu1  ;;  %13952 = vmatprep.subr.bf16.mxu1 %v15099_v50  ;;  %v15133_v49 = vld [vmem:[%s15453_s15 + $0x17a8] sm:$0xff]   ;;  %v15134_v51 = vld [vmem:[%s15453_s15 + $0x1760] sm:$0xff]  }
 0x2d8   : > { %v15137_v55 = vld [vmem:[%s15453_s15 + $0x17a0] sm:$0xff]   ;;  %v15141_v59 = vld [vmem:[%s15453_s15 + $0x1798] sm:$0xff]  }
 0x2d9   : > { %13931 = vmatpush3.bf16.msra.mxu0 %v15100_v53  ;;  %v15135_v53 = vld [vmem:[%s15453_s15 + $0x17e0] sm:$0xff]  }
 0x2da   : > { %13932 = vmatprep.subr.bf16.mxu0 %v15102_v58  ;;  %13953 = vmatpush3.bf16.msra.mxu1 %v15101_v56  ;;  %v15138_v56 = vld [vmem:[%s15453_s15 + $0x1758] sm:$0xff]  }
 0x2db   : > { %13954 = vmatprep.subr.bf16.mxu1 %v15103_v60  ;;  %v15140_v58 = vld [vmem:[%s15453_s15 + $0x1718] sm:$0xff]   ;;  %v15142_v60 = vld [vmem:[%s15453_s15 + $0x1750] sm:$0xff]  }
 0x2dd   : > { %13933 = vmatpush3.bf16.msra.mxu0 %v15104_v61  ;;  %v15143_v61 = vld [vmem:[%s15453_s15 + $0x17d0] sm:$0xff]  }
 0x2de   : > { %13934 = vmatprep.subr.bf16.mxu0 %v15106_v63  ;;  %13955 = vmatpush3.bf16.msra.mxu1 %v15105_v62  ;;  %v15144_v62 = vld [vmem:[%s15453_s15 + $0x1710] sm:$0xff]  }
 0x2df   : > { %13956 = vmatprep.subr.bf16.mxu1 %v15107_v0  ;;  %v15145_v63 = vld [vmem:[%s15453_s15 + $0x1790] sm:$0xff]   ;;  %v15146_v0 = vld [vmem:[%s15453_s15 + $0x1748] sm:$0xff]  }
 0x2e1   : > { %13935 = vmatpush3.bf16.msra.mxu0 %v15108_v1  ;;  %v15147_v1 = vld [vmem:[%s15453_s15 + $0x17c8] sm:$0xff]  }
 0x2e2   : > { %13936 = vmatprep.subr.bf16.mxu0 %v15110_v3  ;;  %13957 = vmatpush3.bf16.msra.mxu1 %v15109_v2  ;;  %v15148_v2 = vld [vmem:[%s15453_s15 + $0x1708] sm:$0xff]  }
 0x2e3   : > { %13958 = vmatprep.subr.bf16.mxu1 %v15111_v4  ;;  %v15149_v3 = vld [vmem:[%s15453_s15 + $0x1788] sm:$0xff]   ;;  %v15150_v4 = vld [vmem:[%s15453_s15 + $0x1740] sm:$0xff]  }
 0x2e5   : > { %13937 = vmatpush3.bf16.msra.mxu0 %v15112_v5  ;;  %v15151_v5 = vld [vmem:[%s15453_s15 + $0x17c0] sm:$0xff]  }
 0x2e6   : > { %13938 = vmatprep.subr.bf16.mxu0 %v15114_v7  ;;  %13959 = vmatpush3.bf16.msra.mxu1 %v15113_v6  ;;  %v15152_v6 = vld [vmem:[%s15453_s15 + $0x1700] sm:$0xff]  }
 0x2e7   : > { %13960 = vmatprep.subr.bf16.mxu1 %v15115_v8  ;;  %v15153_v7 = vld [vmem:[%s15453_s15 + $0x1780] sm:$0xff]   ;;  %v2813_v8 = vrot.slane %v16384_v22, %v15491_v35  ;;  %v15163_v22 = vld [vmem:[%s15453_s15 + $0x1868] sm:$0xff]  }
 0x2e9   : > { %13939 = vmatpush3.bf16.msra.mxu0 %v15116_v9  ;;  %v15155_v9 = vld [vmem:[%s15453_s15 + $0x1878] sm:$0xff]  }
 0x2ea   : > { %13940 = vmatprep.subr.bf16.mxu0 %v15118_v11  ;;  %13961 = vmatpush3.bf16.msra.mxu1 %v15117_v10  ;;  %v15156_v10 = vld [vmem:[%s15453_s15 + $0x18f8] sm:$0xff]  }
 0x2eb   : > { %13962 = vmatprep.subr.bf16.mxu1 %v15119_v12  ;;  %v15157_v11 = vld [vmem:[%s15453_s15 + $0x1838] sm:$0xff]  }
 0x2ec   : > { %v15158_v12 = vld [vmem:[%s15453_s15 + $0x18b8] sm:$0xff]  }
 0x2ed   : > { %13941 = vmatpush3.bf16.msra.mxu0 %v15120_v13  ;;  %v2829_v13 = vcombine.high %v2813_v8, %v2813_v8 }
 0x2ee   : > { %13970 = vmatprep.subr.bf16.mxu0 %v15122_v18  ;;  %13963 = vmatpush3.bf16.msra.mxu1 %v15121_v15 }
 0x2ef   : > { %13992 = vmatprep.subr.bf16.mxu1 %v15123_v21 }
 0x2f0   : > { %v13678_v30 = vpop.f32.mrf.mxu0  ;;  %11093 = vmatmul.mubr.bf16.vlgmr.msra.gmra.mxu0 %v2806_v20  ;;  %v15162_v20 = vld [vmem:[%s15453_s15 + $0x18b0] sm:$0xff]  }
 0x2f1   : > { %v13700_v34 = vpop.f32.mrf.mxu1  ;;  %13971 = vmatpush3.bf16.msra.mxu0 %v15124_v23  ;;  %11133 = vmatmul.mubr.bf16.vlgmr.msra.gmra.mxu1 %v2828_v27 }
 0x2f2   : > { %v13679_v36 = vpop.f32.mrf.mxu0  ;;  %13972 = vmatprep.subr.bf16.mxu0 %v15126_v28  ;;  %13993 = vmatpush3.bf16.msra.mxu1 %v15125_v25  ;;  %v15164_v25 = vld [vmem:[%s15453_s15 + $0x18e8] sm:$0xff]  }
 0x2f3   : > { %v13680_v39 = vadd.f32 %v13679_v36, %v13678_v30  ;;  %v13701_v41 = vpop.f32.mrf.mxu1  ;;  %11172 = vmatprep.mubr.bf16.mxu0 %v2827_v32  ;;  %13994 = vmatprep.subr.bf16.mxu1 %v15127_v31  ;;  %v15165_v28 = vld [vmem:[%s15453_s15 + $0x1828] sm:$0xff]   ;;  %v15168_v36 = vld [vmem:[%s15453_s15 + $0x18e0] sm:$0xff]  }
 0x2f4   : > { %v13681_v42 = vpop.f32.mrf.mxu0  ;;  %v13702_v45 = vadd.f32 %v13701_v41, %v13700_v34  ;;  %11212 = vmatprep.mubr.bf16.mxu1 %v2831_v38  ;;  %v15166_v31 = vld [vmem:[%s15453_s15 + $0x18a8] sm:$0xff]   ;;  %v15170_v38 = vld [vmem:[%s15453_s15 + $0x18a0] sm:$0xff]   ;;  %v15173_v41 = vld [vmem:[%s15453_s15 + $0x1818] sm:$0xff]  }
 0x2f5   : > { %v10615_v44 = vadd.f32 %v13680_v39, %v16356_v57  ;;  %v13703_v47 = vpop.f32.mrf.mxu1  ;;  %13973 = vmatpush3.bf16.msra.mxu0 %v15128_v33  ;;  %v15139_v57 = vld [vmem:[%s15453_s15 + $0x17d8] sm:$0xff]   ;;  %v15167_v33 = vld [vmem:[%s15453_s15 + $0x1860] sm:$0xff]  }
 0x2f6   : > { %v13682_v48 = vpop.f32.mrf.mxu0  ;;  %13974 = vmatprep.subr.bf16.mxu0 %v15130_v40  ;;  %13995 = vmatpush3.bf16.msra.mxu1 %v15129_v37  ;;  %v15169_v37 = vld [vmem:[%s15453_s15 + $0x1820] sm:$0xff]   ;;  %v15171_v39 = vld [vmem:[%s15453_s15 + $0x1858] sm:$0xff]   ;;  %v15179_v47 = vld [vmem:[%s15453_s15 + $0x1848] sm:$0xff]  }
 0x2f7   : > { %v16401_v50 = vadd.f32 %v13702_v45, %v10615_v44  ;;  %v13704_v52 = vpop.f32.mrf.mxu1  ;;  %13996 = vmatprep.subr.bf16.mxu1 %v15131_v43  ;;  %v15172_v40 = vld [vmem:[%s15453_s15 + $0x18d8] sm:$0xff]   ;;  %v15175_v43 = vld [vmem:[%s15453_s15 + $0x1850] sm:$0xff]   ;;  %v15180_v48 = vld [vmem:[%s15453_s15 + $0x18c8] sm:$0xff]  }
 0x2f8   : > { %v15174_v42 = vld [vmem:[%s15453_s15 + $0x1898] sm:$0xff]   ;;  %v15176_v44 = vld [vmem:[%s15453_s15 + $0x18d0] sm:$0xff]   ;;  %v15184_v52 = vld [vmem:[%s15453_s15 + $0x18c0] sm:$0xff]  }
 0x2f9   : > { %13975 = vmatpush3.bf16.msra.mxu0 %v15132_v46  ;;  %v15177_v45 = vld [vmem:[%s15453_s15 + $0x1810] sm:$0xff]  }
 0x2fa   : > { %13976 = vmatprep.subr.bf16.mxu0 %v15134_v51  ;;  %13997 = vmatpush3.bf16.msra.mxu1 %v15133_v49  ;;  %v15178_v46 = vld [vmem:[%s15453_s15 + $0x1890] sm:$0xff]   ;;  %v15181_v49 = vld [vmem:[%s15453_s15 + $0x1808] sm:$0xff]   ;;  %v15183_v51 = vld [vmem:[%s15453_s15 + $0x1840] sm:$0xff]  }
 0x2fb   : > { %13998 = vmatprep.subr.bf16.mxu1 %v15135_v53  ;;  %v15185_v53 = vld [vmem:[%s15453_s15 + $0x1800] sm:$0xff]  }
 0x2fd   : > { %13977 = vmatpush3.bf16.msra.mxu0 %v15136_v54  ;;  %v176_v54 = vld [vmem:[%s15489_s19 + $0x60] sm:$0xff] }
 0x2fe   : > { %13978 = vmatprep.subr.bf16.mxu0 %v15138_v56  ;;  %13999 = vmatpush3.bf16.msra.mxu1 %v15137_v55  ;;  %v2839_v55 = vrot.slane %v176_v54, %v15491_v35  ;;  %v15187_v56 = vld [vmem:[%s15453_s15 + $0x1978] sm:$0xff]  }
 0x2ff   : > { %14000 = vmatprep.subr.bf16.mxu1 %v15139_v57  ;;  %v2832_v57 = vcombine.high %v176_v54, %v176_v54  ;;  %v15224_v54 = vld [vmem:[%s15453_s15 + $0x1a70] sm:$0xff]  }
 0x301   : > { %13979 = vmatpush3.bf16.msra.mxu0 %v15140_v58  ;;  %v15186_v58 = vld [vmem:[%s15453_s15 + $0x1880] sm:$0xff]  }
 0x302   : > { %13980 = vmatprep.subr.bf16.mxu0 %v15142_v60  ;;  %14001 = vmatpush3.bf16.msra.mxu1 %v15141_v59  ;;  %v2847_v59 = vcombine.high %v2839_v55, %v2839_v55  ;;  %v2855_v60 = vrot.slane %v2839_v55, %v15491_v35 }
 0x303   : > { %14002 = vmatprep.subr.bf16.mxu1 %v15143_v61  ;;  %v15188_v61 = vld [vmem:[%s15453_s15 + $0x19f8] sm:$0xff]  }
 0x305   : > { %13981 = vmatpush3.bf16.msra.mxu0 %v15144_v62  ;;  %v16466_v62 = vrot.slane %v2832_v57, %v15491_v35  ;;  %v15226_v57 = vld [vmem:[%s15453_s15 + $0x1a30] sm:$0xff]  }
 0x306   : > { %13982 = vmatprep.subr.bf16.mxu0 %v15146_v0  ;;  %14003 = vmatpush3.bf16.msra.mxu1 %v15145_v63  ;;  %v15189_v63 = vld [vmem:[%s15453_s15 + $0x1938] sm:$0xff]   ;;  %v2869_v0 = vrot.slane %v2847_v59, %v15491_v35 }
 0x307   : > { %14004 = vmatprep.subr.bf16.mxu1 %v15147_v1  ;;  %v15190_v1 = vld [vmem:[%s15453_s15 + $0x19b8] sm:$0xff]  }
 0x309   : > { %13983 = vmatpush3.bf16.msra.mxu0 %v15148_v2  ;;  %v2848_v2 = vcombine.high %v16466_v62, %v16466_v62 }
 0x30a   : > { %13984 = vmatprep.subr.bf16.mxu0 %v15150_v4  ;;  %14005 = vmatpush3.bf16.msra.mxu1 %v15149_v3  ;;  %v2877_v3 = vcombine.high %v2855_v60, %v2855_v60  ;;  %v15191_v4 = vld [vmem:[%s15453_s15 + $0x1970] sm:$0xff]  }
 0x30b   : > { %14006 = vmatprep.subr.bf16.mxu1 %v15151_v5  ;;  %v2879_v5 = vcombine.high %v2869_v0, %v2869_v0 }
 0x30d   : > { %13985 = vmatpush3.bf16.msra.mxu0 %v15152_v6 }
 0x30e   : > { %14014 = vmatprep.subr.bf16.mxu0 %v15155_v9  ;;  %14007 = vmatpush3.bf16.msra.mxu1 %v15153_v7  ;;  %v15192_v7 = vld [vmem:[%s15453_s15 + $0x19f0] sm:$0xff]  }
 0x30f   : > { %14036 = vmatprep.subr.bf16.mxu1 %v15156_v10  ;;  %v15193_v9 = vld [vmem:[%s15453_s15 + $0x1930] sm:$0xff]  }
 0x310   : > { %v13722_v15 = vpop.f32.mrf.mxu0  ;;  %11173 = vmatmul.mubr.bf16.vlgmr.msra.gmra.mxu0 %v2813_v8  ;;  %v2876_v8 = vrot.slane %v2848_v2, %v15491_v35 }
 0x311   : > { %v13744_v18 = vpop.f32.mrf.mxu1  ;;  %14015 = vmatpush3.bf16.msra.mxu0 %v15157_v11  ;;  %11213 = vmatmul.mubr.bf16.vlgmr.msra.gmra.mxu1 %v2829_v13 }
 0x312   : > { %v13723_v19 = vpop.f32.mrf.mxu0  ;;  %14016 = vmatprep.subr.bf16.mxu0 %v15159_v14  ;;  %14037 = vmatpush3.bf16.msra.mxu1 %v15158_v12  ;;  %v15194_v12 = vld [vmem:[%s15453_s15 + $0x19b0] sm:$0xff]   ;;  %v2880_v13 = vcombine.high %v2876_v8, %v2876_v8 }
 0x313   : > { %v13724_v21 = vadd.f32 %v13723_v19, %v13722_v15  ;;  %v13745_v23 = vpop.f32.mrf.mxu1  ;;  %14038 = vmatprep.subr.bf16.mxu1 %v15160_v16  ;;  %11252 = vmatprep.mubr.bf16.mxu0 %v2869_v0  ;;  %v15195_v15 = vld [vmem:[%s15453_s15 + $0x1968] sm:$0xff]  }
 0x314   : > { %v13725_v24 = vpop.f32.mrf.mxu0  ;;  %v13746_v27 = vadd.f32 %v13745_v23, %v13744_v18  ;;  %11292 = vmatprep.mubr.bf16.mxu1 %v2879_v5  ;;  %v15196_v18 = vld [vmem:[%s15453_s15 + $0x19e8] sm:$0xff]  }
 0x315   : > { %v10695_v26 = vadd.f32 %v13724_v21, %v16401_v50  ;;  %v13747_v29 = vpop.f32.mrf.mxu1  ;;  %14017 = vmatpush3.bf16.msra.mxu0 %v15161_v17  ;;  %v15182_v50 = vld [vmem:[%s15453_s15 + $0x1888] sm:$0xff]  }
 0x316   : > { %v13726_v30 = vpop.f32.mrf.mxu0  ;;  %14018 = vmatprep.subr.bf16.mxu0 %v15163_v22  ;;  %14039 = vmatpush3.bf16.msra.mxu1 %v15162_v20  ;;  %v15197_v21 = vld [vmem:[%s15453_s15 + $0x1928] sm:$0xff]   ;;  %v15201_v29 = vld [vmem:[%s15453_s15 + $0x1920] sm:$0xff]  }
 0x317   : > { %v16438_v32 = vadd.f32 %v13746_v27, %v10695_v26  ;;  %v13748_v34 = vpop.f32.mrf.mxu1  ;;  %14040 = vmatprep.subr.bf16.mxu1 %v15164_v25  ;;  %v15198_v24 = vld [vmem:[%s15453_s15 + $0x19a8] sm:$0xff]   ;;  %v15199_v26 = vld [vmem:[%s15453_s15 + $0x1960] sm:$0xff]  }
 0x318   : > { %v15202_v30 = vld [vmem:[%s15453_s15 + $0x19a0] sm:$0xff]   ;;  %v15206_v34 = vld [vmem:[%s15453_s15 + $0x1998] sm:$0xff]  }
 0x319   : > { %14019 = vmatpush3.bf16.msra.mxu0 %v15165_v28  ;;  %v15200_v28 = vld [vmem:[%s15453_s15 + $0x19e0] sm:$0xff]  }
 0x31a   : > { %14020 = vmatprep.subr.bf16.mxu0 %v15167_v33  ;;  %14041 = vmatpush3.bf16.msra.mxu1 %v15166_v31  ;;  %v15203_v31 = vld [vmem:[%s15453_s15 + $0x1958] sm:$0xff]  }
 0x31b   : > { %14042 = vmatprep.subr.bf16.mxu1 %v15168_v36  ;;  %v15205_v33 = vld [vmem:[%s15453_s15 + $0x1918] sm:$0xff]   ;;  %v15207_v36 = vld [vmem:[%s15453_s15 + $0x1950] sm:$0xff]  }
 0x31d   : > { %14021 = vmatpush3.bf16.msra.mxu0 %v15169_v37  ;;  %v15208_v37 = vld [vmem:[%s15453_s15 + $0x19d0] sm:$0xff]  }
 0x31e   : > { %14022 = vmatprep.subr.bf16.mxu0 %v15171_v39  ;;  %14043 = vmatpush3.bf16.msra.mxu1 %v15170_v38  ;;  %v15209_v38 = vld [vmem:[%s15453_s15 + $0x1910] sm:$0xff]  }
 0x31f   : > { %14044 = vmatprep.subr.bf16.mxu1 %v15172_v40  ;;  %v15210_v39 = vld [vmem:[%s15453_s15 + $0x1990] sm:$0xff]   ;;  %v15211_v40 = vld [vmem:[%s15453_s15 + $0x1948] sm:$0xff]  }
 0x321   : > { %14023 = vmatpush3.bf16.msra.mxu0 %v15173_v41  ;;  %v15212_v41 = vld [vmem:[%s15453_s15 + $0x19c8] sm:$0xff]  }
 0x322   : > { %14024 = vmatprep.subr.bf16.mxu0 %v15175_v43  ;;  %14045 = vmatpush3.bf16.msra.mxu1 %v15174_v42  ;;  %v15213_v42 = vld [vmem:[%s15453_s15 + $0x1908] sm:$0xff]  }
 0x323   : > { %14046 = vmatprep.subr.bf16.mxu1 %v15176_v44  ;;  %v15214_v43 = vld [vmem:[%s15453_s15 + $0x1988] sm:$0xff]   ;;  %v15215_v44 = vld [vmem:[%s15453_s15 + $0x1940] sm:$0xff]  }
 0x325   : > { %14025 = vmatpush3.bf16.msra.mxu0 %v15177_v45  ;;  %v15216_v45 = vld [vmem:[%s15453_s15 + $0x19c0] sm:$0xff]  }
 0x326   : > { %14026 = vmatprep.subr.bf16.mxu0 %v15179_v47  ;;  %14047 = vmatpush3.bf16.msra.mxu1 %v15178_v46  ;;  %v15217_v46 = vld [vmem:[%s15453_s15 + $0x1900] sm:$0xff]  }
 0x327   : > { %14048 = vmatprep.subr.bf16.mxu1 %v15180_v48  ;;  %v15218_v47 = vld [vmem:[%s15453_s15 + $0x1980] sm:$0xff]   ;;  %v2862_v48 = vrot.slane %v16466_v62, %v15491_v35  ;;  %v15228_v62 = vld [vmem:[%s15453_s15 + $0x1a68] sm:$0xff]  }
 0x329   : > { %14027 = vmatpush3.bf16.msra.mxu0 %v15181_v49  ;;  %v15220_v49 = vld [vmem:[%s15453_s15 + $0x1a78] sm:$0xff]  }
 0x32a   : > { %14028 = vmatprep.subr.bf16.mxu0 %v15183_v51  ;;  %14049 = vmatpush3.bf16.msra.mxu1 %v15182_v50  ;;  %v15221_v50 = vld [vmem:[%s15453_s15 + $0x1af8] sm:$0xff]  }
 0x32b   : > { %14050 = vmatprep.subr.bf16.mxu1 %v15184_v52  ;;  %v15222_v51 = vld [vmem:[%s15453_s15 + $0x1a38] sm:$0xff]  }
 0x32c   : > { %v15223_v52 = vld [vmem:[%s15453_s15 + $0x1ab8] sm:$0xff]  }
 0x32d   : > { %14029 = vmatpush3.bf16.msra.mxu0 %v15185_v53  ;;  %v2878_v53 = vcombine.high %v2862_v48, %v2862_v48 }
 0x32e   : > { %14058 = vmatprep.subr.bf16.mxu0 %v15187_v56  ;;  %14051 = vmatpush3.bf16.msra.mxu1 %v15186_v58  ;;  %v15225_v56 = vld [vmem:[%s15453_s15 + $0x1af0] sm:$0xff]  }
 0x32f   : > { %14080 = vmatprep.subr.bf16.mxu1 %v15188_v61 }
 0x330   : > { %v13766_v6 = vpop.f32.mrf.mxu0  ;;  %11253 = vmatmul.mubr.bf16.vlgmr.msra.gmra.mxu0 %v2855_v60  ;;  %v15227_v60 = vld [vmem:[%s15453_s15 + $0x1ab0] sm:$0xff]  }
 0x331   : > { %v13788_v10 = vpop.f32.mrf.mxu1  ;;  %14059 = vmatpush3.bf16.msra.mxu0 %v15189_v63  ;;  %11293 = vmatmul.mubr.bf16.vlgmr.msra.gmra.mxu1 %v2877_v3 }
 0x332   : > { %v13767_v11 = vpop.f32.mrf.mxu0  ;;  %14060 = vmatprep.subr.bf16.mxu0 %v15191_v4  ;;  %14081 = vmatpush3.bf16.msra.mxu1 %v15190_v1  ;;  %v15229_v1 = vld [vmem:[%s15453_s15 + $0x1ae8] sm:$0xff]  }
 0x333   : > { %v13768_v14 = vadd.f32 %v13767_v11, %v13766_v6  ;;  %v13789_v16 = vpop.f32.mrf.mxu1  ;;  %11332 = vmatprep.mubr.bf16.mxu0 %v2876_v8  ;;  %14082 = vmatprep.subr.bf16.mxu1 %v15192_v7  ;;  %v15230_v4 = vld [vmem:[%s15453_s15 + $0x1a28] sm:$0xff]   ;;  %v15233_v11 = vld [vmem:[%s15453_s15 + $0x1ae0] sm:$0xff]  }
 0x334   : > { %v13769_v17 = vpop.f32.mrf.mxu0  ;;  %v13790_v20 = vadd.f32 %v13789_v16, %v13788_v10  ;;  %11372 = vmatprep.mubr.bf16.mxu1 %v2880_v13  ;;  %v15231_v7 = vld [vmem:[%s15453_s15 + $0x1aa8] sm:$0xff]   ;;  %v15235_v13 = vld [vmem:[%s15453_s15 + $0x1aa0] sm:$0xff]   ;;  %v15238_v16 = vld [vmem:[%s15453_s15 + $0x1a18] sm:$0xff]  }
 0x335   : > { %v10775_v19 = vadd.f32 %v13768_v14, %v16438_v32  ;;  %v13791_v22 = vpop.f32.mrf.mxu1  ;;  %14061 = vmatpush3.bf16.msra.mxu0 %v15193_v9  ;;  %v15204_v32 = vld [vmem:[%s15453_s15 + $0x19d8] sm:$0xff]   ;;  %v15232_v9 = vld [vmem:[%s15453_s15 + $0x1a60] sm:$0xff]  }
 0x336   : > { %v13770_v23 = vpop.f32.mrf.mxu0  ;;  %14062 = vmatprep.subr.bf16.mxu0 %v15195_v15  ;;  %14083 = vmatpush3.bf16.msra.mxu1 %v15194_v12  ;;  %v15234_v12 = vld [vmem:[%s15453_s15 + $0x1a20] sm:$0xff]   ;;  %v15236_v14 = vld [vmem:[%s15453_s15 + $0x1a58] sm:$0xff]   ;;  %v15244_v22 = vld [vmem:[%s15453_s15 + $0x1a48] sm:$0xff]  }
 0x337   : > { %v16483_v25 = vadd.f32 %v13790_v20, %v10775_v19  ;;  %v13792_v27 = vpop.f32.mrf.mxu1  ;;  %14084 = vmatprep.subr.bf16.mxu1 %v15196_v18  ;;  %v15237_v15 = vld [vmem:[%s15453_s15 + $0x1ad8] sm:$0xff]   ;;  %v15240_v18 = vld [vmem:[%s15453_s15 + $0x1a50] sm:$0xff]   ;;  %v15245_v23 = vld [vmem:[%s15453_s15 + $0x1ac8] sm:$0xff]  }
 0x338   : > { %v15239_v17 = vld [vmem:[%s15453_s15 + $0x1a98] sm:$0xff]   ;;  %v15241_v19 = vld [vmem:[%s15453_s15 + $0x1ad0] sm:$0xff]   ;;  %v15249_v27 = vld [vmem:[%s15453_s15 + $0x1ac0] sm:$0xff]  }
 0x339   : > { %14063 = vmatpush3.bf16.msra.mxu0 %v15197_v21  ;;  %v15242_v20 = vld [vmem:[%s15453_s15 + $0x1a10] sm:$0xff]  }
 0x33a   : > { %14064 = vmatprep.subr.bf16.mxu0 %v15199_v26  ;;  %14085 = vmatpush3.bf16.msra.mxu1 %v15198_v24  ;;  %v15243_v21 = vld [vmem:[%s15453_s15 + $0x1a90] sm:$0xff]   ;;  %v15246_v24 = vld [vmem:[%s15453_s15 + $0x1a08] sm:$0xff]   ;;  %v15248_v26 = vld [vmem:[%s15453_s15 + $0x1a40] sm:$0xff]  }
 0x33b   : > { %14086 = vmatprep.subr.bf16.mxu1 %v15200_v28  ;;  %v15250_v28 = vld [vmem:[%s15453_s15 + $0x1a00] sm:$0xff]  }
 0x33d   : > { %14065 = vmatpush3.bf16.msra.mxu0 %v15201_v29  ;;  %v177_v29 = vld [vmem:[%s15489_s19 + $0x68] sm:$0xff] }
 0x33e   : > { %14066 = vmatprep.subr.bf16.mxu0 %v15203_v31  ;;  %14087 = vmatpush3.bf16.msra.mxu1 %v15202_v30  ;;  %v15251_v30 = vld [vmem:[%s15453_s15 + $0x1a80] sm:$0xff]   ;;  %v2888_v31 = vrot.slane %v177_v29, %v15491_v35 }
 0x33f   : > { %14088 = vmatprep.subr.bf16.mxu1 %v15204_v32  ;;  %v2881_v32 = vcombine.high %v177_v29, %v177_v29  ;;  %v15289_v29 = vld [vmem:[%s15453_s15 + $0x1c70] sm:$0xff]  }
 0x341   : > { %14067 = vmatpush3.bf16.msra.mxu0 %v15205_v33  ;;  %v15252_v33 = vld [vmem:[%s15453_s15 + $0x1b78] sm:$0xff]  }
 0x342   : > { %14068 = vmatprep.subr.bf16.mxu0 %v15207_v36  ;;  %14089 = vmatpush3.bf16.msra.mxu1 %v15206_v34  ;;  %v2896_v34 = vcombine.high %v2888_v31, %v2888_v31  ;;  %v2904_v36 = vrot.slane %v2888_v31, %v15491_v35  ;;  %v15290_v31 = vld [vmem:[%s15453_s15 + $0x1cf0] sm:$0xff]  }
 0x343   : > { %14090 = vmatprep.subr.bf16.mxu1 %v15208_v37  ;;  %v15253_v37 = vld [vmem:[%s15453_s15 + $0x1bf8] sm:$0xff]  }
 0x345   : > { %14069 = vmatpush3.bf16.msra.mxu0 %v15209_v38  ;;  %v16548_v38 = vrot.slane %v2881_v32, %v15491_v35  ;;  %v15291_v32 = vld [vmem:[%s15453_s15 + $0x1c30] sm:$0xff]  }
 0x346   : > { %14070 = vmatprep.subr.bf16.mxu0 %v15211_v40  ;;  %14091 = vmatpush3.bf16.msra.mxu1 %v15210_v39  ;;  %v15254_v39 = vld [vmem:[%s15453_s15 + $0x1b38] sm:$0xff]   ;;  %v2918_v40 = vrot.slane %v2896_v34, %v15491_v35 }
 0x347   : > { %14092 = vmatprep.subr.bf16.mxu1 %v15212_v41  ;;  %v15255_v41 = vld [vmem:[%s15453_s15 + $0x1bb8] sm:$0xff]  }
 0x349   : > { %14071 = vmatpush3.bf16.msra.mxu0 %v15213_v42  ;;  %v2897_v42 = vcombine.high %v16548_v38, %v16548_v38 }
 0x34a   : > { %14072 = vmatprep.subr.bf16.mxu0 %v15215_v44  ;;  %14093 = vmatpush3.bf16.msra.mxu1 %v15214_v43  ;;  %v2926_v43 = vcombine.high %v2904_v36, %v2904_v36  ;;  %v15256_v44 = vld [vmem:[%s15453_s15 + $0x1b70] sm:$0xff]  }
 0x34b   : > { %14094 = vmatprep.subr.bf16.mxu1 %v15216_v45  ;;  %v2928_v45 = vcombine.high %v2918_v40, %v2918_v40 }
 0x34d   : > { %14073 = vmatpush3.bf16.msra.mxu0 %v15217_v46 }
 0x34e   : > { %14102 = vmatprep.subr.bf16.mxu0 %v15220_v49  ;;  %14095 = vmatpush3.bf16.msra.mxu1 %v15218_v47  ;;  %v15257_v47 = vld [vmem:[%s15453_s15 + $0x1bf0] sm:$0xff]  }
 0x34f   : > { %14124 = vmatprep.subr.bf16.mxu1 %v15221_v50  ;;  %v15258_v49 = vld [vmem:[%s15453_s15 + $0x1b30] sm:$0xff]  }
 0x350   : > { %v13810_v55 = vpop.f32.mrf.mxu0  ;;  %11333 = vmatmul.mubr.bf16.vlgmr.msra.gmra.mxu0 %v2862_v48  ;;  %v2925_v48 = vrot.slane %v2897_v42, %v15491_v35 }
 0x351   : > { %v13832_v58 = vpop.f32.mrf.mxu1  ;;  %14103 = vmatpush3.bf16.msra.mxu0 %v15222_v51  ;;  %11373 = vmatmul.mubr.bf16.vlgmr.msra.gmra.mxu1 %v2878_v53 }
 0x352   : > { %v13811_v59 = vpop.f32.mrf.mxu0  ;;  %14104 = vmatprep.subr.bf16.mxu0 %v15224_v54  ;;  %14125 = vmatpush3.bf16.msra.mxu1 %v15223_v52  ;;  %v15259_v52 = vld [vmem:[%s15453_s15 + $0x1bb0] sm:$0xff]   ;;  %v2929_v53 = vcombine.high %v2925_v48, %v2925_v48 }
 0x353   : > { %v13812_v61 = vadd.f32 %v13811_v59, %v13810_v55  ;;  %v13833_v63 = vpop.f32.mrf.mxu1  ;;  %14126 = vmatprep.subr.bf16.mxu1 %v15225_v56  ;;  %11412 = vmatprep.mubr.bf16.mxu0 %v2918_v40  ;;  %v15260_v55 = vld [vmem:[%s15453_s15 + $0x1b68] sm:$0xff]  }
 0x354   : > { %v13813_v0 = vpop.f32.mrf.mxu0  ;;  %v13834_v3 = vadd.f32 %v13833_v63, %v13832_v58  ;;  %11452 = vmatprep.mubr.bf16.mxu1 %v2928_v45  ;;  %v15261_v58 = vld [vmem:[%s15453_s15 + $0x1be8] sm:$0xff]  }
 0x355   : > { %v10855_v2 = vadd.f32 %v13812_v61, %v16483_v25  ;;  %v13835_v5 = vpop.f32.mrf.mxu1  ;;  %14105 = vmatpush3.bf16.msra.mxu0 %v15226_v57  ;;  %v15247_v25 = vld [vmem:[%s15453_s15 + $0x1a88] sm:$0xff]  }
 0x356   : > { %v13814_v6 = vpop.f32.mrf.mxu0  ;;  %14106 = vmatprep.subr.bf16.mxu0 %v15228_v62  ;;  %14127 = vmatpush3.bf16.msra.mxu1 %v15227_v60  ;;  %v15262_v61 = vld [vmem:[%s15453_s15 + $0x1b28] sm:$0xff]   ;;  %v15266_v5 = vld [vmem:[%s15453_s15 + $0x1b20] sm:$0xff]  }
 0x357   : > { %v16520_v8 = vadd.f32 %v13834_v3, %v10855_v2  ;;  %v13836_v10 = vpop.f32.mrf.mxu1  ;;  %14128 = vmatprep.subr.bf16.mxu1 %v15229_v1  ;;  %v15263_v0 = vld [vmem:[%s15453_s15 + $0x1ba8] sm:$0xff]   ;;  %v15264_v2 = vld [vmem:[%s15453_s15 + $0x1b60] sm:$0xff]  }
 0x358   : > { %v15267_v6 = vld [vmem:[%s15453_s15 + $0x1ba0] sm:$0xff]   ;;  %v15271_v10 = vld [vmem:[%s15453_s15 + $0x1b98] sm:$0xff]  }
 0x359   : > { %14107 = vmatpush3.bf16.msra.mxu0 %v15230_v4  ;;  %v15265_v4 = vld [vmem:[%s15453_s15 + $0x1be0] sm:$0xff]  }
 0x35a   : > { %14108 = vmatprep.subr.bf16.mxu0 %v15232_v9  ;;  %14129 = vmatpush3.bf16.msra.mxu1 %v15231_v7  ;;  %v15268_v7 = vld [vmem:[%s15453_s15 + $0x1b58] sm:$0xff]  }
 0x35b   : > { %14130 = vmatprep.subr.bf16.mxu1 %v15233_v11  ;;  %v15270_v9 = vld [vmem:[%s15453_s15 + $0x1b18] sm:$0xff]   ;;  %v15272_v11 = vld [vmem:[%s15453_s15 + $0x1b50] sm:$0xff]  }
 0x35d   : > { %14109 = vmatpush3.bf16.msra.mxu0 %v15234_v12  ;;  %v15273_v12 = vld [vmem:[%s15453_s15 + $0x1bd0] sm:$0xff]  }
 0x35e   : > { %14110 = vmatprep.subr.bf16.mxu0 %v15236_v14  ;;  %14131 = vmatpush3.bf16.msra.mxu1 %v15235_v13  ;;  %v15274_v13 = vld [vmem:[%s15453_s15 + $0x1b10] sm:$0xff]  }
 0x35f   : > { %14132 = vmatprep.subr.bf16.mxu1 %v15237_v15  ;;  %v15275_v14 = vld [vmem:[%s15453_s15 + $0x1b90] sm:$0xff]   ;;  %v15276_v15 = vld [vmem:[%s15453_s15 + $0x1b48] sm:$0xff]  }
 0x361   : > { %14111 = vmatpush3.bf16.msra.mxu0 %v15238_v16  ;;  %v15277_v16 = vld [vmem:[%s15453_s15 + $0x1bc8] sm:$0xff]  }
 0x362   : > { %14112 = vmatprep.subr.bf16.mxu0 %v15240_v18  ;;  %14133 = vmatpush3.bf16.msra.mxu1 %v15239_v17  ;;  %v15278_v17 = vld [vmem:[%s15453_s15 + $0x1b08] sm:$0xff]  }
 0x363   : > { %14134 = vmatprep.subr.bf16.mxu1 %v15241_v19  ;;  %v15279_v18 = vld [vmem:[%s15453_s15 + $0x1b88] sm:$0xff]   ;;  %v15280_v19 = vld [vmem:[%s15453_s15 + $0x1b40] sm:$0xff]  }
 0x365   : > { %14113 = vmatpush3.bf16.msra.mxu0 %v15242_v20  ;;  %v15281_v20 = vld [vmem:[%s15453_s15 + $0x1bc0] sm:$0xff]  }
 0x366   : > { %14114 = vmatprep.subr.bf16.mxu0 %v15244_v22  ;;  %14135 = vmatpush3.bf16.msra.mxu1 %v15243_v21  ;;  %v15282_v21 = vld [vmem:[%s15453_s15 + $0x1b00] sm:$0xff]  }
 0x367   : > { %14136 = vmatprep.subr.bf16.mxu1 %v15245_v23  ;;  %v15283_v22 = vld [vmem:[%s15453_s15 + $0x1b80] sm:$0xff]   ;;  %v2911_v23 = vrot.slane %v16548_v38, %v15491_v35  ;;  %v15293_v38 = vld [vmem:[%s15453_s15 + $0x1c68] sm:$0xff]  }
 0x369   : > { %14115 = vmatpush3.bf16.msra.mxu0 %v15246_v24  ;;  %v15285_v24 = vld [vmem:[%s15453_s15 + $0x1c78] sm:$0xff]  }
 0x36a   : > { %14116 = vmatprep.subr.bf16.mxu0 %v15248_v26  ;;  %14137 = vmatpush3.bf16.msra.mxu1 %v15247_v25  ;;  %v15286_v25 = vld [vmem:[%s15453_s15 + $0x1cf8] sm:$0xff]  }
 0x36b   : > { %14138 = vmatprep.subr.bf16.mxu1 %v15249_v27  ;;  %v15287_v26 = vld [vmem:[%s15453_s15 + $0x1c38] sm:$0xff]  }
 0x36c   : > { %v15288_v27 = vld [vmem:[%s15453_s15 + $0x1cb8] sm:$0xff]  }
 0x36d   : > { %14117 = vmatpush3.bf16.msra.mxu0 %v15250_v28  ;;  %v2927_v28 = vcombine.high %v2911_v23, %v2911_v23 }
 0x36e   : > { %14146 = vmatprep.subr.bf16.mxu0 %v15252_v33  ;;  %14139 = vmatpush3.bf16.msra.mxu1 %v15251_v30 }
 0x36f   : > { %14168 = vmatprep.subr.bf16.mxu1 %v15253_v37 }
 0x370   : > { %v13854_v46 = vpop.f32.mrf.mxu0  ;;  %11413 = vmatmul.mubr.bf16.vlgmr.msra.gmra.mxu0 %v2904_v36  ;;  %v15292_v36 = vld [vmem:[%s15453_s15 + $0x1cb0] sm:$0xff]  }
 0x371   : > { %v13876_v50 = vpop.f32.mrf.mxu1  ;;  %14147 = vmatpush3.bf16.msra.mxu0 %v15254_v39  ;;  %11453 = vmatmul.mubr.bf16.vlgmr.msra.gmra.mxu1 %v2926_v43 }
 0x372   : > { %v13855_v51 = vpop.f32.mrf.mxu0  ;;  %14148 = vmatprep.subr.bf16.mxu0 %v15256_v44  ;;  %14169 = vmatpush3.bf16.msra.mxu1 %v15255_v41  ;;  %v15294_v41 = vld [vmem:[%s15453_s15 + $0x1ce8] sm:$0xff]  }
 0x373   : > { %v13856_v54 = vadd.f32 %v13855_v51, %v13854_v46  ;;  %v13877_v56 = vpop.f32.mrf.mxu1  ;;  %11492 = vmatprep.mubr.bf16.mxu0 %v2925_v48  ;;  %14170 = vmatprep.subr.bf16.mxu1 %v15257_v47  ;;  %v15295_v44 = vld [vmem:[%s15453_s15 + $0x1c28] sm:$0xff]   ;;  %v15298_v51 = vld [vmem:[%s15453_s15 + $0x1ce0] sm:$0xff]  }
 0x374   : > { %v13857_v57 = vpop.f32.mrf.mxu0  ;;  %v13878_v60 = vadd.f32 %v13877_v56, %v13876_v50  ;;  %11532 = vmatprep.mubr.bf16.mxu1 %v2929_v53  ;;  %v15296_v47 = vld [vmem:[%s15453_s15 + $0x1ca8] sm:$0xff]   ;;  %v15300_v53 = vld [vmem:[%s15453_s15 + $0x1ca0] sm:$0xff]   ;;  %v15303_v56 = vld [vmem:[%s15453_s15 + $0x1c18] sm:$0xff]  }
 0x375   : > { %v10935_v59 = vadd.f32 %v13856_v54, %v16520_v8  ;;  %v13879_v62 = vpop.f32.mrf.mxu1  ;;  %14149 = vmatpush3.bf16.msra.mxu0 %v15258_v49  ;;  %v15269_v8 = vld [vmem:[%s15453_s15 + $0x1bd8] sm:$0xff]   ;;  %v15297_v49 = vld [vmem:[%s15453_s15 + $0x1c60] sm:$0xff]  }
 0x376   : > { %v13858_v63 = vpop.f32.mrf.mxu0  ;;  %14150 = vmatprep.subr.bf16.mxu0 %v15260_v55  ;;  %14171 = vmatpush3.bf16.msra.mxu1 %v15259_v52  ;;  %v15299_v52 = vld [vmem:[%s15453_s15 + $0x1c20] sm:$0xff]   ;;  %v15301_v54 = vld [vmem:[%s15453_s15 + $0x1c58] sm:$0xff]   ;;  %v15309_v62 = vld [vmem:[%s15453_s15 + $0x1c48] sm:$0xff]  }
 0x377   : > { %v16565_v1 = vadd.f32 %v13878_v60, %v10935_v59  ;;  %v13880_v3 = vpop.f32.mrf.mxu1  ;;  %14172 = vmatprep.subr.bf16.mxu1 %v15261_v58  ;;  %v15302_v55 = vld [vmem:[%s15453_s15 + $0x1cd8] sm:$0xff]   ;;  %v15305_v58 = vld [vmem:[%s15453_s15 + $0x1c50] sm:$0xff]   ;;  %v15310_v63 = vld [vmem:[%s15453_s15 + $0x1cc8] sm:$0xff]  }
 0x378   : > { %v15304_v57 = vld [vmem:[%s15453_s15 + $0x1c98] sm:$0xff]   ;;  %v15306_v59 = vld [vmem:[%s15453_s15 + $0x1cd0] sm:$0xff]   ;;  %v15314_v3 = vld [vmem:[%s15453_s15 + $0x1cc0] sm:$0xff]  }
 0x379   : > { %14151 = vmatpush3.bf16.msra.mxu0 %v15262_v61  ;;  %v15307_v60 = vld [vmem:[%s15453_s15 + $0x1c10] sm:$0xff]  }
 0x37a   : > { %14152 = vmatprep.subr.bf16.mxu0 %v15264_v2  ;;  %14173 = vmatpush3.bf16.msra.mxu1 %v15263_v0  ;;  %v15308_v61 = vld [vmem:[%s15453_s15 + $0x1c90] sm:$0xff]   ;;  %v15311_v0 = vld [vmem:[%s15453_s15 + $0x1c08] sm:$0xff]   ;;  %v15313_v2 = vld [vmem:[%s15453_s15 + $0x1c40] sm:$0xff]  }
 0x37b   : > { %14174 = vmatprep.subr.bf16.mxu1 %v15265_v4  ;;  %v15315_v4 = vld [vmem:[%s15453_s15 + $0x1c00] sm:$0xff]  }
 0x37d   : > { %14153 = vmatpush3.bf16.msra.mxu0 %v15266_v5  ;;  %v178_v5 = vld [vmem:[%s15489_s19 + $0x70] sm:$0xff] }
 0x37e   : > { %14154 = vmatprep.subr.bf16.mxu0 %v15268_v7  ;;  %14175 = vmatpush3.bf16.msra.mxu1 %v15267_v6  ;;  %v15316_v6 = vld [vmem:[%s15453_s15 + $0x1c80] sm:$0xff]   ;;  %v2937_v7 = vrot.slane %v178_v5, %v15491_v35 }
 0x37f   : > { %14176 = vmatprep.subr.bf16.mxu1 %v15269_v8  ;;  %v2930_v8 = vcombine.high %v178_v5, %v178_v5  ;;  %v15354_v5 = vld [vmem:[%s15453_s15 + $0x1e70] sm:$0xff]  }
 0x381   : > { %14155 = vmatpush3.bf16.msra.mxu0 %v15270_v9  ;;  %v15317_v9 = vld [vmem:[%s15453_s15 + $0x1d78] sm:$0xff]  }
 0x382   : > { %14156 = vmatprep.subr.bf16.mxu0 %v15272_v11  ;;  %14177 = vmatpush3.bf16.msra.mxu1 %v15271_v10  ;;  %v2945_v10 = vcombine.high %v2937_v7, %v2937_v7  ;;  %v2953_v11 = vrot.slane %v2937_v7, %v15491_v35  ;;  %v15355_v7 = vld [vmem:[%s15453_s15 + $0x1ef0] sm:$0xff]  }
 0x383   : > { %14178 = vmatprep.subr.bf16.mxu1 %v15273_v12  ;;  %v15318_v12 = vld [vmem:[%s15453_s15 + $0x1df8] sm:$0xff]  }
 0x385   : > { %14157 = vmatpush3.bf16.msra.mxu0 %v15274_v13  ;;  %v16630_v13 = vrot.slane %v2930_v8, %v15491_v35  ;;  %v15356_v8 = vld [vmem:[%s15453_s15 + $0x1e30] sm:$0xff]  }
 0x386   : > { %14158 = vmatprep.subr.bf16.mxu0 %v15276_v15  ;;  %14179 = vmatpush3.bf16.msra.mxu1 %v15275_v14  ;;  %v15319_v14 = vld [vmem:[%s15453_s15 + $0x1d38] sm:$0xff]   ;;  %v2967_v15 = vrot.slane %v2945_v10, %v15491_v35 }
 0x387   : > { %14180 = vmatprep.subr.bf16.mxu1 %v15277_v16  ;;  %v15320_v16 = vld [vmem:[%s15453_s15 + $0x1db8] sm:$0xff]  }
 0x389   : > { %14159 = vmatpush3.bf16.msra.mxu0 %v15278_v17  ;;  %v2946_v17 = vcombine.high %v16630_v13, %v16630_v13 }
 0x38a   : > { %14160 = vmatprep.subr.bf16.mxu0 %v15280_v19  ;;  %14181 = vmatpush3.bf16.msra.mxu1 %v15279_v18  ;;  %v2975_v18 = vcombine.high %v2953_v11, %v2953_v11  ;;  %v15321_v19 = vld [vmem:[%s15453_s15 + $0x1d70] sm:$0xff]  }
 0x38b   : > { %14182 = vmatprep.subr.bf16.mxu1 %v15281_v20  ;;  %v2977_v20 = vcombine.high %v2967_v15, %v2967_v15 }
 0x38d   : > { %14161 = vmatpush3.bf16.msra.mxu0 %v15282_v21 }
 0x38e   : > { %14190 = vmatprep.subr.bf16.mxu0 %v15285_v24  ;;  %14183 = vmatpush3.bf16.msra.mxu1 %v15283_v22  ;;  %v15322_v22 = vld [vmem:[%s15453_s15 + $0x1df0] sm:$0xff]  }
 0x38f   : > { %14212 = vmatprep.subr.bf16.mxu1 %v15286_v25  ;;  %v15323_v24 = vld [vmem:[%s15453_s15 + $0x1d30] sm:$0xff]  }
 0x390   : > { %v13898_v30 = vpop.f32.mrf.mxu0  ;;  %11493 = vmatmul.mubr.bf16.vlgmr.msra.gmra.mxu0 %v2911_v23  ;;  %v2974_v23 = vrot.slane %v2946_v17, %v15491_v35 }
 0x391   : > { %v13920_v33 = vpop.f32.mrf.mxu1  ;;  %14191 = vmatpush3.bf16.msra.mxu0 %v15287_v26  ;;  %11533 = vmatmul.mubr.bf16.vlgmr.msra.gmra.mxu1 %v2927_v28 }
 0x392   : > { %v13899_v34 = vpop.f32.mrf.mxu0  ;;  %14192 = vmatprep.subr.bf16.mxu0 %v15289_v29  ;;  %14213 = vmatpush3.bf16.msra.mxu1 %v15288_v27  ;;  %v15324_v27 = vld [vmem:[%s15453_s15 + $0x1db0] sm:$0xff]   ;;  %v2978_v28 = vcombine.high %v2974_v23, %v2974_v23 }
 0x393   : > { %v13900_v37 = vadd.f32 %v13899_v34, %v13898_v30  ;;  %v13921_v39 = vpop.f32.mrf.mxu1  ;;  %14214 = vmatprep.subr.bf16.mxu1 %v15290_v31  ;;  %11572 = vmatprep.mubr.bf16.mxu0 %v2967_v15  ;;  %v15325_v30 = vld [vmem:[%s15453_s15 + $0x1d68] sm:$0xff]  }
 0x394   : > { %v13901_v40 = vpop.f32.mrf.mxu0  ;;  %v13922_v43 = vadd.f32 %v13921_v39, %v13920_v33  ;;  %11612 = vmatprep.mubr.bf16.mxu1 %v2977_v20  ;;  %v15326_v33 = vld [vmem:[%s15453_s15 + $0x1de8] sm:$0xff]  }
 0x395   : > { %v11015_v42 = vadd.f32 %v13900_v37, %v16565_v1  ;;  %v13923_v45 = vpop.f32.mrf.mxu1  ;;  %14193 = vmatpush3.bf16.msra.mxu0 %v15291_v32  ;;  %v15312_v1 = vld [vmem:[%s15453_s15 + $0x1c88] sm:$0xff]  }
 0x396   : > { %v13902_v46 = vpop.f32.mrf.mxu0  ;;  %14194 = vmatprep.subr.bf16.mxu0 %v15293_v38  ;;  %14215 = vmatpush3.bf16.msra.mxu1 %v15292_v36  ;;  %v15327_v37 = vld [vmem:[%s15453_s15 + $0x1d28] sm:$0xff]   ;;  %v15331_v45 = vld [vmem:[%s15453_s15 + $0x1d20] sm:$0xff]  }
 0x397   : > { %v16602_v48 = vadd.f32 %v13922_v43, %v11015_v42  ;;  %v13924_v50 = vpop.f32.mrf.mxu1  ;;  %14216 = vmatprep.subr.bf16.mxu1 %v15294_v41  ;;  %v15328_v40 = vld [vmem:[%s15453_s15 + $0x1da8] sm:$0xff]   ;;  %v15329_v42 = vld [vmem:[%s15453_s15 + $0x1d60] sm:$0xff]  }
 0x398   : > { %v15332_v46 = vld [vmem:[%s15453_s15 + $0x1da0] sm:$0xff]   ;;  %v15336_v50 = vld [vmem:[%s15453_s15 + $0x1d98] sm:$0xff]  }
 0x399   : > { %14195 = vmatpush3.bf16.msra.mxu0 %v15295_v44  ;;  %v15330_v44 = vld [vmem:[%s15453_s15 + $0x1de0] sm:$0xff]  }
 0x39a   : > { %14196 = vmatprep.subr.bf16.mxu0 %v15297_v49  ;;  %14217 = vmatpush3.bf16.msra.mxu1 %v15296_v47  ;;  %v15333_v47 = vld [vmem:[%s15453_s15 + $0x1d58] sm:$0xff]  }
 0x39b   : > { %14218 = vmatprep.subr.bf16.mxu1 %v15298_v51  ;;  %v15335_v49 = vld [vmem:[%s15453_s15 + $0x1d18] sm:$0xff]   ;;  %v15337_v51 = vld [vmem:[%s15453_s15 + $0x1d50] sm:$0xff]  }
 0x39d   : > { %14197 = vmatpush3.bf16.msra.mxu0 %v15299_v52  ;;  %v15338_v52 = vld [vmem:[%s15453_s15 + $0x1dd0] sm:$0xff]  }
 0x39e   : > { %14198 = vmatprep.subr.bf16.mxu0 %v15301_v54  ;;  %14219 = vmatpush3.bf16.msra.mxu1 %v15300_v53  ;;  %v15339_v53 = vld [vmem:[%s15453_s15 + $0x1d10] sm:$0xff]  }
 0x39f   : > { %14220 = vmatprep.subr.bf16.mxu1 %v15302_v55  ;;  %v15340_v54 = vld [vmem:[%s15453_s15 + $0x1d90] sm:$0xff]   ;;  %v15341_v55 = vld [vmem:[%s15453_s15 + $0x1d48] sm:$0xff]  }
 0x3a1   : > { %14199 = vmatpush3.bf16.msra.mxu0 %v15303_v56  ;;  %v15342_v56 = vld [vmem:[%s15453_s15 + $0x1dc8] sm:$0xff]  }
 0x3a2   : > { %14200 = vmatprep.subr.bf16.mxu0 %v15305_v58  ;;  %14221 = vmatpush3.bf16.msra.mxu1 %v15304_v57  ;;  %v15343_v57 = vld [vmem:[%s15453_s15 + $0x1d08] sm:$0xff]  }
 0x3a3   : > { %14222 = vmatprep.subr.bf16.mxu1 %v15306_v59  ;;  %v15344_v58 = vld [vmem:[%s15453_s15 + $0x1d88] sm:$0xff]   ;;  %v15345_v59 = vld [vmem:[%s15453_s15 + $0x1d40] sm:$0xff]  }
 0x3a5   : > { %14201 = vmatpush3.bf16.msra.mxu0 %v15307_v60  ;;  %v15346_v60 = vld [vmem:[%s15453_s15 + $0x1dc0] sm:$0xff]  }
 0x3a6   : > { %14202 = vmatprep.subr.bf16.mxu0 %v15309_v62  ;;  %14223 = vmatpush3.bf16.msra.mxu1 %v15308_v61  ;;  %v15347_v61 = vld [vmem:[%s15453_s15 + $0x1d00] sm:$0xff]  }
 0x3a7   : > { %14224 = vmatprep.subr.bf16.mxu1 %v15310_v63  ;;  %v15348_v62 = vld [vmem:[%s15453_s15 + $0x1d80] sm:$0xff]   ;;  %v2960_v63 = vrot.slane %v16630_v13, %v15491_v35  ;;  %v15358_v13 = vld [vmem:[%s15453_s15 + $0x1e68] sm:$0xff]  }
 0x3a9   : > { %14203 = vmatpush3.bf16.msra.mxu0 %v15311_v0  ;;  %v15350_v0 = vld [vmem:[%s15453_s15 + $0x1e78] sm:$0xff]  }
 0x3aa   : > { %14204 = vmatprep.subr.bf16.mxu0 %v15313_v2  ;;  %14225 = vmatpush3.bf16.msra.mxu1 %v15312_v1  ;;  %v15351_v1 = vld [vmem:[%s15453_s15 + $0x1ef8] sm:$0xff]  }
 0x3ab   : > { %14226 = vmatprep.subr.bf16.mxu1 %v15314_v3  ;;  %v15352_v2 = vld [vmem:[%s15453_s15 + $0x1e38] sm:$0xff]  }
 0x3ac   : > { %v15353_v3 = vld [vmem:[%s15453_s15 + $0x1eb8] sm:$0xff]  }
 0x3ad   : > { %14205 = vmatpush3.bf16.msra.mxu0 %v15315_v4  ;;  %v2976_v4 = vcombine.high %v2960_v63, %v2960_v63 }
 0x3ae   : > { %14234 = vmatprep.subr.bf16.mxu0 %v15317_v9  ;;  %14227 = vmatpush3.bf16.msra.mxu1 %v15316_v6 }
 0x3af   : > { %14256 = vmatprep.subr.bf16.mxu1 %v15318_v12 }
 0x3b0   : > { %v13942_v21 = vpop.f32.mrf.mxu0  ;;  %11573 = vmatmul.mubr.bf16.vlgmr.msra.gmra.mxu0 %v2953_v11  ;;  %v15357_v11 = vld [vmem:[%s15453_s15 + $0x1eb0] sm:$0xff]  }
 0x3b1   : > { %v13964_v25 = vpop.f32.mrf.mxu1  ;;  %14235 = vmatpush3.bf16.msra.mxu0 %v15319_v14  ;;  %11613 = vmatmul.mubr.bf16.vlgmr.msra.gmra.mxu1 %v2975_v18 }
 0x3b2   : > { %v13943_v26 = vpop.f32.mrf.mxu0  ;;  %14236 = vmatprep.subr.bf16.mxu0 %v15321_v19  ;;  %14257 = vmatpush3.bf16.msra.mxu1 %v15320_v16  ;;  %v15359_v16 = vld [vmem:[%s15453_s15 + $0x1ee8] sm:$0xff]  }
 0x3b3   : > { %v13944_v29 = vadd.f32 %v13943_v26, %v13942_v21  ;;  %v13965_v31 = vpop.f32.mrf.mxu1  ;;  %11652 = vmatprep.mubr.bf16.mxu0 %v2974_v23  ;;  %14258 = vmatprep.subr.bf16.mxu1 %v15322_v22  ;;  %v15360_v19 = vld [vmem:[%s15453_s15 + $0x1e28] sm:$0xff]   ;;  %v15363_v26 = vld [vmem:[%s15453_s15 + $0x1ee0] sm:$0xff]  }
 0x3b4   : > { %v13945_v32 = vpop.f32.mrf.mxu0  ;;  %v13966_v36 = vadd.f32 %v13965_v31, %v13964_v25  ;;  %11692 = vmatprep.mubr.bf16.mxu1 %v2978_v28  ;;  %v15361_v22 = vld [vmem:[%s15453_s15 + $0x1ea8] sm:$0xff]   ;;  %v15365_v28 = vld [vmem:[%s15453_s15 + $0x1ea0] sm:$0xff]   ;;  %v15368_v31 = vld [vmem:[%s15453_s15 + $0x1e18] sm:$0xff]  }
 0x3b5   : > { %v11095_v34 = vadd.f32 %v13944_v29, %v16602_v48  ;;  %v13967_v38 = vpop.f32.mrf.mxu1  ;;  %14237 = vmatpush3.bf16.msra.mxu0 %v15323_v24  ;;  %v15334_v48 = vld [vmem:[%s15453_s15 + $0x1dd8] sm:$0xff]   ;;  %v15362_v24 = vld [vmem:[%s15453_s15 + $0x1e60] sm:$0xff]  }
 0x3b6   : > { %v13946_v39 = vpop.f32.mrf.mxu0  ;;  %14238 = vmatprep.subr.bf16.mxu0 %v15325_v30  ;;  %14259 = vmatpush3.bf16.msra.mxu1 %v15324_v27  ;;  %v15364_v27 = vld [vmem:[%s15453_s15 + $0x1e20] sm:$0xff]   ;;  %v15366_v29 = vld [vmem:[%s15453_s15 + $0x1e58] sm:$0xff]   ;;  %v15374_v38 = vld [vmem:[%s15453_s15 + $0x1e48] sm:$0xff]  }
 0x3b7   : > { %v16647_v41 = vadd.f32 %v13966_v36, %v11095_v34  ;;  %v13968_v43 = vpop.f32.mrf.mxu1  ;;  %14260 = vmatprep.subr.bf16.mxu1 %v15326_v33  ;;  %v15367_v30 = vld [vmem:[%s15453_s15 + $0x1ed8] sm:$0xff]   ;;  %v15370_v33 = vld [vmem:[%s15453_s15 + $0x1e50] sm:$0xff]   ;;  %v15375_v39 = vld [vmem:[%s15453_s15 + $0x1ec8] sm:$0xff]  }
 0x3b8   : > { %v15369_v32 = vld [vmem:[%s15453_s15 + $0x1e98] sm:$0xff]   ;;  %v15371_v34 = vld [vmem:[%s15453_s15 + $0x1ed0] sm:$0xff]   ;;  %v15379_v43 = vld [vmem:[%s15453_s15 + $0x1ec0] sm:$0xff]  }
 0x3b9   : > { %14239 = vmatpush3.bf16.msra.mxu0 %v15327_v37  ;;  %v15372_v36 = vld [vmem:[%s15453_s15 + $0x1e10] sm:$0xff]  }
 0x3ba   : > { %14240 = vmatprep.subr.bf16.mxu0 %v15329_v42  ;;  %14261 = vmatpush3.bf16.msra.mxu1 %v15328_v40  ;;  %v15373_v37 = vld [vmem:[%s15453_s15 + $0x1e90] sm:$0xff]   ;;  %v15376_v40 = vld [vmem:[%s15453_s15 + $0x1e08] sm:$0xff]   ;;  %v15378_v42 = vld [vmem:[%s15453_s15 + $0x1e40] sm:$0xff]  }
 0x3bb   : > { %14262 = vmatprep.subr.bf16.mxu1 %v15330_v44  ;;  %v15380_v44 = vld [vmem:[%s15453_s15 + $0x1e00] sm:$0xff]  }
 0x3bd   : > { %14241 = vmatpush3.bf16.msra.mxu0 %v15331_v45  ;;  %v179_v45 = vld [vmem:[%s15489_s19 + $0x78] sm:$0xff] }
 0x3be   : > { %14242 = vmatprep.subr.bf16.mxu0 %v15333_v47  ;;  %14263 = vmatpush3.bf16.msra.mxu1 %v15332_v46  ;;  %v2986_v46 = vrot.slane %v179_v45, %v15491_v35  ;;  %v15382_v47 = vld [vmem:[%s15453_s15 + $0x1f78] sm:$0xff]  }
 0x3bf   : > { %14264 = vmatprep.subr.bf16.mxu1 %v15334_v48  ;;  %v2979_v48 = vcombine.high %v179_v45, %v179_v45 }
 0x3c1   : > { %14243 = vmatpush3.bf16.msra.mxu0 %v15335_v49  ;;  %v15381_v49 = vld [vmem:[%s15453_s15 + $0x1e80] sm:$0xff]  }
 0x3c2   : > { %14244 = vmatprep.subr.bf16.mxu0 %v15337_v51  ;;  %14265 = vmatpush3.bf16.msra.mxu1 %v15336_v50  ;;  %v2994_v50 = vcombine.high %v2986_v46, %v2986_v46  ;;  %v3002_v51 = vrot.slane %v2986_v46, %v15491_v35 }
 0x3c3   : > { %14266 = vmatprep.subr.bf16.mxu1 %v15338_v52  ;;  %v15383_v52 = vld [vmem:[%s15453_s15 + $0x1ff8] sm:$0xff]  }
 0x3c5   : > { %14245 = vmatpush3.bf16.msra.mxu0 %v15339_v53  ;;  %v16712_v53 = vrot.slane %v2979_v48, %v15491_v35 }
 0x3c6   : > { %14246 = vmatprep.subr.bf16.mxu0 %v15341_v55  ;;  %14267 = vmatpush3.bf16.msra.mxu1 %v15340_v54  ;;  %v3016_v54 = vrot.slane %v2994_v50, %v15491_v35  ;;  %v15384_v55 = vld [vmem:[%s15453_s15 + $0x1f38] sm:$0xff]  }
 0x3c7   : > { %14268 = vmatprep.subr.bf16.mxu1 %v15342_v56  ;;  %v2995_v56 = vcombine.high %v16712_v53, %v16712_v53 }
 0x3c9   : > { %14247 = vmatpush3.bf16.msra.mxu0 %v15343_v57  ;;  %v3024_v57 = vcombine.high %v3002_v51, %v3002_v51 }
 0x3ca   : > { %14248 = vmatprep.subr.bf16.mxu0 %v15345_v59  ;;  %14269 = vmatpush3.bf16.msra.mxu1 %v15344_v58  ;;  %v15386_v58 = vld [vmem:[%s15453_s15 + $0x1f70] sm:$0xff]   ;;  %v3026_v59 = vcombine.high %v3016_v54, %v3016_v54 }
 0x3cb   : > { %14270 = vmatprep.subr.bf16.mxu1 %v15346_v60 }
 0x3cd   : > { %14249 = vmatpush3.bf16.msra.mxu0 %v15347_v61  ;;  %v15385_v61 = vld [vmem:[%s15453_s15 + $0x1fb8] sm:$0xff]  }
 0x3ce   : > { %14278 = vmatprep.subr.bf16.mxu0 %v15350_v0  ;;  %14271 = vmatpush3.bf16.msra.mxu1 %v15348_v62  ;;  %v3023_v62 = vrot.slane %v2995_v56, %v15491_v35 }
 0x3cf   : > { %14300 = vmatprep.subr.bf16.mxu1 %v15351_v1 }
 0x3d0   : > { %v13986_v6 = vpop.f32.mrf.mxu0  ;;  %11653 = vmatmul.mubr.bf16.vlgmr.msra.gmra.mxu0 %v2960_v63  ;;  %v15387_v63 = vld [vmem:[%s15453_s15 + $0x1ff0] sm:$0xff]  }
 0x3d1   : > { %v14008_v9 = vpop.f32.mrf.mxu1  ;;  %14279 = vmatpush3.bf16.msra.mxu0 %v15352_v2  ;;  %11693 = vmatmul.mubr.bf16.vlgmr.msra.gmra.mxu1 %v2976_v4  ;;  %v15388_v2 = vld [vmem:[%s15453_s15 + $0x1f30] sm:$0xff]  }
 0x3d2   : > { %v13987_v10 = vpop.f32.mrf.mxu0  ;;  %14280 = vmatprep.subr.bf16.mxu0 %v15354_v5  ;;  %14301 = vmatpush3.bf16.msra.mxu1 %v15353_v3  ;;  %v3027_v3 = vcombine.high %v3023_v62, %v3023_v62  ;;  %v15390_v5 = vld [vmem:[%s15453_s15 + $0x1f68] sm:$0xff]  }
 0x3d3   : > { %v13988_v12 = vadd.f32 %v13987_v10, %v13986_v6  ;;  %v14009_v14 = vpop.f32.mrf.mxu1  ;;  %14302 = vmatprep.subr.bf16.mxu1 %v15355_v7  ;;  %11732 = vmatprep.mubr.bf16.mxu0 %v3016_v54 }
 0x3d4   : > { %v13989_v15 = vpop.f32.mrf.mxu0  ;;  %v14010_v18 = vadd.f32 %v14009_v14, %v14008_v9  ;;  %11772 = vmatprep.mubr.bf16.mxu1 %v3026_v59  ;;  %v15392_v14 = vld [vmem:[%s15453_s15 + $0x1f28] sm:$0xff]  }
 0x3d5   : > { %v11175_v17 = vadd.f32 %v13988_v12, %v16647_v41  ;;  %v14011_v20 = vpop.f32.mrf.mxu1  ;;  %14281 = vmatpush3.bf16.msra.mxu0 %v15356_v8  ;;  %v15377_v41 = vld [vmem:[%s15453_s15 + $0x1e88] sm:$0xff]   ;;  %v15389_v8 = vld [vmem:[%s15453_s15 + $0x1fb0] sm:$0xff]  }
 0x3d6   : > { %v13990_v21 = vpop.f32.mrf.mxu0  ;;  %14282 = vmatprep.subr.bf16.mxu0 %v15358_v13  ;;  %14303 = vmatpush3.bf16.msra.mxu1 %v15357_v11  ;;  %v15391_v11 = vld [vmem:[%s15453_s15 + $0x1fe8] sm:$0xff]   ;;  %v15396_v20 = vld [vmem:[%s15453_s15 + $0x1f20] sm:$0xff]  }
 0x3d7   : > { %v16684_v23 = vadd.f32 %v14010_v18, %v11175_v17  ;;  %v14012_v25 = vpop.f32.mrf.mxu1  ;;  %14304 = vmatprep.subr.bf16.mxu1 %v15359_v16  ;;  %v15394_v16 = vld [vmem:[%s15453_s15 + $0x1f60] sm:$0xff]   ;;  %v15393_v18 = vld [vmem:[%s15453_s15 + $0x1fa8] sm:$0xff]   ;;  %v15398_v21 = vld [vmem:[%s15453_s15 + $0x1f58] sm:$0xff]  }
 0x3d8   : > { %v15402_v25 = vld [vmem:[%s15453_s15 + $0x1f50] sm:$0xff]  }
 0x3d9   : > { %14283 = vmatpush3.bf16.msra.mxu0 %v15360_v19  ;;  %v15395_v19 = vld [vmem:[%s15453_s15 + $0x1fe0] sm:$0xff]  }
 0x3da   : > { %14284 = vmatprep.subr.bf16.mxu0 %v15362_v24  ;;  %14305 = vmatpush3.bf16.msra.mxu1 %v15361_v22  ;;  %v15397_v22 = vld [vmem:[%s15453_s15 + $0x1fa0] sm:$0xff]   ;;  %v15400_v24 = vld [vmem:[%s15453_s15 + $0x1f18] sm:$0xff]  }
 0x3db   : > { %14306 = vmatprep.subr.bf16.mxu1 %v15363_v26  ;;  %v15401_v26 = vld [vmem:[%s15453_s15 + $0x1f98] sm:$0xff]  }
 0x3dd   : > { %14285 = vmatpush3.bf16.msra.mxu0 %v15364_v27  ;;  %v15403_v27 = vld [vmem:[%s15453_s15 + $0x1fd0] sm:$0xff]  }
 0x3de   : > { %14286 = vmatprep.subr.bf16.mxu0 %v15366_v29  ;;  %14307 = vmatpush3.bf16.msra.mxu1 %v15365_v28  ;;  %v15404_v28 = vld [vmem:[%s15453_s15 + $0x1f10] sm:$0xff]   ;;  %v15406_v29 = vld [vmem:[%s15453_s15 + $0x1f48] sm:$0xff]  }
 0x3df   : > { %14308 = vmatprep.subr.bf16.mxu1 %v15367_v30  ;;  %v15405_v30 = vld [vmem:[%s15453_s15 + $0x1f90] sm:$0xff]  }
 0x3e1   : > { %14287 = vmatpush3.bf16.msra.mxu0 %v15368_v31  ;;  %v15407_v31 = vld [vmem:[%s15453_s15 + $0x1fc8] sm:$0xff]  }
 0x3e2   : > { %14288 = vmatprep.subr.bf16.mxu0 %v15370_v33  ;;  %14309 = vmatpush3.bf16.msra.mxu1 %v15369_v32  ;;  %v15408_v32 = vld [vmem:[%s15453_s15 + $0x1f08] sm:$0xff]   ;;  %v15410_v33 = vld [vmem:[%s15453_s15 + $0x1f40] sm:$0xff]  }
 0x3e3   : > { %14310 = vmatprep.subr.bf16.mxu1 %v15371_v34  ;;  %v15409_v34 = vld [vmem:[%s15453_s15 + $0x1f88] sm:$0xff]  }
 0x3e5   : > { %14289 = vmatpush3.bf16.msra.mxu0 %v15372_v36  ;;  %v15411_v36 = vld [vmem:[%s15453_s15 + $0x1fc0] sm:$0xff]  }
 0x3e6   : > { %14290 = vmatprep.subr.bf16.mxu0 %v15374_v38  ;;  %14311 = vmatpush3.bf16.msra.mxu1 %v15373_v37  ;;  %v15412_v37 = vld [vmem:[%s15453_s15 + $0x1f00] sm:$0xff]   ;;  %v3009_v38 = vrot.slane %v16712_v53, %v15491_v35 }
 0x3e7   : > { %14312 = vmatprep.subr.bf16.mxu1 %v15375_v39  ;;  %v15413_v39 = vld [vmem:[%s15453_s15 + $0x1f80] sm:$0xff]  }
 0x3e9   : > { %14291 = vmatpush3.bf16.msra.mxu0 %v15376_v40  ;;  %v3025_v40 = vcombine.high %v3009_v38, %v3009_v38 }
 0x3ea   : > { %14292 = vmatprep.subr.bf16.mxu0 %v15378_v42  ;;  %14313 = vmatpush3.bf16.msra.mxu1 %v15377_v41 }
 0x3eb   : > { %14314 = vmatprep.subr.bf16.mxu1 %v15379_v43 }
 0x3ed   : > { %14293 = vmatpush3.bf16.msra.mxu0 %v15380_v44 }
 0x3ee   : > { %14322 = vmatprep.subr.bf16.mxu0 %v15382_v47  ;;  %14315 = vmatpush3.bf16.msra.mxu1 %v15381_v49 }
 0x3ef   : > { %14344 = vmatprep.subr.bf16.mxu1 %v15383_v52 }
 0x3f0   : > { %v14030_v60 = vpop.f32.mrf.mxu0  ;;  %11733 = vmatmul.mubr.bf16.vlgmr.msra.gmra.mxu0 %v3002_v51 }
 0x3f1   : > { %v14052_v0 = vpop.f32.mrf.mxu1  ;;  %14323 = vmatpush3.bf16.msra.mxu0 %v15384_v55  ;;  %11773 = vmatmul.mubr.bf16.vlgmr.msra.gmra.mxu1 %v3024_v57 }
 0x3f2   : > { %v14031_v1 = vpop.f32.mrf.mxu0  ;;  %14324 = vmatprep.subr.bf16.mxu0 %v15386_v58  ;;  %14345 = vmatpush3.bf16.msra.mxu1 %v15385_v61 }
 0x3f3   : > { %v14032_v4 = vadd.f32 %v14031_v1, %v14030_v60  ;;  %v14053_v6 = vpop.f32.mrf.mxu1  ;;  %11812 = vmatprep.mubr.bf16.mxu0 %v3023_v62  ;;  %14346 = vmatprep.subr.bf16.mxu1 %v15387_v63 }
 0x3f4   : > { %v14033_v7 = vpop.f32.mrf.mxu0  ;;  %v14054_v10 = vadd.f32 %v14053_v6, %v14052_v0  ;;  %11852 = vmatprep.mubr.bf16.mxu1 %v3027_v3 }
 0x3f5   : > { %v11255_v9 = vadd.f32 %v14032_v4, %v16684_v23  ;;  %v14055_v12 = vpop.f32.mrf.mxu1  ;;  %14325 = vmatpush3.bf16.msra.mxu0 %v15388_v2  ;;  %v15399_v23 = vld [vmem:[%s15453_s15 + $0x1fd8] sm:$0xff]  }
 0x3f6   : > { %v14034_v13 = vpop.f32.mrf.mxu0  ;;  %14326 = vmatprep.subr.bf16.mxu0 %v15390_v5  ;;  %14347 = vmatpush3.bf16.msra.mxu1 %v15389_v8 }
 0x3f7   : > { %v11295_v15 = vadd.f32 %v14054_v10, %v11255_v9  ;;  %v14056_v17 = vpop.f32.mrf.mxu1  ;;  %14348 = vmatprep.subr.bf16.mxu1 %v15391_v11 }
 0x3f9   : > { %14327 = vmatpush3.bf16.msra.mxu0 %v15392_v14 }
 0x3fa   : > { %14328 = vmatprep.subr.bf16.mxu0 %v15394_v16  ;;  %14349 = vmatpush3.bf16.msra.mxu1 %v15393_v18 }
 0x3fb   : > { %14350 = vmatprep.subr.bf16.mxu1 %v15395_v19 }
 0x3fd   : > { %14329 = vmatpush3.bf16.msra.mxu0 %v15396_v20 }
 0x3fe   : > { %14330 = vmatprep.subr.bf16.mxu0 %v15398_v21  ;;  %14351 = vmatpush3.bf16.msra.mxu1 %v15397_v22 }
 0x3ff   : > { %14352 = vmatprep.subr.bf16.mxu1 %v15399_v23 }
 0x401   : > { %14331 = vmatpush3.bf16.msra.mxu0 %v15400_v24 }
 0x402   : > { %14332 = vmatprep.subr.bf16.mxu0 %v15402_v25  ;;  %14353 = vmatpush3.bf16.msra.mxu1 %v15401_v26 }
 0x403   : > { %14354 = vmatprep.subr.bf16.mxu1 %v15403_v27 }
 0x405   : > { %14333 = vmatpush3.bf16.msra.mxu0 %v15404_v28 }
 0x406   : > { %14334 = vmatprep.subr.bf16.mxu0 %v15406_v29  ;;  %14355 = vmatpush3.bf16.msra.mxu1 %v15405_v30 }
 0x407   : > { %14356 = vmatprep.subr.bf16.mxu1 %v15407_v31 }
 0x409   : > { %14335 = vmatpush3.bf16.msra.mxu0 %v15408_v32 }
 0x40a   : > { %14336 = vmatprep.subr.bf16.mxu0 %v15410_v33  ;;  %14357 = vmatpush3.bf16.msra.mxu1 %v15409_v34 }
 0x40b   : > { %14358 = vmatprep.subr.bf16.mxu1 %v15411_v36 }
 0x40d   : > { %14337 = vmatpush3.bf16.msra.mxu0 %v15412_v37 }
 0x40e   : > { %14359 = vmatpush3.bf16.msra.mxu1 %v15413_v39 }
 0x410   : > { %v14074_v41 = vpop.f32.mrf.mxu0  ;;  %11813 = vmatmul.mubr.bf16.vlgmr.msra.gmra.mxu0 %v3009_v38 }
 0x411   : > { %v14096_v42 = vpop.f32.mrf.mxu1  ;;  %11853 = vmatmul.mubr.bf16.vlgmr.msra.gmra.mxu1 %v3025_v40 }
 0x412   : > { %v14075_v43 = vpop.f32.mrf.mxu0 }
 0x413   : > { %v14076_v44 = vadd.f32 %v14075_v43, %v14074_v41  ;;  %v14097_v45 = vpop.f32.mrf.mxu1 }
 0x414   : > { %v14077_v46 = vpop.f32.mrf.mxu0  ;;  %v14098_v48 = vadd.f32 %v14097_v45, %v14096_v42 }
 0x415   : > { %v11335_v47 = vadd.f32 %v14076_v44, %v11295_v15  ;;  %v14099_v49 = vpop.f32.mrf.mxu1 }
 0x416   : > { %v14078_v50 = vpop.f32.mrf.mxu0 }
 0x417   : > { %v11375_v51 = vadd.f32 %v14098_v48, %v11335_v47  ;;  %v14100_v35 = vpop.f32.mrf.mxu1 }
 0x430   : > { %v14118_v52 = vpop.f32.mrf.mxu0 }
 0x431   : > { %v14140_v53 = vpop.f32.mrf.mxu1 }
 0x432   : > { %v14119_v54 = vpop.f32.mrf.mxu0 }
 0x433   : > { %v14120_v55 = vadd.f32 %v14119_v54, %v14118_v52  ;;  %v14141_v56 = vpop.f32.mrf.mxu1 }
 0x434   : > { %v14121_v57 = vpop.f32.mrf.mxu0  ;;  %v14142_v59 = vadd.f32 %v14141_v56, %v14140_v53 }
 0x435   : > { %v11415_v58 = vadd.f32 %v14120_v55, %v11375_v51  ;;  %v14143_v60 = vpop.f32.mrf.mxu1 }
 0x436   : > { %v14122_v61 = vpop.f32.mrf.mxu0 }
 0x437   : > { %v11455_v62 = vadd.f32 %v14142_v59, %v11415_v58  ;;  %v14144_v63 = vpop.f32.mrf.mxu1 }
 0x450   : > { %v14162_v0 = vpop.f32.mrf.mxu0 }
 0x451   : > { %v14184_v1 = vpop.f32.mrf.mxu1 }
 0x452   : > { %v14163_v2 = vpop.f32.mrf.mxu0 }
 0x453   : > { %v14164_v3 = vadd.f32 %v14163_v2, %v14162_v0  ;;  %v14185_v4 = vpop.f32.mrf.mxu1 }
 0x454   : > { %v14165_v5 = vpop.f32.mrf.mxu0  ;;  %v14186_v7 = vadd.f32 %v14185_v4, %v14184_v1 }
 0x455   : > { %v11495_v6 = vadd.f32 %v14164_v3, %v11455_v62  ;;  %v14187_v8 = vpop.f32.mrf.mxu1 }
 0x456   : > { %v14166_v9 = vpop.f32.mrf.mxu0 }
 0x457   : > { %v11535_v10 = vadd.f32 %v14186_v7, %v11495_v6  ;;  %v14188_v11 = vpop.f32.mrf.mxu1 }
 0x470   : > { %v14206_v12 = vpop.f32.mrf.mxu0 }
 0x471   : > { %v14228_v13 = vpop.f32.mrf.mxu1 }
 0x472   : > { %v14207_v14 = vpop.f32.mrf.mxu0 }
 0x473   : > { %v14208_v15 = vadd.f32 %v14207_v14, %v14206_v12  ;;  %v14229_v16 = vpop.f32.mrf.mxu1 }
 0x474   : > { %v14209_v17 = vpop.f32.mrf.mxu0  ;;  %v14230_v19 = vadd.f32 %v14229_v16, %v14228_v13 }
 0x475   : > { %v11575_v18 = vadd.f32 %v14208_v15, %v11535_v10  ;;  %v14231_v20 = vpop.f32.mrf.mxu1 }
 0x476   : > { %v14210_v21 = vpop.f32.mrf.mxu0 }
 0x477   : > { %v11615_v22 = vadd.f32 %v14230_v19, %v11575_v18  ;;  %v14232_v23 = vpop.f32.mrf.mxu1 }
 0x490   : > { %v14250_v24 = vpop.f32.mrf.mxu0 }
 0x491   : > { %v14272_v25 = vpop.f32.mrf.mxu1 }
 0x492   : > { %v14251_v26 = vpop.f32.mrf.mxu0 }
 0x493   : > { %v14273_v27 = vpop.f32.mrf.mxu1  ;;  %v14252_v41 = vadd.f32 %v14251_v26, %v14250_v24 }
 0x494   : > { %v14253_v28 = vpop.f32.mrf.mxu0  ;;  %v14274_v43 = vadd.f32 %v14273_v27, %v14272_v25 }
 0x495   : > { %v14275_v29 = vpop.f32.mrf.mxu1  ;;  %v11655_v42 = vadd.f32 %v14252_v41, %v11615_v22 }
 0x496   : > { %v14254_v30 = vpop.f32.mrf.mxu0 }
 0x497   : > { %v14276_v31 = vpop.f32.mrf.mxu1  ;;  %v11695_v45 = vadd.f32 %v14274_v43, %v11655_v42 }
 0x4b0   : > { %v14294_v32 = vpop.f32.mrf.mxu0 }
 0x4b1   : > { %v14316_v33 = vpop.f32.mrf.mxu1 }
 0x4b2   : > { %v14295_v34 = vpop.f32.mrf.mxu0 }
 0x4b3   : > { %v14317_v36 = vpop.f32.mrf.mxu1  ;;  %v14296_v44 = vadd.f32 %v14295_v34, %v14294_v32 }
 0x4b4   : > { %v14297_v37 = vpop.f32.mrf.mxu0  ;;  %v14318_v47 = vadd.f32 %v14317_v36, %v14316_v33 }
 0x4b5   : > { %v14319_v38 = vpop.f32.mrf.mxu1  ;;  %v11735_v46 = vadd.f32 %v14296_v44, %v11695_v45 }
 0x4b6   : > { %v14298_v39 = vpop.f32.mrf.mxu0 }
 0x4b7   : > { %v14320_v40 = vpop.f32.mrf.mxu1  ;;  %v11775_v51 = vadd.f32 %v14318_v47, %v11735_v46 }
 0x4d0   : > { %v14338_v48 = vpop.f32.mrf.mxu0 }
 0x4d1   : > { %v14360_v49 = vpop.f32.mrf.mxu1 }
 0x4d2   : > { %v14339_v50 = vpop.f32.mrf.mxu0 }
 0x4d3   : > { %v14340_v35 = vadd.f32 %v14339_v50, %v14338_v48  ;;  %v14361_v52 = vpop.f32.mrf.mxu1 }
 0x4d4   : > { %v14341_v53 = vpop.f32.mrf.mxu0  ;;  %v14362_v55 = vadd.f32 %v14361_v52, %v14360_v49 }
 0x4d5   : > { %v11815_v54 = vadd.f32 %v14340_v35, %v11775_v51  ;;  %v14363_v56 = vpop.f32.mrf.mxu1 }
 0x4d6   : > { %v14342_v57 = vpop.f32.mrf.mxu0 }
 0x4d7   : > { %v11855_v58 = vadd.f32 %v14362_v55, %v11815_v54  ;;  %v14364_v59 = vpop.f32.mrf.mxu1 }
 0x4d9   : > { %11860 = vst [vmem:[%s162_s23] sm:$0x3] %v11855_v58 }
 0x4da PF: > { %s12_s9 = sadd.s32 1, %s15421_s9  }
 0x4db   : > { %p9_p6 = scmp.ge.s32.totalorder %s12_s9, 4  }
 0x4dd   :  { %11 = sbr.rel (!%p9_p6) target bundleno = 1 (0x1), region = 61 }

</bundles_post_ra>
